<compile_context>
chip_gen: v6e
topology: v6e:2x2x1
jax: 0.10.0
libtpu: 0.0.40
codegen_flags: <defaults>
</compile_context>

<pallas_src>
import numpy as np
import jax
import jax.numpy as jnp
from jax import lax
from jax.experimental import pallas as pl
from jax.experimental.pallas import tpu as pltpu

NLAYERS = 3
HIDDEN = 50
HP = 128                      # hidden / feature lanes padded to one lane tile
TWO_PI = 2.0 * np.pi


def _mm(a, b):
    # f32 matmul (see precision note in the header).
    return jnp.dot(a, b, precision=lax.Precision.HIGHEST,
                   preferred_element_type=jnp.float32)


# ----------------------------------------------------------------------------
# Pallas kernel
# ----------------------------------------------------------------------------
def approximate_curve_kernel(data_ref, W_ref, b_ref, out_ref):
    """Single-block kernel.

    data_ref : (B, 128)     lanes 0-1 q1, 2-3 q2, 4-5 v1, 6-7 v2, 8 s, rest 0
    W_ref    : (9, 128,128) [embed-plane, Wl, WL0..2, WO0..2, Wp], zero-padded
    b_ref    : (9, 128)     [be, bl, bL0..2, bO0..2, bp],          zero-padded
    out_ref  : (B, 128)     lanes 0-1 result, remaining lanes exactly 0
    """
    B = data_ref.shape[0]
    data = data_ref[...]                         # (B, HP)
    b_all = b_ref[...]                           # (9, HP)

    # --- lane masks (built once on the VPU) ----------------------------------
    lane = lax.broadcasted_iota(jnp.int32, (1, HP), 1)
    feat_scale = jnp.where(lane < 2, 1.0 / 1.5,
                           jnp.where(lane < 8, 1.0, 0.0))   # q1 scale, s/pad -> 0
    feat_shift = jnp.where(lane < 2, -1.0, 0.0)             # q1/1.5 - 1 = (q1-1.5)/1.5

    # --- per-stream row masks -------------------------------------------------
    # stream order: [primal(s), primal(0), tangent(0), primal(1), tangent(1)]
    one = jnp.ones((B, 1), jnp.float32)
    zero = jnp.zeros((B, 1), jnp.float32)
    pmask = jnp.concatenate([one, one, zero, one, zero], axis=0)   # (5B, 1)
    is_tan = pmask < 0.5                                           # bool (5B, 1)

    # --- per-batch operands from the fused slab -------------------------------
    s = data[:, 8:9]                             # (B, 1)
    q1 = data[:, 0:2]                            # (B, 2), un-normalized
    q2 = data[:, 2:4]
    v1 = data[:, 4:6]
    v2 = data[:, 6:8]

    # --- embedding -------------------------------------------------------------
    We = W_ref[0]                  # (HP, HP): rows 0..7 feature rows, row 8 = s row
    We_s = We[8:9, :]              # (1, HP) embed weight row for `s`
    be = b_all[0:1, :]

    feat = data * feat_scale + feat_shift        # [(q1-1.5)/1.5, q2, v1, v2, 0...]
    z_feat = _mm(feat, We) + be                  # (B, HP)   == z at s = 0
    z_s = s * We_s + z_feat                      # (B, HP)
    z_one = z_feat + We_s                        # (B, HP)   == z at s = 1

    # single stream-assembly concatenate of the whole forward pass
    Z5 = jnp.concatenate([z_s, z_feat, z_feat, z_one, z_one], axis=0)   # (5B, HP)
    # primal rows: sin(2*pi*z); tangent rows: d/ds = 2*pi*cos(2*pi*z) * We_s
    X = jnp.where(is_tan,
                  (TWO_PI * jnp.cos(TWO_PI * Z5)) * We_s,
                  jnp.sin(TWO_PI * Z5))

    def act_block(Wx, b):
        # primal rows:  tanh(Wx + b)
        # tangent rows: (1 - tanh(primal preact)^2) * Wx   (tangent of bias = 0)
        A = jnp.tanh(Wx + b)                      # tangent rows' tanh is discarded
        Ash = pltpu.roll(A, shift=B, axis=0)      # tangent row r sees primal row r-B
        return jnp.where(is_tan, (1.0 - Ash * Ash) * Wx, A)

    # --- lift -------------------------------------------------------------------
    X = act_block(_mm(X, W_ref[1]), b_all[1:2, :])

    # --- residual blocks ----------------------------------------------------------
    for i in range(NLAYERS):
        Y = act_block(_mm(X, W_ref[2 + i]), b_all[2 + i:3 + i, :])
        X = X + _mm(Y, W_ref[5 + i]) + pmask * b_all[5 + i:6 + i, :]

    # --- projection (only lanes 0..1 of Wp / bp are nonzero) ----------------------
    Out = _mm(X, W_ref[8]) + pmask * b_all[8:9, :]                 # (5B, HP)

    net = Out[0 * B:1 * B, 0:2]
    g_l = Out[1 * B:2 * B, 0:2]
    gp_l = Out[2 * B:3 * B, 0:2]
    g_r = Out[3 * B:4 * B, 0:2]
    gp_r = Out[4 * B:5 * B, 0:2]

    # cubic Hermite-style boundary-condition correction (impose_both_bcs=True)
    a0 = q1 - g_l
    a1 = v1 - gp_l
    a2 = (2.0 * gp_l + gp_r - 3.0 * g_r + 3.0 * g_l
          - 3.0 * q1 + 3.0 * q2 - 2.0 * v1 - v2)
    a3 = (-gp_r + 2.0 * g_r - 2.0 * g_l + 2.0 * q1
          - gp_l - 2.0 * q2 + v1 + v2)

    s2 = s * s
    res = net + a0 + a1 * s + a2 * s2 + a3 * (s2 * s)              # (B, 2)

    out_ref[...] = jnp.zeros((B, HP), jnp.float32)   # keep padded lanes exactly 0
    out_ref[:, 0:2] = res


# ----------------------------------------------------------------------------
# One-time parameter preparation (pad + stack; NOT in the per-call hot path)
# ----------------------------------------------------------------------------
def prepare_params(params):
    We, be = params["embed"]          # (9, H), (1, H)
    Wl, bl = params["lift"]           # (H, H), (1, H)
    WL, bL = params["linears"]        # (3, H, H), (3, 1, H)
    WO, bO = params["linearsO"]
    Wp, bp = params["proj"]           # (H, 2), (1, 2)

    def pad_w(w):
        return jnp.pad(w, ((0, HP - w.shape[0]), (0, HP - w.shape[1])))

    def pad_b(b):
        return jnp.pad(b[0], (0, HP - b.shape[1]))

    # embed plane: rows 0..7 = feature rows (q1n, q2, v1, v2), row 8 = s row
    embed_plane = jnp.zeros((HP, HP), jnp.float32)
    embed_plane = embed_plane.at[0:8, 0:HIDDEN].set(We[1:9])
    embed_plane = embed_plane.at[8, 0:HIDDEN].set(We[0])

    W_stack = jnp.stack(
        [embed_plane, pad_w(Wl)]
        + [pad_w(WL[i]) for i in range(NLAYERS)]
        + [pad_w(WO[i]) for i in range(NLAYERS)]
        + [pad_w(Wp)], axis=0)                      # (9, HP, HP)

    b_stack = jnp.stack(
        [pad_b(be), pad_b(bl)]
        + [pad_b(bL[i]) for i in range(NLAYERS)]
        + [pad_b(bO[i]) for i in range(NLAYERS)]
        + [pad_b(bp)], axis=0)                      # (9, HP)

    return jax.device_put(W_stack), jax.device_put(b_stack)


# ----------------------------------------------------------------------------
# Hot-path wrapper (takes the pre-packed weights)
# ----------------------------------------------------------------------------
@jax.jit
def approximate_curve_forward(s, q1, q2, v1, v2, W_stack, b_stack):
    B = s.shape[0]                  # B a multiple of 8 keeps sublane tiles aligned
    # single fused per-batch slab: lanes 0-1 q1, 2-3 q2, 4-5 v1, 6-7 v2, lane 8 s
    data = jnp.pad(jnp.concatenate([q1, q2, v1, v2, s], axis=1),
                   ((0, 0), (0, HP - 9)))

    vmem = pl.BlockSpec(memory_space=pltpu.MemorySpace.VMEM)
    out_padded = pl.pallas_call(
        approximate_curve_kernel,
        out_shape=jax.ShapeDtypeStruct((B, HP), jnp.float32),
        in_specs=[vmem, vmem, vmem],
        out_specs=vmem,
    )(data, W_stack, b_stack)
    return out_padded[:, :2]


# ----------------------------------------------------------------------------
# Deterministic parameter init (synthetic; torch.nn.Linear-style uniform bounds)
# ----------------------------------------------------------------------------
def _init_linear(key, fan_in, fan_out):
    kw, kb = jax.random.split(key)
    bound = 1.0 / np.sqrt(fan_in)
    W = jax.random.uniform(kw, (fan_in, fan_out), jnp.float32, -bound, bound)
    b = jax.random.uniform(kb, (1, fan_out), jnp.float32, -bound, bound)
    return W, b


def init_params(key):
    keys = jax.random.split(key, 3 + 2 * NLAYERS)
    embed = _init_linear(keys[0], 9, HIDDEN)
    lift = _init_linear(keys[1], HIDDEN, HIDDEN)
    proj = _init_linear(keys[2], HIDDEN, 2)
    WL, bL, WO, bO = [], [], [], []
    for i in range(NLAYERS):
        W, b = _init_linear(keys[3 + 2 * i], HIDDEN, HIDDEN)
        WL.append(W); bL.append(b)
        W, b = _init_linear(keys[4 + 2 * i], HIDDEN, HIDDEN)
        WO.append(W); bO.append(b)
    # NOTE: lift_U / lift_V / lift_H / linears_Z exist in __init__ but are
    # unused on the default (is_mult=False) forward path, so they are omitted.
    return {
        "embed": embed,
        "lift": lift,
        "linears": (jnp.stack(WL), jnp.stack(bL)),
        "linearsO": (jnp.stack(WO), jnp.stack(bO)),
        "proj": proj,
    }


# ----------------------------------------------------------------------------
# Pure-JAX reference (uses jax.jvp for the d/ds derivatives, unpadded weights)
# ----------------------------------------------------------------------------
def reference_forward(s, q1, q2, v1, v2, params):
    q1n = (q1 - 1.5) / 1.5
    We, be = params["embed"]
    Wl, bl = params["lift"]
    WL, bL = params["linears"]
    WO, bO = params["linearsO"]
    Wp, bp = params["proj"]

    def pp(sv):
        x = jnp.concatenate([sv, q1n, q2, v1, v2], axis=1)
        h = jnp.sin(TWO_PI * (_mm(x, We) + be))
        h = jnp.tanh(_mm(h, Wl) + bl)
        for i in range(NLAYERS):
            h = h + _mm(jnp.tanh(_mm(h, WL[i]) + bL[i]), WO[i]) + bO[i]
        return _mm(h, Wp) + bp

    net_part = pp(s)
    zeros = jnp.zeros_like(s)
    ones = jnp.ones_like(s)
    tang = jnp.ones_like(s)
    g_left, gp_left = jax.jvp(pp, (zeros,), (tang,))
    g_right, gp_right = jax.jvp(pp, (ones,), (tang,))

    a0 = q1 - g_left
    a1 = v1 - gp_left
    a2 = (2.0 * gp_left + gp_right - 3.0 * g_right + 3.0 * g_left
          - 3.0 * q1 + 3.0 * q2 - 2.0 * v1 - v2)
    a3 = (-gp_right + 2.0 * g_right - 2.0 * g_left + 2.0 * q1
          - gp_left - 2.0 * q2 + v1 + v2)
    return net_part + a0 + a1 * s + a2 * s ** 2 + a3 * s ** 3


# ----------------------------------------------------------------------------
if __name__ == "__main__":
    key = jax.random.PRNGKey(0)
    kp, ks, k1, k2, k3, k4 = jax.random.split(key, 6)

    B = 8   # multiple of 8 keeps the 5-stream block sublane-tile aligned
    params = init_params(kp)
    W_stack, b_stack = prepare_params(params)   # one-time packing, off the hot path

    s = jax.random.uniform(ks, (B, 1), jnp.float32)          # curve parameter
    q1 = jax.random.normal(k1, (B, 2), jnp.float32) + 1.5
    q2 = jax.random.normal(k2, (B, 2), jnp.float32)
    v1 = jax.random.normal(k3, (B, 2), jnp.float32)
    v2 = jax.random.normal(k4, (B, 2), jnp.float32)

    out = approximate_curve_forward(s, q1, q2, v1, v2, W_stack, b_stack)
    out = jax.block_until_ready(out)

    ref = jax.block_until_ready(reference_forward(s, q1, q2, v1, v2, params))
    assert out.shape == (B, 2) and out.dtype == jnp.float32
    np.testing.assert_allclose(np.asarray(out), np.asarray(ref),
                               rtol=1e-4, atol=1e-4)
    print("KERNEL_OK")
</pallas_src>

<mosaic_0001>
module attributes {stable_mosaic.version = 11 : i64} {
  func.func @approximate_curve_kernel(%arg0: memref<8x128xf32, #tpu.memory_space<vmem>>, %arg1: memref<9x128x128xf32, #tpu.memory_space<vmem>>, %arg2: memref<9x128xf32, #tpu.memory_space<vmem>>, %arg3: memref<8x128xf32, #tpu.memory_space<vmem>>) attributes {dimension_semantics = [], scalar_prefetch = 0 : i64, scratch_operands = 0 : i64, tpu.core_type = #tpu.core_type<tc>} {
    %c0 = arith.constant 0 : index
    %c0_0 = arith.constant 0 : index
    %0 = vector.load %arg0[%c0, %c0_0] : memref<8x128xf32, #tpu.memory_space<vmem>>, vector<8x128xf32>
    %c0_1 = arith.constant 0 : index
    %c0_2 = arith.constant 0 : index
    %1 = vector.load %arg2[%c0_1, %c0_2] : memref<9x128xf32, #tpu.memory_space<vmem>>, vector<9x128xf32>
    %2 = tpu.iota {dimensions = array<i32: 1>} : vector<1x128xi32>
    %c2_i32 = arith.constant 2 : i32
    %3 = vector.broadcast %c2_i32 : i32 to vector<1x128xi32>
    %4 = arith.cmpi slt, %2, %3 : vector<1x128xi32>
    %c8_i32 = arith.constant 8 : i32
    %5 = vector.broadcast %c8_i32 : i32 to vector<1x128xi32>
    %6 = arith.cmpi slt, %2, %5 : vector<1x128xi32>
    %cst = arith.constant 1.000000e+00 : f32
    %cst_3 = arith.constant 0.000000e+00 : f32
    %7 = vector.broadcast %cst : f32 to vector<1x128xf32>
    %8 = vector.broadcast %cst_3 : f32 to vector<1x128xf32>
    %9 = arith.select %6, %7, %8 : vector<1x128xi1>, vector<1x128xf32>
    %cst_4 = arith.constant 0.666666686 : f32
    %10 = vector.broadcast %cst_4 : f32 to vector<1x128xf32>
    %11 = arith.select %4, %10, %9 : vector<1x128xi1>, vector<1x128xf32>
    %c2_i32_5 = arith.constant 2 : i32
    %12 = vector.broadcast %c2_i32_5 : i32 to vector<1x128xi32>
    %13 = arith.cmpi slt, %2, %12 : vector<1x128xi32>
    %cst_6 = arith.constant -1.000000e+00 : f32
    %cst_7 = arith.constant 0.000000e+00 : f32
    %14 = vector.broadcast %cst_6 : f32 to vector<1x128xf32>
    %15 = vector.broadcast %cst_7 : f32 to vector<1x128xf32>
    %16 = arith.select %13, %14, %15 : vector<1x128xi1>, vector<1x128xf32>
    %cst_8 = arith.constant 1.000000e+00 : f32
    %17 = vector.broadcast %cst_8 : f32 to vector<8x1xf32>
    %cst_9 = arith.constant 0.000000e+00 : f32
    %18 = vector.broadcast %cst_9 : f32 to vector<8x1xf32>
    %19 = tpu.concatenate %17, %17, %18, %17, %18 in 0 : vector<8x1xf32>, vector<8x1xf32>, vector<8x1xf32>, vector<8x1xf32>, vector<8x1xf32> -> vector<40x1xf32>
    %cst_10 = arith.constant 5.000000e-01 : f32
    %20 = vector.broadcast %cst_10 : f32 to vector<40x1xf32>
    %21 = arith.cmpf olt, %19, %20 : vector<40x1xf32>
    %22 = vector.extract_strided_slice %0 {offsets = [0, 8], sizes = [8, 1], strides = [1, 1]} : vector<8x128xf32> to vector<8x1xf32>
    %23 = vector.extract_strided_slice %0 {offsets = [0, 0], sizes = [8, 2], strides = [1, 1]} : vector<8x128xf32> to vector<8x2xf32>
    %24 = vector.extract_strided_slice %0 {offsets = [0, 2], sizes = [8, 2], strides = [1, 1]} : vector<8x128xf32> to vector<8x2xf32>
    %25 = vector.extract_strided_slice %0 {offsets = [0, 4], sizes = [8, 2], strides = [1, 1]} : vector<8x128xf32> to vector<8x2xf32>
    %26 = vector.extract_strided_slice %0 {offsets = [0, 6], sizes = [8, 2], strides = [1, 1]} : vector<8x128xf32> to vector<8x2xf32>
    %c0_11 = arith.constant 0 : index
    %c0_12 = arith.constant 0 : index
    %c0_13 = arith.constant 0 : index
    %27 = vector.load %arg1[%c0_11, %c0_12, %c0_13] : memref<9x128x128xf32, #tpu.memory_space<vmem>>, vector<1x128x128xf32>
    %28 = vector.shape_cast %27 : vector<1x128x128xf32> to vector<128x128xf32>
    %29 = vector.extract_strided_slice %28 {offsets = [8, 0], sizes = [1, 128], strides = [1, 1]} : vector<128x128xf32> to vector<1x128xf32>
    %30 = vector.extract_strided_slice %1 {offsets = [0, 0], sizes = [1, 128], strides = [1, 1]} : vector<9x128xf32> to vector<1x128xf32>
    %31 = vector.broadcast %11 : vector<1x128xf32> to vector<8x128xf32>
    %32 = arith.mulf %0, %31 : vector<8x128xf32>
    %33 = vector.broadcast %16 : vector<1x128xf32> to vector<8x128xf32>
    %34 = arith.addf %32, %33 : vector<8x128xf32>
    %cst_14 = arith.constant dense<0.000000e+00> : vector<8x128xf32>
    %35 = tpu.matmul %34, %28, %cst_14 {dimension_numbers = #tpu.dot_dimension_numbers<[1], [0], [0], [1], [0, 0, 1, 1], [], []>, precision = #tpu.contract_precision<fp32>} : vector<8x128xf32>, vector<128x128xf32>, vector<8x128xf32> -> vector<8x128xf32>
    %36 = vector.broadcast %30 : vector<1x128xf32> to vector<8x128xf32>
    %37 = arith.addf %35, %36 : vector<8x128xf32>
    %38 = vector.broadcast %22 : vector<8x1xf32> to vector<8x128xf32>
    %39 = vector.broadcast %29 : vector<1x128xf32> to vector<8x128xf32>
    %40 = arith.mulf %38, %39 : vector<8x128xf32>
    %41 = arith.addf %40, %37 : vector<8x128xf32>
    %42 = vector.broadcast %29 : vector<1x128xf32> to vector<8x128xf32>
    %43 = arith.addf %37, %42 : vector<8x128xf32>
    %44 = tpu.concatenate %41, %37, %37, %43, %43 in 0 : vector<8x128xf32>, vector<8x128xf32>, vector<8x128xf32>, vector<8x128xf32>, vector<8x128xf32> -> vector<40x128xf32>
    %cst_15 = arith.constant 6.28318548 : f32
    %45 = vector.broadcast %cst_15 : f32 to vector<40x128xf32>
    %46 = arith.mulf %45, %44 : vector<40x128xf32>
    %47 = math.cos %46 : vector<40x128xf32>
    %cst_16 = arith.constant 6.28318548 : f32
    %48 = vector.broadcast %cst_16 : f32 to vector<40x128xf32>
    %49 = arith.mulf %48, %47 : vector<40x128xf32>
    %50 = vector.broadcast %29 : vector<1x128xf32> to vector<40x128xf32>
    %51 = arith.mulf %49, %50 : vector<40x128xf32>
    %cst_17 = arith.constant 6.28318548 : f32
    %52 = vector.broadcast %cst_17 : f32 to vector<40x128xf32>
    %53 = arith.mulf %52, %44 : vector<40x128xf32>
    %54 = math.sin %53 : vector<40x128xf32>
    %55 = vector.shape_cast %21 : vector<40x1xi1> to vector<40x1xi1>
    %56 = vector.broadcast %55 : vector<40x1xi1> to vector<40x128xi1>
    %57 = arith.select %56, %51, %54 : vector<40x128xi1>, vector<40x128xf32>
    %c1 = arith.constant 1 : index
    %c0_18 = arith.constant 0 : index
    %c0_19 = arith.constant 0 : index
    %58 = vector.load %arg1[%c1, %c0_18, %c0_19] : memref<9x128x128xf32, #tpu.memory_space<vmem>>, vector<1x128x128xf32>
    %59 = vector.shape_cast %58 : vector<1x128x128xf32> to vector<128x128xf32>
    %cst_20 = arith.constant dense<0.000000e+00> : vector<40x128xf32>
    %60 = tpu.matmul %57, %59, %cst_20 {dimension_numbers = #tpu.dot_dimension_numbers<[1], [0], [0], [1], [0, 0, 1, 1], [], []>, precision = #tpu.contract_precision<fp32>} : vector<40x128xf32>, vector<128x128xf32>, vector<40x128xf32> -> vector<40x128xf32>
    %61 = vector.extract_strided_slice %1 {offsets = [1, 0], sizes = [1, 128], strides = [1, 1]} : vector<9x128xf32> to vector<1x128xf32>
    %62 = vector.broadcast %61 : vector<1x128xf32> to vector<40x128xf32>
    %63 = arith.addf %60, %62 : vector<40x128xf32>
    %64 = math.tanh %63 : vector<40x128xf32>
    %c8_i32_21 = arith.constant 8 : i32
    %65 = tpu.dynamic_rotate %64 by %c8_i32_21 dim 0 : vector<40x128xf32>, i32 -> vector<40x128xf32>
    %66 = arith.mulf %65, %65 : vector<40x128xf32>
    %cst_22 = arith.constant 1.000000e+00 : f32
    %67 = vector.broadcast %cst_22 : f32 to vector<40x128xf32>
    %68 = arith.subf %67, %66 : vector<40x128xf32>
    %69 = arith.mulf %68, %60 : vector<40x128xf32>
    %70 = vector.shape_cast %21 : vector<40x1xi1> to vector<40x1xi1>
    %71 = vector.broadcast %70 : vector<40x1xi1> to vector<40x128xi1>
    %72 = arith.select %71, %69, %64 : vector<40x128xi1>, vector<40x128xf32>
    %c2 = arith.constant 2 : index
    %c0_23 = arith.constant 0 : index
    %c0_24 = arith.constant 0 : index
    %73 = vector.load %arg1[%c2, %c0_23, %c0_24] : memref<9x128x128xf32, #tpu.memory_space<vmem>>, vector<1x128x128xf32>
    %74 = vector.shape_cast %73 : vector<1x128x128xf32> to vector<128x128xf32>
    %cst_25 = arith.constant dense<0.000000e+00> : vector<40x128xf32>
    %75 = tpu.matmul %72, %74, %cst_25 {dimension_numbers = #tpu.dot_dimension_numbers<[1], [0], [0], [1], [0, 0, 1, 1], [], []>, precision = #tpu.contract_precision<fp32>} : vector<40x128xf32>, vector<128x128xf32>, vector<40x128xf32> -> vector<40x128xf32>
    %76 = vector.extract_strided_slice %1 {offsets = [2, 0], sizes = [1, 128], strides = [1, 1]} : vector<9x128xf32> to vector<1x128xf32>
    %77 = vector.broadcast %76 : vector<1x128xf32> to vector<40x128xf32>
    %78 = arith.addf %75, %77 : vector<40x128xf32>
    %79 = math.tanh %78 : vector<40x128xf32>
    %c8_i32_26 = arith.constant 8 : i32
    %80 = tpu.dynamic_rotate %79 by %c8_i32_26 dim 0 : vector<40x128xf32>, i32 -> vector<40x128xf32>
    %81 = arith.mulf %80, %80 : vector<40x128xf32>
    %cst_27 = arith.constant 1.000000e+00 : f32
    %82 = vector.broadcast %cst_27 : f32 to vector<40x128xf32>
    %83 = arith.subf %82, %81 : vector<40x128xf32>
    %84 = arith.mulf %83, %75 : vector<40x128xf32>
    %85 = vector.shape_cast %21 : vector<40x1xi1> to vector<40x1xi1>
    %86 = vector.broadcast %85 : vector<40x1xi1> to vector<40x128xi1>
    %87 = arith.select %86, %84, %79 : vector<40x128xi1>, vector<40x128xf32>
    %c5 = arith.constant 5 : index
    %c0_28 = arith.constant 0 : index
    %c0_29 = arith.constant 0 : index
    %88 = vector.load %arg1[%c5, %c0_28, %c0_29] : memref<9x128x128xf32, #tpu.memory_space<vmem>>, vector<1x128x128xf32>
    %89 = vector.shape_cast %88 : vector<1x128x128xf32> to vector<128x128xf32>
    %cst_30 = arith.constant dense<0.000000e+00> : vector<40x128xf32>
    %90 = tpu.matmul %87, %89, %cst_30 {dimension_numbers = #tpu.dot_dimension_numbers<[1], [0], [0], [1], [0, 0, 1, 1], [], []>, precision = #tpu.contract_precision<fp32>} : vector<40x128xf32>, vector<128x128xf32>, vector<40x128xf32> -> vector<40x128xf32>
    %91 = arith.addf %72, %90 : vector<40x128xf32>
    %92 = vector.extract_strided_slice %1 {offsets = [5, 0], sizes = [1, 128], strides = [1, 1]} : vector<9x128xf32> to vector<1x128xf32>
    %93 = vector.broadcast %19 : vector<40x1xf32> to vector<40x128xf32>
    %94 = vector.broadcast %92 : vector<1x128xf32> to vector<40x128xf32>
    %95 = arith.mulf %93, %94 : vector<40x128xf32>
    %96 = arith.addf %91, %95 : vector<40x128xf32>
    %c3 = arith.constant 3 : index
    %c0_31 = arith.constant 0 : index
    %c0_32 = arith.constant 0 : index
    %97 = vector.load %arg1[%c3, %c0_31, %c0_32] : memref<9x128x128xf32, #tpu.memory_space<vmem>>, vector<1x128x128xf32>
    %98 = vector.shape_cast %97 : vector<1x128x128xf32> to vector<128x128xf32>
    %cst_33 = arith.constant dense<0.000000e+00> : vector<40x128xf32>
    %99 = tpu.matmul %96, %98, %cst_33 {dimension_numbers = #tpu.dot_dimension_numbers<[1], [0], [0], [1], [0, 0, 1, 1], [], []>, precision = #tpu.contract_precision<fp32>} : vector<40x128xf32>, vector<128x128xf32>, vector<40x128xf32> -> vector<40x128xf32>
    %100 = vector.extract_strided_slice %1 {offsets = [3, 0], sizes = [1, 128], strides = [1, 1]} : vector<9x128xf32> to vector<1x128xf32>
    %101 = vector.broadcast %100 : vector<1x128xf32> to vector<40x128xf32>
    %102 = arith.addf %99, %101 : vector<40x128xf32>
    %103 = math.tanh %102 : vector<40x128xf32>
    %c8_i32_34 = arith.constant 8 : i32
    %104 = tpu.dynamic_rotate %103 by %c8_i32_34 dim 0 : vector<40x128xf32>, i32 -> vector<40x128xf32>
    %105 = arith.mulf %104, %104 : vector<40x128xf32>
    %cst_35 = arith.constant 1.000000e+00 : f32
    %106 = vector.broadcast %cst_35 : f32 to vector<40x128xf32>
    %107 = arith.subf %106, %105 : vector<40x128xf32>
    %108 = arith.mulf %107, %99 : vector<40x128xf32>
    %109 = vector.shape_cast %21 : vector<40x1xi1> to vector<40x1xi1>
    %110 = vector.broadcast %109 : vector<40x1xi1> to vector<40x128xi1>
    %111 = arith.select %110, %108, %103 : vector<40x128xi1>, vector<40x128xf32>
    %c6 = arith.constant 6 : index
    %c0_36 = arith.constant 0 : index
    %c0_37 = arith.constant 0 : index
    %112 = vector.load %arg1[%c6, %c0_36, %c0_37] : memref<9x128x128xf32, #tpu.memory_space<vmem>>, vector<1x128x128xf32>
    %113 = vector.shape_cast %112 : vector<1x128x128xf32> to vector<128x128xf32>
    %cst_38 = arith.constant dense<0.000000e+00> : vector<40x128xf32>
    %114 = tpu.matmul %111, %113, %cst_38 {dimension_numbers = #tpu.dot_dimension_numbers<[1], [0], [0], [1], [0, 0, 1, 1], [], []>, precision = #tpu.contract_precision<fp32>} : vector<40x128xf32>, vector<128x128xf32>, vector<40x128xf32> -> vector<40x128xf32>
    %115 = arith.addf %96, %114 : vector<40x128xf32>
    %116 = vector.extract_strided_slice %1 {offsets = [6, 0], sizes = [1, 128], strides = [1, 1]} : vector<9x128xf32> to vector<1x128xf32>
    %117 = vector.broadcast %19 : vector<40x1xf32> to vector<40x128xf32>
    %118 = vector.broadcast %116 : vector<1x128xf32> to vector<40x128xf32>
    %119 = arith.mulf %117, %118 : vector<40x128xf32>
    %120 = arith.addf %115, %119 : vector<40x128xf32>
    %c4 = arith.constant 4 : index
    %c0_39 = arith.constant 0 : index
    %c0_40 = arith.constant 0 : index
    %121 = vector.load %arg1[%c4, %c0_39, %c0_40] : memref<9x128x128xf32, #tpu.memory_space<vmem>>, vector<1x128x128xf32>
    %122 = vector.shape_cast %121 : vector<1x128x128xf32> to vector<128x128xf32>
    %cst_41 = arith.constant dense<0.000000e+00> : vector<40x128xf32>
    %123 = tpu.matmul %120, %122, %cst_41 {dimension_numbers = #tpu.dot_dimension_numbers<[1], [0], [0], [1], [0, 0, 1, 1], [], []>, precision = #tpu.contract_precision<fp32>} : vector<40x128xf32>, vector<128x128xf32>, vector<40x128xf32> -> vector<40x128xf32>
    %124 = vector.extract_strided_slice %1 {offsets = [4, 0], sizes = [1, 128], strides = [1, 1]} : vector<9x128xf32> to vector<1x128xf32>
    %125 = vector.broadcast %124 : vector<1x128xf32> to vector<40x128xf32>
    %126 = arith.addf %123, %125 : vector<40x128xf32>
    %127 = math.tanh %126 : vector<40x128xf32>
    %c8_i32_42 = arith.constant 8 : i32
    %128 = tpu.dynamic_rotate %127 by %c8_i32_42 dim 0 : vector<40x128xf32>, i32 -> vector<40x128xf32>
    %129 = arith.mulf %128, %128 : vector<40x128xf32>
    %cst_43 = arith.constant 1.000000e+00 : f32
    %130 = vector.broadcast %cst_43 : f32 to vector<40x128xf32>
    %131 = arith.subf %130, %129 : vector<40x128xf32>
    %132 = arith.mulf %131, %123 : vector<40x128xf32>
    %133 = vector.shape_cast %21 : vector<40x1xi1> to vector<40x1xi1>
    %134 = vector.broadcast %133 : vector<40x1xi1> to vector<40x128xi1>
    %135 = arith.select %134, %132, %127 : vector<40x128xi1>, vector<40x128xf32>
    %c7 = arith.constant 7 : index
    %c0_44 = arith.constant 0 : index
    %c0_45 = arith.constant 0 : index
    %136 = vector.load %arg1[%c7, %c0_44, %c0_45] : memref<9x128x128xf32, #tpu.memory_space<vmem>>, vector<1x128x128xf32>
    %137 = vector.shape_cast %136 : vector<1x128x128xf32> to vector<128x128xf32>
    %cst_46 = arith.constant dense<0.000000e+00> : vector<40x128xf32>
    %138 = tpu.matmul %135, %137, %cst_46 {dimension_numbers = #tpu.dot_dimension_numbers<[1], [0], [0], [1], [0, 0, 1, 1], [], []>, precision = #tpu.contract_precision<fp32>} : vector<40x128xf32>, vector<128x128xf32>, vector<40x128xf32> -> vector<40x128xf32>
    %139 = arith.addf %120, %138 : vector<40x128xf32>
    %140 = vector.extract_strided_slice %1 {offsets = [7, 0], sizes = [1, 128], strides = [1, 1]} : vector<9x128xf32> to vector<1x128xf32>
    %141 = vector.broadcast %19 : vector<40x1xf32> to vector<40x128xf32>
    %142 = vector.broadcast %140 : vector<1x128xf32> to vector<40x128xf32>
    %143 = arith.mulf %141, %142 : vector<40x128xf32>
    %144 = arith.addf %139, %143 : vector<40x128xf32>
    %c8 = arith.constant 8 : index
    %c0_47 = arith.constant 0 : index
    %c0_48 = arith.constant 0 : index
    %145 = vector.load %arg1[%c8, %c0_47, %c0_48] : memref<9x128x128xf32, #tpu.memory_space<vmem>>, vector<1x128x128xf32>
    %146 = vector.shape_cast %145 : vector<1x128x128xf32> to vector<128x128xf32>
    %cst_49 = arith.constant dense<0.000000e+00> : vector<40x128xf32>
    %147 = tpu.matmul %144, %146, %cst_49 {dimension_numbers = #tpu.dot_dimension_numbers<[1], [0], [0], [1], [0, 0, 1, 1], [], []>, precision = #tpu.contract_precision<fp32>} : vector<40x128xf32>, vector<128x128xf32>, vector<40x128xf32> -> vector<40x128xf32>
    %148 = vector.extract_strided_slice %1 {offsets = [8, 0], sizes = [1, 128], strides = [1, 1]} : vector<9x128xf32> to vector<1x128xf32>
    %149 = vector.broadcast %19 : vector<40x1xf32> to vector<40x128xf32>
    %150 = vector.broadcast %148 : vector<1x128xf32> to vector<40x128xf32>
    %151 = arith.mulf %149, %150 : vector<40x128xf32>
    %152 = arith.addf %147, %151 : vector<40x128xf32>
    %153 = vector.extract_strided_slice %152 {offsets = [0, 0], sizes = [8, 2], strides = [1, 1]} : vector<40x128xf32> to vector<8x2xf32>
    %154 = vector.extract_strided_slice %152 {offsets = [8, 0], sizes = [8, 2], strides = [1, 1]} : vector<40x128xf32> to vector<8x2xf32>
    %155 = vector.extract_strided_slice %152 {offsets = [16, 0], sizes = [8, 2], strides = [1, 1]} : vector<40x128xf32> to vector<8x2xf32>
    %156 = vector.extract_strided_slice %152 {offsets = [24, 0], sizes = [8, 2], strides = [1, 1]} : vector<40x128xf32> to vector<8x2xf32>
    %157 = vector.extract_strided_slice %152 {offsets = [32, 0], sizes = [8, 2], strides = [1, 1]} : vector<40x128xf32> to vector<8x2xf32>
    %158 = arith.subf %23, %154 : vector<8x2xf32>
    %159 = arith.subf %25, %155 : vector<8x2xf32>
    %cst_50 = arith.constant 2.000000e+00 : f32
    %160 = vector.broadcast %cst_50 : f32 to vector<8x2xf32>
    %161 = arith.mulf %160, %155 : vector<8x2xf32>
    %162 = arith.addf %161, %157 : vector<8x2xf32>
    %cst_51 = arith.constant 3.000000e+00 : f32
    %163 = vector.broadcast %cst_51 : f32 to vector<8x2xf32>
    %164 = arith.mulf %163, %156 : vector<8x2xf32>
    %165 = arith.subf %162, %164 : vector<8x2xf32>
    %cst_52 = arith.constant 3.000000e+00 : f32
    %166 = vector.broadcast %cst_52 : f32 to vector<8x2xf32>
    %167 = arith.mulf %166, %154 : vector<8x2xf32>
    %168 = arith.addf %165, %167 : vector<8x2xf32>
    %cst_53 = arith.constant 3.000000e+00 : f32
    %169 = vector.broadcast %cst_53 : f32 to vector<8x2xf32>
    %170 = arith.mulf %169, %23 : vector<8x2xf32>
    %171 = arith.subf %168, %170 : vector<8x2xf32>
    %cst_54 = arith.constant 3.000000e+00 : f32
    %172 = vector.broadcast %cst_54 : f32 to vector<8x2xf32>
    %173 = arith.mulf %172, %24 : vector<8x2xf32>
    %174 = arith.addf %171, %173 : vector<8x2xf32>
    %cst_55 = arith.constant 2.000000e+00 : f32
    %175 = vector.broadcast %cst_55 : f32 to vector<8x2xf32>
    %176 = arith.mulf %175, %25 : vector<8x2xf32>
    %177 = arith.subf %174, %176 : vector<8x2xf32>
    %178 = arith.subf %177, %26 : vector<8x2xf32>
    %cst_56 = arith.constant 0.000000e+00 : f32
    %179 = vector.broadcast %cst_56 : f32 to vector<8x2xf32>
    %180 = arith.subf %179, %157 : vector<8x2xf32>
    %cst_57 = arith.constant 2.000000e+00 : f32
    %181 = vector.broadcast %cst_57 : f32 to vector<8x2xf32>
    %182 = arith.mulf %181, %156 : vector<8x2xf32>
    %183 = arith.addf %180, %182 : vector<8x2xf32>
    %cst_58 = arith.constant 2.000000e+00 : f32
    %184 = vector.broadcast %cst_58 : f32 to vector<8x2xf32>
    %185 = arith.mulf %184, %154 : vector<8x2xf32>
    %186 = arith.subf %183, %185 : vector<8x2xf32>
    %cst_59 = arith.constant 2.000000e+00 : f32
    %187 = vector.broadcast %cst_59 : f32 to vector<8x2xf32>
    %188 = arith.mulf %187, %23 : vector<8x2xf32>
    %189 = arith.addf %186, %188 : vector<8x2xf32>
    %190 = arith.subf %189, %155 : vector<8x2xf32>
    %cst_60 = arith.constant 2.000000e+00 : f32
    %191 = vector.broadcast %cst_60 : f32 to vector<8x2xf32>
    %192 = arith.mulf %191, %24 : vector<8x2xf32>
    %193 = arith.subf %190, %192 : vector<8x2xf32>
    %194 = arith.addf %193, %25 : vector<8x2xf32>
    %195 = arith.addf %194, %26 : vector<8x2xf32>
    %196 = arith.mulf %22, %22 : vector<8x1xf32>
    %197 = arith.addf %153, %158 : vector<8x2xf32>
    %198 = vector.broadcast %22 : vector<8x1xf32> to vector<8x2xf32>
    %199 = arith.mulf %159, %198 : vector<8x2xf32>
    %200 = arith.addf %197, %199 : vector<8x2xf32>
    %201 = vector.broadcast %196 : vector<8x1xf32> to vector<8x2xf32>
    %202 = arith.mulf %178, %201 : vector<8x2xf32>
    %203 = arith.addf %200, %202 : vector<8x2xf32>
    %204 = arith.mulf %196, %22 : vector<8x1xf32>
    %205 = vector.broadcast %204 : vector<8x1xf32> to vector<8x2xf32>
    %206 = arith.mulf %195, %205 : vector<8x2xf32>
    %207 = arith.addf %203, %206 : vector<8x2xf32>
    %cst_61 = arith.constant 0.000000e+00 : f32
    %208 = vector.broadcast %cst_61 : f32 to vector<8x128xf32>
    %c0_62 = arith.constant 0 : index
    %c0_63 = arith.constant 0 : index
    %209 = vector.load %arg3[%c0_62, %c0_63] : memref<8x128xf32, #tpu.memory_space<vmem>>, vector<8x128xf32>
    tpu.vector_store %arg3[%c0_62, %c0_63], %208 {strides = array<i32>} : memref<8x128xf32, #tpu.memory_space<vmem>>, vector<8x128xf32>,
    %c0_64 = arith.constant 0 : index
    %c0_65 = arith.constant 0 : index
    %210 = vector.load %arg3[%c0_64, %c0_65] : memref<8x128xf32, #tpu.memory_space<vmem>>, vector<8x2xf32>
    tpu.vector_store %arg3[%c0_64, %c0_65], %207 {strides = array<i32>} : memref<8x128xf32, #tpu.memory_space<vmem>>, vector<8x2xf32>,
    return
  }
}

</mosaic_0001>

<bundles_post_ra>
// kernel: approximate_curve_forward.1
= control target key start
LH: loop header
LB: loop body
LE: loop exit
PB: predicated region body
PF: predicated region fallthrough
CT: control target
= control target key end

     0   :  { %8 = vsyncpa [#allocation3], 0  ;;  %s11998_s12 = smov [#allocation2]   ;;  %s16635_s0 = inlined_call_operand.vmem [shape: f32[8,128], index: 0, kind: input, shape index: {}]   ;;  %s16636_s1 = inlined_call_operand.hbm [shape: f32[9,128,128], index: 1, kind: input, shape index: {}]   ;;  %s16637_s2 = inlined_call_operand.vmem [shape: f32[9,128], index: 2, kind: input, shape index: {}]   ;;  %s16638_s3 = inlined_call_operand.vmem [shape: f32[8,128], index: 3, kind: output, shape index: {}]  }
   0x1   :  { %s16_s13 = sshll.u32 %s11998_s12, 4  ;;  %s17_s13 = int_to_ptr.vmem [resolvable:$true] %s16_s13 }
   0x2   :  { %s11984_s14 = scalar_lea.vmem %s17_s13, 18432  ;;  %p11989_p1 = scmp.lt.s32.totalorder %s17_s13, %s17_s13 }
   0x3   :  { %p11985_p0 = scmp.ne.s32.totalorder %s17_s13, %s11984_s14  ;;  %p11990_p2 = scmp.lt.s32.totalorder %s11984_s14, %s11984_s14 }
   0x5   :  { %p11991_p3 = por %p11990_p2, %p11989_p1 }
   0x7   :  { %p11992_p4 = pnand %p11991_p3, %p11985_p0 }
   0x9   :  { %11995 = shalt.err (!%p11992_p4)
}
   0xa   :  { %s11999_s15 = smov 128   ;;  %s12000_s16 = smov 8  }
   0xb   :  { %22 = dma.hbm_to_vmem [thread:$0]  %s16636_s1, 18432, %s17_s13, [#allocation3], %s11999_s15, %s11999_s15, %s12000_s16  }
   0xc   :  { %11996 = dma.done.wait [#allocation3], 18432  }
   0xd   :  { %11997 = vsyncadd [#allocation3], 4294948864  ;;  %v16639_v0 = vlaneseq  ;;  %v12001_v1 = vmov 0.0   ;;  %vm12002_vm0 = vmmov 0   ;;  %v12003_v3 = vmov 8   ;;  %v55_v4 = vld [vmem:[#allocation2 + $0x78] sm:$0xff] }
   0xe   :  { %9411 = vmatprep.subr.mxu0 %v12001_v1  ;;  %8268 = vst [vmem:[%s16638_s3] sm:$0xff] %v12001_v1  ;;  %9446 = vmatprep.subr.mxu1 %v12001_v1  ;;  %v54_v5 = vld [vmem:[#allocation2 + $0x70] sm:$0xff]  ;;  %v53_v6 = vld [vmem:[#allocation2 + $0x68] sm:$0xff]  ;;  %v12054_v7 = vand.u32 4294901760, %v55_v4  ;;  %v52_v10 = vld [vmem:[#allocation2 + $0x60] sm:$0xff]  ;;  %s12012_s22 = smov 124   ;;  %s12015_s25 = smov 122  }
   0xf   :  { %9443 = vmatprep.mubr.msk.f32.mxu0 %vm12002_vm0, %v12001_v1  ;;  %9478 = vmatprep.mubr.msk.f32.mxu1 %vm12002_vm0, %v12001_v1  ;;  %v12050_v2 = vand.u32 127, %v16639_v0  ;;  %v12056_v8 = vand.u32 4294901760, %v54_v5  ;;  %v12058_v9 = vand.u32 4294901760, %v53_v6  ;;  %v51_v11 = vld [vmem:[#allocation2 + $0x58] sm:$0xff]  ;;  %v50_v12 = vld [vmem:[#allocation2 + $0x50] sm:$0xff]  ;;  %v12060_v13 = vand.u32 4294901760, %v52_v10 }
  0x10   :  { %11907 = vset.pattern.permute.xlu0 %v12003_v3  ;;  %v12062_v14 = vand.u32 4294901760, %v51_v11  ;;  %v12064_v15 = vand.u32 4294901760, %v50_v12  ;;  %v49_v16 = vld [vmem:[#allocation2 + $0x48] sm:$0xff]  ;;  %v48_v17 = vld [vmem:[#allocation2 + $0x40] sm:$0xff]  ;;  %9412 = vmatpush3.msra.mxu0 %v12054_v7  ;;  %v12068_v18 = vsub.f32 %v55_v4, %v12054_v7  ;;  %v47_v22 = vld [vmem:[#allocation2 + $0x38] sm:$0xff] }
  0x11   :  { %vm34_vm1 = vcmp.lt.s32.totalorder %v12050_v2, 8  ;;  %v12071_v19 = vsub.f32 %v54_v5, %v12056_v8  ;;  %v12073_v20 = vand.u32 4294901760, %v49_v16  ;;  %v12076_v21 = vsub.f32 %v53_v6, %v12058_v9  ;;  %9413 = vmatprep.subr.mxu0 %v12001_v1  ;;  %v46_v30 = vld [vmem:[#allocation2 + $0x30] sm:$0xff]  ;;  %v28_v31 = vld [vmem:[%s16635_s0] sm:$0xff]  ;;  %v45_v39 = vld [vmem:[#allocation2 + $0x28] sm:$0xff] }
  0x12   :  { %v12080_v23 = vsub.f32 %v52_v10, %v12060_v13  ;;  %v12083_v24 = vsub.f32 %v51_v11, %v12062_v14  ;;  %vm33_vm2 = vcmp.lt.s32.totalorder %v12050_v2, 2  ;;  %v35_v25 = vsel %vm34_vm1, 1.0, %v12001_v1  ;;  %9414 = vmatpush3.msra.mxu0 %v12056_v8  ;;  %705 = vperm.xlu0 %11907, %v28_v31   ;;  %v44_v46 = vld [vmem:[#allocation2 + $0x20] sm:$0xff]  ;;  %v43_v55 = vld [vmem:[#allocation2 + $0x18] sm:$0xff]  ;;  %v42_v60 = vld [vmem:[#allocation2 + $0x10] sm:$0xff] }
  0x13   :  { %v156_v26 = vand.u32 4294901760, %v12068_v18  ;;  %v163_v27 = vand.u32 4294901760, %v12071_v19  ;;  %v170_v28 = vand.u32 4294901760, %v12076_v21  ;;  %v12093_v29 = vand.u32 4294901760, %v48_v17  ;;  %9415 = vmatprep.subr.mxu0 %v12001_v1  ;;  %v12174_v11 = vld [vmem:[#allocation2 + $0x8] sm:$0xff] }
  0x14   :  { %v177_v32 = vand.u32 4294901760, %v12080_v23  ;;  %v12100_v33 = vand.u32 4294901760, %v47_v22  ;;  %v184_v34 = vand.u32 4294901760, %v12083_v24  ;;  %v12104_v35 = vsub.f32 %v50_v12, %v12064_v15  ;;  %9416 = vmatpush3.msra.mxu0 %v12058_v9 }
  0x15   :  { %v157_v36 = vsub.f32 %v12068_v18, %v156_v26  ;;  %v164_v37 = vsub.f32 %v12071_v19, %v163_v27  ;;  %v171_v38 = vsub.f32 %v12076_v21, %v170_v28  ;;  %v12117_v40 = vsub.f32 %v49_v16, %v12073_v20  ;;  %9417 = vmatprep.subr.mxu0 %v12001_v1 }
  0x16   :  { %v12120_v41 = vand.u32 4294901760, %v46_v30  ;;  %9418 = vmatpush3.msra.mxu0 %v12060_v13  ;;  %v178_v44 = vsub.f32 %v12080_v23, %v177_v32  ;;  %v191_v45 = vand.u32 4294901760, %v12104_v35  ;;  %v12128_v47 = vand.u32 4294901760, %v45_v39 }
  0x17   :  { %v158_v42 = vand.u32 4294901760, %v157_v36  ;;  %v165_v43 = vand.u32 4294901760, %v164_v37  ;;  %9419 = vmatprep.subr.mxu0 %v12001_v1  ;;  %v12131_v48 = vsub.f32 %v48_v17, %v12093_v29  ;;  %v36_v49 = vsel %vm33_vm2, 0.6666667, %v35_v25  ;;  %v40_v25 = vld [vmem:[#allocation2] sm:$0xff] }
  0x18   :  { %9420 = vmatpush3.msra.mxu0 %v12062_v14  ;;  %v172_v50 = vand.u32 4294901760, %v171_v38  ;;  %v185_v51 = vsub.f32 %v12083_v24, %v184_v34  ;;  %v198_v52 = vand.u32 4294901760, %v12117_v40  ;;  %v12141_v53 = vsub.f32 %v47_v22, %v12100_v33 }
  0x19   :  { %9447 = vmatpush3.msra.mxu1 %v158_v42  ;;  %9421 = vmatprep.subr.mxu0 %v12001_v1  ;;  %v12145_v54 = vand.u32 4294901760, %v44_v46  ;;  %v37_v56 = vsel %vm33_vm2, -1.0, %v12001_v1  ;;  %v179_v57 = vand.u32 4294901760, %v178_v44  ;;  %v192_v58 = vsub.f32 %v12104_v35, %v191_v45 }
  0x1a   :  { %9448 = vmatprep.subr.mxu1 %v12001_v1  ;;  %9422 = vmatpush3.msra.mxu0 %v12064_v15  ;;  %v205_v59 = vand.u32 4294901760, %v12131_v48  ;;  %v12156_v61 = vsub.f32 %v46_v30, %v12120_v41  ;;  %v212_v62 = vand.u32 4294901760, %v12141_v53  ;;  %v56_v63 = vmul.f32 %v36_v49, %v28_v31 }
  0x1b   :  { %9449 = vmatpush3.msra.mxu1 %v165_v43  ;;  %9423 = vmatprep.subr.mxu0 %v12001_v1  ;;  %v186_v2 = vand.u32 4294901760, %v185_v51  ;;  %v199_v4 = vsub.f32 %v12117_v40, %v198_v52  ;;  %v12165_v5 = vand.u32 4294901760, %v43_v55  ;;  %v12168_v6 = vsub.f32 %v45_v39, %v12128_v47 }
  0x1c   :  { %9450 = vmatprep.subr.mxu1 %v12001_v1  ;;  %9424 = vmatpush3.msra.mxu0 %v12073_v20  ;;  %v12172_v10 = vand.u32 4294901760, %v42_v60  ;;  %v57_v12 = vadd.f32 %v56_v63, %v37_v56  ;;  %v193_v16 = vand.u32 4294901760, %v192_v58  ;;  %v206_v17 = vsub.f32 %v12131_v48, %v205_v59 }
  0x1d   :  { %9451 = vmatpush3.msra.mxu1 %v172_v50  ;;  %9425 = vmatprep.subr.mxu0 %v12001_v1  ;;  %v219_v22 = vand.u32 4294901760, %v12156_v61  ;;  %v12182_v30 = vsub.f32 %v44_v46, %v12145_v54  ;;  %v213_v31 = vsub.f32 %v12141_v53, %v212_v62  ;;  %v200_v37 = vand.u32 4294901760, %v199_v4 }
  0x1e   :  { %9452 = vmatprep.subr.mxu1 %v12001_v1  ;;  %9426 = vmatpush3.msra.mxu0 %v12093_v29  ;;  %v12189_v36 = vand.u32 4294901760, %v57_v12  ;;  %v12193_v38 = vand.u32 4294901760, %v12174_v11  ;;  %v226_v39 = vand.u32 4294901760, %v12168_v6  ;;  %v12197_v42 = vsub.f32 %v43_v55, %v12165_v5 }
  0x1f   :  { %9453 = vmatpush3.msra.mxu1 %v179_v57  ;;  %9427 = vmatprep.subr.mxu0 %v12001_v1  ;;  %v12201_v43 = vand.u32 4294901760, %v40_v25  ;;  %v207_v46 = vand.u32 4294901760, %v206_v17  ;;  %v220_v49 = vsub.f32 %v12156_v61, %v219_v22  ;;  %v233_v50 = vand.u32 4294901760, %v12182_v30 }
  0x20   :  { %9454 = vmatprep.subr.mxu1 %v12001_v1  ;;  %9428 = vmatpush3.msra.mxu0 %v12100_v33  ;;  %v12204_v44 = vsub.f32 %v57_v12, %v12189_v36  ;;  %v12212_v51 = vsub.f32 %v42_v60, %v12172_v10  ;;  %v214_v55 = vand.u32 4294901760, %v213_v31  ;;  %v227_v56 = vsub.f32 %v12168_v6, %v226_v39 }
  0x21   :  { %9455 = vmatpush3.msra.mxu1 %v186_v2  ;;  %9429 = vmatprep.subr.mxu0 %v12001_v1  ;;  %v240_v58 = vand.u32 4294901760, %v12197_v42  ;;  %v12224_v60 = vsub.f32 %v12174_v11, %v12193_v38  ;;  %v221_v63 = vand.u32 4294901760, %v220_v49  ;;  %v234_v2 = vsub.f32 %v12182_v30, %v233_v50 }
  0x22   :  { %9456 = vmatprep.subr.mxu1 %v12001_v1  ;;  %9430 = vmatpush3.msra.mxu0 %v12120_v41  ;;  %v145_v57 = vand.u32 4294901760, %v12204_v44  ;;  %v247_v4 = vand.u32 4294901760, %v12212_v51  ;;  %v12234_v12 = vsub.f32 %v40_v25, %v12201_v43 }
  0x23   :  { %9457 = vmatpush3.msra.mxu1 %v193_v16  ;;  %9431 = vmatprep.subr.mxu0 %v12001_v1  ;;  %v228_v16 = vand.u32 4294901760, %v227_v56  ;;  %v241_v31 = vsub.f32 %v12197_v42, %v240_v58  ;;  %v235_v25 = vand.u32 4294901760, %v234_v2 }
  0x24   :  { %9458 = vmatprep.subr.mxu1 %v12001_v1  ;;  %9432 = vmatpush3.msra.mxu0 %v12128_v47  ;;  %v146_v17 = vsub.f32 %v12204_v44, %v145_v57  ;;  %v261_v49 = vand.u32 4294901760, %v12234_v12 }
  0x25   :  { %9459 = vmatpush3.msra.mxu1 %v200_v37  ;;  %9433 = vmatprep.subr.mxu0 %v12001_v1  ;;  %v254_v37 = vand.u32 4294901760, %v12224_v60  ;;  %v242_v56 = vand.u32 4294901760, %v241_v31 }
  0x26   :  { %9460 = vmatprep.subr.mxu1 %v12001_v1  ;;  %9434 = vmatpush3.msra.mxu0 %v12145_v54  ;;  %v262_v0 = vsub.f32 %v12234_v12, %v261_v49 }
  0x27   :  { %9461 = vmatpush3.msra.mxu1 %v207_v46  ;;  %9435 = vmatprep.subr.mxu0 %v12001_v1  ;;  %v248_v46 = vsub.f32 %v12212_v51, %v247_v4 }
  0x28   :  { %9462 = vmatprep.subr.mxu1 %v12001_v1  ;;  %9436 = vmatpush3.msra.mxu0 %v12165_v5 }
  0x29   :  { %9463 = vmatpush3.msra.mxu1 %v214_v55  ;;  %9437 = vmatprep.subr.mxu0 %v12001_v1  ;;  %v147_v55 = vand.u32 4294901760, %v146_v17  ;;  %v249_v2 = vand.u32 4294901760, %v248_v46  ;;  %v263_v17 = vand.u32 4294901760, %v262_v0  ;;  %v12004_v0 = vmov 0  }
  0x2a   :  { %9464 = vmatprep.subr.mxu1 %v12001_v1  ;;  %9438 = vmatpush3.msra.mxu0 %v12172_v10 }
  0x2b   :  { %9465 = vmatpush3.msra.mxu1 %v221_v63  ;;  %9439 = vmatprep.subr.mxu0 %v12001_v1  ;;  %v255_v63 = vsub.f32 %v12224_v60, %v254_v37 }
  0x2c   :  { %9466 = vmatprep.subr.mxu1 %v12001_v1  ;;  %9440 = vmatpush3.msra.mxu0 %v12193_v38 }
  0x2d   :  { %9467 = vmatpush3.msra.mxu1 %v228_v16  ;;  %9441 = vmatprep.subr.mxu0 %v12001_v1  ;;  %v256_v16 = vand.u32 4294901760, %v255_v63 }
  0x2e   :  { %9468 = vmatprep.subr.mxu1 %v12001_v1  ;;  %9442 = vmatpush3.msra.mxu0 %v12201_v43 }
  0x2f   :  { %9469 = vmatpush3.msra.mxu1 %v235_v25  ;;  %9481 = vmatprep.subr.mxu0 %v12001_v1 }
  0x30   :  { %9470 = vmatprep.subr.mxu1 %v12001_v1  ;;  %9444 = vmatmul.mubr.f32.vlgmr.msra.gmra.mxu0 %v147_v55  ;;  %v1366_v55 = vld [vmem:[#allocation2 + $0xa8] sm:$0xff] }
  0x31   :  { %9471 = vmatpush3.msra.mxu1 %v242_v56  ;;  %9482 = vmatpush3.msra.mxu0 %v12068_v18  ;;  %v1376_v18 = vld [vmem:[#allocation2 + $0xf8] sm:$0xff]  ;;  %v1365_v56 = vld [vmem:[#allocation2 + $0xa0] sm:$0xff] }
  0x32   :  { %9472 = vmatprep.subr.mxu1 %v12001_v1  ;;  %9483 = vmatprep.subr.mxu0 %v12001_v1 }
  0x33   :  { %9473 = vmatpush3.msra.mxu1 %v249_v2  ;;  %9484 = vmatpush3.msra.mxu0 %v12071_v19  ;;  %v12440_v19 = vand.u32 4294901760, %v1376_v18 }
  0x34   :  { %9474 = vmatprep.subr.mxu1 %v12001_v1  ;;  %9485 = vmatprep.subr.mxu0 %v12001_v1 }
  0x35   :  { %9475 = vmatpush3.msra.mxu1 %v256_v16  ;;  %9486 = vmatpush3.msra.mxu0 %v12076_v21  ;;  %v1375_v21 = vld [vmem:[#allocation2 + $0xf0] sm:$0xff]  ;;  %v12532_v16 = vand.u32 4294901760, %v1366_v55 }
  0x36   :  { %9476 = vmatprep.subr.mxu1 %v12001_v1  ;;  %9487 = vmatprep.subr.mxu0 %v12001_v1 }
  0x37   :  { %9477 = vmatpush3.msra.mxu1 %v263_v17  ;;  %9488 = vmatpush3.msra.mxu0 %v12080_v23  ;;  %v12443_v23 = vsub.f32 %v1376_v18, %v12440_v19  ;;  %v12535_v17 = vand.u32 4294901760, %v1365_v56 }
  0x38   :  { %9479 = vmatmul.mubr.f32.vlgmr.msra.gmra.mxu1 %v12189_v36  ;;  %9489 = vmatprep.subr.mxu0 %v12001_v1 }
  0x39   :  { %9516 = vmatprep.subr.mxu1 %v12001_v1  ;;  %9490 = vmatpush3.msra.mxu0 %v12083_v24  ;;  %v12445_v24 = vand.u32 4294901760, %v1375_v21 }
  0x3a   :  { %9517 = vmatpush3.msra.mxu1 %v12054_v7  ;;  %9491 = vmatprep.subr.mxu0 %v12001_v1 }
  0x3b   :  { %9518 = vmatprep.subr.mxu1 %v12001_v1  ;;  %9492 = vmatpush3.msra.mxu0 %v12104_v35 }
  0x3c   :  { %9519 = vmatpush3.msra.mxu1 %v12056_v8  ;;  %9493 = vmatprep.subr.mxu0 %v12001_v1 }
  0x3d   :  { %9520 = vmatprep.subr.mxu1 %v12001_v1  ;;  %9494 = vmatpush3.msra.mxu0 %v12117_v40  ;;  %v1372_v40 = vld [vmem:[#allocation2 + $0xd8] sm:$0xff] }
  0x3e   :  { %9521 = vmatpush3.msra.mxu1 %v12058_v9  ;;  %9495 = vmatprep.subr.mxu0 %v12001_v1 }
  0x3f   :  { %9522 = vmatprep.subr.mxu1 %v12001_v1  ;;  %9496 = vmatpush3.msra.mxu0 %v12131_v48 }
  0x40   :  { %9523 = vmatpush3.msra.mxu1 %v12060_v13  ;;  %9497 = vmatprep.subr.mxu0 %v12001_v1 }
  0x41   :  { %9524 = vmatprep.subr.mxu1 %v12001_v1  ;;  %9498 = vmatpush3.msra.mxu0 %v12141_v53  ;;  %v12478_v53 = vand.u32 4294901760, %v1372_v40 }
  0x42   :  { %9525 = vmatpush3.msra.mxu1 %v12062_v14  ;;  %9499 = vmatprep.subr.mxu0 %v12001_v1 }
  0x43   :  { %9526 = vmatprep.subr.mxu1 %v12001_v1  ;;  %9500 = vmatpush3.msra.mxu0 %v12156_v61 }
  0x44   :  { %9527 = vmatpush3.msra.mxu1 %v12064_v15  ;;  %9501 = vmatprep.subr.mxu0 %v12001_v1 }
  0x45   :  { %9528 = vmatprep.subr.mxu1 %v12001_v1  ;;  %9502 = vmatpush3.msra.mxu0 %v12168_v6 }
  0x46   :  { %9529 = vmatpush3.msra.mxu1 %v12073_v20  ;;  %9503 = vmatprep.subr.mxu0 %v12001_v1 }
  0x47   :  { %9530 = vmatprep.subr.mxu1 %v12001_v1  ;;  %9504 = vmatpush3.msra.mxu0 %v12182_v30 }
  0x48   :  { %9531 = vmatpush3.msra.mxu1 %v12093_v29  ;;  %9505 = vmatprep.subr.mxu0 %v12001_v1 }
  0x49   :  { %9532 = vmatprep.subr.mxu1 %v12001_v1  ;;  %9506 = vmatpush3.msra.mxu0 %v12197_v42 }
  0x4a   :  { %9533 = vmatpush3.msra.mxu1 %v12100_v33  ;;  %9507 = vmatprep.subr.mxu0 %v12001_v1 }
  0x4b   :  { %9534 = vmatprep.subr.mxu1 %v12001_v1  ;;  %9508 = vmatpush3.msra.mxu0 %v12212_v51 }
  0x4c   :  { %9535 = vmatpush3.msra.mxu1 %v12120_v41  ;;  %9509 = vmatprep.subr.mxu0 %v12001_v1 }
  0x4d   :  { %9536 = vmatprep.subr.mxu1 %v12001_v1  ;;  %9510 = vmatpush3.msra.mxu0 %v12224_v60 }
  0x4e   :  { %9537 = vmatpush3.msra.mxu1 %v12128_v47  ;;  %9511 = vmatprep.subr.mxu0 %v12001_v1 }
  0x4f   :  { %9538 = vmatprep.subr.mxu1 %v12001_v1  ;;  %9512 = vmatpush3.msra.mxu0 %v12234_v12  ;;  %v1368_v12 = vld [vmem:[#allocation2 + $0xb8] sm:$0xff] }
  0x50   :  { %9513 = vmatprep.mubr.msk.f32.mxu0 %vm12002_vm0, %v12001_v1  ;;  %9539 = vmatpush3.msra.mxu1 %v12145_v54  ;;  %v12526_v46 = vand.u32 4294901760, %v1368_v12 }
  0x51   :  { %9514 = vmatmul.mubr.f32.vlgmr.msra.gmra.mxu0 %v12204_v44  ;;  %9540 = vmatprep.subr.mxu1 %v12001_v1 }
  0x52   :  { %9551 = vmatprep.subr.mxu0 %v12001_v1  ;;  %9541 = vmatpush3.msra.mxu1 %v12165_v5  ;;  %v12542_v18 = vsub.f32 %v1368_v12, %v12526_v46 }
  0x53   :  { %9552 = vmatpush3.msra.mxu0 %v156_v26  ;;  %9542 = vmatprep.subr.mxu1 %v12001_v1  ;;  %v16655_v26 = vand.u32 4294901760, %v12443_v23 }
  0x54   :  { %9553 = vmatprep.subr.mxu0 %v12001_v1  ;;  %9543 = vmatpush3.msra.mxu1 %v12172_v10 }
  0x55   :  { %9554 = vmatpush3.msra.mxu0 %v163_v27  ;;  %9544 = vmatprep.subr.mxu1 %v12001_v1  ;;  %v12451_v27 = vsub.f32 %v1375_v21, %v12445_v24  ;;  %v12549_v21 = vsub.f32 %v1366_v55, %v12532_v16 }
  0x56   :  { %9555 = vmatprep.subr.mxu0 %v12001_v1  ;;  %9545 = vmatpush3.msra.mxu1 %v12193_v38 }
  0x57   :  { %9556 = vmatpush3.msra.mxu0 %v170_v28  ;;  %9546 = vmatprep.subr.mxu1 %v12001_v1  ;;  %16848 = vst [vmem:[#allocation6_spill] sm:$0xff] %v12549_v21 }
  0x58   :  { %9557 = vmatprep.subr.mxu0 %v12001_v1  ;;  %9547 = vmatpush3.msra.mxu1 %v12201_v43 }
  0x59   :  { %9548 = vmatprep.mubr.msk.f32.mxu1 %vm12002_vm0, %v12001_v1  ;;  %9558 = vmatpush3.msra.mxu0 %v177_v32  ;;  %v1512_v32 = vsub.f32 %v12443_v23, %v16655_v26 }
  0x5a   :  { %9549 = vmatmul.mubr.f32.vlgmr.msra.gmra.mxu1 %v145_v57  ;;  %9559 = vmatprep.subr.mxu0 %v12001_v1 }
  0x5b   :  { %9586 = vmatprep.subr.mxu1 %v12001_v1  ;;  %9560 = vmatpush3.msra.mxu0 %v184_v34 }
  0x5c   :  { %9587 = vmatpush3.msra.mxu1 %v12054_v7  ;;  %9561 = vmatprep.subr.mxu0 %v12001_v1  ;;  %v12005_v7 = vmov 1  }
  0x5d   :  { %9588 = vmatprep.subr.mxu1 %v12001_v1  ;;  %9562 = vmatpush3.msra.mxu0 %v191_v45  ;;  %v1513_v45 = vand.u32 4294901760, %v1512_v32  ;;  %v1363_v32 = vld [vmem:[#allocation2 + $0x90] sm:$0xff] }
  0x5e   :  { %9589 = vmatpush3.msra.mxu1 %v12056_v8  ;;  %9563 = vmatprep.subr.mxu0 %v12001_v1 }
  0x5f   :  { %9590 = vmatprep.subr.mxu1 %v12001_v1  ;;  %9564 = vmatpush3.msra.mxu0 %v198_v52 }
  0x60   :  { %9591 = vmatpush3.msra.mxu1 %v12058_v9  ;;  %9565 = vmatprep.subr.mxu0 %v12001_v1 }
  0x61   :  { %9592 = vmatprep.subr.mxu1 %v12001_v1  ;;  %9566 = vmatpush3.msra.mxu0 %v205_v59 }
  0x62   :  { %9593 = vmatpush3.msra.mxu1 %v12060_v13  ;;  %9567 = vmatprep.subr.mxu0 %v12001_v1 }
  0x63   :  { %9594 = vmatprep.subr.mxu1 %v12001_v1  ;;  %9568 = vmatpush3.msra.mxu0 %v212_v62 }
  0x64   :  { %9595 = vmatpush3.msra.mxu1 %v12062_v14  ;;  %9569 = vmatprep.subr.mxu0 %v12001_v1 }
  0x65   :  { %9596 = vmatprep.subr.mxu1 %v12001_v1  ;;  %9570 = vmatpush3.msra.mxu0 %v219_v22  ;;  %v1370_v22 = vld [vmem:[#allocation2 + $0xc8] sm:$0xff] }
  0x66   :  { %9597 = vmatpush3.msra.mxu1 %v12064_v15  ;;  %9571 = vmatprep.subr.mxu0 %v12001_v1 }
  0x67   :  { %9598 = vmatprep.subr.mxu1 %v12001_v1  ;;  %9572 = vmatpush3.msra.mxu0 %v226_v39  ;;  %v12498_v39 = vand.u32 4294901760, %v1370_v22 }
  0x68   :  { %9599 = vmatpush3.msra.mxu1 %v12073_v20  ;;  %9573 = vmatprep.subr.mxu0 %v12001_v1 }
  0x69   :  { %9600 = vmatprep.subr.mxu1 %v12001_v1  ;;  %9574 = vmatpush3.msra.mxu0 %v233_v50  ;;  %v12506_v51 = vsub.f32 %v1370_v22, %v12498_v39  ;;  %v1362_v22 = vld [vmem:[#allocation2 + $0x88] sm:$0xff] }
  0x6a   :  { %9601 = vmatpush3.msra.mxu1 %v12093_v29  ;;  %9575 = vmatprep.subr.mxu0 %v12001_v1  ;;  %v1373_v29 = vld [vmem:[#allocation2 + $0xe0] sm:$0xff] }
  0x6b   :  { %9602 = vmatprep.subr.mxu1 %v12001_v1  ;;  %9576 = vmatpush3.msra.mxu0 %v240_v58  ;;  %v12464_v35 = vand.u32 4294901760, %v1373_v29  ;;  %v16846_v58 = vlaneseq }
  0x6c   :  { %9603 = vmatpush3.msra.mxu1 %v12100_v33  ;;  %9577 = vmatprep.subr.mxu0 %v12001_v1  ;;  %v16654_v33 = vand.u32 4294901760, %v12451_v27 }
  0x6d   :  { %9604 = vmatprep.subr.mxu1 %v12001_v1  ;;  %9578 = vmatpush3.msra.mxu0 %v247_v4  ;;  %v12475_v52 = vsub.f32 %v1373_v29, %v12464_v35  ;;  %v12512_v60 = vshrl.u32 %v16846_v58, 7 }
  0x6e   :  { %9605 = vmatpush3.msra.mxu1 %v12120_v41  ;;  %9579 = vmatprep.subr.mxu0 %v12001_v1 }
  0x6f   :  { %9606 = vmatprep.subr.mxu1 %v12001_v1  ;;  %9580 = vmatpush3.msra.mxu0 %v254_v37  ;;  %16847 = vst [vmem:[#allocation5_spill] sm:$0xff] %v12512_v60  ;;  %v16649_v37 = vand.u32 4294901760, %v12506_v51  ;;  %v60_v58 = vsub.s32 0, %v12512_v60  ;;  %v16685_v60 = vmov 1326507024  }
  0x70   :  { %9607 = vmatpush3.msra.mxu1 %v12128_v47  ;;  %9581 = vmatprep.subr.mxu0 %v12001_v1  ;;  %v1519_v47 = vsub.f32 %v12451_v27, %v16654_v33 }
  0x71   :  { %9608 = vmatprep.subr.mxu1 %v12001_v1  ;;  %9582 = vmatpush3.msra.mxu0 %v261_v49  ;;  %v1367_v49 = vld [vmem:[#allocation2 + $0xb0] sm:$0xff] }
  0x72   :  { %9583 = vmatprep.mubr.msk.f32.mxu0 %vm12002_vm0, %v12001_v1  ;;  %9609 = vmatpush3.msra.mxu1 %v12145_v54  ;;  %v1371_v54 = vld [vmem:[#allocation2 + $0xd0] sm:$0xff]  ;;  %v1520_v61 = vand.u32 4294901760, %v1519_v47  ;;  %v12530_v2 = vand.u32 4294901760, %v1367_v49  ;;  %v16647_v47 = vand.u32 4294901760, %v12542_v18 }
  0x73   :  { %9584 = vmatmul.mubr.f32.vlgmr.msra.gmra.mxu0 %v12189_v36  ;;  %9610 = vmatprep.subr.mxu1 %v12001_v1  ;;  %v12485_v6 = vand.u32 4294901760, %v1371_v54 }
  0x74   :  { %9618 = vmatprep.mubr.msk.f32.mxu1 %vm12002_vm0, %v12001_v1  ;;  %9611 = vmatpush3.msra.mxu1 %v12165_v5  ;;  %v16652_v5 = vand.u32 4294901760, %v12475_v52 }
  0x75   :  { %9621 = vmatprep.subr.mxu0 %v12001_v1  ;;  %9612 = vmatprep.subr.mxu1 %v12001_v1 }
  0x76   :  { %9653 = vmatprep.mubr.msk.f32.mxu0 %vm12002_vm0, %v12001_v1  ;;  %9613 = vmatpush3.msra.mxu1 %v12172_v10  ;;  %v12489_v10 = vsub.f32 %v1372_v40, %v12478_v53 }
  0x77   :  { %9614 = vmatprep.subr.mxu1 %v12001_v1  ;;  %11909 = vset.pattern.permute.xlu1 %v12004_v0 }
  0x78   :  { %9615 = vmatpush3.msra.mxu1 %v12193_v38  ;;  %11908 = vset.pattern.permute.xlu0 %v12004_v0  ;;  %v12496_v38 = vsub.f32 %v1371_v54, %v12485_v6  ;;  %v16651_v42 = vand.u32 4294901760, %v12489_v10 }
  0x79   :  { %9616 = vmatprep.subr.mxu1 %v12001_v1  ;;  %1351 = vperm.xlu1 %11909, %v12005_v7  }
  0x7a   :  { %9617 = vmatpush3.msra.mxu1 %v12201_v43  ;;  %1348 = vperm.xlu0 %11908, %v12004_v0   ;;  %v1369_v43 = vld [vmem:[#allocation2 + $0xc0] sm:$0xff]  ;;  %v16650_v50 = vand.u32 4294901760, %v12496_v38  ;;  %v1540_v4 = vsub.f32 %v12489_v10, %v16651_v42  ;;  %v1364_v0 = vld [vmem:[#allocation2 + $0x98] sm:$0xff] }
  0x7b   :  { %9619 = vmatmul.mubr.f32.vlgmr.msra.gmra.mxu1 %v12189_v36  ;;  %9668 = vmatprep.subr.mxu1 %v12001_v1  ;;  %v1533_v36 = vsub.f32 %v12475_v52, %v16652_v5  ;;  %v12508_v57 = vand.u32 4294901760, %v1369_v43  ;;  %v12555_v29 = vand.u32 4294901760, %v1364_v0  ;;  %v16677_v5 = vmov 2102212464  }
  0x7c   :  { %9700 = vmatprep.mubr.msk.f32.mxu1 %vm12002_vm0, %v12001_v1  ;;  %9622 = vmatpush3.msra.mxu0 %v12440_v19  ;;  %v1547_v31 = vsub.f32 %v12496_v38, %v16650_v50  ;;  %v1541_v63 = vand.u32 4294901760, %v1540_v4 }
  0x7d   :  { %9623 = vmatprep.subr.mxu0 %v12001_v1  ;;  %9669 = vmatpush3.msra.mxu1 %v1513_v45  ;;  %v1534_v44 = vand.u32 4294901760, %v1533_v36  ;;  %v12524_v25 = vsub.f32 %v1369_v43, %v12508_v57  ;;  %v1568_v43 = vsub.f32 %v12542_v18, %v16647_v47 }
  0x7e   :  { %11910 = vset.pattern.permute.xlu0 %v12003_v3  ;;  %v1374_v3 = vld [vmem:[#allocation2 + $0xe8] sm:$0xff]  ;;  %9624 = vmatpush3.msra.mxu0 %v12445_v24  ;;  %v1548_v7 = vand.u32 4294901760, %v1547_v31 }
  0x7f   :  { %v12453_v28 = vand.u32 4294901760, %v1374_v3  ;;  %9625 = vmatprep.subr.mxu0 %v12001_v1  ;;  %9670 = vmatprep.subr.mxu1 %v12001_v1  ;;  %v1569_v55 = vand.u32 4294901760, %v1568_v43 }
  0x80   :  { %9671 = vmatpush3.msra.mxu1 %v1520_v61 }
  0x81   :  { %v12462_v34 = vsub.f32 %v1374_v3, %v12453_v28  ;;  %9626 = vmatpush3.msra.mxu0 %v12453_v28  ;;  %9672 = vmatprep.subr.mxu1 %v12001_v1  ;;  %v12552_v3 = vsub.f32 %v1365_v56, %v12535_v17 }
  0x82   :  { %9627 = vmatprep.subr.mxu0 %v12001_v1 }
  0x83   :  { %v16653_v48 = vand.u32 4294901760, %v12462_v34  ;;  %9628 = vmatpush3.msra.mxu0 %v12464_v35  ;;  %16849 = vst [vmem:[#allocation7_spill] sm:$0xff] %v12552_v3  ;;  %v16640_v61 = vand.u32 4294901760, %v12552_v3 }
  0x84   :  { %9629 = vmatprep.subr.mxu0 %v12001_v1 }
  0x85   :  { %v1526_v62 = vsub.f32 %v12462_v34, %v16653_v48  ;;  %9630 = vmatpush3.msra.mxu0 %v12478_v53 }
  0x86   :  { %9631 = vmatprep.subr.mxu0 %v12001_v1 }
  0x87   :  { %v1527_v30 = vand.u32 4294901760, %v1526_v62  ;;  %9632 = vmatpush3.msra.mxu0 %v12485_v6  ;;  %v12567_v62 = vsub.f32 %v1364_v0, %v12555_v29 }
  0x88   :  { %9633 = vmatprep.subr.mxu0 %v12001_v1 }
  0x89   :  { %9673 = vmatpush3.msra.mxu1 %v1527_v30  ;;  %9634 = vmatpush3.msra.mxu0 %v12498_v39  ;;  %16850 = vst [vmem:[#allocation8_spill] sm:$0xff] %v12567_v62  ;;  %v1361_v30 = vld [vmem:[#allocation2 + $0x80] sm:$0xff]  ;;  %v16642_v31 = vand.u32 4294901760, %v12567_v62 }
  0x8a   :  { %9674 = vmatprep.subr.mxu1 %v12001_v1  ;;  %9635 = vmatprep.subr.mxu0 %v12001_v1  ;;  %v12596_v0 = vand.u32 4294901760, %v1361_v30 }
  0x8b   :  { %9675 = vmatpush3.msra.mxu1 %v1534_v44  ;;  %9636 = vmatpush3.msra.mxu0 %v12508_v57  ;;  %v12574_v44 = vand.u32 4294901760, %v1363_v32 }
  0x8c   :  { %9676 = vmatprep.subr.mxu1 %v12001_v1  ;;  %9637 = vmatprep.subr.mxu0 %v12001_v1  ;;  %16853 = vst [vmem:[#allocation11_spill] sm:$0xff] %v12596_v0 }
  0x8d   :  { %9677 = vmatpush3.msra.mxu1 %v1541_v63  ;;  %9638 = vmatpush3.msra.mxu0 %v12526_v46  ;;  %v12591_v56 = vsub.f32 %v1363_v32, %v12574_v44  ;;  %v12593_v63 = vand.u32 4294901760, %v1362_v22 }
  0x8e   :  { %9678 = vmatprep.subr.mxu1 %v12001_v1  ;;  %9639 = vmatprep.subr.mxu0 %v12001_v1 }
  0x8f   :  { %9679 = vmatpush3.msra.mxu1 %v1548_v7  ;;  %9640 = vmatpush3.msra.mxu0 %v12530_v2  ;;  %16851 = vst [vmem:[#allocation9_spill] sm:$0xff] %v12591_v56  ;;  %16852 = vst [vmem:[#allocation10_spill] sm:$0xff] %v12593_v63  ;;  %v12605_v32 = vsub.f32 %v1362_v22, %v12593_v63 }
  0x90   :  { %9680 = vmatprep.subr.mxu1 %v12001_v1  ;;  %9641 = vmatprep.subr.mxu0 %v12001_v1 }
  0x91   :  { %9642 = vmatpush3.msra.mxu0 %v12532_v16  ;;  %16854 = vst [vmem:[#allocation12_spill] sm:$0xff] %v12605_v32 }
  0x92   :  { %9643 = vmatprep.subr.mxu0 %v12001_v1 }
  0x93   :  { %9644 = vmatpush3.msra.mxu0 %v12535_v17 }
  0x94   :  { %9645 = vmatprep.subr.mxu0 %v12001_v1 }
  0x95   :  { %9646 = vmatpush3.msra.mxu0 %v12555_v29 }
  0x96   :  { %9647 = vmatprep.subr.mxu0 %v12001_v1 }
  0x97   :  { %9648 = vmatpush3.msra.mxu0 %v12574_v44 }
  0x98   :  { %9649 = vmatprep.subr.mxu0 %v12001_v1 }
  0x99   :  { %9650 = vmatpush3.msra.mxu0 %v12593_v63 }
  0x9a   :  { %9651 = vmatprep.subr.mxu0 %v12001_v1 }
  0x9b   :  { %9652 = vmatpush3.msra.mxu0 %v12596_v0 }
  0x9c   :  { %9715 = vmatprep.subr.mxu0 %v12001_v1 }
  0xf0   :  { %v12434_v8 = vpop.f32.mrf.mxu0 }
  0xf2   :  { %v9445_v9 = vpop.f32.mrf.mxu0 }
  0xf3   :  { %v1554_v9 = vsub.f32 %v12506_v51, %v16649_v37 }
  0xf5   :  { %v1555_v40 = vand.u32 4294901760, %v1554_v9  ;;  %v1589_v9 = vsub.f32 %v12552_v3, %v16640_v61  ;;  %v16644_v61 = vand.u32 4294901760, %v12605_v32 }
  0xf7   :  { %9681 = vmatpush3.msra.mxu1 %v1555_v40  ;;  %v16641_v40 = vand.u32 4294901760, %v12591_v56  ;;  %v1590_v22 = vand.u32 4294901760, %v1589_v9 }
  0xf8   :  { %v12436_v13 = vpop.f32.mrf.mxu1  ;;  %9682 = vmatprep.subr.mxu1 %v12001_v1 }
  0xfa   :  { %v9480_v14 = vpop.f32.mrf.mxu1 }
  0xfb   :  { %v16648_v14 = vand.u32 4294901760, %v12524_v25 }
  0xfd   :  { %v1561_v45 = vsub.f32 %v12524_v25, %v16648_v14 }
  0xff   :  { %v1562_v36 = vand.u32 4294901760, %v1561_v45  ;;  %v12608_v45 = vsub.f32 %v1361_v30, %v12596_v0  ;;  %v1603_v30 = vsub.f32 %v12591_v56, %v16641_v40 }
 0x101   :  { %9683 = vmatpush3.msra.mxu1 %v1562_v36  ;;  %16855 = vst [vmem:[#allocation13_spill] sm:$0xff] %v12608_v45  ;;  %v1604_v40 = vand.u32 4294901760, %v1603_v30 }
 0x102   :  { %9684 = vmatprep.subr.mxu1 %v12001_v1 }
 0x103   :  { %9685 = vmatpush3.msra.mxu1 %v1569_v55 }
 0x104   :  { %9686 = vmatprep.subr.mxu1 %v12001_v1 }
 0x111   :  { %v12438_v15 = vpop.f32.mrf.mxu0 }
 0x113   :  { %v9515_v20 = vpop.f32.mrf.mxu0 }
 0x114   :  { %v12546_v20 = vsub.f32 %v1367_v49, %v12530_v2  ;;  %v29_v49 = vld [vmem:[%s16637_s2] sm:$0xff] }
 0x115   :  { %v61_v36 = vrot.slane %v29_v49, %v60_v58 }
 0x116   :  { %v16646_v54 = vand.u32 4294901760, %v12546_v20 }
 0x117   :  { %v150_v49 = vadd.f32 %v12434_v8, %v61_v36 }
 0x118   :  { %v1575_v4 = vsub.f32 %v12546_v20, %v16646_v54 }
 0x119   :  { %v301_v8 = vadd.f32 %v12436_v13, %v150_v49 }
 0x11a   :  { %v12468_v41 = vpop.f32.mrf.mxu1  ;;  %v1576_v7 = vand.u32 4294901760, %v1575_v4  ;;  %v1596_v4 = vsub.f32 %v12567_v62, %v16642_v31 }
 0x11c   :  { %v9550_v59 = vpop.f32.mrf.mxu1  ;;  %9687 = vmatpush3.msra.mxu1 %v1576_v7  ;;  %v1597_v55 = vand.u32 4294901760, %v1596_v4  ;;  %v1610_v7 = vsub.f32 %v12605_v32, %v16644_v61  ;;  %v12641_v4 = vrot.slane %v12174_v11, %v60_v58 }
 0x11d   :  { %v16645_v59 = vand.u32 4294901760, %v12549_v21  ;;  %9688 = vmatprep.subr.mxu1 %v12001_v1 }
 0x11f   :  { %v1582_v12 = vsub.f32 %v12549_v21, %v16645_v59 }
 0x121   :  { %v1583_v43 = vand.u32 4294901760, %v1582_v12  ;;  %v16643_v12 = vand.u32 4294901760, %v12608_v45 }
 0x123   :  { %9689 = vmatpush3.msra.mxu1 %v1583_v43  ;;  %v1617_v31 = vsub.f32 %v12608_v45, %v16643_v12  ;;  %v1611_v43 = vand.u32 4294901760, %v1610_v7  ;;  %v12644_v12 = vpop.permute.xlu0 %705 }
 0x124   :  { %9690 = vmatprep.subr.mxu1 %v12001_v1  ;;  %16856 = vst [vmem:[#allocation14_spill] sm:$0xff] %v12644_v12  ;;  %v712_v49 = vmul.f32 %v12641_v4, %v12644_v12 }
 0x125   :  { %9691 = vmatpush3.msra.mxu1 %v1590_v22  ;;  %v405_v22 = vadd.f32 %v12438_v15, %v301_v8  ;;  %v1618_v30 = vand.u32 4294901760, %v1617_v31 }
 0x126   :  { %9692 = vmatprep.subr.mxu1 %v12001_v1 }
 0x127   :  { %9693 = vmatpush3.msra.mxu1 %v1597_v55  ;;  %v494_v61 = vadd.f32 %v12468_v41, %v405_v22 }
 0x128   :  { %9694 = vmatprep.subr.mxu1 %v12001_v1 }
 0x129   :  { %9695 = vmatpush3.msra.mxu1 %v1604_v40 }
 0x12a   :  { %9696 = vmatprep.subr.mxu1 %v12001_v1 }
 0x12b   :  { %9697 = vmatpush3.msra.mxu1 %v1611_v43 }
 0x12c   :  { %9698 = vmatprep.subr.mxu1 %v12001_v1 }
 0x12d   :  { %9699 = vmatpush3.msra.mxu1 %v1618_v30 }
 0x12e   :  { %9762 = vmatprep.subr.mxu1 %v12001_v1 }
 0x133   :  { %v612_v9 = vpop.f32.mrf.mxu0 }
 0x134   :  { %v613_v13 = vadd.f32 %v612_v9, %v494_v61 }
 0x135   :  { %v9585_v36 = vpop.f32.mrf.mxu0 }
 0x13b   :  { %v699_v11 = vpop.f32.mrf.mxu1 }
 0x13c   :  { %v700_v15 = vadd.f32 %v699_v11, %v613_v13 }
 0x13d   :  { %v9620_v58 = vpop.f32.mrf.mxu1 }
 0x13e   :  { %v713_v31 = vadd.f32 %v712_v49, %v700_v15  ;;  %v714_v40 = vadd.f32 %v12641_v4, %v700_v15  ;;  %v12653_v55 = vmul.f32 6.2831855, %v700_v15 }
 0x140   :  { %v12655_v7 = vmul.f32 6.2831855, %v713_v31  ;;  %v12657_v41 = vmul.f32 6.2831855, %v714_v40  ;;  %v16656_v61 = vand.u32 2147483647, %v12653_v55 }
 0x141   :  { %v824_v9 = vand.u32 2139095040, %v12653_v55 }
 0x142   :  { %v16657_v8 = vand.u32 2147483647, %v12655_v7  ;;  %v721_v36 = vand.u32 2139095040, %v12655_v7  ;;  %v828_v30 = vand.u32 8388607, %v16656_v61  ;;  %v927_v13 = vand.u32 2139095040, %v12657_v41 }
 0x143   :  { %v825_v1 = vshrl.u32 %v824_v9, 23 }
 0x144   :  { %v722_v43 = vshrl.u32 %v721_v36, 23  ;;  %v725_v22 = vand.u32 8388607, %v16657_v8  ;;  %v928_v15 = vshrl.u32 %v927_v13, 23  ;;  %v829_v59 = vor.u32 8388608, %v828_v30 }
 0x145   :  { %v8280_v49 = vadd.s32 4294967169, %v825_v1  ;;  %v16675_v30 = vmov 683565275  }
 0x146   :  { %v8276_v11 = vadd.s32 4294967169, %v722_v43  ;;  %v726_v31 = vor.u32 8388608, %v725_v22  ;;  %v8284_v54 = vadd.s32 4294967169, %v928_v15  ;;  %v12673_v1 = vshll.u32 %v829_v59, 8 }
 0x147   :  { %v831_v58 = vadd.s32 1, %v8280_v49 }
 0x148   :  { %v728_v40 = vadd.s32 1, %v8276_v11  ;;  %v12671_v42 = vshll.u32 %v726_v31, 8  ;;  %v12680_v49 = vadd.s32 1, %v8284_v54  ;;  %v16679_v54 = vmov 920167782  }
 0x149   :  { %vm832_vm3 = vcmp.gt.s32.totalorder %v831_v58, 0 }
 0x14a   :  { %vm729_vm4 = vcmp.gt.s32.totalorder %v728_v40, 0  ;;  %v833_v9 = vsel %vm832_vm3, %v831_v58, 0  ;;  %v16683_v58 = vmov 2475754826   ;;  %vm935_vm8 = vcmp.gt.s32.totalorder %v12680_v49, 0 }
 0x14b   :  { %v730_v36 = vsel %vm729_vm4, %v728_v40, 0  ;;  %v12668_v47 = vand.u32 31, %v833_v9  ;;  %v12675_v43 = vshrl.u32 %v833_v9, 5  ;;  %v16681_v40 = vmov 2131351028  }
 0x14c   :  { %v731_v37 = vshrl.u32 %v730_v36, 5  ;;  %v732_v50 = vand.u32 31, %v730_v36 }
 0x14d   :  { %v836_v22 = vsub.s32 32, %v12668_v47  ;;  %v838_v13 = vshll.u32 %v16675_v30, %v12668_v47  ;;  %v841_v31 = vshll.u32 %v16683_v58, %v12668_v47  ;;  %v844_v59 = vshll.u32 %v16681_v40, %v12668_v47 }
 0x14e   :  { %v733_v11 = vsub.s32 32, %v732_v50  ;;  %v735_v15 = vshll.u32 %v16675_v30, %v732_v50  ;;  %v738_v9 = vshll.u32 %v16683_v58, %v732_v50  ;;  %v741_v36 = vshll.u32 %v16681_v40, %v732_v50 }
 0x14f   :  { %v744_v48 = vshll.u32 %v16677_v5, %v732_v50  ;;  %v747_v33 = vshll.u32 %v16679_v54, %v732_v50  ;;  %vm750_vm5 = vcmp.lt.s32.totalorder %v731_v37, 1  ;;  %vm752_vm6 = vcmp.lt.s32.totalorder %v731_v37, 3 }
 0x150   :  { %v736_v26 = vshrl.u32 %v16683_v58, %v733_v11  ;;  %v739_v61 = vshrl.u32 %v16681_v40, %v733_v11  ;;  %v742_v8 = vshrl.u32 %v16677_v5, %v733_v11  ;;  %v734_v14 = vshrl.u32 %v16675_v30, %v733_v11 }
 0x151   :  { %v745_v12 = vshrl.u32 %v16679_v54, %v733_v11  ;;  %v748_v45 = vshrl.u32 %v16685_v60, %v733_v11  ;;  %vm753_vm7 = vcmp.lt.s32.totalorder %v731_v37, 4  ;;  %v839_v3 = vshrl.u32 %v16683_v58, %v836_v22 }
 0x152   :  { %v737_v32 = vor.u32 %v736_v26, %v735_v15  ;;  %v740_v56 = vor.u32 %v739_v61, %v738_v9  ;;  %v743_v62 = vor.u32 %v742_v8, %v741_v36  ;;  %v842_v63 = vshrl.u32 %v16681_v40, %v836_v22 }
 0x153   :  { %v746_v50 = vor.u32 %v745_v12, %v744_v48  ;;  %v749_v0 = vor.u32 %v748_v45, %v747_v33  ;;  %vm751_vm9 = vcmp.lt.s32.totalorder %v731_v37, 2  ;;  %v840_v12 = vor.u32 %v839_v3, %v838_v13 }
 0x154   :  { %v754_v30 = vsel %vm750_vm5, %v734_v14, %v737_v32  ;;  %v755_v5 = vsel %vm753_vm7, %v743_v62, 2102212464  ;;  %v758_v54 = vsel %vm750_vm5, %v737_v32, %v740_v56  ;;  %v762_v11 = vsel %vm750_vm5, %v740_v56, %v743_v62 }
 0x155   :  { %v756_v26 = vsel %vm752_vm6, %v740_v56, %v755_v5  ;;  %v759_v61 = vsel %vm753_vm7, %v746_v50, 920167782  ;;  %v763_v8 = vsel %vm753_vm7, %v749_v0, 1326507024  ;;  %v843_v36 = vor.u32 %v842_v63, %v841_v31 }
 0x156   :  { %v757_v48 = vsel %vm751_vm9, %v754_v30, %v756_v26  ;;  %v760_v33 = vsel %vm752_vm6, %v743_v62, %v759_v61  ;;  %v764_v45 = vsel %vm752_vm6, %v746_v50, %v763_v8  ;;  %v16857_v14 = vmov 2102212464  }
 0x157   :  { %v761_v15 = vsel %vm751_vm9, %v758_v54, %v760_v33  ;;  %v765_v9 = vsel %vm751_vm9, %v762_v11, %v764_v45  ;;  %v845_v40 = vshrl.u32 %v16857_v14, %v836_v22  ;;  %v16858_v56 = vmov 683565275  }
 0x158   :  { %v12708_v32 = vmul.u32.u64.low %v12671_v42, %v765_v9  ;;  %v12709_v58 = vmul.u32.u64.high %v12671_v42, %v765_v9, %v12708_v32  ;;  %v12712_v60 = vmul.u32.u64.low %v12671_v42, %v761_v15  ;;  %v12713_v5 = vmul.u32.u64.high %v12671_v42, %v761_v15, %v12712_v60 }
 0x159   :  { %v837_v0 = vshrl.u32 %v16858_v56, %v836_v22  ;;  %v846_v62 = vor.u32 %v845_v40, %v844_v59  ;;  %v847_v37 = vshll.u32 %v16857_v14, %v12668_v47  ;;  %v16859_v3 = vmov 920167782  }
 0x15a   :  { %v848_v30 = vshrl.u32 %v16859_v3, %v836_v22  ;;  %v773_v63 = vmul.u32 %v12671_v42, %v757_v48  ;;  %v850_v13 = vshll.u32 %v16859_v3, %v12668_v47  ;;  %v16860_v31 = vmov 1326507024  }
 0x15b   :  { %v851_v54 = vshrl.u32 %v16860_v31, %v836_v22  ;;  %vm853_vm10 = vcmp.lt.s32.totalorder %v12675_v43, 1  ;;  %vm854_vm11 = vcmp.lt.s32.totalorder %v12675_v43, 2  ;;  %vm855_vm12 = vcmp.lt.s32.totalorder %v12675_v43, 3 }
 0x15c   :  { %v849_v50 = vor.u32 %v848_v30, %v847_v37  ;;  %vm856_vm13 = vcmp.lt.s32.totalorder %v12675_v43, 4  ;;  %vm775_vm14 = vc.u32 %v12709_v58, %v12712_v60  ;;  %v776_v40 = vadd.s32 1, %v12713_v5 }
 0x15d   :  { %v852_v42 = vor.u32 %v851_v54, %v850_v13  ;;  %v861_v59 = vsel %vm853_vm10, %v840_v12, %v843_v36  ;;  %v857_v11 = vsel %vm853_vm10, %v837_v0, %v840_v12  ;;  %v858_v47 = vsel %vm856_vm13, %v846_v62, 2102212464 }
 0x15e   :  { %v862_v26 = vsel %vm856_vm13, %v849_v50, 920167782  ;;  %v865_v22 = vsel %vm853_vm10, %v843_v36, %v846_v62  ;;  %v777_v61 = vsel %vm775_vm14, %v776_v40, %v12713_v5  ;;  %v936_v33 = vsel %vm935_vm8, %v12680_v49, 0 }
 0x15f   :  { %v863_v8 = vsel %vm855_vm12, %v846_v62, %v862_v26  ;;  %v866_v48 = vsel %vm856_vm13, %v852_v42, 1326507024  ;;  %v778_v45 = vadd.s32 %v777_v61, %v773_v63  ;;  %v859_v15 = vsel %vm855_vm12, %v843_v36, %v858_v47 }
 0x160   :  { %v864_v12 = vsel %vm854_vm11, %v861_v59, %v863_v8  ;;  %v867_v9 = vsel %vm855_vm12, %v849_v50, %v866_v48  ;;  %v860_v36 = vsel %vm854_vm11, %v857_v11, %v859_v15  ;;  %v938_v30 = vand.u32 31, %v936_v33 }
 0x161   :  { %v868_v32 = vsel %vm854_vm11, %v865_v22, %v867_v9  ;;  %v12746_v5 = vmul.u32.u64.low %v12673_v1, %v864_v12  ;;  %v12747_v0 = vmul.u32.u64.high %v12673_v1, %v864_v12, %v12746_v5  ;;  %v779_v62 = vadd.s32 536870912, %v778_v45 }
 0x162   :  { %v12751_v49 = vmul.u32.u64.low %v12673_v1, %v868_v32  ;;  %v12752_v37 = vmul.u32.u64.high %v12673_v1, %v868_v32, %v12751_v49  ;;  %v16861_v13 = vand.u32 2147483647, %v12657_v41  ;;  %v939_v40 = vsub.s32 32, %v938_v30 }
 0x163   :  { %v12756_v63 = vshrl.u32 %v779_v62, 30  ;;  %v879_v50 = vadd.s32 1, %v12747_v0  ;;  %v876_v59 = vmul.u32 %v12673_v1, %v860_v36  ;;  %v941_v43 = vshll.u32 %v16858_v56, %v938_v30 }
 0x164   :  { %v931_v54 = vand.u32 8388607, %v16861_v13  ;;  %vm878_vm15 = vc.u32 %v12752_v37, %v12746_v5  ;;  %v16862_v11 = vmov 2475754826   ;;  %v16863_v22 = vmov 2131351028  }
 0x165   :  { %v781_v42 = vshll.u32 %v12756_v63, 30  ;;  %v880_v47 = vsel %vm878_vm15, %v879_v50, %v12747_v0  ;;  %v942_v26 = vshrl.u32 %v16862_v11, %v939_v40  ;;  %v945_v61 = vshrl.u32 %v16863_v22, %v939_v40 }
 0x166   :  { %v881_v48 = vadd.s32 %v880_v47, %v876_v59  ;;  %v932_v15 = vor.u32 8388608, %v931_v54  ;;  %v937_v12 = vshrl.u32 %v936_v33, 5  ;;  %v944_v32 = vshll.u32 %v16862_v11, %v938_v30 }
 0x167   :  { %v782_v8 = vsub.s32 %v778_v45, %v781_v42  ;;  %v943_v9 = vor.u32 %v942_v26, %v941_v43  ;;  %v947_v1 = vshll.u32 %v16863_v22, %v938_v30  ;;  %v948_v62 = vshrl.u32 %v16857_v14, %v939_v40 }
 0x168   :  { %v882_v36 = vadd.s32 536870912, %v881_v48  ;;  %v950_v0 = vshll.u32 %v16857_v14, %v938_v30  ;;  %v951_v13 = vshrl.u32 %v16859_v3, %v939_v40  ;;  %v946_v50 = vor.u32 %v945_v61, %v944_v32 }
 0x169   :  { %v784_v49 = vsub.s32 0, %v782_v8  ;;  %v949_v21 = vor.u32 %v948_v62, %v947_v1  ;;  %v953_v45 = vshll.u32 %v16859_v3, %v938_v30  ;;  %v954_v54 = vshrl.u32 %v16860_v31, %v939_v40 }
 0x16a   :  { %v12776_v42 = vshrl.u32 %v882_v36, 30  ;;  %v952_v59 = vor.u32 %v951_v13, %v950_v0  ;;  %vm956_vm1 = vcmp.lt.s32.totalorder %v937_v12, 1  ;;  %v972_v43 = vshll.u32 %v932_v15, 8 }
 0x16b   :  { %v8277_v33 = vmin.u32 %v784_v49, %v782_v8  ;;  %v955_v47 = vor.u32 %v954_v54, %v953_v45  ;;  %vm958_vm2 = vcmp.lt.s32.totalorder %v937_v12, 3  ;;  %vm959_vm3 = vcmp.lt.s32.totalorder %v937_v12, 4 }
 0x16c   :  { %v884_v26 = vshll.u32 %v12776_v42, 30  ;;  %v964_v14 = vsel %vm956_vm1, %v943_v9, %v946_v50  ;;  %v965_v22 = vsel %vm959_vm3, %v952_v59, 920167782  ;;  %v968_v61 = vsel %vm956_vm1, %v946_v50, %v949_v21 }
 0x16d   :  { %v786_v11 = vclz %v8277_v33  ;;  %v969_v3 = vsel %vm959_vm3, %v955_v47, 1326507024  ;;  %v774_v31 = vadd.s32 %v12712_v60, %v12709_v58  ;;  %v966_v1 = vsel %vm958_vm2, %v949_v21, %v965_v22 }
 0x16e   :  { %v885_v32 = vsub.s32 %v881_v48, %v884_v26  ;;  %v940_v15 = vshrl.u32 %v16858_v56, %v939_v40  ;;  %vm957_vm4 = vcmp.lt.s32.totalorder %v937_v12, 2  ;;  %v961_v62 = vsel %vm959_vm3, %v949_v21, 2102212464 }
 0x16f   :  { %v8278_v30 = vadd.s32 4294967294, %v786_v11  ;;  %v970_v49 = vsel %vm958_vm2, %v952_v59, %v969_v3  ;;  %v967_v0 = vsel %vm957_vm4, %v964_v14, %v966_v1  ;;  %v962_v56 = vsel %vm958_vm2, %v946_v50, %v961_v62 }
 0x170   :  { %v887_v36 = vsub.s32 0, %v885_v32  ;;  %v971_v13 = vsel %vm957_vm4, %v968_v61, %v970_v49  ;;  %v960_v54 = vsel %vm956_vm1, %v940_v15, %v943_v9  ;;  %v877_v50 = vadd.s32 %v12746_v5, %v12752_v37 }
 0x171   :  { %vm8279_vm5 = vcmp.lt.s32.totalorder %v8278_v30, 0  ;;  %v12789_v60 = vmul.u32.u64.low %v972_v43, %v971_v13  ;;  %v12790_v58 = vmul.u32.u64.high %v972_v43, %v971_v13, %v12789_v60  ;;  %v963_v22 = vsel %vm957_vm4, %v960_v54, %v962_v56 }
 0x172   :  { %v789_v45 = vsel %vm8279_vm5, 0, %v8278_v30  ;;  %v8281_v47 = vmin.u32 %v887_v36, %v885_v32  ;;  %v12793_v21 = vmul.u32.u64.low %v972_v43, %v967_v0  ;;  %v12794_v40 = vmul.u32.u64.high %v972_v43, %v967_v0, %v12793_v21 }
 0x173   :  { %v790_v48 = vsub.s32 32, %v789_v45  ;;  %v794_v33 = vsub.s32 4294967266, %v789_v45  ;;  %v791_v59 = vshll.u32 %v782_v8, %v789_v45  ;;  %v979_v8 = vmul.u32 %v972_v43, %v963_v22 }
 0x174   :  { %v889_v14 = vclz %v8281_v47  ;;  %vm981_vm6 = vc.u32 %v12790_v58, %v12793_v21  ;;  %v982_v30 = vadd.s32 1, %v12794_v40  ;;  %v804_v47 = vsub.s32 4, %v12756_v63 }
 0x175   :  { %v792_v11 = vshrl.u32 %v774_v31, %v790_v48  ;;  %v795_v26 = vadd.s32 127, %v794_v33  ;;  %vm720_vm8 = vcmp.lt.s32.totalorder %v12655_v7, 0  ;;  %v16864_v37 = vand.u32 2147483647, %v12655_v7 }
 0x176   :  { %v8282_v3 = vadd.s32 4294967294, %v889_v14  ;;  %v983_v31 = vsel %vm981_vm6, %v982_v30, %v12794_v40  ;;  %vm823_vm10 = vcmp.lt.s32.totalorder %v12653_v55, 0  ;;  %vm810_vm4 = vweird.f32 %v12655_v7 }
 0x177   :  { %v793_v61 = vor.u32 %v792_v11, %v791_v59  ;;  %v796_v9 = vshll.u32 %v795_v26, 23  ;;  %v984_v0 = vadd.s32 %v983_v31, %v979_v8  ;;  %vm719_vm9 = vcmp.le.f32.partialorder %v16864_v37, 0.7853982 }
 0x178   :  { %vm8283_vm7 = vcmp.lt.s32.totalorder %v8282_v3, 0  ;;  %v805_v26 = vsel %vm720_vm8, %v804_v47, %v12756_v63  ;;  %v16865_v8 = vand.u32 2147483647, %v12653_v55  ;;  %vm913_vm6 = vweird.f32 %v12653_v55 }
 0x179   :  { %v797_v1 = vor.u32 4788187, %v796_v9  ;;  %v892_v15 = vsel %vm8283_vm7, 0, %v8282_v3  ;;  %v800_v12 = vcvt.s32.f32 %v793_v61  ;;  %v985_v48 = vadd.s32 536870912, %v984_v0 }
 0x17a   :  { %v893_v49 = vsub.s32 32, %v892_v15  ;;  %v897_v36 = vsub.s32 4294967266, %v892_v15  ;;  %v894_v45 = vshll.u32 %v885_v32, %v892_v15  ;;  %v807_v30 = vsel %vm719_vm9, 0, %v805_v26 }
 0x17b   :  { %v798_v62 = vand.u32 2147483647, %v797_v1  ;;  %v12806_v5 = vshrl.u32 %v985_v48, 30  ;;  %vm822_vm11 = vcmp.le.f32.partialorder %v16865_v8, 0.7853982  ;;  %v980_v48 = vadd.s32 %v12793_v21, %v12790_v58 }
 0x17c   :  { %v895_v54 = vshrl.u32 %v877_v50, %v893_v49  ;;  %v898_v60 = vadd.s32 127, %v897_v36  ;;  %v907_v50 = vsub.s32 4, %v12776_v42  ;;  %v811_v36 = vand.u32 3, %v807_v30 }
 0x17d   :  { %v801_v13 = vmul.f32 %v800_v12, %v798_v62  ;;  %v987_v32 = vshll.u32 %v12806_v5, 30  ;;  %v1126_v62 = vadd.s32 3, %v807_v30 }
 0x17e   :  { %v896_v56 = vor.u32 %v895_v54, %v894_v45  ;;  %v899_v59 = vshll.u32 %v898_v60, 23  ;;  %v908_v49 = vsel %vm823_vm10, %v907_v50, %v12776_v42  ;;  %vm812_vm13 = vcmp.lt.s32.totalorder %v811_v36, 2 }
 0x17f   :  { %v802_v33 = vxor.u32 2147483648, %v801_v13  ;;  %v988_v61 = vsub.s32 %v984_v0, %v987_v32  ;;  %v910_v45 = vsel %vm822_vm11, 0, %v908_v49  ;;  %vm813_vm14 = vcmp.eq.s32.totalorder %v811_v36, 0 }
 0x180   :  { %v900_v40 = vor.u32 4788187, %v899_v59  ;;  %v903_v22 = vcvt.s32.f32 %v896_v56  ;;  %vm816_vm15 = vcmp.eq.s32.totalorder %v811_v36, 2  ;;  %v1230_v42 = vadd.s32 3, %v910_v45 }
 0x181   :  { %v803_v43 = vsel %vm720_vm8, %v802_v33, %v801_v13  ;;  %v990_v3 = vsub.s32 0, %v988_v61  ;;  %v1127_v13 = vand.u32 3, %v1126_v62 }
 0x182   :  { %v806_v11 = vsel %vm719_vm9, %v12655_v7, %v803_v43  ;;  %v901_v14 = vand.u32 2147483647, %v900_v40  ;;  %v1231_v8 = vand.u32 3, %v1230_v42 }
 0x183   :  { %11911 = vcosq.f32 %v806_v11  ;;  %v8285_v15 = vmin.u32 %v990_v3, %v988_v61  ;;  %vm1132_vm1 = vcmp.eq.s32.totalorder %v1127_v13, 2  ;;  %vm1128_vm2 = vcmp.lt.s32.totalorder %v1127_v13, 2 }
 0x184   :  { %11913 = vsinq.f32 %v806_v11  ;;  %v904_v9 = vmul.f32 %v903_v22, %v901_v14  ;;  %vm1129_vm3 = vcmp.eq.s32.totalorder %v1127_v13, 0 }
 0x185   :  { %v992_v12 = vclz %v8285_v15 }
 0x186   :  { %v905_v1 = vxor.u32 2147483648, %v904_v9 }
 0x187   :  { %v8286_v0 = vadd.s32 4294967294, %v992_v12 }
 0x188   :  { %v906_v31 = vsel %vm823_vm10, %v905_v1, %v904_v9  ;;  %v12822_v9 = vpop.permute.xlu0 %1348  ;;  %vm1236_vm10 = vcmp.eq.s32.totalorder %v1231_v8, 2 }
 0x189   :  { %v909_v63 = vsel %vm822_vm11, %v12653_v55, %v906_v31  ;;  %vm8287_vm12 = vcmp.lt.s32.totalorder %v8286_v0, 0  ;;  %16866 = vst [vmem:[#allocation15_spill] sm:$0xff] %v12822_v9  ;;  %vm1353_vm5 = vcmp.eq.s32.totalorder %v12822_v9, 1  ;;  %vm1233_vm11 = vcmp.eq.s32.totalorder %v1231_v8, 0 }
 0x18a   :  { %11915 = vcosq.f32 %v909_v63  ;;  %v995_v54 = vsel %vm8287_vm12, 0, %v8286_v0 }
 0x18b   :  { %11917 = vsinq.f32 %v909_v63  ;;  %v996_v33 = vsub.s32 32, %v995_v54  ;;  %v1000_v47 = vsub.s32 4294967266, %v995_v54  ;;  %v997_v37 = vshll.u32 %v988_v61, %v995_v54 }
 0x18c   :  { %v914_v61 = vand.u32 3, %v910_v45 }
 0x18d   :  { %v998_v43 = vshrl.u32 %v980_v48, %v996_v33  ;;  %v1001_v40 = vadd.s32 127, %v1000_v47 }
 0x18e   :  { %vm915_vm7 = vcmp.lt.s32.totalorder %v914_v61, 2  ;;  %vm916_vm8 = vcmp.eq.s32.totalorder %v914_v61, 0  ;;  %vm919_vm9 = vcmp.eq.s32.totalorder %v914_v61, 2 }
 0x18f   :  { %v999_v14 = vor.u32 %v998_v43, %v997_v37  ;;  %v1002_v22 = vshll.u32 %v1001_v40, 23  ;;  %v12840_v37 = vpop.permute.xlu1 %1351 }
 0x190   :  { %v11912_v60 = vpop.eup %11911  ;;  %16870 = vst [vmem:[#allocation16_spill] sm:$0xff] %v12840_v37 }
 0x191   :  { %v11914_v56 = vpop.eup %11913  ;;  %v817_v59 = vxor.u32 2147483648, %v11912_v60  ;;  %v1003_v1 = vor.u32 4788187, %v1002_v22  ;;  %v1006_v12 = vcvt.s32.f32 %v999_v14  ;;  %v12859_v22 = vld [vmem:[%s16638_s3] sm:$0xff] }
 0x192   :  { %v814_v11 = vxor.u32 2147483648, %v11914_v56 }
 0x193   :  { %v818_v32 = vsel %vm816_vm15, %v817_v59, %v11914_v56  ;;  %v1134_v26 = vsel %vm1132_vm1, %v817_v59, %v11914_v56  ;;  %v1004_v63 = vand.u32 2147483647, %v1003_v1  ;;  %v16867_v59 = vand.u32 2147483647, %v12657_v41 }
 0x194   :  { %v815_v58 = vsel %vm813_vm14, %v11912_v60, %v814_v11  ;;  %v1131_v21 = vsel %vm1129_vm3, %v11912_v60, %v814_v11  ;;  %vm1232_vm14 = vcmp.lt.s32.totalorder %v1231_v8, 2  ;;  %v1010_v11 = vsub.s32 4, %v12806_v5 }
 0x195   :  { %v819_v3 = vsel %vm812_vm13, %v815_v58, %v818_v32  ;;  %v1135_v30 = vsel %vm1128_vm2, %v1131_v21, %v1134_v26  ;;  %v1007_v36 = vmul.f32 %v1006_v12, %v1004_v63  ;;  %vm12835_vm12 = vcmp.le.f32.partialorder %v16867_v59, 0.7853982 }
 0x196   :  { %v820_v50 = vsel %vm810_vm4, nan, %v819_v3  ;;  %v1136_v15 = vsel %vm810_vm4, nan, %v1135_v30  ;;  %vm926_vm13 = vcmp.lt.s32.totalorder %v12657_v41, 0  ;;  %vm1354_vm15 = vcmp.eq.s32.totalorder %v12840_v37, 1 }
 0x197   :  { %v1027_v31 = vmul.f32 6.2831855, %v820_v50  ;;  %v11916_v62 = vpop.eup %11915  ;;  %v1008_v48 = vxor.u32 2147483648, %v1007_v36  ;;  %v1011_v61 = vsel %vm926_vm13, %v1010_v11, %v12806_v5 }
 0x198   :  { %v11918_v49 = vpop.eup %11917  ;;  %v920_v7 = vxor.u32 2147483648, %v11916_v62  ;;  %v1013_v55 = vsel %vm12835_vm12, 0, %v1011_v61 }
 0x199   :  { %v1030_v0 = vmul.f32 %v1027_v31, %v12641_v4  ;;  %v917_v13 = vxor.u32 2147483648, %v11918_v49  ;;  %v1009_v40 = vsel %vm926_vm13, %v1008_v48, %v1007_v36 }
 0x19a   :  { %v921_v54 = vsel %vm919_vm9, %v920_v7, %v11918_v49  ;;  %v1238_v60 = vsel %vm1236_vm10, %v920_v7, %v11918_v49  ;;  %v1012_v14 = vsel %vm12835_vm12, %v12657_v41, %v1009_v40 }
 0x19b   :  { %v1355_v45 = vsel %vm1353_vm5, %v1030_v0, %v1136_v15  ;;  %v918_v47 = vsel %vm916_vm8, %v11916_v62, %v917_v13  ;;  %v1235_v56 = vsel %vm1233_vm11, %v11916_v62, %v917_v13  ;;  %11919 = vcosq.f32 %v1012_v14 }
 0x19c   :  { %v12831_v33 = vand.u32 4294901760, %v1355_v45  ;;  %v922_v43 = vsel %vm915_vm7, %v918_v47, %v921_v54  ;;  %v1239_v21 = vsel %vm1232_vm14, %v1235_v56, %v1238_v60  ;;  %11921 = vsinq.f32 %v1012_v14 }
 0x19d   :  { %v923_v26 = vsel %vm913_vm6, nan, %v922_v43  ;;  %v1240_v1 = vsel %vm913_vm6, nan, %v1239_v21  ;;  %v1334_v0 = vadd.s32 3, %v1013_v55  ;;  %v1017_v13 = vand.u32 3, %v1013_v55 }
 0x19e   :  { %v12847_v32 = vsub.f32 %v1355_v45, %v12831_v33  ;;  %9701 = vmatmul.mubr.f32.vlgmr.msra.gmra.mxu1 %v12831_v33  ;;  %v1028_v58 = vmul.f32 6.2831855, %v923_v26  ;;  %vm1016_vm7 = vweird.f32 %v12657_v41 }
 0x19f   :  { %9763 = vmatpush3.msra.mxu1 %v12440_v19  ;;  %9703 = vmatprep.mubr.msk.f32.mxu1 %vm12002_vm0, %v12859_v22  ;;  %v1335_v54 = vand.u32 3, %v1334_v0  ;;  %vm1019_vm1 = vcmp.eq.s32.totalorder %v1017_v13, 0  ;;  %vm1022_vm2 = vcmp.eq.s32.totalorder %v1017_v13, 2  ;;  %vm1018_vm6 = vcmp.lt.s32.totalorder %v1017_v13, 2  ;;  %v16871_v13 = vld [vmem:[#allocation6_spill] sm:$0xff] }
 0x1a0   :  { %9764 = vmatprep.subr.mxu1 %v12859_v22  ;;  %v1460_v3 = vand.u32 4294901760, %v12847_v32  ;;  %v1031_v30 = vmul.f32 %v1028_v58, %v12641_v4 }
 0x1a1   :  { %9765 = vmatpush3.msra.mxu1 %v12445_v24  ;;  %vm1337_vm3 = vcmp.eq.s32.totalorder %v1335_v54, 0  ;;  %vm1340_vm4 = vcmp.eq.s32.totalorder %v1335_v54, 2  ;;  %vm1336_vm8 = vcmp.lt.s32.totalorder %v1335_v54, 2 }
 0x1a2   :  { %9766 = vmatprep.subr.mxu1 %v12859_v22  ;;  %v1461_v50 = vsub.f32 %v12847_v32, %v1460_v3  ;;  %v1356_v15 = vsel %vm1353_vm5, %v1031_v30, %v1240_v1  ;;  %v1357_v8 = vsel %vm1354_vm15, %v1031_v30, %v1240_v1 }
 0x1a3   :  { %9767 = vmatpush3.msra.mxu1 %v12453_v28  ;;  %v12882_v31 = vand.u32 4294901760, %v1356_v15  ;;  %v12885_v62 = vand.u32 4294901760, %v1357_v8 }
 0x1a4   :  { %9768 = vmatprep.subr.mxu1 %v12859_v22  ;;  %v1462_v5 = vand.u32 4294901760, %v1461_v50 }
 0x1a5   :  { %9769 = vmatpush3.msra.mxu1 %v12464_v35  ;;  %v12893_v63 = vsub.f32 %v1356_v15, %v12882_v31  ;;  %v12896_v12 = vsub.f32 %v1357_v8, %v12885_v62 }
 0x1a6   :  { %9704 = vmatmul.mubr.f32.gmra.mxu1 %v12882_v31  ;;  %9770 = vmatprep.subr.mxu1 %v12859_v22 }
 0x1a7   :  { %9706 = vmatprep.mubr.msk.f32.mxu1 %vm12002_vm0, %v12859_v22  ;;  %9654 = vmatmul.mubr.f32.vlgmr.msra.gmra.mxu0 %v1462_v5  ;;  %v1470_v49 = vand.u32 4294901760, %v12893_v63  ;;  %v1480_v7 = vand.u32 4294901760, %v12896_v12 }
 0x1a8   :  { %9716 = vmatpush3.msra.mxu0 %v12443_v23  ;;  %9771 = vmatpush3.msra.mxu1 %v12478_v53  ;;  %v11920_v48 = vpop.eup %11919 }
 0x1a9   :  { %9717 = vmatprep.subr.mxu0 %v12859_v22  ;;  %9772 = vmatprep.subr.mxu1 %v12859_v22  ;;  %v1471_v36 = vsub.f32 %v12893_v63, %v1470_v49  ;;  %v1481_v60 = vsub.f32 %v12896_v12, %v1480_v7  ;;  %v11922_v47 = vpop.eup %11921  ;;  %v1023_v56 = vxor.u32 2147483648, %v11920_v48 }
 0x1aa   :  { %9707 = vmatmul.mubr.f32.gmra.mxu1 %v12885_v62  ;;  %9718 = vmatpush3.msra.mxu0 %v12451_v27  ;;  %v1020_v59 = vxor.u32 2147483648, %v11922_v47 }
 0x1ab   :  { %9773 = vmatpush3.msra.mxu1 %v12485_v6  ;;  %9656 = vmatprep.mubr.msk.f32.mxu0 %vm12002_vm0, %v12859_v22  ;;  %v1472_v45 = vand.u32 4294901760, %v1471_v36  ;;  %v1024_v42 = vsel %vm1022_vm2, %v1023_v56, %v11922_v47  ;;  %v1482_v43 = vand.u32 4294901760, %v1481_v60  ;;  %v1342_v26 = vsel %vm1340_vm4, %v1023_v56, %v11922_v47  ;;  %v16872_v60 = vld [vmem:[#allocation10_spill] sm:$0xff]  ;;  %v16874_v47 = vld [vmem:[#allocation11_spill] sm:$0xff] }
 0x1ac   :  { %9709 = vmatprep.mubr.msk.f32.mxu1 %vm12002_vm0, %v12859_v22  ;;  %9719 = vmatprep.subr.mxu0 %v12859_v22  ;;  %v1021_v40 = vsel %vm1019_vm1, %v11920_v48, %v1020_v59  ;;  %v1339_v11 = vsel %vm1337_vm3, %v11920_v48, %v1020_v59  ;;  %v16873_v48 = vld [vmem:[#allocation7_spill] sm:$0xff]  ;;  %v16875_v59 = vld [vmem:[#allocation8_spill] sm:$0xff] }
 0x1ad   :  { %9774 = vmatprep.subr.mxu1 %v12859_v22  ;;  %9720 = vmatpush3.msra.mxu0 %v12462_v34  ;;  %v1025_v14 = vsel %vm1018_vm6, %v1021_v40, %v1024_v42  ;;  %v1343_v30 = vsel %vm1336_vm8, %v1339_v11, %v1342_v26  ;;  %v16876_v42 = vld [vmem:[#allocation9_spill] sm:$0xff] }
 0x1ae   :  { %9657 = vmatmul.mubr.f32.gmra.mxu0 %v1472_v45  ;;  %9775 = vmatpush3.msra.mxu1 %v12498_v39  ;;  %v1026_v58 = vsel %vm1016_vm7, nan, %v1025_v14  ;;  %v1344_v1 = vsel %vm1016_vm7, nan, %v1343_v30 }
 0x1af   :  { %9721 = vmatprep.subr.mxu0 %v12859_v22  ;;  %9776 = vmatprep.subr.mxu1 %v12859_v22  ;;  %v1029_v21 = vmul.f32 6.2831855, %v1026_v58  ;;  %v2235_v58 = vld [vmem:[#allocation2 + $0x150] sm:$0xff] }
 0x1b0   :  { %9722 = vmatpush3.msra.mxu0 %v12475_v52  ;;  %9777 = vmatpush3.msra.mxu1 %v12508_v57 }
 0x1b1   :  { %9659 = vmatprep.mubr.msk.f32.mxu0 %vm12002_vm0, %v12859_v22  ;;  %9723 = vmatprep.subr.mxu0 %v12859_v22  ;;  %v1032_v61 = vmul.f32 %v1029_v21, %v12641_v4 }
 0x1b2   :  { %9778 = vmatprep.subr.mxu1 %v12859_v22  ;;  %9660 = vmatmul.mubr.f32.gmra.mxu0 %v1482_v43 }
 0x1b3   :  { %9724 = vmatpush3.msra.mxu0 %v12489_v10  ;;  %9779 = vmatpush3.msra.mxu1 %v12526_v46  ;;  %v1358_v50 = vsel %vm1353_vm5, %v1032_v61, %v1344_v1  ;;  %v1359_v15 = vsel %vm1354_vm15, %v1032_v61, %v1344_v1  ;;  %v13195_v1 = vand.u32 4294901760, %v2235_v58 }
 0x1b4   :  { %9725 = vmatprep.subr.mxu0 %v12859_v22  ;;  %9780 = vmatprep.subr.mxu1 %v12859_v22  ;;  %v12954_v4 = vand.u32 4294901760, %v1358_v50  ;;  %v12956_v8 = vand.u32 4294901760, %v1359_v15 }
 0x1b5   :  { %9726 = vmatpush3.msra.mxu0 %v12496_v38  ;;  %9781 = vmatpush3.msra.mxu1 %v12530_v2 }
 0x1b6   :  { %9662 = vmatprep.mubr.msk.f32.mxu0 %vm12002_vm0, %v12859_v22  ;;  %9727 = vmatprep.subr.mxu0 %v12859_v22  ;;  %v12964_v41 = vsub.f32 %v1358_v50, %v12954_v4  ;;  %v12968_v5 = vsub.f32 %v1359_v15, %v12956_v8  ;;  %v2234_v15 = vld [vmem:[#allocation2 + $0x148] sm:$0xff] }
 0x1b7   :  { %9782 = vmatprep.subr.mxu1 %v12859_v22  ;;  %9728 = vmatpush3.msra.mxu0 %v12506_v51 }
 0x1b8   :  { %9783 = vmatpush3.msra.mxu1 %v12532_v16  ;;  %9729 = vmatprep.subr.mxu0 %v12859_v22  ;;  %v1490_v55 = vand.u32 4294901760, %v12964_v41  ;;  %v1500_v0 = vand.u32 4294901760, %v12968_v5 }
 0x1b9   :  { %9784 = vmatprep.subr.mxu1 %v12859_v22  ;;  %9730 = vmatpush3.msra.mxu0 %v12524_v25 }
 0x1ba   :  { %9785 = vmatpush3.msra.mxu1 %v12535_v17  ;;  %9731 = vmatprep.subr.mxu0 %v12859_v22  ;;  %v1491_v36 = vsub.f32 %v12964_v41, %v1490_v55  ;;  %v1501_v54 = vsub.f32 %v12968_v5, %v1500_v0 }
 0x1bb   :  { %9710 = vmatmul.mubr.f32.gmra.mxu1 %v12954_v4  ;;  %9786 = vmatprep.subr.mxu1 %v12859_v22 }
 0x1bc   :  { %9712 = vmatprep.mubr.msk.f32.mxu1 %vm12002_vm0, %v12859_v22  ;;  %9732 = vmatpush3.msra.mxu0 %v12542_v18  ;;  %v1492_v45 = vand.u32 4294901760, %v1491_v36  ;;  %v1502_v56 = vand.u32 4294901760, %v1501_v54 }
 0x1bd   :  { %9787 = vmatpush3.msra.mxu1 %v12555_v29  ;;  %9733 = vmatprep.subr.mxu0 %v12859_v22 }
 0x1be   :  { %9788 = vmatprep.subr.mxu1 %v12859_v22  ;;  %9734 = vmatpush3.msra.mxu0 %v12546_v20 }
 0x1bf   :  { %9713 = vmatmul.mubr.f32.gmra.mxu1 %v12956_v8  ;;  %9735 = vmatprep.subr.mxu0 %v12859_v22 }
 0x1c0   :  { %9789 = vmatpush3.msra.mxu1 %v12574_v44  ;;  %9736 = vmatpush3.msra.mxu0 %v16871_v13 }
 0x1c1   :  { %9790 = vmatprep.subr.mxu1 %v12859_v22  ;;  %9737 = vmatprep.subr.mxu0 %v12859_v22 }
 0x1c2   :  { %9791 = vmatpush3.msra.mxu1 %v16872_v60  ;;  %9738 = vmatpush3.msra.mxu0 %v16873_v48 }
 0x1c3   :  { %9663 = vmatmul.mubr.f32.gmra.mxu0 %v1492_v45  ;;  %9792 = vmatprep.subr.mxu1 %v12859_v22 }
 0x1c4   :  { %9665 = vmatprep.mubr.msk.f32.mxu0 %vm12002_vm0, %v12859_v22  ;;  %9793 = vmatpush3.msra.mxu1 %v16874_v47 }
 0x1c5   :  { %9794 = vmatprep.mubr.msk.f32.mxu1 %vm12002_vm0, %v12859_v22  ;;  %9739 = vmatprep.subr.mxu0 %v12859_v22 }
 0x1c6   :  { %9795 = vmatmul.mubr.f32.vlgmr.msra.gmra.mxu1 %v1460_v3  ;;  %9856 = vmatprep.subr.mxu1 %v12859_v22  ;;  %v16878_v3 = vld [vmem:[#allocation13_spill] sm:$0xff] }
 0x1c7   :  { %9666 = vmatmul.mubr.f32.gmra.mxu0 %v1502_v56  ;;  %9857 = vmatpush3.msra.mxu1 %v12440_v19  ;;  %v16877_v19 = vld [vmem:[#allocation12_spill] sm:$0xff] }
 0x1c8   :  { %9740 = vmatpush3.msra.mxu0 %v16875_v59  ;;  %9858 = vmatprep.subr.mxu1 %v12859_v22 }
 0x1c9   :  { %9741 = vmatprep.subr.mxu0 %v12859_v22  ;;  %9797 = vmatprep.mubr.msk.f32.mxu1 %vm12002_vm0, %v12859_v22 }
 0x1ca   :  { %9742 = vmatpush3.msra.mxu0 %v16876_v42  ;;  %9859 = vmatpush3.msra.mxu1 %v12445_v24  ;;  %v16879_v24 = vand.u32 4294901760, %v12443_v23  ;;  %v16881_v23 = vand.u32 4294901760, %v12462_v34  ;;  %v16883_v34 = vand.u32 4294901760, %v12489_v10  ;;  %v16888_v10 = vand.u32 4294901760, %v12546_v20 }
 0x1cb   :  { %9743 = vmatprep.subr.mxu0 %v12859_v22  ;;  %9798 = vmatmul.mubr.f32.gmra.mxu1 %v1470_v49 }
 0x1cc   :  { %9860 = vmatprep.subr.mxu1 %v12859_v22  ;;  %9744 = vmatpush3.msra.mxu0 %v16877_v19 }
 0x1cd   :  { %9861 = vmatpush3.msra.mxu1 %v12453_v28  ;;  %9745 = vmatprep.subr.mxu0 %v12859_v22  ;;  %v16880_v28 = vand.u32 4294901760, %v12451_v27  ;;  %v16882_v27 = vand.u32 4294901760, %v12475_v52  ;;  %v16885_v52 = vand.u32 4294901760, %v12506_v51  ;;  %v16891_v51 = vand.u32 4294901760, %v16875_v59 }
 0x1ce   :  { %9862 = vmatprep.subr.mxu1 %v12859_v22  ;;  %9746 = vmatpush3.msra.mxu0 %v16878_v3 }
 0x1cf   :  { %9747 = vmatprep.mubr.msk.f32.mxu0 %vm12002_vm0, %v12859_v22  ;;  %9800 = vmatprep.mubr.msk.f32.mxu1 %vm12002_vm0, %v12859_v22 }
 0x1d0   :  { %9863 = vmatpush3.msra.mxu1 %v12464_v35  ;;  %9748 = vmatmul.mubr.f32.vlgmr.msra.gmra.mxu0 %v12847_v32  ;;  %v16884_v35 = vand.u32 4294901760, %v12496_v38  ;;  %v16889_v38 = vand.u32 4294901760, %v16871_v13 }
 0x1d1   :  { %9801 = vmatmul.mubr.f32.gmra.mxu1 %v1480_v7  ;;  %9809 = vmatprep.subr.mxu0 %v12859_v22  ;;  %v2236_v7 = vld [vmem:[#allocation2 + $0x158] sm:$0xff] }
 0x1d2   :  { %9864 = vmatprep.subr.mxu1 %v12859_v22  ;;  %9810 = vmatpush3.msra.mxu0 %v16879_v24  ;;  %v13188_v14 = vand.u32 4294901760, %v2236_v7 }
 0x1d3   :  { %9865 = vmatpush3.msra.mxu1 %v12478_v53  ;;  %9811 = vmatprep.subr.mxu0 %v12859_v22  ;;  %v16886_v53 = vand.u32 4294901760, %v12524_v25  ;;  %v16893_v25 = vand.u32 4294901760, %v16877_v19 }
 0x1d4   :  { %9866 = vmatprep.subr.mxu1 %v12859_v22  ;;  %9750 = vmatprep.mubr.msk.f32.mxu0 %vm12002_vm0, %v12859_v22  ;;  %v13199_v50 = vsub.f32 %v2236_v7, %v13188_v14 }
 0x1d5   :  { %9803 = vmatprep.mubr.msk.f32.mxu1 %vm12002_vm0, %v12859_v22  ;;  %9812 = vmatpush3.msra.mxu0 %v16880_v28 }
 0x1d6   :  { %9867 = vmatpush3.msra.mxu1 %v12485_v6  ;;  %9751 = vmatmul.mubr.f32.gmra.mxu0 %v12893_v63  ;;  %v16887_v6 = vand.u32 4294901760, %v12542_v18 }
 0x1d7   :  { %9804 = vmatmul.mubr.f32.gmra.mxu1 %v1490_v55  ;;  %9813 = vmatprep.subr.mxu0 %v12859_v22  ;;  %v16700_v55 = vand.u32 4294901760, %v13199_v50 }
 0x1d8   :  { %9868 = vmatprep.subr.mxu1 %v12859_v22  ;;  %9814 = vmatpush3.msra.mxu0 %v16881_v23 }
 0x1d9   :  { %9869 = vmatpush3.msra.mxu1 %v12498_v39  ;;  %9815 = vmatprep.subr.mxu0 %v12859_v22  ;;  %v16890_v39 = vand.u32 4294901760, %v16873_v48  ;;  %v2232_v48 = vld [vmem:[#allocation2 + $0x138] sm:$0xff] }
 0x1da   :  { %9870 = vmatprep.subr.mxu1 %v12859_v22  ;;  %9753 = vmatprep.mubr.msk.f32.mxu0 %vm12002_vm0, %v12859_v22 }
 0x1db   :  { %9806 = vmatprep.mubr.msk.f32.mxu1 %vm12002_vm0, %v12859_v22  ;;  %9816 = vmatpush3.msra.mxu0 %v16882_v27 }
 0x1dc   :  { %9871 = vmatpush3.msra.mxu1 %v12508_v57  ;;  %9754 = vmatmul.mubr.f32.gmra.mxu0 %v12896_v12  ;;  %v16892_v57 = vand.u32 4294901760, %v16876_v42  ;;  %v13233_v42 = vand.u32 4294901760, %v2232_v48 }
 0x1dd   :  { %9807 = vmatmul.mubr.f32.gmra.mxu1 %v1500_v0  ;;  %9817 = vmatprep.subr.mxu0 %v12859_v22  ;;  %v2233_v0 = vld [vmem:[#allocation2 + $0x140] sm:$0xff] }
 0x1de   :  { %9872 = vmatprep.subr.mxu1 %v12859_v22  ;;  %9818 = vmatpush3.msra.mxu0 %v16883_v34  ;;  %v13218_v54 = vand.u32 4294901760, %v2233_v0  ;;  %v13243_v27 = vsub.f32 %v2232_v48, %v13233_v42 }
 0x1df   :  { %9873 = vmatpush3.msra.mxu1 %v12526_v46  ;;  %9819 = vmatprep.subr.mxu0 %v12859_v22  ;;  %v16894_v46 = vand.u32 4294901760, %v16878_v3  ;;  %v2231_v3 = vld [vmem:[#allocation2 + $0x130] sm:$0xff] }
 0x1e0   :  { %9874 = vmatprep.subr.mxu1 %v12859_v22  ;;  %9756 = vmatprep.mubr.msk.f32.mxu0 %vm12002_vm0, %v12859_v22  ;;  %v13231_v59 = vsub.f32 %v2233_v0, %v13218_v54  ;;  %v13246_v34 = vand.u32 4294901760, %v2231_v3 }
 0x1e1   :  { %9820 = vmatpush3.msra.mxu0 %v16884_v35  ;;  %9875 = vmatpush3.msra.mxu1 %v12530_v2  ;;  %v2240_v2 = vld [vmem:[#allocation2 + $0x178] sm:$0xff]  ;;  %v2230_v35 = vld [vmem:[#allocation2 + $0x128] sm:$0xff] }
 0x1e2   :  { %9757 = vmatmul.mubr.f32.gmra.mxu0 %v12964_v41  ;;  %9821 = vmatprep.subr.mxu0 %v12859_v22  ;;  %v13206_v41 = vsub.f32 %v2235_v58, %v13195_v1  ;;  %v16697_v23 = vand.u32 4294901760, %v13231_v59  ;;  %v2227_v58 = vld [vmem:[#allocation2 + $0x110] sm:$0xff] }
 0x1e3   :  { %9876 = vmatprep.subr.mxu1 %v12859_v22  ;;  %9822 = vmatpush3.msra.mxu0 %v16885_v52 }
 0x1e4   :  { %9877 = vmatpush3.msra.mxu1 %v12532_v16  ;;  %9823 = vmatprep.subr.mxu0 %v12859_v22  ;;  %v13152_v16 = vand.u32 4294901760, %v2240_v2  ;;  %v16699_v13 = vand.u32 4294901760, %v13206_v41 }
 0x1e5   :  { %9878 = vmatprep.subr.mxu1 %v12859_v22  ;;  %9759 = vmatprep.mubr.msk.f32.mxu0 %vm12002_vm0, %v12859_v22 }
 0x1e6   :  { %9824 = vmatpush3.msra.mxu0 %v16886_v53  ;;  %9879 = vmatpush3.msra.mxu1 %v12535_v17  ;;  %v2239_v17 = vld [vmem:[#allocation2 + $0x170] sm:$0xff]  ;;  %v13155_v18 = vsub.f32 %v2240_v2, %v13152_v16  ;;  %v2425_v53 = vsub.f32 %v13231_v59, %v16697_v23 }
 0x1e7   :  { %9760 = vmatmul.mubr.f32.gmra.mxu0 %v12968_v5  ;;  %9825 = vmatprep.subr.mxu0 %v12859_v22  ;;  %v13157_v20 = vand.u32 4294901760, %v2239_v17  ;;  %v13208_v5 = vand.u32 4294901760, %v2234_v15 }
 0x1e8   :  { %9880 = vmatprep.subr.mxu1 %v12859_v22  ;;  %9826 = vmatpush3.msra.mxu0 %v16887_v6  ;;  %v16696_v6 = vand.u32 4294901760, %v13243_v27 }
 0x1e9   :  { %9881 = vmatpush3.msra.mxu1 %v12555_v29  ;;  %9827 = vmatprep.subr.mxu0 %v12859_v22  ;;  %v2238_v29 = vld [vmem:[#allocation2 + $0x168] sm:$0xff]  ;;  %v13216_v45 = vsub.f32 %v2234_v15, %v13208_v5 }
 0x1ea   :  { %9882 = vmatprep.subr.mxu1 %v12859_v22  ;;  %9828 = vmatpush3.msra.mxu0 %v16888_v10  ;;  %v13165_v32 = vand.u32 4294901760, %v2238_v29  ;;  %v13254_v10 = vand.u32 4294901760, %v2230_v35 }
 0x1eb   :  { %9883 = vmatpush3.msra.mxu1 %v12574_v44  ;;  %9829 = vmatprep.subr.mxu0 %v12859_v22  ;;  %v16704_v44 = vand.u32 4294901760, %v13155_v18  ;;  %v16698_v56 = vand.u32 4294901760, %v13216_v45 }
 0x1ec   :  { %9884 = vmatprep.subr.mxu1 %v12859_v22  ;;  %9830 = vmatpush3.msra.mxu0 %v16889_v38  ;;  %v13174_v12 = vsub.f32 %v2238_v29, %v13165_v32  ;;  %v13258_v38 = vsub.f32 %v2231_v3, %v13246_v34 }
 0x1ed   :  { %9885 = vmatpush3.msra.mxu1 %v16872_v60  ;;  %9831 = vmatprep.subr.mxu0 %v12859_v22  ;;  %v2404_v60 = vsub.f32 %v13199_v50, %v16700_v55  ;;  %v2418_v28 = vsub.f32 %v13216_v45, %v16698_v56 }
 0x1ee   :  { %9886 = vmatprep.subr.mxu1 %v12859_v22  ;;  %9832 = vmatpush3.msra.mxu0 %v16890_v39  ;;  %v16702_v11 = vand.u32 4294901760, %v13174_v12  ;;  %v2229_v39 = vld [vmem:[#allocation2 + $0x120] sm:$0xff]  ;;  %v16695_v2 = vand.u32 4294901760, %v13258_v38 }
 0x1ef   :  { %9887 = vmatpush3.msra.mxu1 %v16874_v47  ;;  %9888 = vmatprep.mubr.msk.f32.mxu1 %vm12002_vm0, %v12859_v22  ;;  %v2411_v47 = vsub.f32 %v13206_v41, %v16699_v13  ;;  %v2405_v19 = vand.u32 4294901760, %v2404_v60  ;;  %v2419_v52 = vand.u32 4294901760, %v2418_v28 }
 0x1f0   :  { %9833 = vmatprep.subr.mxu0 %v12859_v22  ;;  %9889 = vmatmul.mubr.f32.vlgmr.msra.gmra.mxu1 %v12831_v33  ;;  %v2390_v30 = vsub.f32 %v13174_v12, %v16702_v11 }
 0x1f1   :  { %9834 = vmatpush3.msra.mxu0 %v16891_v51  ;;  %9891 = vmatprep.mubr.msk.f32.mxu1 %vm12002_vm0, %v12859_v22  ;;  %v2412_v24 = vand.u32 4294901760, %v2411_v47  ;;  %v2426_v51 = vand.u32 4294901760, %v2425_v53 }
 0x1f2   :  { %9835 = vmatprep.subr.mxu0 %v12859_v22  ;;  %9841 = vmatprep.mubr.msk.f32.mxu0 %vm12002_vm0, %v12859_v22 }
 0x1f3   :  { %9836 = vmatpush3.msra.mxu0 %v16892_v57  ;;  %9950 = vmatprep.subr.mxu1 %v12859_v22  ;;  %v2432_v57 = vsub.f32 %v13243_v27, %v16696_v6 }
 0x1f4   :  { %9837 = vmatprep.subr.mxu0 %v12859_v22  ;;  %9892 = vmatmul.mubr.f32.gmra.mxu1 %v12882_v31 }
 0x1f5   :  { %9838 = vmatpush3.msra.mxu0 %v16893_v25  ;;  %9894 = vmatprep.mubr.msk.f32.mxu1 %vm12002_vm0, %v12859_v22  ;;  %v13266_v25 = vsub.f32 %v2230_v35, %v13254_v10 }
 0x1f6   :  { %9839 = vmatprep.subr.mxu0 %v12859_v22 }
 0x1f7   :  { %9840 = vmatpush3.msra.mxu0 %v16894_v46  ;;  %v13268_v46 = vand.u32 4294901760, %v2229_v39 }
 0x1f8   :  { %9842 = vmatmul.mubr.f32.vlgmr.msra.gmra.mxu0 %v12831_v33  ;;  %9895 = vmatmul.mubr.f32.gmra.mxu1 %v12885_v62  ;;  %v13163_v33 = vsub.f32 %v2239_v17, %v13157_v20  ;;  %v2228_v17 = vld [vmem:[#allocation2 + $0x118] sm:$0xff] }
 0x1f9   :  { %9844 = vmatprep.mubr.msk.f32.mxu0 %vm12002_vm0, %v12859_v22  ;;  %9897 = vmatprep.mubr.msk.f32.mxu1 %vm12002_vm0, %v12859_v22  ;;  %v13276_v7 = vsub.f32 %v2229_v39, %v13268_v46 }
 0x1fa   :  { %9903 = vmatprep.subr.mxu0 %v12859_v22  ;;  %v16703_v63 = vand.u32 4294901760, %v13163_v33 }
 0x1fb   :  { %9904 = vmatpush3.msra.mxu0 %v13152_v16 }
 0x1fc   :  { %9845 = vmatmul.mubr.f32.gmra.mxu0 %v12882_v31  ;;  %9898 = vmatmul.mubr.f32.gmra.mxu1 %v12954_v4  ;;  %v2237_v31 = vld [vmem:[#allocation2 + $0x160] sm:$0xff]  ;;  %v2383_v40 = vsub.f32 %v13163_v33, %v16703_v63 }
 0x1fd   :  { %9847 = vmatprep.mubr.msk.f32.mxu0 %vm12002_vm0, %v12859_v22  ;;  %9900 = vmatprep.mubr.msk.f32.mxu1 %vm12002_vm0, %v12859_v22  ;;  %v13176_v49 = vand.u32 4294901760, %v2237_v31 }
 0x1fe   :  { %9905 = vmatprep.subr.mxu0 %v12859_v22  ;;  %v2384_v21 = vand.u32 4294901760, %v2383_v40  ;;  %v2439_v40 = vsub.f32 %v13258_v38, %v16695_v2 }
 0x1ff   :  { %9906 = vmatpush3.msra.mxu0 %v13157_v20  ;;  %v13185_v26 = vsub.f32 %v2237_v31, %v13176_v49  ;;  %v2433_v31 = vand.u32 4294901760, %v2432_v57 }
 0x200   :  { %9848 = vmatmul.mubr.f32.gmra.mxu0 %v12885_v62  ;;  %9901 = vmatmul.mubr.f32.gmra.mxu1 %v12956_v8  ;;  %v2376_v62 = vsub.f32 %v13155_v18, %v16704_v44  ;;  %v2440_v60 = vand.u32 4294901760, %v2439_v40 }
 0x201   :  { %9850 = vmatprep.mubr.msk.f32.mxu0 %vm12002_vm0, %v12859_v22  ;;  %9982 = vmatprep.mubr.msk.f32.mxu1 %vm12002_vm0, %v12859_v22  ;;  %v16701_v61 = vand.u32 4294901760, %v13185_v26 }
 0x202   :  { %9907 = vmatprep.subr.mxu0 %v12859_v22  ;;  %v2377_v43 = vand.u32 4294901760, %v2376_v62  ;;  %v16694_v62 = vand.u32 4294901760, %v13266_v25 }
 0x203   :  { %9908 = vmatpush3.msra.mxu0 %v13165_v32 }
 0x204   :  { %9851 = vmatmul.mubr.f32.gmra.mxu0 %v12954_v4  ;;  %9909 = vmatprep.subr.mxu0 %v12859_v22  ;;  %v2391_v4 = vand.u32 4294901760, %v2390_v30  ;;  %v2225_v30 = vld [vmem:[#allocation2 + $0x100] sm:$0xff] }
 0x205   :  { %9853 = vmatprep.mubr.msk.f32.mxu0 %vm12002_vm0, %v12859_v22  ;;  %9910 = vmatpush3.msra.mxu0 %v13176_v49  ;;  %v13298_v47 = vand.u32 4294901760, %v2225_v30 }
 0x206   :  { %9911 = vmatprep.subr.mxu0 %v12859_v22  ;;  %9951 = vmatpush3.msra.mxu1 %v2377_v43  ;;  %v13278_v43 = vand.u32 4294901760, %v2228_v17 }
 0x207   :  { %9952 = vmatprep.subr.mxu1 %v12859_v22  ;;  %9912 = vmatpush3.msra.mxu0 %v13188_v14 }
 0x208   :  { %9854 = vmatmul.mubr.f32.gmra.mxu0 %v12956_v8  ;;  %9953 = vmatpush3.msra.mxu1 %v2384_v21  ;;  %v2397_v8 = vsub.f32 %v13185_v26, %v16701_v61  ;;  %v2226_v21 = vld [vmem:[#allocation2 + $0x108] sm:$0xff]  ;;  %v13291_v0 = vsub.f32 %v2228_v17, %v13278_v43 }
 0x209   :  { %9935 = vmatprep.mubr.msk.f32.mxu0 %vm12002_vm0, %v12859_v22  ;;  %9913 = vmatprep.subr.mxu0 %v12859_v22  ;;  %v13296_v48 = vand.u32 4294901760, %v2226_v21 }
 0x20a   :  { %9954 = vmatprep.subr.mxu1 %v12859_v22  ;;  %9914 = vmatpush3.msra.mxu0 %v13195_v1  ;;  %v2398_v36 = vand.u32 4294901760, %v2397_v8  ;;  %v16693_v8 = vand.u32 4294901760, %v13276_v7 }
 0x20b   :  { %9955 = vmatpush3.msra.mxu1 %v2391_v4  ;;  %9915 = vmatprep.subr.mxu0 %v12859_v22  ;;  %v2446_v4 = vsub.f32 %v13266_v25, %v16694_v62  ;;  %v13311_v35 = vsub.f32 %v2226_v21, %v13296_v48 }
 0x20c   :  { %9956 = vmatprep.subr.mxu1 %v12859_v22  ;;  %9916 = vmatpush3.msra.mxu0 %v13208_v5  ;;  %v2453_v3 = vsub.f32 %v13276_v7, %v16693_v8 }
 0x20d   :  { %9957 = vmatpush3.msra.mxu1 %v2398_v36  ;;  %9917 = vmatprep.subr.mxu0 %v12859_v22  ;;  %v13293_v36 = vand.u32 4294901760, %v2227_v58  ;;  %16895 = vst [vmem:[#allocation6_spill] sm:$0xff] %v13311_v35  ;;  %v16689_v57 = vand.u32 4294901760, %v13311_v35 }
 0x20e   :  { %9958 = vmatprep.subr.mxu1 %v12859_v22  ;;  %9918 = vmatpush3.msra.mxu0 %v13218_v54  ;;  %v2454_v53 = vand.u32 4294901760, %v2453_v3 }
 0x20f   :  { %9919 = vmatprep.subr.mxu0 %v12859_v22  ;;  %9959 = vmatpush3.msra.mxu1 %v2405_v19  ;;  %v2447_v19 = vand.u32 4294901760, %v2446_v4  ;;  %v13307_v28 = vsub.f32 %v2227_v58, %v13293_v36 }
 0x210   :  { %9920 = vmatpush3.msra.mxu0 %v13233_v42  ;;  %9960 = vmatprep.subr.mxu1 %v12859_v22 }
 0x211   :  { %9921 = vmatprep.subr.mxu0 %v12859_v22  ;;  %9961 = vmatpush3.msra.mxu1 %v2412_v24  ;;  %v16692_v24 = vand.u32 4294901760, %v13291_v0 }
 0x212   :  { %9922 = vmatpush3.msra.mxu0 %v13246_v34  ;;  %9962 = vmatprep.subr.mxu1 %v12859_v22 }
 0x213   :  { %9923 = vmatprep.subr.mxu0 %v12859_v22  ;;  %9963 = vmatpush3.msra.mxu1 %v2419_v52  ;;  %v13314_v52 = vsub.f32 %v2225_v30, %v13298_v47  ;;  %v2460_v39 = vsub.f32 %v13291_v0, %v16692_v24  ;;  %v2474_v30 = vsub.f32 %v13311_v35, %v16689_v57 }
 0x214   :  { %9924 = vmatpush3.msra.mxu0 %v13254_v10  ;;  %9964 = vmatprep.subr.mxu1 %v12859_v22 }
 0x215   :  { %9925 = vmatprep.subr.mxu0 %v12859_v22  ;;  %9965 = vmatpush3.msra.mxu1 %v2426_v51  ;;  %16896 = vst [vmem:[#allocation10_spill] sm:$0xff] %v13314_v52  ;;  %v16690_v51 = vand.u32 4294901760, %v13307_v28  ;;  %v16691_v17 = vand.u32 4294901760, %v13314_v52  ;;  %v2461_v40 = vand.u32 4294901760, %v2460_v39 }
 0x216   :  { %9926 = vmatpush3.msra.mxu0 %v13268_v46  ;;  %9966 = vmatprep.subr.mxu1 %v12859_v22 }
 0x217   :  { %9927 = vmatprep.subr.mxu0 %v12859_v22  ;;  %9967 = vmatpush3.msra.mxu1 %v2433_v31  ;;  %v2467_v58 = vsub.f32 %v13307_v28, %v16690_v51 }
 0x218   :  { %9928 = vmatpush3.msra.mxu0 %v13278_v43  ;;  %9968 = vmatprep.subr.mxu1 %v12859_v22 }
 0x219   :  { %9929 = vmatprep.subr.mxu0 %v12859_v22  ;;  %9969 = vmatpush3.msra.mxu1 %v2440_v60 }
 0x21a   :  { %9930 = vmatpush3.msra.mxu0 %v13293_v36  ;;  %9970 = vmatprep.subr.mxu1 %v12859_v22 }
 0x21b   :  { %9931 = vmatprep.subr.mxu0 %v12859_v22  ;;  %9971 = vmatpush3.msra.mxu1 %v2447_v19  ;;  %v2468_v19 = vand.u32 4294901760, %v2467_v58 }
 0x21c   :  { %9932 = vmatpush3.msra.mxu0 %v13296_v48  ;;  %9972 = vmatprep.subr.mxu1 %v12859_v22 }
 0x21d   :  { %9933 = vmatprep.subr.mxu0 %v12859_v22  ;;  %9973 = vmatpush3.msra.mxu1 %v2454_v53  ;;  %v2475_v53 = vand.u32 4294901760, %v2474_v30 }
 0x21e   :  { %9934 = vmatpush3.msra.mxu0 %v13298_v47  ;;  %9974 = vmatprep.subr.mxu1 %v12859_v22 }
 0x21f   :  { %9997 = vmatprep.subr.mxu0 %v12859_v22  ;;  %9975 = vmatpush3.msra.mxu1 %v2461_v40 }
 0x220   :  { %9976 = vmatprep.subr.mxu1 %v12859_v22 }
 0x221   :  { %9977 = vmatpush3.msra.mxu1 %v2468_v19 }
 0x222   :  { %9978 = vmatprep.subr.mxu1 %v12859_v22 }
 0x223   :  { %9979 = vmatpush3.msra.mxu1 %v2475_v53 }
 0x224   :  { %9980 = vmatprep.subr.mxu1 %v12859_v22 }
 0x25e   :  { %v1655_v29 = vpop.f32.mrf.mxu1 }
 0x260   :  { %v9702_v15 = vpop.f32.mrf.mxu1 }
 0x261   :  { %v2481_v15 = vsub.f32 %v13314_v52, %v16691_v17 }
 0x263   :  { %v2482_v57 = vand.u32 4294901760, %v2481_v15 }
 0x265   :  { %9981 = vmatpush3.msra.mxu1 %v2482_v57 }
 0x266   :  { %v1661_v31 = vpop.f32.mrf.mxu1  ;;  %10044 = vmatprep.subr.mxu1 %v12859_v22 }
 0x267   :  { %v1464_v21 = vpop.f32.mrf.mxu0 }
 0x268   :  { %v9705_v4 = vpop.f32.mrf.mxu1  ;;  %v1656_v60 = vadd.f32 %v1655_v29, %v1464_v21 }
 0x269   :  { %v9655_v3 = vpop.f32.mrf.mxu0 }
 0x26a   :  { %v1667_v39 = vpop.f32.mrf.mxu1 }
 0x26c   :  { %v9708_v51 = vpop.f32.mrf.mxu1 }
 0x26e   :  { %v1474_v17 = vpop.f32.mrf.mxu0 }
 0x26f   :  { %v1662_v29 = vadd.f32 %v1661_v31, %v1474_v17 }
 0x270   :  { %v9658_v58 = vpop.f32.mrf.mxu0 }
 0x272   :  { %v1484_v21 = vpop.f32.mrf.mxu0 }
 0x273   :  { %v1668_v40 = vadd.f32 %v1667_v39, %v1484_v21 }
 0x274   :  { %v9661_v30 = vpop.f32.mrf.mxu0 }
 0x27b   :  { %v1673_v4 = vpop.f32.mrf.mxu1 }
 0x27d   :  { %v9711_v3 = vpop.f32.mrf.mxu1 }
 0x27f   :  { %v1679_v24 = vpop.f32.mrf.mxu1 }
 0x281   :  { %v9714_v19 = vpop.f32.mrf.mxu1 }
 0x283   :  { %v1494_v15 = vpop.f32.mrf.mxu0 }
 0x284   :  { %v1674_v51 = vadd.f32 %v1673_v4, %v1494_v15 }
 0x285   :  { %v9664_v8 = vpop.f32.mrf.mxu0 }
 0x286   :  { %v1900_v62 = vpop.f32.mrf.mxu1 }
 0x287   :  { %v1504_v53 = vpop.f32.mrf.mxu0 }
 0x288   :  { %v9796_v2 = vpop.f32.mrf.mxu1 }
 0x289   :  { %v9667_v6 = vpop.f32.mrf.mxu0 }
 0x28b   :  { %v1908_v23 = vpop.f32.mrf.mxu1 }
 0x28d   :  { %v9799_v17 = vpop.f32.mrf.mxu1 }
 0x290   :  { %v1783_v57 = vpop.f32.mrf.mxu0 }
 0x291   :  { %v1784_v31 = vadd.f32 %v1783_v57, %v1656_v60  ;;  %v1916_v58 = vpop.f32.mrf.mxu1 }
 0x292   :  { %v9749_v22 = vpop.f32.mrf.mxu0 }
 0x293   :  { %v9802_v56 = vpop.f32.mrf.mxu1  ;;  %v1901_v39 = vadd.f32 %v1900_v62, %v1784_v31 }
 0x296   :  { %v1790_v21 = vpop.f32.mrf.mxu0 }
 0x297   :  { %v1791_v30 = vadd.f32 %v1790_v21, %v1662_v29  ;;  %v1924_v3 = vpop.f32.mrf.mxu1  ;;  %v16897_v29 = vld [vmem:[#allocation5_spill] sm:$0xff] }
 0x298   :  { %v9752_v13 = vpop.f32.mrf.mxu0  ;;  %v2192_v21 = vsub.s32 1, %v16897_v29 }
 0x299   :  { %v9805_v19 = vpop.f32.mrf.mxu1  ;;  %v1909_v55 = vadd.f32 %v1908_v23, %v1791_v30 }
 0x29c   :  { %v1797_v4 = vpop.f32.mrf.mxu0 }
 0x29d   :  { %v1798_v8 = vadd.f32 %v1797_v4, %v1668_v40  ;;  %v1932_v15 = vpop.f32.mrf.mxu1 }
 0x29e   :  { %v9755_v61 = vpop.f32.mrf.mxu0 }
 0x29f   :  { %v9808_v2 = vpop.f32.mrf.mxu1  ;;  %v1917_v6 = vadd.f32 %v1916_v58, %v1798_v8  ;;  %v13348_v61 = vld [vmem:[%s16637_s2] sm:$0xff] }
 0x2a2   :  { %v1804_v11 = vpop.f32.mrf.mxu0 }
 0x2a3   :  { %v1805_v17 = vadd.f32 %v1804_v11, %v1674_v51  ;;  %v2193_v11 = vrot.slane %v13348_v61, %v2192_v21 }
 0x2a4   :  { %v9758_v63 = vpop.f32.mrf.mxu0 }
 0x2a5   :  { %v1925_v60 = vadd.f32 %v1924_v3, %v1805_v17 }
 0x2a7   :  { %v1811_v57 = vpop.f32.mrf.mxu0 }
 0x2a9   :  { %v9761_v22 = vpop.f32.mrf.mxu0 }
 0x2b0   :  { %v2162_v56 = vpop.f32.mrf.mxu1 }
 0x2b2   :  { %v9890_v62 = vpop.f32.mrf.mxu1 }
 0x2b4   :  { %v2168_v31 = vpop.f32.mrf.mxu1 }
 0x2b6   :  { %v9893_v13 = vpop.f32.mrf.mxu1 }
 0x2b7   :  { %v1680_v13 = vadd.f32 %v1679_v24, %v1504_v53 }
 0x2b8   :  { %v2051_v19 = vpop.f32.mrf.mxu0  ;;  %v2174_v23 = vpop.f32.mrf.mxu1 }
 0x2b9   :  { %v2052_v30 = vadd.f32 %v2051_v19, %v1901_v39  ;;  %v1812_v35 = vadd.f32 %v1811_v57, %v1680_v13 }
 0x2ba   :  { %v9843_v63 = vpop.f32.mrf.mxu0  ;;  %v9896_v40 = vpop.f32.mrf.mxu1 }
 0x2bb   :  { %v2163_v51 = vadd.f32 %v2162_v56, %v2052_v30 }
 0x2bc   :  { %v2057_v58 = vpop.f32.mrf.mxu0  ;;  %v2180_v3 = vpop.f32.mrf.mxu1 }
 0x2bd   :  { %v2194_v4 = vadd.f32 %v2193_v11, %v2163_v51  ;;  %v2058_v8 = vadd.f32 %v2057_v58, %v1909_v55  ;;  %v1933_v58 = vadd.f32 %v1932_v15, %v1812_v35 }
 0x2be   :  { %v9846_v2 = vpop.f32.mrf.mxu0  ;;  %v9899_v17 = vpop.f32.mrf.mxu1 }
 0x2bf   :  { %11923 = vtanh.f32 %v2194_v4  ;;  %v2169_v22 = vadd.f32 %v2168_v31, %v2058_v8 }
 0x2c0   :  { %v2063_v62 = vpop.f32.mrf.mxu0  ;;  %v2186_v39 = vpop.f32.mrf.mxu1 }
 0x2c1   :  { %v2195_v19 = vadd.f32 %v2193_v11, %v2169_v22  ;;  %v2064_v44 = vadd.f32 %v2063_v62, %v1917_v6 }
 0x2c2   :  { %v9849_v29 = vpop.f32.mrf.mxu0  ;;  %v9902_v52 = vpop.f32.mrf.mxu1 }
 0x2c3   :  { %11925 = vtanh.f32 %v2195_v19  ;;  %v2175_v21 = vadd.f32 %v2174_v23, %v2064_v44 }
 0x2c4   :  { %v2069_v63 = vpop.f32.mrf.mxu0 }
 0x2c5   :  { %v2196_v56 = vadd.f32 %v2193_v11, %v2175_v21  ;;  %v2070_v30 = vadd.f32 %v2069_v63, %v1925_v60 }
 0x2c6   :  { %v9852_v40 = vpop.f32.mrf.mxu0 }
 0x2c7   :  { %11927 = vtanh.f32 %v2196_v56  ;;  %v2181_v55 = vadd.f32 %v2180_v3, %v2070_v30 }
 0x2c8   :  { %v2075_v2 = vpop.f32.mrf.mxu0 }
 0x2c9   :  { %v2197_v4 = vadd.f32 %v2193_v11, %v2181_v55  ;;  %v2076_v31 = vadd.f32 %v2075_v2, %v1933_v58 }
 0x2ca   :  { %v9855_v8 = vpop.f32.mrf.mxu0 }
 0x2cb   :  { %11929 = vtanh.f32 %v2197_v4  ;;  %v2187_v24 = vadd.f32 %v2186_v39, %v2076_v31 }
 0x2cc   :  { %v11924_v53 = vpop.eup %11923 }
 0x2cd   :  { %v2205_v6 = vmul.f32 %v11924_v53, %v11924_v53  ;;  %v2198_v29 = vadd.f32 %v2193_v11, %v2187_v24 }
 0x2cf   :  { %v2210_v52 = vsub.f32 1.0, %v2205_v6  ;;  %11931 = vtanh.f32 %v2198_v29 }
 0x2d0   :  { %v11926_v57 = vpop.eup %11925 }
 0x2d1   :  { %v2215_v44 = vmul.f32 %v2210_v52, %v2169_v22  ;;  %v2206_v23 = vmul.f32 %v11926_v57, %v11926_v57 }
 0x2d3   :  { %v13353_v60 = vsel %vm1353_vm5, %v2215_v44, %v11926_v57  ;;  %v2211_v3 = vsub.f32 1.0, %v2206_v23 }
 0x2d4   :  { %16898 = vst [vmem:[#allocation7_spill] sm:$0xff] %v13353_v60  ;;  %v11928_v35 = vpop.eup %11927  ;;  %v13368_v4 = vand.u32 4294901760, %v13353_v60 }
 0x2d5   :  { %v2216_v15 = vmul.f32 %v2211_v3, %v2175_v21  ;;  %v2207_v17 = vmul.f32 %v11928_v35, %v11928_v35 }
 0x2d7   :  { %v13357_v62 = vsel %vm1354_vm15, %v2216_v15, %v11928_v35  ;;  %v2212_v39 = vsub.f32 1.0, %v2207_v17 }
 0x2d8   :  { %16899 = vst [vmem:[#allocation11_spill] sm:$0xff] %v13357_v62  ;;  %v11930_v13 = vpop.eup %11929  ;;  %v13397_v6 = vand.u32 4294901760, %v13357_v62 }
 0x2d9   :  { %v2217_v11 = vmul.f32 %v2212_v39, %v2181_v55  ;;  %v2208_v19 = vmul.f32 %v11930_v13, %v11930_v13 }
 0x2da   :  { %v13412_v44 = vsub.f32 %v13357_v62, %v13397_v6 }
 0x2db   :  { %v13361_v22 = vsel %vm1353_vm5, %v2217_v11, %v11930_v13  ;;  %v2213_v63 = vsub.f32 1.0, %v2208_v19 }
 0x2dc   :  { %16900 = vst [vmem:[#allocation8_spill] sm:$0xff] %v13361_v22  ;;  %v11932_v56 = vpop.eup %11931  ;;  %v13420_v3 = vand.u32 4294901760, %v13361_v22  ;;  %v2344_v35 = vand.u32 4294901760, %v13412_v44 }
 0x2dd   :  { %v2204_v30 = vmul.f32 %v11932_v56, %v11932_v56  ;;  %v2218_v40 = vmul.f32 %v2213_v63, %v2187_v24  ;;  %v13384_v24 = vsub.f32 %v13353_v60, %v13368_v4 }
 0x2de   :  { %v13434_v17 = vsub.f32 %v13361_v22, %v13420_v3  ;;  %v2345_v13 = vsub.f32 %v13412_v44, %v2344_v35 }
 0x2df   :  { %v2209_v58 = vsub.f32 1.0, %v2204_v30  ;;  %v13365_v21 = vsel %vm1354_vm15, %v2218_v40, %v11932_v56  ;;  %v2334_v52 = vand.u32 4294901760, %v13384_v24 }
 0x2e0   :  { %16901 = vst [vmem:[#allocation9_spill] sm:$0xff] %v13365_v21  ;;  %v13440_v39 = vand.u32 4294901760, %v13365_v21  ;;  %v2354_v11 = vand.u32 4294901760, %v13434_v17  ;;  %v2346_v63 = vand.u32 4294901760, %v2345_v13 }
 0x2e1   :  { %v2214_v2 = vmul.f32 %v2209_v58, %v2163_v51  ;;  %v13390_v51 = vld [vmem:[%s16638_s3] sm:$0xff]  ;;  %v2335_v23 = vsub.f32 %v13384_v24, %v2334_v52 }
 0x2e2   :  { %v13455_v19 = vsub.f32 %v13365_v21, %v13440_v39  ;;  %v2355_v56 = vsub.f32 %v13434_v17, %v2354_v11 }
 0x2e3   :  { %v13372_v55 = vsel %vm1353_vm5, %v2214_v2, %v11924_v53  ;;  %v2336_v15 = vand.u32 4294901760, %v2335_v23 }
 0x2e4   :  { %16902 = vst [vmem:[#allocation12_spill] sm:$0xff] %v13372_v55  ;;  %v13375_v31 = vand.u32 4294901760, %v13372_v55  ;;  %v2364_v30 = vand.u32 4294901760, %v13455_v19  ;;  %v2356_v40 = vand.u32 4294901760, %v2355_v56  ;;  %v3097_v56 = vld [vmem:[#allocation2 + $0x2c0] sm:$0xff] }
 0x2e6   :  { %v13379_v8 = vsub.f32 %v13372_v55, %v13375_v31  ;;  %9983 = vmatmul.mubr.f32.vlgmr.msra.gmra.mxu1 %v13375_v31  ;;  %v2365_v58 = vsub.f32 %v13455_v19, %v2364_v30 }
 0x2e7   :  { %10045 = vmatpush3.msra.mxu1 %v13152_v16  ;;  %9985 = vmatprep.mubr.msk.f32.mxu1 %vm12002_vm0, %v13390_v51 }
 0x2e8   :  { %10046 = vmatprep.subr.mxu1 %v13390_v51  ;;  %v2324_v53 = vand.u32 4294901760, %v13379_v8  ;;  %v2366_v2 = vand.u32 4294901760, %v2365_v58 }
 0x2e9   :  { %10047 = vmatpush3.msra.mxu1 %v13157_v20 }
 0x2ea   :  { %10048 = vmatprep.subr.mxu1 %v13390_v51  ;;  %9986 = vmatmul.mubr.f32.gmra.mxu1 %v13368_v4  ;;  %v2325_v29 = vsub.f32 %v13379_v8, %v2324_v53 }
 0x2eb   :  { %10049 = vmatpush3.msra.mxu1 %v13165_v32  ;;  %9988 = vmatprep.mubr.msk.f32.mxu1 %vm12002_vm0, %v13390_v51 }
 0x2ec   :  { %10050 = vmatprep.subr.mxu1 %v13390_v51  ;;  %v2326_v57 = vand.u32 4294901760, %v2325_v29 }
 0x2ed   :  { %10051 = vmatpush3.msra.mxu1 %v13176_v49 }
 0x2ee   :  { %10052 = vmatprep.subr.mxu1 %v13390_v51  ;;  %9936 = vmatmul.mubr.f32.vlgmr.msra.gmra.mxu0 %v2326_v57  ;;  %v3099_v57 = vld [vmem:[#allocation2 + $0x2d0] sm:$0xff] }
 0x2ef   :  { %9989 = vmatmul.mubr.f32.gmra.mxu1 %v13397_v6  ;;  %9998 = vmatpush3.msra.mxu0 %v13155_v18 }
 0x2f0   :  { %10053 = vmatpush3.msra.mxu1 %v13188_v14  ;;  %9999 = vmatprep.subr.mxu0 %v13390_v51 }
 0x2f1   :  { %10054 = vmatprep.subr.mxu1 %v13390_v51  ;;  %10000 = vmatpush3.msra.mxu0 %v13163_v33 }
 0x2f2   :  { %10055 = vmatpush3.msra.mxu1 %v13195_v1  ;;  %9938 = vmatprep.mubr.msk.f32.mxu0 %vm12002_vm0, %v13390_v51 }
 0x2f3   :  { %9991 = vmatprep.mubr.msk.f32.mxu1 %vm12002_vm0, %v13390_v51  ;;  %10001 = vmatprep.subr.mxu0 %v13390_v51 }
 0x2f4   :  { %10056 = vmatprep.subr.mxu1 %v13390_v51  ;;  %9939 = vmatmul.mubr.f32.gmra.mxu0 %v2336_v15 }
 0x2f5   :  { %9992 = vmatmul.mubr.f32.gmra.mxu1 %v13420_v3  ;;  %10002 = vmatpush3.msra.mxu0 %v13174_v12 }
 0x2f6   :  { %10057 = vmatpush3.msra.mxu1 %v13208_v5  ;;  %10003 = vmatprep.subr.mxu0 %v13390_v51 }
 0x2f7   :  { %10058 = vmatprep.subr.mxu1 %v13390_v51  ;;  %10004 = vmatpush3.msra.mxu0 %v13185_v26 }
 0x2f8   :  { %10059 = vmatpush3.msra.mxu1 %v13218_v54  ;;  %9941 = vmatprep.mubr.msk.f32.mxu0 %vm12002_vm0, %v13390_v51 }
 0x2f9   :  { %9994 = vmatprep.mubr.msk.f32.mxu1 %vm12002_vm0, %v13390_v51  ;;  %10005 = vmatprep.subr.mxu0 %v13390_v51 }
 0x2fa   :  { %10060 = vmatprep.subr.mxu1 %v13390_v51  ;;  %9942 = vmatmul.mubr.f32.gmra.mxu0 %v2346_v63 }
 0x2fb   :  { %9995 = vmatmul.mubr.f32.gmra.mxu1 %v13440_v39  ;;  %10006 = vmatpush3.msra.mxu0 %v13199_v50 }
 0x2fc   :  { %10061 = vmatpush3.msra.mxu1 %v13233_v42  ;;  %10007 = vmatprep.subr.mxu0 %v13390_v51 }
 0x2fd   :  { %10062 = vmatprep.subr.mxu1 %v13390_v51  ;;  %10008 = vmatpush3.msra.mxu0 %v13206_v41 }
 0x2fe   :  { %10063 = vmatpush3.msra.mxu1 %v13246_v34  ;;  %9944 = vmatprep.mubr.msk.f32.mxu0 %vm12002_vm0, %v13390_v51 }
 0x2ff   :  { %10009 = vmatprep.subr.mxu0 %v13390_v51  ;;  %10064 = vmatprep.subr.mxu1 %v13390_v51 }
 0x300   :  { %9945 = vmatmul.mubr.f32.gmra.mxu0 %v2356_v40  ;;  %10065 = vmatpush3.msra.mxu1 %v13254_v10 }
 0x301   :  { %10010 = vmatpush3.msra.mxu0 %v13216_v45  ;;  %10066 = vmatprep.subr.mxu1 %v13390_v51 }
 0x302   :  { %10011 = vmatprep.subr.mxu0 %v13390_v51  ;;  %10067 = vmatpush3.msra.mxu1 %v13268_v46 }
 0x303   :  { %10012 = vmatpush3.msra.mxu0 %v13231_v59  ;;  %9947 = vmatprep.mubr.msk.f32.mxu0 %vm12002_vm0, %v13390_v51 }
 0x304   :  { %10013 = vmatprep.subr.mxu0 %v13390_v51  ;;  %10068 = vmatprep.subr.mxu1 %v13390_v51 }
 0x305   :  { %9948 = vmatmul.mubr.f32.gmra.mxu0 %v2366_v2  ;;  %10069 = vmatpush3.msra.mxu1 %v13278_v43  ;;  %v13731_v2 = vand.u32 4294901760, %v3097_v56 }
 0x306   :  { %10014 = vmatpush3.msra.mxu0 %v13243_v27  ;;  %10070 = vmatprep.subr.mxu1 %v13390_v51 }
 0x307   :  { %10015 = vmatprep.subr.mxu0 %v13390_v51  ;;  %10071 = vmatpush3.msra.mxu1 %v13293_v36 }
 0x308   :  { %10016 = vmatpush3.msra.mxu0 %v13258_v38  ;;  %10072 = vmatprep.subr.mxu1 %v13390_v51 }
 0x309   :  { %10017 = vmatprep.subr.mxu0 %v13390_v51  ;;  %10073 = vmatpush3.msra.mxu1 %v13296_v48 }
 0x30a   :  { %10018 = vmatpush3.msra.mxu0 %v13266_v25  ;;  %10074 = vmatprep.subr.mxu1 %v13390_v51 }
 0x30b   :  { %10019 = vmatprep.subr.mxu0 %v13390_v51  ;;  %10075 = vmatpush3.msra.mxu1 %v13298_v47 }
 0x30c   :  { %10020 = vmatpush3.msra.mxu0 %v13276_v7  ;;  %10076 = vmatprep.mubr.msk.f32.mxu1 %vm12002_vm0, %v13390_v51 }
 0x30d   :  { %10021 = vmatprep.subr.mxu0 %v13390_v51  ;;  %10077 = vmatmul.mubr.f32.vlgmr.msra.gmra.mxu1 %v2324_v53  ;;  %v16903_v53 = vld [vmem:[#allocation6_spill] sm:$0xff] }
 0x30e   :  { %10138 = vmatprep.subr.mxu1 %v13390_v51  ;;  %10022 = vmatpush3.msra.mxu0 %v13291_v0 }
 0x30f   :  { %10139 = vmatpush3.msra.mxu1 %v13152_v16  ;;  %10023 = vmatprep.subr.mxu0 %v13390_v51  ;;  %v16904_v16 = vld [vmem:[#allocation10_spill] sm:$0xff] }
 0x310   :  { %10140 = vmatprep.subr.mxu1 %v13390_v51  ;;  %10024 = vmatpush3.msra.mxu0 %v13307_v28 }
 0x311   :  { %10079 = vmatprep.mubr.msk.f32.mxu1 %vm12002_vm0, %v13390_v51  ;;  %10141 = vmatpush3.msra.mxu1 %v13157_v20  ;;  %v16905_v20 = vand.u32 4294901760, %v13155_v18  ;;  %v16907_v18 = vand.u32 4294901760, %v13174_v12  ;;  %v16909_v12 = vand.u32 4294901760, %v13199_v50  ;;  %v16914_v50 = vand.u32 4294901760, %v13258_v38 }
 0x312   :  { %10025 = vmatprep.subr.mxu0 %v13390_v51  ;;  %10080 = vmatmul.mubr.f32.gmra.mxu1 %v2334_v52 }
 0x313   :  { %10142 = vmatprep.subr.mxu1 %v13390_v51  ;;  %10026 = vmatpush3.msra.mxu0 %v16903_v53 }
 0x314   :  { %10143 = vmatpush3.msra.mxu1 %v13165_v32  ;;  %10027 = vmatprep.subr.mxu0 %v13390_v51  ;;  %v16906_v32 = vand.u32 4294901760, %v13163_v33  ;;  %v16908_v33 = vand.u32 4294901760, %v13185_v26  ;;  %v16911_v26 = vand.u32 4294901760, %v13216_v45  ;;  %v16917_v45 = vand.u32 4294901760, %v13291_v0 }
 0x315   :  { %10144 = vmatprep.subr.mxu1 %v13390_v51  ;;  %10028 = vmatpush3.msra.mxu0 %v16904_v16 }
 0x316   :  { %10029 = vmatprep.mubr.msk.f32.mxu0 %vm12002_vm0, %v13390_v51  ;;  %10082 = vmatprep.mubr.msk.f32.mxu1 %vm12002_vm0, %v13390_v51 }
 0x317   :  { %10145 = vmatpush3.msra.mxu1 %v13176_v49  ;;  %10030 = vmatmul.mubr.f32.vlgmr.msra.gmra.mxu0 %v13379_v8  ;;  %v16910_v49 = vand.u32 4294901760, %v13206_v41  ;;  %v16915_v41 = vand.u32 4294901760, %v13266_v25 }
 0x318   :  { %10083 = vmatmul.mubr.f32.gmra.mxu1 %v2344_v35  ;;  %10091 = vmatprep.subr.mxu0 %v13390_v51  ;;  %v13708_v35 = vand.u32 4294901760, %v3099_v57 }
 0x319   :  { %10146 = vmatprep.subr.mxu1 %v13390_v51  ;;  %10092 = vmatpush3.msra.mxu0 %v16905_v20 }
 0x31a   :  { %10147 = vmatpush3.msra.mxu1 %v13188_v14  ;;  %10093 = vmatprep.subr.mxu0 %v13390_v51  ;;  %v16912_v14 = vand.u32 4294901760, %v13231_v59  ;;  %v16919_v59 = vand.u32 4294901760, %v16903_v53 }
 0x31b   :  { %10148 = vmatprep.subr.mxu1 %v13390_v51  ;;  %10032 = vmatprep.mubr.msk.f32.mxu0 %vm12002_vm0, %v13390_v51 }
 0x31c   :  { %10085 = vmatprep.mubr.msk.f32.mxu1 %vm12002_vm0, %v13390_v51  ;;  %10094 = vmatpush3.msra.mxu0 %v16906_v32 }
 0x31d   :  { %10149 = vmatpush3.msra.mxu1 %v13195_v1  ;;  %10033 = vmatmul.mubr.f32.gmra.mxu0 %v13384_v24  ;;  %v16913_v1 = vand.u32 4294901760, %v13243_v27  ;;  %v3104_v27 = vld [vmem:[#allocation2 + $0x2f8] sm:$0xff] }
 0x31e   :  { %10086 = vmatmul.mubr.f32.gmra.mxu1 %v2354_v11  ;;  %10095 = vmatprep.subr.mxu0 %v13390_v51  ;;  %v13719_v11 = vsub.f32 %v3099_v57, %v13708_v35 }
 0x31f   :  { %10150 = vmatprep.subr.mxu1 %v13390_v51  ;;  %10096 = vmatpush3.msra.mxu0 %v16907_v18  ;;  %v13744_v18 = vsub.f32 %v3097_v56, %v13731_v2 }
 0x320   :  { %10151 = vmatpush3.msra.mxu1 %v13208_v5  ;;  %10097 = vmatprep.subr.mxu0 %v13390_v51  ;;  %v16916_v5 = vand.u32 4294901760, %v13276_v7  ;;  %v16719_v40 = vand.u32 4294901760, %v13719_v11 }
 0x321   :  { %10152 = vmatprep.subr.mxu1 %v13390_v51  ;;  %10035 = vmatprep.mubr.msk.f32.mxu0 %vm12002_vm0, %v13390_v51 }
 0x322   :  { %10088 = vmatprep.mubr.msk.f32.mxu1 %vm12002_vm0, %v13390_v51  ;;  %10098 = vmatpush3.msra.mxu0 %v16908_v33  ;;  %v3275_v20 = vsub.f32 %v13719_v11, %v16719_v40 }
 0x323   :  { %10153 = vmatpush3.msra.mxu1 %v13218_v54  ;;  %10036 = vmatmul.mubr.f32.gmra.mxu0 %v13412_v44  ;;  %v16918_v54 = vand.u32 4294901760, %v13307_v28 }
 0x324   :  { %10089 = vmatmul.mubr.f32.gmra.mxu1 %v2364_v30  ;;  %10099 = vmatprep.subr.mxu0 %v13390_v51 }
 0x325   :  { %10154 = vmatprep.subr.mxu1 %v13390_v51  ;;  %10100 = vmatpush3.msra.mxu0 %v16909_v12 }
 0x326   :  { %10155 = vmatpush3.msra.mxu1 %v13233_v42  ;;  %10101 = vmatprep.subr.mxu0 %v13390_v51  ;;  %v16920_v42 = vand.u32 4294901760, %v16904_v16  ;;  %v3096_v16 = vld [vmem:[#allocation2 + $0x2b8] sm:$0xff] }
 0x327   :  { %10156 = vmatprep.subr.mxu1 %v13390_v51  ;;  %10038 = vmatprep.mubr.msk.f32.mxu0 %vm12002_vm0, %v13390_v51  ;;  %v13746_v33 = vand.u32 4294901760, %v3096_v16 }
 0x328   :  { %10102 = vmatpush3.msra.mxu0 %v16910_v49  ;;  %10157 = vmatpush3.msra.mxu1 %v13246_v34  ;;  %v13665_v34 = vand.u32 4294901760, %v3104_v27  ;;  %v3095_v49 = vld [vmem:[#allocation2 + $0x2b0] sm:$0xff] }
 0x329   :  { %10039 = vmatmul.mubr.f32.gmra.mxu0 %v13434_v17  ;;  %10103 = vmatprep.subr.mxu0 %v13390_v51  ;;  %v3098_v17 = vld [vmem:[#allocation2 + $0x2c8] sm:$0xff] }
 0x32a   :  { %10158 = vmatprep.subr.mxu1 %v13390_v51  ;;  %10104 = vmatpush3.msra.mxu0 %v16911_v26  ;;  %v13668_v38 = vsub.f32 %v3104_v27, %v13665_v34  ;;  %v3276_v26 = vand.u32 4294901760, %v3275_v20 }
 0x32b   :  { %10159 = vmatpush3.msra.mxu1 %v13254_v10  ;;  %10105 = vmatprep.subr.mxu0 %v13390_v51  ;;  %v3103_v10 = vld [vmem:[#allocation2 + $0x2f0] sm:$0xff] }
 0x32c   :  { %10160 = vmatprep.subr.mxu1 %v13390_v51  ;;  %10041 = vmatprep.mubr.msk.f32.mxu0 %vm12002_vm0, %v13390_v51  ;;  %v13670_v25 = vand.u32 4294901760, %v3103_v10  ;;  %v16724_v7 = vand.u32 4294901760, %v13668_v38 }
 0x32d   :  { %10106 = vmatpush3.msra.mxu0 %v16912_v14  ;;  %10161 = vmatpush3.msra.mxu1 %v13268_v46  ;;  %v3102_v46 = vld [vmem:[#allocation2 + $0x2e8] sm:$0xff] }
 0x32e   :  { %10042 = vmatmul.mubr.f32.gmra.mxu0 %v13455_v19  ;;  %10107 = vmatprep.subr.mxu0 %v13390_v51  ;;  %v13678_v0 = vand.u32 4294901760, %v3102_v46  ;;  %v13721_v19 = vand.u32 4294901760, %v3098_v17 }
 0x32f   :  { %10162 = vmatprep.subr.mxu1 %v13390_v51  ;;  %10108 = vmatpush3.msra.mxu0 %v16913_v1  ;;  %v16717_v1 = vand.u32 4294901760, %v13744_v18 }
 0x330   :  { %10163 = vmatpush3.msra.mxu1 %v13278_v43  ;;  %10109 = vmatprep.subr.mxu0 %v13390_v51  ;;  %v13676_v43 = vsub.f32 %v3103_v10, %v13670_v25  ;;  %v13687_v28 = vsub.f32 %v3102_v46, %v13678_v0  ;;  %v13729_v58 = vsub.f32 %v3098_v17, %v13721_v19  ;;  %v3093_v10 = vld [vmem:[#allocation2 + $0x2a0] sm:$0xff] }
 0x331   :  { %10164 = vmatprep.subr.mxu1 %v13390_v51  ;;  %10110 = vmatpush3.msra.mxu0 %v16914_v50  ;;  %v13756_v50 = vsub.f32 %v3096_v16, %v13746_v33 }
 0x332   :  { %10165 = vmatpush3.msra.mxu1 %v13293_v36  ;;  %10111 = vmatprep.subr.mxu0 %v13390_v51  ;;  %v3101_v36 = vld [vmem:[#allocation2 + $0x2e0] sm:$0xff]  ;;  %v16718_v32 = vand.u32 4294901760, %v13729_v58 }
 0x333   :  { %10166 = vmatprep.subr.mxu1 %v13390_v51  ;;  %10112 = vmatpush3.msra.mxu0 %v16915_v41  ;;  %v13759_v41 = vand.u32 4294901760, %v3095_v49 }
 0x334   :  { %10167 = vmatpush3.msra.mxu1 %v13296_v48  ;;  %10113 = vmatprep.subr.mxu0 %v13390_v51  ;;  %v3240_v48 = vsub.f32 %v13668_v38, %v16724_v7  ;;  %v3282_v14 = vsub.f32 %v13729_v58, %v16718_v32 }
 0x335   :  { %10168 = vmatprep.subr.mxu1 %v13390_v51  ;;  %10114 = vmatpush3.msra.mxu0 %v16916_v5  ;;  %v3094_v5 = vld [vmem:[#allocation2 + $0x2a8] sm:$0xff]  ;;  %v13771_v27 = vsub.f32 %v3095_v49, %v13759_v41 }
 0x336   :  { %10169 = vmatpush3.msra.mxu1 %v13298_v47  ;;  %10170 = vmatprep.mubr.msk.f32.mxu1 %vm12002_vm0, %v13390_v51  ;;  %v16723_v47 = vand.u32 4294901760, %v13676_v43  ;;  %v3241_v8 = vand.u32 4294901760, %v3240_v48 }
 0x337   :  { %10115 = vmatprep.subr.mxu0 %v13390_v51  ;;  %10171 = vmatmul.mubr.f32.vlgmr.msra.gmra.mxu1 %v13375_v31 }
 0x338   :  { %10116 = vmatpush3.msra.mxu0 %v16917_v45  ;;  %10173 = vmatprep.mubr.msk.f32.mxu1 %vm12002_vm0, %v13390_v51  ;;  %v3247_v24 = vsub.f32 %v13676_v43, %v16723_v47  ;;  %v3283_v45 = vand.u32 4294901760, %v3282_v14 }
 0x339   :  { %10117 = vmatprep.subr.mxu0 %v13390_v51  ;;  %10123 = vmatprep.mubr.msk.f32.mxu0 %vm12002_vm0, %v13390_v51 }
 0x33a   :  { %10118 = vmatpush3.msra.mxu0 %v16918_v54  ;;  %10232 = vmatprep.subr.mxu1 %v13390_v51  ;;  %v3248_v44 = vand.u32 4294901760, %v3247_v24  ;;  %v3289_v54 = vsub.f32 %v13744_v18, %v16717_v1  ;;  %v3092_v24 = vld [vmem:[#allocation2 + $0x298] sm:$0xff] }
 0x33b   :  { %10119 = vmatprep.subr.mxu0 %v13390_v51  ;;  %10174 = vmatmul.mubr.f32.gmra.mxu1 %v13368_v4  ;;  %v13791_v17 = vand.u32 4294901760, %v3092_v24 }
 0x33c   :  { %10120 = vmatpush3.msra.mxu0 %v16919_v59  ;;  %10176 = vmatprep.mubr.msk.f32.mxu1 %vm12002_vm0, %v13390_v51  ;;  %v16715_v59 = vand.u32 4294901760, %v13756_v50  ;;  %v3290_v46 = vand.u32 4294901760, %v3289_v54  ;;  %v3089_v54 = vld [vmem:[#allocation2 + $0x280] sm:$0xff] }
 0x33d   :  { %10121 = vmatprep.subr.mxu0 %v13390_v51  ;;  %10233 = vmatpush3.msra.mxu1 %v3241_v8  ;;  %v16714_v8 = vand.u32 4294901760, %v13771_v27 }
 0x33e   :  { %10122 = vmatpush3.msra.mxu0 %v16920_v42  ;;  %10234 = vmatprep.subr.mxu1 %v13390_v51  ;;  %v13767_v42 = vand.u32 4294901760, %v3094_v5 }
 0x33f   :  { %10124 = vmatmul.mubr.f32.vlgmr.msra.gmra.mxu0 %v13375_v31  ;;  %10177 = vmatmul.mubr.f32.gmra.mxu1 %v13397_v6  ;;  %v3100_v31 = vld [vmem:[#allocation2 + $0x2d8] sm:$0xff] }
 0x340   :  { %10126 = vmatprep.mubr.msk.f32.mxu0 %vm12002_vm0, %v13390_v51  ;;  %10179 = vmatprep.mubr.msk.f32.mxu1 %vm12002_vm0, %v13390_v51  ;;  %v13701_v52 = vand.u32 4294901760, %v3100_v31  ;;  %v13779_v48 = vsub.f32 %v3094_v5, %v13767_v42 }
 0x341   :  { %10185 = vmatprep.subr.mxu0 %v13390_v51  ;;  %10235 = vmatpush3.msra.mxu1 %v3248_v44 }
 0x342   :  { %10186 = vmatpush3.msra.mxu0 %v13665_v34  ;;  %v13712_v15 = vsub.f32 %v3100_v31, %v13701_v52  ;;  %10236 = vmatprep.subr.mxu1 %v13390_v51  ;;  %v13781_v31 = vand.u32 4294901760, %v3093_v10  ;;  %v16713_v44 = vand.u32 4294901760, %v13779_v48 }
 0x343   :  { %10127 = vmatmul.mubr.f32.gmra.mxu0 %v13368_v4  ;;  %10180 = vmatmul.mubr.f32.gmra.mxu1 %v13420_v3  ;;  %v13689_v4 = vand.u32 4294901760, %v3101_v36 }
 0x344   :  { %10129 = vmatprep.mubr.msk.f32.mxu0 %vm12002_vm0, %v13390_v51  ;;  %10182 = vmatprep.mubr.msk.f32.mxu1 %vm12002_vm0, %v13390_v51  ;;  %v16720_v63 = vand.u32 4294901760, %v13712_v15  ;;  %v3310_v56 = vsub.f32 %v13779_v48, %v16713_v44 }
 0x345   :  { %10187 = vmatprep.subr.mxu0 %v13390_v51  ;;  %v13698_v29 = vsub.f32 %v3101_v36, %v13689_v4  ;;  %v3296_v36 = vsub.f32 %v13756_v50, %v16715_v59 }
 0x346   :  { %10188 = vmatpush3.msra.mxu0 %v13670_v25  ;;  %v3268_v53 = vsub.f32 %v13712_v15, %v16720_v63  ;;  %v3311_v49 = vand.u32 4294901760, %v3310_v56 }
 0x347   :  { %10130 = vmatmul.mubr.f32.gmra.mxu0 %v13397_v6  ;;  %10183 = vmatmul.mubr.f32.gmra.mxu1 %v13440_v39  ;;  %v16722_v6 = vand.u32 4294901760, %v13687_v28  ;;  %v3297_v57 = vand.u32 4294901760, %v3296_v36 }
 0x348   :  { %10132 = vmatprep.mubr.msk.f32.mxu0 %vm12002_vm0, %v13390_v51  ;;  %10264 = vmatprep.mubr.msk.f32.mxu1 %vm12002_vm0, %v13390_v51  ;;  %v3269_v12 = vand.u32 4294901760, %v3268_v53  ;;  %v13804_v53 = vsub.f32 %v3092_v24, %v13791_v17  ;;  %v13827_v24 = vand.u32 4294901760, %v3089_v54 }
 0x349   :  { %10189 = vmatprep.subr.mxu0 %v13390_v51  ;;  %v3254_v23 = vsub.f32 %v13687_v28, %v16722_v6 }
 0x34a   :  { %10190 = vmatpush3.msra.mxu0 %v13678_v0  ;;  %v16710_v14 = vand.u32 4294901760, %v13804_v53  ;;  %v13839_v56 = vsub.f32 %v3089_v54, %v13827_v24 }
 0x34b   :  { %10133 = vmatmul.mubr.f32.gmra.mxu0 %v13420_v3  ;;  %10191 = vmatprep.subr.mxu0 %v13390_v51  ;;  %v16721_v3 = vand.u32 4294901760, %v13698_v29 }
 0x34c   :  { %10135 = vmatprep.mubr.msk.f32.mxu0 %vm12002_vm0, %v13390_v51  ;;  %10192 = vmatpush3.msra.mxu0 %v13689_v4  ;;  %16922 = vst [vmem:[#allocation6_spill] sm:$0xff] %v13839_v56 }
 0x34d   :  { %10193 = vmatprep.subr.mxu0 %v13390_v51  ;;  %v3261_v13 = vsub.f32 %v13698_v29, %v16721_v3 }
 0x34e   :  { %10194 = vmatpush3.msra.mxu0 %v13701_v52 }
 0x34f   :  { %10136 = vmatmul.mubr.f32.gmra.mxu0 %v13440_v39  ;;  %v3255_v39 = vand.u32 4294901760, %v3254_v23  ;;  %10195 = vmatprep.subr.mxu0 %v13390_v51  ;;  %v3262_v30 = vand.u32 4294901760, %v3261_v13  ;;  %v13789_v23 = vsub.f32 %v3093_v10, %v13781_v31  ;;  %v3091_v13 = vld [vmem:[#allocation2 + $0x290] sm:$0xff] }
 0x350   :  { %10217 = vmatprep.mubr.msk.f32.mxu0 %vm12002_vm0, %v13390_v51  ;;  %10196 = vmatpush3.msra.mxu0 %v13708_v35  ;;  %v13806_v16 = vand.u32 4294901760, %v3091_v13 }
 0x351   :  { %10237 = vmatpush3.msra.mxu1 %v3255_v39  ;;  %10197 = vmatprep.subr.mxu0 %v13390_v51  ;;  %v3303_v39 = vsub.f32 %v13771_v27, %v16714_v8 }
 0x352   :  { %10238 = vmatprep.subr.mxu1 %v13390_v51  ;;  %10198 = vmatpush3.msra.mxu0 %v13721_v19  ;;  %v13816_v5 = vsub.f32 %v3091_v13, %v13806_v16 }
 0x353   :  { %10239 = vmatpush3.msra.mxu1 %v3262_v30  ;;  %10199 = vmatprep.subr.mxu0 %v13390_v51  ;;  %v16712_v30 = vand.u32 4294901760, %v13789_v23  ;;  %v3304_v20 = vand.u32 4294901760, %v3303_v39 }
 0x354   :  { %10240 = vmatprep.subr.mxu1 %v13390_v51  ;;  %10200 = vmatpush3.msra.mxu0 %v13731_v2  ;;  %v16709_v36 = vand.u32 4294901760, %v13816_v5 }
 0x355   :  { %10201 = vmatprep.subr.mxu0 %v13390_v51  ;;  %10241 = vmatpush3.msra.mxu1 %v3269_v12  ;;  %v3090_v12 = vld [vmem:[#allocation2 + $0x288] sm:$0xff] }
 0x356   :  { %10202 = vmatpush3.msra.mxu0 %v13746_v33  ;;  %10242 = vmatprep.subr.mxu1 %v13390_v51  ;;  %v3331_v13 = vsub.f32 %v13816_v5, %v16709_v36 }
 0x357   :  { %10203 = vmatprep.subr.mxu0 %v13390_v51  ;;  %10243 = vmatpush3.msra.mxu1 %v3276_v26  ;;  %v3317_v26 = vsub.f32 %v13789_v23, %v16712_v30 }
 0x358   :  { %10204 = vmatpush3.msra.mxu0 %v13759_v41  ;;  %10244 = vmatprep.subr.mxu1 %v13390_v51 }
 0x359   :  { %10205 = vmatprep.subr.mxu0 %v13390_v51  ;;  %10245 = vmatpush3.msra.mxu1 %v3283_v45  ;;  %v13819_v45 = vand.u32 4294901760, %v3090_v12  ;;  %v3318_v10 = vand.u32 4294901760, %v3317_v26 }
 0x35a   :  { %10206 = vmatpush3.msra.mxu0 %v13767_v42  ;;  %10246 = vmatprep.subr.mxu1 %v13390_v51 }
 0x35b   :  { %10207 = vmatprep.subr.mxu0 %v13390_v51  ;;  %10247 = vmatpush3.msra.mxu1 %v3290_v46  ;;  %v3324_v46 = vsub.f32 %v13804_v53, %v16710_v14 }
 0x35c   :  { %10208 = vmatpush3.msra.mxu0 %v13781_v31  ;;  %10248 = vmatprep.subr.mxu1 %v13390_v51 }
 0x35d   :  { %10209 = vmatprep.subr.mxu0 %v13390_v51  ;;  %10249 = vmatpush3.msra.mxu1 %v3297_v57  ;;  %v13831_v57 = vsub.f32 %v3090_v12, %v13819_v45  ;;  %v3325_v39 = vand.u32 4294901760, %v3324_v46  ;;  %v3332_v12 = vand.u32 4294901760, %v3331_v13 }
 0x35e   :  { %10210 = vmatpush3.msra.mxu0 %v13791_v17  ;;  %10250 = vmatprep.subr.mxu1 %v13390_v51 }
 0x35f   :  { %10211 = vmatprep.subr.mxu0 %v13390_v51  ;;  %10251 = vmatpush3.msra.mxu1 %v3304_v20  ;;  %16921 = vst [vmem:[#allocation13_spill] sm:$0xff] %v13831_v57  ;;  %v16711_v20 = vand.u32 4294901760, %v13831_v57 }
 0x360   :  { %10212 = vmatpush3.msra.mxu0 %v13806_v16  ;;  %10252 = vmatprep.subr.mxu1 %v13390_v51 }
 0x361   :  { %10213 = vmatprep.subr.mxu0 %v13390_v51  ;;  %10253 = vmatpush3.msra.mxu1 %v3311_v49  ;;  %v16716_v49 = vand.u32 4294901760, %v13839_v56  ;;  %v3338_v54 = vsub.f32 %v13831_v57, %v16711_v20 }
 0x362   :  { %10214 = vmatpush3.msra.mxu0 %v13819_v45  ;;  %10254 = vmatprep.subr.mxu1 %v13390_v51 }
 0x363   :  { %10215 = vmatprep.subr.mxu0 %v13390_v51  ;;  %10255 = vmatpush3.msra.mxu1 %v3318_v10  ;;  %v3345_v10 = vsub.f32 %v13839_v56, %v16716_v49  ;;  %v3339_v36 = vand.u32 4294901760, %v3338_v54 }
 0x364   :  { %10216 = vmatpush3.msra.mxu0 %v13827_v24  ;;  %10256 = vmatprep.subr.mxu1 %v13390_v51 }
 0x365   :  { %10279 = vmatprep.subr.mxu0 %v13390_v51  ;;  %10257 = vmatpush3.msra.mxu1 %v3325_v39  ;;  %v3346_v13 = vand.u32 4294901760, %v3345_v10 }
 0x366   :  { %10258 = vmatprep.subr.mxu1 %v13390_v51 }
 0x367   :  { %10259 = vmatpush3.msra.mxu1 %v3332_v12 }
 0x368   :  { %10260 = vmatprep.subr.mxu1 %v13390_v51 }
 0x369   :  { %10261 = vmatpush3.msra.mxu1 %v3339_v36 }
 0x36a   :  { %10262 = vmatprep.subr.mxu1 %v13390_v51 }
 0x36b   :  { %10263 = vmatpush3.msra.mxu1 %v3346_v13 }
 0x36c   :  { %10326 = vmatprep.subr.mxu1 %v13390_v51 }
 0x3a6   :  { %v2519_v26 = vpop.f32.mrf.mxu1 }
 0x3a8   :  { %v9984_v46 = vpop.f32.mrf.mxu1 }
 0x3aa   :  { %v2525_v14 = vpop.f32.mrf.mxu1 }
 0x3ac   :  { %v9987_v39 = vpop.f32.mrf.mxu1 }
 0x3ae   :  { %v2328_v20 = vpop.f32.mrf.mxu0 }
 0x3af   :  { %v2520_v30 = vadd.f32 %v2519_v26, %v2328_v20  ;;  %v2531_v44 = vpop.f32.mrf.mxu1 }
 0x3b0   :  { %v9937_v8 = vpop.f32.mrf.mxu0 }
 0x3b1   :  { %v9990_v59 = vpop.f32.mrf.mxu1 }
 0x3b4   :  { %v2338_v49 = vpop.f32.mrf.mxu0 }
 0x3b5   :  { %v2526_v46 = vadd.f32 %v2525_v14, %v2338_v49  ;;  %v2537_v12 = vpop.f32.mrf.mxu1 }
 0x3b6   :  { %v9940_v54 = vpop.f32.mrf.mxu0 }
 0x3b7   :  { %v9993_v1 = vpop.f32.mrf.mxu1 }
 0x3ba   :  { %v2348_v32 = vpop.f32.mrf.mxu0 }
 0x3bb   :  { %v2532_v10 = vadd.f32 %v2531_v44, %v2348_v32  ;;  %v2543_v40 = vpop.f32.mrf.mxu1 }
 0x3bc   :  { %v9943_v36 = vpop.f32.mrf.mxu0 }
 0x3bd   :  { %v9996_v63 = vpop.f32.mrf.mxu1 }
 0x3c0   :  { %v2358_v3 = vpop.f32.mrf.mxu0 }
 0x3c1   :  { %v2538_v39 = vadd.f32 %v2537_v12, %v2358_v3 }
 0x3c2   :  { %v9946_v13 = vpop.f32.mrf.mxu0 }
 0x3c5   :  { %v2368_v6 = vpop.f32.mrf.mxu0 }
 0x3c6   :  { %v2544_v47 = vadd.f32 %v2543_v40, %v2368_v6 }
 0x3c7   :  { %v9949_v7 = vpop.f32.mrf.mxu0 }
 0x3cd   :  { %v2764_v20 = vpop.f32.mrf.mxu1 }
 0x3cf   :  { %v10078_v26 = vpop.f32.mrf.mxu1 }
 0x3d2   :  { %v2772_v8 = vpop.f32.mrf.mxu1 }
 0x3d4   :  { %v10081_v59 = vpop.f32.mrf.mxu1 }
 0x3d7   :  { %v2647_v21 = vpop.f32.mrf.mxu0 }
 0x3d8   :  { %v2648_v14 = vadd.f32 %v2647_v21, %v2520_v30  ;;  %v2780_v49 = vpop.f32.mrf.mxu1 }
 0x3d9   :  { %v10031_v54 = vpop.f32.mrf.mxu0 }
 0x3da   :  { %v10084_v1 = vpop.f32.mrf.mxu1  ;;  %v2765_v22 = vadd.f32 %v2764_v20, %v2648_v14 }
 0x3dd   :  { %v2654_v32 = vpop.f32.mrf.mxu0 }
 0x3de   :  { %v2655_v44 = vadd.f32 %v2654_v32, %v2526_v46  ;;  %v2788_v36 = vpop.f32.mrf.mxu1  ;;  %v16923_v46 = vld [vmem:[#allocation5_spill] sm:$0xff] }
 0x3df   :  { %v10034_v63 = vpop.f32.mrf.mxu0  ;;  %v3056_v32 = vsub.s32 2, %v16923_v46 }
 0x3e0   :  { %v10087_v62 = vpop.f32.mrf.mxu1  ;;  %v2773_v3 = vadd.f32 %v2772_v8, %v2655_v44 }
 0x3e3   :  { %v2661_v12 = vpop.f32.mrf.mxu0 }
 0x3e4   :  { %v2662_v13 = vadd.f32 %v2661_v12, %v2532_v10  ;;  %v2796_v6 = vpop.f32.mrf.mxu1  ;;  %v3057_v10 = vrot.slane %v13348_v61, %v3056_v32 }
 0x3e5   :  { %v10037_v7 = vpop.f32.mrf.mxu0 }
 0x3e6   :  { %v10090_v40 = vpop.f32.mrf.mxu1  ;;  %v2781_v26 = vadd.f32 %v2780_v49, %v2662_v13 }
 0x3e9   :  { %v2668_v60 = vpop.f32.mrf.mxu0 }
 0x3ea   :  { %v2669_v59 = vadd.f32 %v2668_v60, %v2538_v39 }
 0x3eb   :  { %v10040_v55 = vpop.f32.mrf.mxu0 }
 0x3ec   :  { %v2789_v21 = vadd.f32 %v2788_v36, %v2669_v59 }
 0x3ee   :  { %v2675_v30 = vpop.f32.mrf.mxu0 }
 0x3f0   :  { %v10043_v54 = vpop.f32.mrf.mxu0 }
 0x3f7   :  { %v3026_v1 = vpop.f32.mrf.mxu1 }
 0x3f9   :  { %v10172_v20 = vpop.f32.mrf.mxu1 }
 0x3fb   :  { %v3032_v14 = vpop.f32.mrf.mxu1 }
 0x3fd   :  { %v10175_v63 = vpop.f32.mrf.mxu1 }
 0x3ff   :  { %v2915_v62 = vpop.f32.mrf.mxu0  ;;  %v3038_v8 = vpop.f32.mrf.mxu1 }
 0x400   :  { %v2916_v44 = vadd.f32 %v2915_v62, %v2765_v22  ;;  %v2676_v22 = vadd.f32 %v2675_v30, %v2544_v47 }
 0x401   :  { %v10125_v12 = vpop.f32.mrf.mxu0  ;;  %v10178_v7 = vpop.f32.mrf.mxu1 }
 0x402   :  { %v3027_v49 = vadd.f32 %v3026_v1, %v2916_v44 }
 0x403   :  { %v2921_v13 = vpop.f32.mrf.mxu0  ;;  %v3044_v60 = vpop.f32.mrf.mxu1 }
 0x404   :  { %v3058_v55 = vadd.f32 %v3057_v10, %v3027_v49  ;;  %v2922_v39 = vadd.f32 %v2921_v13, %v2773_v3  ;;  %v2797_v3 = vadd.f32 %v2796_v6, %v2676_v22 }
 0x405   :  { %v10128_v36 = vpop.f32.mrf.mxu0  ;;  %v10181_v40 = vpop.f32.mrf.mxu1 }
 0x406   :  { %11933 = vtanh.f32 %v3058_v55  ;;  %v3033_v59 = vadd.f32 %v3032_v14, %v2922_v39 }
 0x407   :  { %v2927_v54 = vpop.f32.mrf.mxu0  ;;  %v3050_v20 = vpop.f32.mrf.mxu1 }
 0x408   :  { %v3059_v46 = vadd.f32 %v3057_v10, %v3033_v59  ;;  %v2928_v63 = vadd.f32 %v2927_v54, %v2781_v26 }
 0x409   :  { %v10131_v56 = vpop.f32.mrf.mxu0  ;;  %v10184_v57 = vpop.f32.mrf.mxu1 }
 0x40a   :  { %11935 = vtanh.f32 %v3059_v46  ;;  %v3039_v61 = vadd.f32 %v3038_v8, %v2928_v63 }
 0x40b   :  { %v2933_v32 = vpop.f32.mrf.mxu0 }
 0x40c   :  { %v3060_v62 = vadd.f32 %v3057_v10, %v3039_v61  ;;  %v2934_v1 = vadd.f32 %v2933_v32, %v2789_v21 }
 0x40d   :  { %v10134_v44 = vpop.f32.mrf.mxu0 }
 0x40e   :  { %11937 = vtanh.f32 %v3060_v62  ;;  %v3045_v12 = vadd.f32 %v3044_v60, %v2934_v1 }
 0x40f   :  { %v2939_v7 = vpop.f32.mrf.mxu0 }
 0x410   :  { %v3061_v13 = vadd.f32 %v3057_v10, %v3045_v12  ;;  %v2940_v55 = vadd.f32 %v2939_v7, %v2797_v3 }
 0x411   :  { %v10137_v14 = vpop.f32.mrf.mxu0 }
 0x412   :  { %11939 = vtanh.f32 %v3061_v13  ;;  %v3051_v39 = vadd.f32 %v3050_v20, %v2940_v55 }
 0x413   :  { %v11934_v36 = vpop.eup %11933 }
 0x414   :  { %v3069_v26 = vmul.f32 %v11934_v36, %v11934_v36  ;;  %v3062_v56 = vadd.f32 %v3057_v10, %v3051_v39 }
 0x416   :  { %v3074_v57 = vsub.f32 1.0, %v3069_v26  ;;  %11941 = vtanh.f32 %v3062_v56 }
 0x417   :  { %v11936_v47 = vpop.eup %11935 }
 0x418   :  { %v3079_v30 = vmul.f32 %v3074_v57, %v3033_v59  ;;  %v3070_v46 = vmul.f32 %v11936_v47, %v11936_v47 }
 0x41a   :  { %v3075_v8 = vsub.f32 1.0, %v3070_v46  ;;  %v3084_v21 = vsel %vm1353_vm5, %v3079_v30, %v11936_v47 }
 0x41b   :  { %v11938_v60 = vpop.eup %11937  ;;  %v13867_v13 = vand.u32 4294901760, %v3084_v21 }
 0x41c   :  { %v3080_v6 = vmul.f32 %v3075_v8, %v3039_v61  ;;  %v3071_v40 = vmul.f32 %v11938_v60, %v11938_v60  ;;  %v13914_v8 = vld [vmem:[%s16638_s3] sm:$0xff] }
 0x41d   :  { %v13878_v26 = vsub.f32 %v3084_v21, %v13867_v13 }
 0x41e   :  { %v3076_v54 = vsub.f32 1.0, %v3071_v40  ;;  %v3085_v63 = vsel %vm1354_vm15, %v3080_v6, %v11938_v60 }
 0x41f   :  { %v11940_v20 = vpop.eup %11939  ;;  %v3198_v56 = vand.u32 4294901760, %v13878_v26 }
 0x420   :  { %v3081_v22 = vmul.f32 %v3076_v54, %v3045_v12  ;;  %v3072_v32 = vmul.f32 %v11940_v20, %v11940_v20 }
 0x421   :  { %v3199_v30 = vsub.f32 %v13878_v26, %v3198_v56 }
 0x422   :  { %v3077_v10 = vsub.f32 1.0, %v3072_v32  ;;  %v3086_v62 = vsel %vm1353_vm5, %v3081_v22, %v11940_v20 }
 0x423   :  { %v11942_v59 = vpop.eup %11941  ;;  %v13906_v46 = vand.u32 4294901760, %v3086_v62  ;;  %v3200_v21 = vand.u32 4294901760, %v3199_v30 }
 0x424   :  { %v3068_v1 = vmul.f32 %v11942_v59, %v11942_v59  ;;  %v3082_v44 = vmul.f32 %v3077_v10, %v3051_v39  ;;  %v13885_v39 = vand.u32 4294901760, %v3085_v63 }
 0x425   :  { %v13924_v60 = vsub.f32 %v3086_v62, %v13906_v46 }
 0x426   :  { %v3073_v3 = vsub.f32 1.0, %v3068_v1  ;;  %v3087_v7 = vsel %vm1354_vm15, %v3082_v44, %v11942_v59  ;;  %v13899_v47 = vsub.f32 %v3085_v63, %v13885_v39  ;;  %v16924_v1 = vld [vmem:[#allocation13_spill] sm:$0xff] }
 0x427   :  { %v13929_v6 = vand.u32 4294901760, %v3087_v7  ;;  %v3218_v54 = vand.u32 4294901760, %v13924_v60 }
 0x428   :  { %v3078_v61 = vmul.f32 %v3073_v3, %v3027_v49  ;;  %v3956_v3 = vld [vmem:[#allocation2 + $0x1d8] sm:$0xff] }
 0x429   :  { %v13943_v63 = vsub.f32 %v3087_v7, %v13929_v6  ;;  %v3219_v22 = vsub.f32 %v13924_v60, %v3218_v54 }
 0x42a   :  { %v3083_v55 = vsel %vm1353_vm5, %v3078_v61, %v11934_v36 }
 0x42b   :  { %v13871_v14 = vand.u32 4294901760, %v3083_v55  ;;  %v3228_v32 = vand.u32 4294901760, %v13943_v63  ;;  %v3220_v10 = vand.u32 4294901760, %v3219_v22  ;;  %v3952_v22 = vld [vmem:[#allocation2 + $0x1b8] sm:$0xff] }
 0x42d   :  { %v13874_v12 = vsub.f32 %v3083_v55, %v13871_v14  ;;  %10265 = vmatmul.mubr.f32.vlgmr.msra.gmra.mxu1 %v13871_v14  ;;  %v3229_v62 = vsub.f32 %v13943_v63, %v3228_v32 }
 0x42e   :  { %10327 = vmatpush3.msra.mxu1 %v13665_v34  ;;  %10267 = vmatprep.mubr.msk.f32.mxu1 %vm12002_vm0, %v13390_v51 }
 0x42f   :  { %10328 = vmatprep.subr.mxu1 %v13390_v51  ;;  %v3188_v49 = vand.u32 4294901760, %v13874_v12  ;;  %v3230_v59 = vand.u32 4294901760, %v3229_v62 }
 0x430   :  { %10329 = vmatpush3.msra.mxu1 %v13670_v25 }
 0x431   :  { %10330 = vmatprep.subr.mxu1 %v13390_v51  ;;  %10268 = vmatmul.mubr.f32.gmra.mxu1 %v13867_v13  ;;  %v3189_v36 = vsub.f32 %v13874_v12, %v3188_v49 }
 0x432   :  { %10331 = vmatpush3.msra.mxu1 %v13678_v0  ;;  %10270 = vmatprep.mubr.msk.f32.mxu1 %vm12002_vm0, %v13390_v51 }
 0x433   :  { %10332 = vmatprep.subr.mxu1 %v13390_v51  ;;  %v3190_v57 = vand.u32 4294901760, %v3189_v36 }
 0x434   :  { %10333 = vmatpush3.msra.mxu1 %v13689_v4 }
 0x435   :  { %10334 = vmatprep.subr.mxu1 %v13390_v51  ;;  %10218 = vmatmul.mubr.f32.vlgmr.msra.gmra.mxu0 %v3190_v57  ;;  %v3208_v51 = vand.u32 4294901760, %v13899_v47  ;;  %v3954_v57 = vld [vmem:[#allocation2 + $0x1c8] sm:$0xff] }
 0x436   :  { %10271 = vmatmul.mubr.f32.gmra.mxu1 %v13885_v39  ;;  %10280 = vmatpush3.msra.mxu0 %v13668_v38 }
 0x437   :  { %10335 = vmatpush3.msra.mxu1 %v13701_v52  ;;  %10281 = vmatprep.subr.mxu0 %v13914_v8  ;;  %v3209_v40 = vsub.f32 %v13899_v47, %v3208_v51 }
 0x438   :  { %10336 = vmatprep.subr.mxu1 %v13914_v8  ;;  %10282 = vmatpush3.msra.mxu0 %v13676_v43 }
 0x439   :  { %10337 = vmatpush3.msra.mxu1 %v13708_v35  ;;  %10220 = vmatprep.mubr.msk.f32.mxu0 %vm12002_vm0, %v13914_v8  ;;  %v3210_v20 = vand.u32 4294901760, %v3209_v40 }
 0x43a   :  { %10273 = vmatprep.mubr.msk.f32.mxu1 %vm12002_vm0, %v13914_v8  ;;  %10283 = vmatprep.subr.mxu0 %v13914_v8 }
 0x43b   :  { %10338 = vmatprep.subr.mxu1 %v13914_v8  ;;  %10221 = vmatmul.mubr.f32.gmra.mxu0 %v3200_v21 }
 0x43c   :  { %10274 = vmatmul.mubr.f32.gmra.mxu1 %v13906_v46  ;;  %10284 = vmatpush3.msra.mxu0 %v13687_v28 }
 0x43d   :  { %10339 = vmatpush3.msra.mxu1 %v13721_v19  ;;  %10285 = vmatprep.subr.mxu0 %v13914_v8 }
 0x43e   :  { %10340 = vmatprep.subr.mxu1 %v13914_v8  ;;  %10286 = vmatpush3.msra.mxu0 %v13698_v29 }
 0x43f   :  { %10341 = vmatpush3.msra.mxu1 %v13731_v2  ;;  %10223 = vmatprep.mubr.msk.f32.mxu0 %vm12002_vm0, %v13914_v8 }
 0x440   :  { %10276 = vmatprep.mubr.msk.f32.mxu1 %vm12002_vm0, %v13914_v8  ;;  %10287 = vmatprep.subr.mxu0 %v13914_v8 }
 0x441   :  { %10342 = vmatprep.subr.mxu1 %v13914_v8  ;;  %10224 = vmatmul.mubr.f32.gmra.mxu0 %v3210_v20 }
 0x442   :  { %10277 = vmatmul.mubr.f32.gmra.mxu1 %v13929_v6  ;;  %10288 = vmatpush3.msra.mxu0 %v13712_v15 }
 0x443   :  { %10343 = vmatpush3.msra.mxu1 %v13746_v33  ;;  %10289 = vmatprep.subr.mxu0 %v13914_v8 }
 0x444   :  { %10344 = vmatprep.subr.mxu1 %v13914_v8  ;;  %10290 = vmatpush3.msra.mxu0 %v13719_v11 }
 0x445   :  { %10345 = vmatpush3.msra.mxu1 %v13759_v41  ;;  %10226 = vmatprep.mubr.msk.f32.mxu0 %vm12002_vm0, %v13914_v8 }
 0x446   :  { %10291 = vmatprep.subr.mxu0 %v13914_v8  ;;  %10346 = vmatprep.subr.mxu1 %v13914_v8 }
 0x447   :  { %10227 = vmatmul.mubr.f32.gmra.mxu0 %v3220_v10  ;;  %10347 = vmatpush3.msra.mxu1 %v13767_v42 }
 0x448   :  { %10292 = vmatpush3.msra.mxu0 %v13729_v58  ;;  %10348 = vmatprep.subr.mxu1 %v13914_v8 }
 0x449   :  { %10293 = vmatprep.subr.mxu0 %v13914_v8  ;;  %10349 = vmatpush3.msra.mxu1 %v13781_v31 }
 0x44a   :  { %10294 = vmatpush3.msra.mxu0 %v13744_v18  ;;  %10229 = vmatprep.mubr.msk.f32.mxu0 %vm12002_vm0, %v13914_v8 }
 0x44b   :  { %10295 = vmatprep.subr.mxu0 %v13914_v8  ;;  %10350 = vmatprep.subr.mxu1 %v13914_v8 }
 0x44c   :  { %10230 = vmatmul.mubr.f32.gmra.mxu0 %v3230_v59  ;;  %10351 = vmatpush3.msra.mxu1 %v13791_v17  ;;  %v14234_v59 = vand.u32 4294901760, %v3952_v22 }
 0x44d   :  { %10296 = vmatpush3.msra.mxu0 %v13756_v50  ;;  %10352 = vmatprep.subr.mxu1 %v13914_v8 }
 0x44e   :  { %10297 = vmatprep.subr.mxu0 %v13914_v8  ;;  %10353 = vmatpush3.msra.mxu1 %v13806_v16 }
 0x44f   :  { %10298 = vmatpush3.msra.mxu0 %v13771_v27  ;;  %10354 = vmatprep.subr.mxu1 %v13914_v8 }
 0x450   :  { %10299 = vmatprep.subr.mxu0 %v13914_v8  ;;  %10355 = vmatpush3.msra.mxu1 %v13819_v45 }
 0x451   :  { %10300 = vmatpush3.msra.mxu0 %v13779_v48  ;;  %10356 = vmatprep.subr.mxu1 %v13914_v8 }
 0x452   :  { %10301 = vmatprep.subr.mxu0 %v13914_v8  ;;  %10357 = vmatpush3.msra.mxu1 %v13827_v24 }
 0x453   :  { %10302 = vmatpush3.msra.mxu0 %v13789_v23  ;;  %10358 = vmatprep.mubr.msk.f32.mxu1 %vm12002_vm0, %v13914_v8 }
 0x454   :  { %10303 = vmatprep.subr.mxu0 %v13914_v8  ;;  %10359 = vmatmul.mubr.f32.vlgmr.msra.gmra.mxu1 %v3188_v49 }
 0x455   :  { %10420 = vmatprep.subr.mxu1 %v13914_v8  ;;  %10304 = vmatpush3.msra.mxu0 %v13804_v53 }
 0x456   :  { %10421 = vmatpush3.msra.mxu1 %v13665_v34  ;;  %10305 = vmatprep.subr.mxu0 %v13914_v8  ;;  %v16925_v34 = vld [vmem:[#allocation6_spill] sm:$0xff] }
 0x457   :  { %10422 = vmatprep.subr.mxu1 %v13914_v8  ;;  %10306 = vmatpush3.msra.mxu0 %v13816_v5 }
 0x458   :  { %10361 = vmatprep.mubr.msk.f32.mxu1 %vm12002_vm0, %v13914_v8  ;;  %10423 = vmatpush3.msra.mxu1 %v13670_v25  ;;  %v16926_v25 = vand.u32 4294901760, %v13668_v38  ;;  %v16928_v38 = vand.u32 4294901760, %v13687_v28  ;;  %v16930_v28 = vand.u32 4294901760, %v13712_v15  ;;  %v16935_v15 = vand.u32 4294901760, %v13771_v27 }
 0x459   :  { %10307 = vmatprep.subr.mxu0 %v13914_v8  ;;  %10362 = vmatmul.mubr.f32.gmra.mxu1 %v3198_v56 }
 0x45a   :  { %10424 = vmatprep.subr.mxu1 %v13914_v8  ;;  %10308 = vmatpush3.msra.mxu0 %v16924_v1 }
 0x45b   :  { %10425 = vmatpush3.msra.mxu1 %v13678_v0  ;;  %10309 = vmatprep.subr.mxu0 %v13914_v8  ;;  %v16927_v0 = vand.u32 4294901760, %v13676_v43  ;;  %v16929_v43 = vand.u32 4294901760, %v13698_v29  ;;  %v16932_v29 = vand.u32 4294901760, %v13729_v58  ;;  %v16938_v58 = vand.u32 4294901760, %v13804_v53 }
 0x45c   :  { %10426 = vmatprep.subr.mxu1 %v13914_v8  ;;  %10310 = vmatpush3.msra.mxu0 %v16925_v34 }
 0x45d   :  { %10311 = vmatprep.mubr.msk.f32.mxu0 %vm12002_vm0, %v13914_v8  ;;  %10364 = vmatprep.mubr.msk.f32.mxu1 %vm12002_vm0, %v13914_v8 }
 0x45e   :  { %10427 = vmatpush3.msra.mxu1 %v13689_v4  ;;  %10312 = vmatmul.mubr.f32.vlgmr.msra.gmra.mxu0 %v13874_v12  ;;  %v16931_v4 = vand.u32 4294901760, %v13719_v11  ;;  %v16936_v11 = vand.u32 4294901760, %v13779_v48  ;;  %v3955_v12 = vld [vmem:[#allocation2 + $0x1d0] sm:$0xff] }
 0x45f   :  { %10365 = vmatmul.mubr.f32.gmra.mxu1 %v3208_v51  ;;  %10373 = vmatprep.subr.mxu0 %v13914_v8  ;;  %v14196_v36 = vand.u32 4294901760, %v3955_v12  ;;  %v14209_v51 = vand.u32 4294901760, %v3954_v57 }
 0x460   :  { %10428 = vmatprep.subr.mxu1 %v13914_v8  ;;  %10374 = vmatpush3.msra.mxu0 %v16926_v25 }
 0x461   :  { %10429 = vmatpush3.msra.mxu1 %v13701_v52  ;;  %10375 = vmatprep.subr.mxu0 %v13914_v8  ;;  %v16933_v52 = vand.u32 4294901760, %v13744_v18  ;;  %v16940_v18 = vand.u32 4294901760, %v16924_v1 }
 0x462   :  { %10430 = vmatprep.subr.mxu1 %v13914_v8  ;;  %10314 = vmatprep.mubr.msk.f32.mxu0 %vm12002_vm0, %v13914_v8 }
 0x463   :  { %10367 = vmatprep.mubr.msk.f32.mxu1 %vm12002_vm0, %v13914_v8  ;;  %10376 = vmatpush3.msra.mxu0 %v16927_v0 }
 0x464   :  { %10431 = vmatpush3.msra.mxu1 %v13708_v35  ;;  %10315 = vmatmul.mubr.f32.gmra.mxu0 %v13878_v26  ;;  %v16934_v35 = vand.u32 4294901760, %v13756_v50  ;;  %v3960_v50 = vld [vmem:[#allocation2 + $0x1f8] sm:$0xff] }
 0x465   :  { %10368 = vmatmul.mubr.f32.gmra.mxu1 %v3218_v54  ;;  %10377 = vmatprep.subr.mxu0 %v13914_v8  ;;  %v14217_v54 = vsub.f32 %v3954_v57, %v14209_v51 }
 0x466   :  { %10432 = vmatprep.subr.mxu1 %v13914_v8  ;;  %10378 = vmatpush3.msra.mxu0 %v16928_v38 }
 0x467   :  { %10433 = vmatpush3.msra.mxu1 %v13721_v19  ;;  %10379 = vmatprep.subr.mxu0 %v13914_v8  ;;  %v16937_v19 = vand.u32 4294901760, %v13789_v23  ;;  %v16743_v10 = vand.u32 4294901760, %v14217_v54 }
 0x468   :  { %10434 = vmatprep.subr.mxu1 %v13914_v8  ;;  %10317 = vmatprep.mubr.msk.f32.mxu0 %vm12002_vm0, %v13914_v8 }
 0x469   :  { %10370 = vmatprep.mubr.msk.f32.mxu1 %vm12002_vm0, %v13914_v8  ;;  %10380 = vmatpush3.msra.mxu0 %v16929_v43  ;;  %v4138_v0 = vsub.f32 %v14217_v54, %v16743_v10  ;;  %v14244_v43 = vsub.f32 %v3952_v22, %v14234_v59 }
 0x46a   :  { %10435 = vmatpush3.msra.mxu1 %v13731_v2  ;;  %10318 = vmatmul.mubr.f32.gmra.mxu0 %v13899_v47  ;;  %v16939_v2 = vand.u32 4294901760, %v13816_v5 }
 0x46b   :  { %10371 = vmatmul.mubr.f32.gmra.mxu1 %v3228_v32  ;;  %10381 = vmatprep.subr.mxu0 %v13914_v8 }
 0x46c   :  { %10436 = vmatprep.subr.mxu1 %v13914_v8  ;;  %10382 = vmatpush3.msra.mxu0 %v16930_v28 }
 0x46d   :  { %10437 = vmatpush3.msra.mxu1 %v13746_v33  ;;  %10383 = vmatprep.subr.mxu0 %v13914_v8  ;;  %v16941_v33 = vand.u32 4294901760, %v16925_v34  ;;  %v3951_v34 = vld [vmem:[#allocation2 + $0x1b0] sm:$0xff] }
 0x46e   :  { %10438 = vmatprep.subr.mxu1 %v13914_v8  ;;  %10320 = vmatprep.mubr.msk.f32.mxu0 %vm12002_vm0, %v13914_v8  ;;  %v14247_v28 = vand.u32 4294901760, %v3951_v34 }
 0x46f   :  { %10384 = vmatpush3.msra.mxu0 %v16931_v4  ;;  %10439 = vmatpush3.msra.mxu1 %v13759_v41  ;;  %v14153_v41 = vand.u32 4294901760, %v3960_v50  ;;  %v3950_v4 = vld [vmem:[#allocation2 + $0x1a8] sm:$0xff] }
 0x470   :  { %10321 = vmatmul.mubr.f32.gmra.mxu0 %v13924_v60  ;;  %10385 = vmatprep.subr.mxu0 %v13914_v8  ;;  %v3953_v60 = vld [vmem:[#allocation2 + $0x1c0] sm:$0xff] }
 0x471   :  { %10440 = vmatprep.subr.mxu1 %v13914_v8  ;;  %10386 = vmatpush3.msra.mxu0 %v16932_v29  ;;  %v14156_v27 = vsub.f32 %v3960_v50, %v14153_v41  ;;  %v4139_v29 = vand.u32 4294901760, %v4138_v0 }
 0x472   :  { %10441 = vmatpush3.msra.mxu1 %v13767_v42  ;;  %10387 = vmatprep.subr.mxu0 %v13914_v8  ;;  %v3959_v42 = vld [vmem:[#allocation2 + $0x1f0] sm:$0xff] }
 0x473   :  { %10442 = vmatprep.subr.mxu1 %v13914_v8  ;;  %10323 = vmatprep.mubr.msk.f32.mxu0 %vm12002_vm0, %v13914_v8  ;;  %v14158_v48 = vand.u32 4294901760, %v3959_v42  ;;  %v16749_v23 = vand.u32 4294901760, %v14156_v27 }
 0x474   :  { %10388 = vmatpush3.msra.mxu0 %v16933_v52  ;;  %10443 = vmatpush3.msra.mxu1 %v13781_v31  ;;  %v3958_v31 = vld [vmem:[#allocation2 + $0x1e8] sm:$0xff] }
 0x475   :  { %10324 = vmatmul.mubr.f32.gmra.mxu0 %v13943_v63  ;;  %10389 = vmatprep.subr.mxu0 %v13914_v8  ;;  %v14166_v53 = vand.u32 4294901760, %v3958_v31  ;;  %v4096_v5 = vsub.f32 %v14156_v27, %v16749_v23  ;;  %v14219_v63 = vand.u32 4294901760, %v3953_v60 }
 0x476   :  { %10444 = vmatprep.subr.mxu1 %v13914_v8  ;;  %10390 = vmatpush3.msra.mxu0 %v16934_v35  ;;  %v16741_v35 = vand.u32 4294901760, %v14244_v43 }
 0x477   :  { %10445 = vmatpush3.msra.mxu1 %v13791_v17  ;;  %10391 = vmatprep.subr.mxu0 %v13914_v8  ;;  %v14164_v17 = vsub.f32 %v3959_v42, %v14158_v48  ;;  %v4097_v7 = vand.u32 4294901760, %v4096_v5  ;;  %v14232_v62 = vsub.f32 %v3953_v60, %v14219_v63  ;;  %v3948_v42 = vld [vmem:[#allocation2 + $0x198] sm:$0xff] }
 0x478   :  { %10446 = vmatprep.subr.mxu1 %v13914_v8  ;;  %10392 = vmatpush3.msra.mxu0 %v16935_v15  ;;  %v14255_v15 = vand.u32 4294901760, %v3950_v4 }
 0x479   :  { %10447 = vmatpush3.msra.mxu1 %v13806_v16  ;;  %10393 = vmatprep.subr.mxu0 %v13914_v8  ;;  %v3957_v16 = vld [vmem:[#allocation2 + $0x1e0] sm:$0xff]  ;;  %v16742_v38 = vand.u32 4294901760, %v14232_v62 }
 0x47a   :  { %10448 = vmatprep.subr.mxu1 %v13914_v8  ;;  %10394 = vmatpush3.msra.mxu0 %v16936_v11  ;;  %v14177_v44 = vand.u32 4294901760, %v3957_v16  ;;  %v14259_v11 = vsub.f32 %v3951_v34, %v14247_v28 }
 0x47b   :  { %10449 = vmatpush3.msra.mxu1 %v13819_v45  ;;  %10395 = vmatprep.subr.mxu0 %v13914_v8  ;;  %v16748_v45 = vand.u32 4294901760, %v14164_v17  ;;  %v4145_v52 = vsub.f32 %v14232_v62, %v16742_v38 }
 0x47c   :  { %10450 = vmatprep.subr.mxu1 %v13914_v8  ;;  %10396 = vmatpush3.msra.mxu0 %v16937_v19  ;;  %v14186_v55 = vsub.f32 %v3957_v16, %v14177_v44  ;;  %v3949_v19 = vld [vmem:[#allocation2 + $0x1a0] sm:$0xff]  ;;  %v16740_v50 = vand.u32 4294901760, %v14259_v11 }
 0x47d   :  { %10451 = vmatpush3.msra.mxu1 %v13827_v24  ;;  %10452 = vmatprep.mubr.msk.f32.mxu1 %vm12002_vm0, %v13914_v8  ;;  %v14175_v24 = vsub.f32 %v3958_v31, %v14166_v53  ;;  %v4103_v61 = vsub.f32 %v14164_v17, %v16748_v45 }
 0x47e   :  { %10397 = vmatprep.subr.mxu0 %v13914_v8  ;;  %10453 = vmatmul.mubr.f32.vlgmr.msra.gmra.mxu1 %v13871_v14 }
 0x47f   :  { %10398 = vmatpush3.msra.mxu0 %v16938_v58  ;;  %10455 = vmatprep.mubr.msk.f32.mxu1 %vm12002_vm0, %v13914_v8  ;;  %v4104_v26 = vand.u32 4294901760, %v4103_v61  ;;  %v4146_v58 = vand.u32 4294901760, %v4145_v52  ;;  %v3947_v61 = vld [vmem:[#allocation2 + $0x190] sm:$0xff] }
 0x480   :  { %10399 = vmatprep.subr.mxu0 %v13914_v8  ;;  %10405 = vmatprep.mubr.msk.f32.mxu0 %vm12002_vm0, %v13914_v8  ;;  %v14294_v57 = vand.u32 4294901760, %v3947_v61 }
 0x481   :  { %10400 = vmatpush3.msra.mxu0 %v16939_v2  ;;  %10514 = vmatprep.subr.mxu1 %v13914_v8  ;;  %v4152_v2 = vsub.f32 %v14244_v43, %v16741_v35 }
 0x482   :  { %10401 = vmatprep.subr.mxu0 %v13914_v8  ;;  %10456 = vmatmul.mubr.f32.gmra.mxu1 %v13867_v13  ;;  %v14304_v22 = vsub.f32 %v3947_v61, %v14294_v57 }
 0x483   :  { %10402 = vmatpush3.msra.mxu0 %v16940_v18  ;;  %10458 = vmatprep.mubr.msk.f32.mxu1 %vm12002_vm0, %v13914_v8  ;;  %v14267_v18 = vsub.f32 %v3950_v4, %v14255_v15  ;;  %v4153_v31 = vand.u32 4294901760, %v4152_v2 }
 0x484   :  { %10403 = vmatprep.subr.mxu0 %v13914_v8  ;;  %10515 = vmatpush3.msra.mxu1 %v4097_v7  ;;  %v4159_v7 = vsub.f32 %v14259_v11, %v16740_v50  ;;  %v16736_v0 = vand.u32 4294901760, %v14304_v22 }
 0x485   :  { %10404 = vmatpush3.msra.mxu0 %v16941_v33  ;;  %10516 = vmatprep.subr.mxu1 %v13914_v8  ;;  %v14269_v33 = vand.u32 4294901760, %v3949_v19  ;;  %v16739_v16 = vand.u32 4294901760, %v14267_v18 }
 0x486   :  { %10406 = vmatmul.mubr.f32.vlgmr.msra.gmra.mxu0 %v13871_v14  ;;  %10459 = vmatmul.mubr.f32.gmra.mxu1 %v13885_v39  ;;  %v14189_v14 = vand.u32 4294901760, %v3956_v3 }
 0x487   :  { %10408 = vmatprep.mubr.msk.f32.mxu0 %vm12002_vm0, %v13914_v8  ;;  %10461 = vmatprep.mubr.msk.f32.mxu1 %vm12002_vm0, %v13914_v8  ;;  %v14277_v5 = vsub.f32 %v3949_v19, %v14269_v33  ;;  %v4187_v19 = vsub.f32 %v14304_v22, %v16736_v0 }
 0x488   :  { %10467 = vmatprep.subr.mxu0 %v13914_v8  ;;  %v14200_v56 = vsub.f32 %v3956_v3, %v14189_v14  ;;  %10517 = vmatpush3.msra.mxu1 %v4104_v26  ;;  %v14279_v3 = vand.u32 4294901760, %v3948_v42 }
 0x489   :  { %10468 = vmatpush3.msra.mxu0 %v14153_v41  ;;  %10518 = vmatprep.subr.mxu1 %v13914_v8  ;;  %v16738_v26 = vand.u32 4294901760, %v14277_v5 }
 0x48a   :  { %10409 = vmatmul.mubr.f32.gmra.mxu0 %v13867_v13  ;;  %10462 = vmatmul.mubr.f32.gmra.mxu1 %v13906_v46  ;;  %v16747_v13 = vand.u32 4294901760, %v14175_v24  ;;  %v16745_v21 = vand.u32 4294901760, %v14200_v56 }
 0x48b   :  { %10411 = vmatprep.mubr.msk.f32.mxu0 %vm12002_vm0, %v13914_v8  ;;  %10464 = vmatprep.mubr.msk.f32.mxu1 %vm12002_vm0, %v13914_v8 }
 0x48c   :  { %10469 = vmatprep.subr.mxu0 %v13914_v8  ;;  %v4110_v49 = vsub.f32 %v14175_v24, %v16747_v13  ;;  %v4124_v20 = vsub.f32 %v14200_v56, %v16745_v21 }
 0x48d   :  { %10470 = vmatpush3.msra.mxu0 %v14158_v48 }
 0x48e   :  { %10412 = vmatmul.mubr.f32.gmra.mxu0 %v13885_v39  ;;  %10465 = vmatmul.mubr.f32.gmra.mxu1 %v13929_v6  ;;  %v16746_v39 = vand.u32 4294901760, %v14186_v55  ;;  %v4111_v47 = vand.u32 4294901760, %v4110_v49  ;;  %v4125_v1 = vand.u32 4294901760, %v4124_v20  ;;  %v14292_v49 = vsub.f32 %v3948_v42, %v14279_v3 }
 0x48f   :  { %10414 = vmatprep.mubr.msk.f32.mxu0 %vm12002_vm0, %v13914_v8  ;;  %10546 = vmatprep.mubr.msk.f32.mxu1 %vm12002_vm0, %v13914_v8  ;;  %v4188_v42 = vand.u32 4294901760, %v4187_v19 }
 0x490   :  { %10471 = vmatprep.subr.mxu0 %v13914_v8  ;;  %v4117_v30 = vsub.f32 %v14186_v55, %v16746_v39  ;;  %10519 = vmatpush3.msra.mxu1 %v4111_v47  ;;  %v4160_v47 = vand.u32 4294901760, %v4159_v7  ;;  %v16737_v20 = vand.u32 4294901760, %v14292_v49 }
 0x491   :  { %10472 = vmatpush3.msra.mxu0 %v14166_v53  ;;  %10520 = vmatprep.subr.mxu1 %v13914_v8 }
 0x492   :  { %10415 = vmatmul.mubr.f32.gmra.mxu0 %v13906_v46  ;;  %10473 = vmatprep.subr.mxu0 %v13914_v8  ;;  %v14207_v46 = vsub.f32 %v3955_v12, %v14196_v36  ;;  %v4166_v12 = vsub.f32 %v14267_v18, %v16739_v16 }
 0x493   :  { %10417 = vmatprep.mubr.msk.f32.mxu0 %vm12002_vm0, %v13914_v8  ;;  %10474 = vmatpush3.msra.mxu0 %v14177_v44 }
 0x494   :  { %10475 = vmatprep.subr.mxu0 %v13914_v8  ;;  %v16744_v40 = vand.u32 4294901760, %v14207_v46  ;;  %v4167_v60 = vand.u32 4294901760, %v4166_v12 }
 0x495   :  { %10476 = vmatpush3.msra.mxu0 %v14189_v14 }
 0x496   :  { %10418 = vmatmul.mubr.f32.gmra.mxu0 %v13929_v6  ;;  %10477 = vmatprep.subr.mxu0 %v13914_v8  ;;  %v4118_v6 = vand.u32 4294901760, %v4117_v30  ;;  %v4131_v32 = vsub.f32 %v14207_v46, %v16744_v40  ;;  %v3946_v30 = vld [vmem:[#allocation2 + $0x188] sm:$0xff] }
 0x497   :  { %10499 = vmatprep.mubr.msk.f32.mxu0 %vm12002_vm0, %v13914_v8  ;;  %10478 = vmatpush3.msra.mxu0 %v14196_v36 }
 0x498   :  { %10479 = vmatprep.subr.mxu0 %v13914_v8  ;;  %10521 = vmatpush3.msra.mxu1 %v4118_v6  ;;  %v4132_v25 = vand.u32 4294901760, %v4131_v32  ;;  %v4173_v6 = vsub.f32 %v14277_v5, %v16738_v26  ;;  %v14307_v32 = vand.u32 4294901760, %v3946_v30 }
 0x499   :  { %10480 = vmatpush3.msra.mxu0 %v14209_v51  ;;  %10522 = vmatprep.subr.mxu1 %v13914_v8 }
 0x49a   :  { %10481 = vmatprep.subr.mxu0 %v13914_v8  ;;  %10523 = vmatpush3.msra.mxu1 %v4125_v1  ;;  %v3945_v1 = vld [vmem:[#allocation2 + $0x180] sm:$0xff]  ;;  %v4174_v34 = vand.u32 4294901760, %v4173_v6 }
 0x49b   :  { %10482 = vmatpush3.msra.mxu0 %v14219_v63  ;;  %10524 = vmatprep.subr.mxu1 %v13914_v8  ;;  %v14315_v4 = vand.u32 4294901760, %v3945_v1 }
 0x49c   :  { %10483 = vmatprep.subr.mxu0 %v13914_v8  ;;  %10525 = vmatpush3.msra.mxu1 %v4132_v25  ;;  %v4180_v25 = vsub.f32 %v14292_v49, %v16737_v20 }
 0x49d   :  { %10484 = vmatpush3.msra.mxu0 %v14234_v59  ;;  %10526 = vmatprep.subr.mxu1 %v13914_v8 }
 0x49e   :  { %10485 = vmatprep.subr.mxu0 %v13914_v8  ;;  %10527 = vmatpush3.msra.mxu1 %v4139_v29  ;;  %v14319_v29 = vsub.f32 %v3946_v30, %v14307_v32  ;;  %v4181_v52 = vand.u32 4294901760, %v4180_v25 }
 0x49f   :  { %10486 = vmatpush3.msra.mxu0 %v14247_v28  ;;  %10528 = vmatprep.subr.mxu1 %v13914_v8 }
 0x4a0   :  { %10487 = vmatprep.subr.mxu0 %v13914_v8  ;;  %10529 = vmatpush3.msra.mxu1 %v4146_v58  ;;  %16942 = vst [vmem:[#allocation10_spill] sm:$0xff] %v14319_v29  ;;  %v14327_v58 = vsub.f32 %v3945_v1, %v14315_v4  ;;  %v16735_v2 = vand.u32 4294901760, %v14319_v29 }
 0x4a1   :  { %10488 = vmatpush3.msra.mxu0 %v14255_v15  ;;  %10530 = vmatprep.subr.mxu1 %v13914_v8 }
 0x4a2   :  { %10489 = vmatprep.subr.mxu0 %v13914_v8  ;;  %10531 = vmatpush3.msra.mxu1 %v4153_v31  ;;  %16943 = vst [vmem:[#allocation13_spill] sm:$0xff] %v14327_v58  ;;  %v16734_v31 = vand.u32 4294901760, %v14327_v58  ;;  %v4194_v7 = vsub.f32 %v14319_v29, %v16735_v2 }
 0x4a3   :  { %10490 = vmatpush3.msra.mxu0 %v14269_v33  ;;  %10532 = vmatprep.subr.mxu1 %v13914_v8 }
 0x4a4   :  { %10491 = vmatprep.subr.mxu0 %v13914_v8  ;;  %10533 = vmatpush3.msra.mxu1 %v4160_v47  ;;  %v4201_v61 = vsub.f32 %v14327_v58, %v16734_v31  ;;  %v4195_v12 = vand.u32 4294901760, %v4194_v7 }
 0x4a5   :  { %10492 = vmatpush3.msra.mxu0 %v14279_v3  ;;  %10534 = vmatprep.subr.mxu1 %v13914_v8 }
 0x4a6   :  { %10493 = vmatprep.subr.mxu0 %v13914_v8  ;;  %10535 = vmatpush3.msra.mxu1 %v4167_v60  ;;  %v4202_v47 = vand.u32 4294901760, %v4201_v61 }
 0x4a7   :  { %10494 = vmatpush3.msra.mxu0 %v14294_v57  ;;  %10536 = vmatprep.subr.mxu1 %v13914_v8 }
 0x4a8   :  { %10495 = vmatprep.subr.mxu0 %v13914_v8  ;;  %10537 = vmatpush3.msra.mxu1 %v4174_v34 }
 0x4a9   :  { %10496 = vmatpush3.msra.mxu0 %v14307_v32  ;;  %10538 = vmatprep.subr.mxu1 %v13914_v8 }
 0x4aa   :  { %10497 = vmatprep.subr.mxu0 %v13914_v8  ;;  %10539 = vmatpush3.msra.mxu1 %v4181_v52 }
 0x4ab   :  { %10498 = vmatpush3.msra.mxu0 %v14315_v4  ;;  %10540 = vmatprep.subr.mxu1 %v13914_v8 }
 0x4ac   :  { %10561 = vmatprep.subr.mxu0 %v13914_v8  ;;  %10541 = vmatpush3.msra.mxu1 %v4188_v42 }
 0x4ad   :  { %10542 = vmatprep.subr.mxu1 %v13914_v8 }
 0x4ae   :  { %10543 = vmatpush3.msra.mxu1 %v4195_v12 }
 0x4af   :  { %10544 = vmatprep.subr.mxu1 %v13914_v8 }
 0x4b0   :  { %10545 = vmatpush3.msra.mxu1 %v4202_v47 }
 0x4b1   :  { %10608 = vmatprep.subr.mxu1 %v13914_v8 }
 0x4ed   :  { %v3383_v30 = vpop.f32.mrf.mxu1 }
 0x4ef   :  { %v10266_v60 = vpop.f32.mrf.mxu1 }
 0x4f1   :  { %v3389_v6 = vpop.f32.mrf.mxu1 }
 0x4f3   :  { %v10269_v1 = vpop.f32.mrf.mxu1 }
 0x4f5   :  { %v3192_v34 = vpop.f32.mrf.mxu0 }
 0x4f6   :  { %v3384_v25 = vadd.f32 %v3383_v30, %v3192_v34  ;;  %v3395_v52 = vpop.f32.mrf.mxu1 }
 0x4f7   :  { %v10219_v19 = vpop.f32.mrf.mxu0 }
 0x4f8   :  { %v10272_v31 = vpop.f32.mrf.mxu1 }
 0x4fb   :  { %v3202_v42 = vpop.f32.mrf.mxu0 }
 0x4fc   :  { %v3390_v7 = vadd.f32 %v3389_v6, %v3202_v42  ;;  %v3401_v2 = vpop.f32.mrf.mxu1 }
 0x4fd   :  { %v10222_v0 = vpop.f32.mrf.mxu0 }
 0x4fe   :  { %v10275_v61 = vpop.f32.mrf.mxu1 }
 0x501   :  { %v3212_v12 = vpop.f32.mrf.mxu0 }
 0x502   :  { %v3396_v20 = vadd.f32 %v3395_v52, %v3212_v12  ;;  %v3407_v26 = vpop.f32.mrf.mxu1 }
 0x503   :  { %v10225_v47 = vpop.f32.mrf.mxu0 }
 0x504   :  { %v10278_v16 = vpop.f32.mrf.mxu1 }
 0x507   :  { %v3222_v50 = vpop.f32.mrf.mxu0 }
 0x508   :  { %v3402_v35 = vadd.f32 %v3401_v2, %v3222_v50 }
 0x509   :  { %v10228_v60 = vpop.f32.mrf.mxu0 }
 0x50c   :  { %v3232_v38 = vpop.f32.mrf.mxu0 }
 0x50d   :  { %v3408_v1 = vadd.f32 %v3407_v26, %v3232_v38 }
 0x50e   :  { %v10231_v10 = vpop.f32.mrf.mxu0 }
 0x514   :  { %v3628_v30 = vpop.f32.mrf.mxu1 }
 0x516   :  { %v10360_v34 = vpop.f32.mrf.mxu1 }
 0x519   :  { %v3636_v19 = vpop.f32.mrf.mxu1 }
 0x51b   :  { %v10363_v31 = vpop.f32.mrf.mxu1 }
 0x51e   :  { %v3511_v40 = vpop.f32.mrf.mxu0 }
 0x51f   :  { %v3644_v6 = vpop.f32.mrf.mxu1  ;;  %v3512_v13 = vadd.f32 %v3511_v40, %v3384_v25 }
 0x520   :  { %v10313_v42 = vpop.f32.mrf.mxu0 }
 0x521   :  { %v10366_v0 = vpop.f32.mrf.mxu1  ;;  %v3629_v42 = vadd.f32 %v3628_v30, %v3512_v13  ;;  %v16946_v13 = vld [vmem:[#allocation12_spill] sm:$0xff] }
 0x522   :  { %v16944_v0 = vld [vmem:[#allocation5_spill] sm:$0xff] }
 0x523   :  { %v3935_v37 = vsub.s32 5, %v16944_v0 }
 0x524   :  { %v3518_v61 = vpop.f32.mrf.mxu0 }
 0x525   :  { %v3652_v21 = vpop.f32.mrf.mxu1  ;;  %v3519_v23 = vadd.f32 %v3518_v61, %v3390_v7 }
 0x526   :  { %v10316_v52 = vpop.f32.mrf.mxu0 }
 0x527   :  { %v10369_v12 = vpop.f32.mrf.mxu1  ;;  %v3637_v25 = vadd.f32 %v3636_v19, %v3519_v23 }
 0x52a   :  { %v3525_v47 = vpop.f32.mrf.mxu0 }
 0x52b   :  { %v3660_v16 = vpop.f32.mrf.mxu1 }
 0x52c   :  { %v10319_v39 = vpop.f32.mrf.mxu0 }
 0x52d   :  { %v10372_v50 = vpop.f32.mrf.mxu1  ;;  %v3526_v39 = vadd.f32 %v3525_v47, %v3396_v20 }
 0x530   :  { %v3532_v2 = vpop.f32.mrf.mxu0 }
 0x532   :  { %v10322_v60 = vpop.f32.mrf.mxu0 }
 0x533   :  { %v14349_v60 = vld [vmem:[%s16637_s2] sm:$0xff] }
 0x534   :  { %16945 = vst [vmem:[#allocation6_spill] sm:$0xff] %v14349_v60  ;;  %v3936_v40 = vrot.slane %v14349_v60, %v3935_v37 }
 0x535   :  { %v3539_v38 = vpop.f32.mrf.mxu0 }
 0x536   :  { %v3540_v19 = vadd.f32 %v3539_v38, %v3408_v1  ;;  %v3938_v60 = vmul.f32 0.0, %v3936_v40  ;;  %v16950_v1 = vld [vmem:[#allocation11_spill] sm:$0xff] }
 0x537   :  { %v10325_v10 = vpop.f32.mrf.mxu0 }
 0x53e   :  { %v3890_v26 = vpop.f32.mrf.mxu1 }
 0x540   :  { %v10454_v34 = vpop.f32.mrf.mxu1 }
 0x542   :  { %v3896_v31 = vpop.f32.mrf.mxu1 }
 0x544   :  { %v10457_v45 = vpop.f32.mrf.mxu1 }
 0x546   :  { %v3779_v9 = vpop.f32.mrf.mxu0  ;;  %v3902_v52 = vpop.f32.mrf.mxu1 }
 0x547   :  { %v3780_v12 = vadd.f32 %v3779_v9, %v3629_v42  ;;  %v3533_v9 = vadd.f32 %v3532_v2, %v3402_v35 }
 0x548   :  { %v10407_v58 = vpop.f32.mrf.mxu0  ;;  %v10460_v29 = vpop.f32.mrf.mxu1 }
 0x549   :  { %v3891_v50 = vadd.f32 %v3890_v26, %v3780_v12  ;;  %v3645_v29 = vadd.f32 %v3644_v6, %v3526_v39  ;;  %v16948_v12 = vld [vmem:[#allocation7_spill] sm:$0xff]  ;;  %v3653_v6 = vadd.f32 %v3652_v21, %v3533_v9  ;;  %v3661_v21 = vadd.f32 %v3660_v16, %v3540_v19 }
 0x54a   :  { %v3785_v45 = vpop.f32.mrf.mxu0  ;;  %v3908_v7 = vpop.f32.mrf.mxu1 }
 0x54b   :  { %v3918_v30 = vadd.f32 %v3891_v50, %v16946_v13  ;;  %v3786_v61 = vadd.f32 %v3785_v45, %v3637_v25 }
 0x54c   :  { %v10410_v10 = vpop.f32.mrf.mxu0  ;;  %v10463_v34 = vpop.f32.mrf.mxu1 }
 0x54d   :  { %v14353_v58 = vadd.f32 %v3936_v40, %v3918_v30  ;;  %v3897_v20 = vadd.f32 %v3896_v31, %v3786_v61  ;;  %v16952_v34 = vld [vmem:[#allocation8_spill] sm:$0xff] }
 0x54e   :  { %v3791_v47 = vpop.f32.mrf.mxu0  ;;  %v3914_v26 = vpop.f32.mrf.mxu1 }
 0x54f   :  { %16947 = vst [vmem:[#allocation12_spill] sm:$0xff] %v14353_v58  ;;  %v14356_v42 = vand.u32 4294901760, %v14353_v58  ;;  %v3919_v37 = vadd.f32 %v3897_v20, %v16948_v12  ;;  %v3792_v23 = vadd.f32 %v3791_v47, %v3645_v29 }
 0x550   :  { %v10413_v0 = vpop.f32.mrf.mxu0  ;;  %v10466_v50 = vpop.f32.mrf.mxu1 }
 0x551   :  { %v14361_v25 = vsub.f32 %v14353_v58, %v14356_v42  ;;  %v14363_v35 = vadd.f32 %v3936_v40, %v3919_v37  ;;  %v3903_v2 = vadd.f32 %v3902_v52, %v3792_v23  ;;  %10547 = vmatmul.mubr.f32.vlgmr.msra.gmra.mxu1 %v14356_v42 }
 0x552   :  { %10609 = vmatpush3.msra.mxu1 %v14153_v41  ;;  %v3797_v31 = vpop.f32.mrf.mxu0  ;;  %10549 = vmatprep.mubr.msk.f32.mxu1 %vm12002_vm0, %v13914_v8 }
 0x553   :  { %16949 = vst [vmem:[#allocation7_spill] sm:$0xff] %v14363_v35  ;;  %v3920_v38 = vadd.f32 %v3903_v2, %v16950_v1  ;;  %v3798_v0 = vadd.f32 %v3797_v31, %v3653_v6  ;;  %10610 = vmatprep.subr.mxu1 %v13914_v8  ;;  %v14372_v39 = vand.u32 4294901760, %v14363_v35  ;;  %v4044_v45 = vand.u32 4294901760, %v14361_v25  ;;  %v16954_v2 = vld [vmem:[#allocation9_spill] sm:$0xff] }
 0x554   :  { %10611 = vmatpush3.msra.mxu1 %v14158_v48  ;;  %v10416_v52 = vpop.f32.mrf.mxu0 }
 0x555   :  { %v14376_v13 = vadd.f32 %v3938_v60, %v3920_v38  ;;  %v3909_v30 = vadd.f32 %v3908_v7, %v3798_v0  ;;  %10612 = vmatprep.subr.mxu1 %v13914_v8  ;;  %10550 = vmatmul.mubr.f32.gmra.mxu1 %v14372_v39  ;;  %v4045_v61 = vsub.f32 %v14361_v25, %v4044_v45 }
 0x556   :  { %10613 = vmatpush3.msra.mxu1 %v14166_v53  ;;  %v3803_v10 = vpop.f32.mrf.mxu0  ;;  %10552 = vmatprep.mubr.msk.f32.mxu1 %vm12002_vm0, %v13914_v8  ;;  %v14388_v16 = vsub.f32 %v14363_v35, %v14372_v39 }
 0x557   :  { %16951 = vst [vmem:[#allocation11_spill] sm:$0xff] %v14376_v13  ;;  %v3921_v7 = vadd.f32 %v3909_v30, %v16952_v34  ;;  %v3804_v9 = vadd.f32 %v3803_v10, %v3661_v21  ;;  %10614 = vmatprep.subr.mxu1 %v13914_v8  ;;  %v4046_v20 = vand.u32 4294901760, %v4045_v61  ;;  %v14393_v29 = vand.u32 4294901760, %v14376_v13 }
 0x558   :  { %10615 = vmatpush3.msra.mxu1 %v14177_v44  ;;  %v10419_v47 = vpop.f32.mrf.mxu0  ;;  %v4054_v12 = vand.u32 4294901760, %v14388_v16 }
 0x559   :  { %v14397_v37 = vadd.f32 %v3936_v40, %v3921_v7  ;;  %v3915_v23 = vadd.f32 %v3914_v26, %v3804_v9  ;;  %10616 = vmatprep.subr.mxu1 %v13914_v8  ;;  %10500 = vmatmul.mubr.f32.vlgmr.msra.gmra.mxu0 %v4046_v20  ;;  %v14402_v19 = vsub.f32 %v14376_v13, %v14393_v29  ;;  %v14474_v9 = vld [vmem:[%s16638_s3] sm:$0xff] }
 0x55a   :  { %10553 = vmatmul.mubr.f32.gmra.mxu1 %v14393_v29  ;;  %10562 = vmatpush3.msra.mxu0 %v14156_v27  ;;  %v4055_v50 = vsub.f32 %v14388_v16, %v4054_v12 }
 0x55b   :  { %16953 = vst [vmem:[#allocation8_spill] sm:$0xff] %v14397_v37  ;;  %v3922_v6 = vadd.f32 %v3915_v23, %v16954_v2  ;;  %10617 = vmatpush3.msra.mxu1 %v14189_v14  ;;  %10563 = vmatprep.subr.mxu0 %v13914_v8  ;;  %v14413_v40 = vand.u32 4294901760, %v14397_v37  ;;  %v4064_v26 = vand.u32 4294901760, %v14402_v19 }
 0x55c   :  { %10618 = vmatprep.subr.mxu1 %v13914_v8  ;;  %10564 = vmatpush3.msra.mxu0 %v14164_v17  ;;  %v4056_v31 = vand.u32 4294901760, %v4055_v50 }
 0x55d   :  { %v14418_v1 = vadd.f32 %v3938_v60, %v3922_v6  ;;  %10619 = vmatpush3.msra.mxu1 %v14196_v36  ;;  %10502 = vmatprep.mubr.msk.f32.mxu0 %vm12002_vm0, %v13914_v8  ;;  %v4065_v38 = vsub.f32 %v14402_v19, %v4064_v26  ;;  %v14428_v0 = vsub.f32 %v14397_v37, %v14413_v40 }
 0x55e   :  { %10555 = vmatprep.mubr.msk.f32.mxu1 %vm12002_vm0, %v13914_v8  ;;  %10565 = vmatprep.subr.mxu0 %v13914_v8 }
 0x55f   :  { %16955 = vst [vmem:[#allocation9_spill] sm:$0xff] %v14418_v1  ;;  %10620 = vmatprep.subr.mxu1 %v13914_v8  ;;  %10503 = vmatmul.mubr.f32.gmra.mxu0 %v4056_v31  ;;  %v14435_v60 = vand.u32 4294901760, %v14418_v1  ;;  %v4074_v52 = vand.u32 4294901760, %v14428_v0  ;;  %v4066_v21 = vand.u32 4294901760, %v4065_v38 }
 0x560   :  { %10556 = vmatmul.mubr.f32.gmra.mxu1 %v14413_v40  ;;  %10566 = vmatpush3.msra.mxu0 %v14175_v24 }
 0x561   :  { %10621 = vmatpush3.msra.mxu1 %v14209_v51  ;;  %10567 = vmatprep.subr.mxu0 %v13914_v8  ;;  %v14444_v30 = vsub.f32 %v14418_v1, %v14435_v60  ;;  %v4075_v61 = vsub.f32 %v14428_v0, %v4074_v52 }
 0x562   :  { %10622 = vmatprep.subr.mxu1 %v13914_v8  ;;  %10568 = vmatpush3.msra.mxu0 %v14186_v55 }
 0x563   :  { %10623 = vmatpush3.msra.mxu1 %v14219_v63  ;;  %10505 = vmatprep.mubr.msk.f32.mxu0 %vm12002_vm0, %v13914_v8  ;;  %v4084_v10 = vand.u32 4294901760, %v14444_v30  ;;  %v4076_v34 = vand.u32 4294901760, %v4075_v61 }
 0x564   :  { %10558 = vmatprep.mubr.msk.f32.mxu1 %vm12002_vm0, %v13914_v8  ;;  %10569 = vmatprep.subr.mxu0 %v13914_v8 }
 0x565   :  { %10624 = vmatprep.subr.mxu1 %v13914_v8  ;;  %10506 = vmatmul.mubr.f32.gmra.mxu0 %v4066_v21  ;;  %v4085_v7 = vsub.f32 %v14444_v30, %v4084_v10 }
 0x566   :  { %10559 = vmatmul.mubr.f32.gmra.mxu1 %v14435_v60  ;;  %10570 = vmatpush3.msra.mxu0 %v14200_v56 }
 0x567   :  { %10625 = vmatpush3.msra.mxu1 %v14234_v59  ;;  %10571 = vmatprep.subr.mxu0 %v13914_v8  ;;  %v4086_v20 = vand.u32 4294901760, %v4085_v7  ;;  %v4816_v7 = vld [vmem:[#allocation2 + $0x338] sm:$0xff] }
 0x568   :  { %10626 = vmatprep.subr.mxu1 %v13914_v8  ;;  %10572 = vmatpush3.msra.mxu0 %v14207_v46 }
 0x569   :  { %10627 = vmatpush3.msra.mxu1 %v14247_v28  ;;  %10508 = vmatprep.mubr.msk.f32.mxu0 %vm12002_vm0, %v13914_v8  ;;  %v16956_v8 = vld [vmem:[#allocation10_spill] sm:$0xff] }
 0x56a   :  { %10573 = vmatprep.subr.mxu0 %v14474_v9  ;;  %10628 = vmatprep.subr.mxu1 %v14474_v9 }
 0x56b   :  { %10509 = vmatmul.mubr.f32.gmra.mxu0 %v4076_v34  ;;  %10629 = vmatpush3.msra.mxu1 %v14255_v15 }
 0x56c   :  { %10574 = vmatpush3.msra.mxu0 %v14217_v54  ;;  %10630 = vmatprep.subr.mxu1 %v14474_v9 }
 0x56d   :  { %10575 = vmatprep.subr.mxu0 %v14474_v9  ;;  %10631 = vmatpush3.msra.mxu1 %v14269_v33 }
 0x56e   :  { %10576 = vmatpush3.msra.mxu0 %v14232_v62  ;;  %10511 = vmatprep.mubr.msk.f32.mxu0 %vm12002_vm0, %v14474_v9 }
 0x56f   :  { %10577 = vmatprep.subr.mxu0 %v14474_v9  ;;  %10632 = vmatprep.subr.mxu1 %v14474_v9 }
 0x570   :  { %10512 = vmatmul.mubr.f32.gmra.mxu0 %v4086_v20  ;;  %10633 = vmatpush3.msra.mxu1 %v14279_v3 }
 0x571   :  { %10578 = vmatpush3.msra.mxu0 %v14244_v43  ;;  %10634 = vmatprep.subr.mxu1 %v14474_v9 }
 0x572   :  { %10579 = vmatprep.subr.mxu0 %v14474_v9  ;;  %10635 = vmatpush3.msra.mxu1 %v14294_v57 }
 0x573   :  { %10580 = vmatpush3.msra.mxu0 %v14259_v11  ;;  %10636 = vmatprep.subr.mxu1 %v14474_v9 }
 0x574   :  { %10581 = vmatprep.subr.mxu0 %v14474_v9  ;;  %10637 = vmatpush3.msra.mxu1 %v14307_v32 }
 0x575   :  { %10582 = vmatpush3.msra.mxu0 %v14267_v18  ;;  %10638 = vmatprep.subr.mxu1 %v14474_v9 }
 0x576   :  { %10583 = vmatprep.subr.mxu0 %v14474_v9  ;;  %10639 = vmatpush3.msra.mxu1 %v14315_v4 }
 0x577   :  { %10584 = vmatpush3.msra.mxu0 %v14277_v5  ;;  %10640 = vmatprep.mubr.msk.f32.mxu1 %vm12002_vm0, %v14474_v9 }
 0x578   :  { %10585 = vmatprep.subr.mxu0 %v14474_v9  ;;  %10641 = vmatmul.mubr.f32.vlgmr.msra.gmra.mxu1 %v4044_v45 }
 0x579   :  { %10702 = vmatprep.subr.mxu1 %v14474_v9  ;;  %10586 = vmatpush3.msra.mxu0 %v14292_v49 }
 0x57a   :  { %10703 = vmatpush3.msra.mxu1 %v14153_v41  ;;  %10587 = vmatprep.subr.mxu0 %v14474_v9  ;;  %v16957_v41 = vld [vmem:[#allocation13_spill] sm:$0xff] }
 0x57b   :  { %10704 = vmatprep.subr.mxu1 %v14474_v9  ;;  %10588 = vmatpush3.msra.mxu0 %v14304_v22 }
 0x57c   :  { %10643 = vmatprep.mubr.msk.f32.mxu1 %vm12002_vm0, %v14474_v9  ;;  %10705 = vmatpush3.msra.mxu1 %v14158_v48  ;;  %v16958_v48 = vand.u32 4294901760, %v14156_v27  ;;  %v16960_v27 = vand.u32 4294901760, %v14175_v24  ;;  %v16962_v24 = vand.u32 4294901760, %v14200_v56  ;;  %v16967_v56 = vand.u32 4294901760, %v14259_v11 }
 0x57d   :  { %10589 = vmatprep.subr.mxu0 %v14474_v9  ;;  %10644 = vmatmul.mubr.f32.gmra.mxu1 %v4054_v12  ;;  %v4819_v12 = vld [vmem:[#allocation2 + $0x350] sm:$0xff] }
 0x57e   :  { %10706 = vmatprep.subr.mxu1 %v14474_v9  ;;  %10590 = vmatpush3.msra.mxu0 %v16956_v8  ;;  %v14704_v2 = vand.u32 4294901760, %v4819_v12 }
 0x57f   :  { %10707 = vmatpush3.msra.mxu1 %v14166_v53  ;;  %10591 = vmatprep.subr.mxu0 %v14474_v9  ;;  %v16959_v53 = vand.u32 4294901760, %v14164_v17  ;;  %v16961_v17 = vand.u32 4294901760, %v14186_v55  ;;  %v16964_v55 = vand.u32 4294901760, %v14217_v54  ;;  %v16970_v54 = vand.u32 4294901760, %v14292_v49 }
 0x580   :  { %10708 = vmatprep.subr.mxu1 %v14474_v9  ;;  %10592 = vmatpush3.msra.mxu0 %v16957_v41  ;;  %v14715_v38 = vsub.f32 %v4819_v12, %v14704_v2 }
 0x581   :  { %10593 = vmatprep.mubr.msk.f32.mxu0 %vm12002_vm0, %v14474_v9  ;;  %10646 = vmatprep.mubr.msk.f32.mxu1 %vm12002_vm0, %v14474_v9 }
 0x582   :  { %10709 = vmatpush3.msra.mxu1 %v14177_v44  ;;  %10594 = vmatmul.mubr.f32.vlgmr.msra.gmra.mxu0 %v14361_v25  ;;  %v16963_v44 = vand.u32 4294901760, %v14207_v46  ;;  %v16968_v46 = vand.u32 4294901760, %v14267_v18  ;;  %v4820_v25 = vld [vmem:[#allocation2 + $0x358] sm:$0xff] }
 0x583   :  { %10647 = vmatmul.mubr.f32.gmra.mxu1 %v4064_v26  ;;  %10655 = vmatprep.subr.mxu0 %v14474_v9  ;;  %v14697_v47 = vand.u32 4294901760, %v4820_v25 }
 0x584   :  { %10710 = vmatprep.subr.mxu1 %v14474_v9  ;;  %10656 = vmatpush3.msra.mxu0 %v16958_v48  ;;  %v14742_v48 = vand.u32 4294901760, %v4816_v7 }
 0x585   :  { %10711 = vmatpush3.msra.mxu1 %v14189_v14  ;;  %10657 = vmatprep.subr.mxu0 %v14474_v9  ;;  %v16965_v14 = vand.u32 4294901760, %v14232_v62  ;;  %v16972_v62 = vand.u32 4294901760, %v16956_v8  ;;  %v14708_v6 = vsub.f32 %v4820_v25, %v14697_v47 }
 0x586   :  { %10712 = vmatprep.subr.mxu1 %v14474_v9  ;;  %10596 = vmatprep.mubr.msk.f32.mxu0 %vm12002_vm0, %v14474_v9 }
 0x587   :  { %10649 = vmatprep.mubr.msk.f32.mxu1 %vm12002_vm0, %v14474_v9  ;;  %10658 = vmatpush3.msra.mxu0 %v16959_v53 }
 0x588   :  { %10713 = vmatpush3.msra.mxu1 %v14196_v36  ;;  %10597 = vmatmul.mubr.f32.gmra.mxu0 %v14388_v16  ;;  %v16966_v36 = vand.u32 4294901760, %v14244_v43  ;;  %v4824_v43 = vld [vmem:[#allocation2 + $0x378] sm:$0xff] }
 0x589   :  { %10650 = vmatmul.mubr.f32.gmra.mxu1 %v4074_v52  ;;  %10659 = vmatprep.subr.mxu0 %v14474_v9  ;;  %v4817_v52 = vld [vmem:[#allocation2 + $0x340] sm:$0xff] }
 0x58a   :  { %10714 = vmatprep.subr.mxu1 %v14474_v9  ;;  %10660 = vmatpush3.msra.mxu0 %v16960_v27  ;;  %v4815_v27 = vld [vmem:[#allocation2 + $0x330] sm:$0xff] }
 0x58b   :  { %10715 = vmatpush3.msra.mxu1 %v14209_v51  ;;  %10661 = vmatprep.subr.mxu0 %v14474_v9  ;;  %v16969_v51 = vand.u32 4294901760, %v14277_v5 }
 0x58c   :  { %10716 = vmatprep.subr.mxu1 %v14474_v9  ;;  %10599 = vmatprep.mubr.msk.f32.mxu0 %vm12002_vm0, %v14474_v9 }
 0x58d   :  { %10652 = vmatprep.mubr.msk.f32.mxu1 %vm12002_vm0, %v14474_v9  ;;  %10662 = vmatpush3.msra.mxu0 %v16961_v17 }
 0x58e   :  { %10717 = vmatpush3.msra.mxu1 %v14219_v63  ;;  %10600 = vmatmul.mubr.f32.gmra.mxu0 %v14402_v19  ;;  %v16971_v63 = vand.u32 4294901760, %v14304_v22 }
 0x58f   :  { %10653 = vmatmul.mubr.f32.gmra.mxu1 %v4084_v10  ;;  %10663 = vmatprep.subr.mxu0 %v14474_v9  ;;  %v14727_v10 = vand.u32 4294901760, %v4817_v52 }
 0x590   :  { %10718 = vmatprep.subr.mxu1 %v14474_v9  ;;  %10664 = vmatpush3.msra.mxu0 %v16962_v24 }
 0x591   :  { %10719 = vmatpush3.msra.mxu1 %v14234_v59  ;;  %10665 = vmatprep.subr.mxu0 %v14474_v9  ;;  %v16973_v59 = vand.u32 4294901760, %v16957_v41  ;;  %v14740_v41 = vsub.f32 %v4817_v52, %v14727_v10 }
 0x592   :  { %10720 = vmatprep.subr.mxu1 %v14474_v9  ;;  %10602 = vmatprep.mubr.msk.f32.mxu0 %vm12002_vm0, %v14474_v9 }
 0x593   :  { %10666 = vmatpush3.msra.mxu0 %v16963_v44  ;;  %10721 = vmatpush3.msra.mxu1 %v14247_v28  ;;  %v14661_v28 = vand.u32 4294901760, %v4824_v43  ;;  %v16767_v44 = vand.u32 4294901760, %v14740_v41 }
 0x594   :  { %10603 = vmatmul.mubr.f32.gmra.mxu0 %v14428_v0  ;;  %10667 = vmatprep.subr.mxu0 %v14474_v9 }
 0x595   :  { %10722 = vmatprep.subr.mxu1 %v14474_v9  ;;  %10668 = vmatpush3.msra.mxu0 %v16964_v55  ;;  %v14664_v11 = vsub.f32 %v4824_v43, %v14661_v28  ;;  %v14752_v55 = vsub.f32 %v4816_v7, %v14742_v48 }
 0x596   :  { %10723 = vmatpush3.msra.mxu1 %v14255_v15  ;;  %10669 = vmatprep.subr.mxu0 %v14474_v9  ;;  %v4823_v15 = vld [vmem:[#allocation2 + $0x370] sm:$0xff] }
 0x597   :  { %10724 = vmatprep.subr.mxu1 %v14474_v9  ;;  %10605 = vmatprep.mubr.msk.f32.mxu0 %vm12002_vm0, %v14474_v9  ;;  %v14666_v18 = vand.u32 4294901760, %v4823_v15  ;;  %v16774_v5 = vand.u32 4294901760, %v14664_v11 }
 0x598   :  { %10670 = vmatpush3.msra.mxu0 %v16965_v14  ;;  %10725 = vmatpush3.msra.mxu1 %v14269_v33  ;;  %v4822_v33 = vld [vmem:[#allocation2 + $0x368] sm:$0xff]  ;;  %v14755_v14 = vand.u32 4294901760, %v4815_v27 }
 0x599   :  { %10606 = vmatmul.mubr.f32.gmra.mxu0 %v14444_v30  ;;  %10671 = vmatprep.subr.mxu0 %v14474_v9  ;;  %v14674_v49 = vand.u32 4294901760, %v4822_v33  ;;  %v4960_v22 = vsub.f32 %v14664_v11, %v16774_v5  ;;  %v16769_v30 = vand.u32 4294901760, %v14715_v38 }
 0x59a   :  { %10726 = vmatprep.subr.mxu1 %v14474_v9  ;;  %10672 = vmatpush3.msra.mxu0 %v16966_v36  ;;  %v4814_v36 = vld [vmem:[#allocation2 + $0x328] sm:$0xff] }
 0x59b   :  { %10727 = vmatpush3.msra.mxu1 %v14279_v3  ;;  %10673 = vmatprep.subr.mxu0 %v14474_v9  ;;  %v14672_v3 = vsub.f32 %v4823_v15, %v14666_v18  ;;  %v4995_v20 = vsub.f32 %v14715_v38, %v16769_v30 }
 0x59c   :  { %10728 = vmatprep.subr.mxu1 %v14474_v9  ;;  %10674 = vmatpush3.msra.mxu0 %v16967_v56 }
 0x59d   :  { %10729 = vmatpush3.msra.mxu1 %v14294_v57  ;;  %10675 = vmatprep.subr.mxu0 %v14474_v9  ;;  %v4821_v57 = vld [vmem:[#allocation2 + $0x360] sm:$0xff]  ;;  %v4996_v17 = vand.u32 4294901760, %v4995_v20 }
 0x59e   :  { %10730 = vmatprep.subr.mxu1 %v14474_v9  ;;  %10676 = vmatpush3.msra.mxu0 %v16968_v46  ;;  %v5009_v46 = vsub.f32 %v14740_v41, %v16767_v44 }
 0x59f   :  { %10731 = vmatpush3.msra.mxu1 %v14307_v32  ;;  %10677 = vmatprep.subr.mxu0 %v14474_v9  ;;  %v16773_v32 = vand.u32 4294901760, %v14672_v3 }
 0x5a0   :  { %10732 = vmatprep.subr.mxu1 %v14474_v9  ;;  %10678 = vmatpush3.msra.mxu0 %v16969_v51  ;;  %v16766_v51 = vand.u32 4294901760, %v14752_v55 }
 0x5a1   :  { %10733 = vmatpush3.msra.mxu1 %v14315_v4  ;;  %10734 = vmatprep.mubr.msk.f32.mxu1 %vm12002_vm0, %v14474_v9  ;;  %v14683_v4 = vsub.f32 %v4822_v33, %v14674_v49  ;;  %v4967_v45 = vsub.f32 %v14672_v3, %v16773_v32 }
 0x5a2   :  { %10679 = vmatprep.subr.mxu0 %v14474_v9  ;;  %10735 = vmatmul.mubr.f32.vlgmr.msra.gmra.mxu1 %v14356_v42  ;;  %v5016_v43 = vsub.f32 %v14752_v55, %v16766_v51 }
 0x5a3   :  { %10680 = vmatpush3.msra.mxu0 %v16970_v54  ;;  %10737 = vmatprep.mubr.msk.f32.mxu1 %vm12002_vm0, %v14474_v9  ;;  %v16772_v16 = vand.u32 4294901760, %v14683_v4  ;;  %v4968_v23 = vand.u32 4294901760, %v4967_v45  ;;  %v14763_v54 = vand.u32 4294901760, %v4814_v36 }
 0x5a4   :  { %10681 = vmatprep.subr.mxu0 %v14474_v9  ;;  %10687 = vmatprep.mubr.msk.f32.mxu0 %vm12002_vm0, %v14474_v9  ;;  %v5017_v25 = vand.u32 4294901760, %v5016_v43 }
 0x5a5   :  { %10682 = vmatpush3.msra.mxu0 %v16971_v63  ;;  %10796 = vmatprep.subr.mxu1 %v14474_v9  ;;  %v4974_v19 = vsub.f32 %v14683_v4, %v16772_v16  ;;  %v14767_v63 = vsub.f32 %v4815_v27, %v14755_v14  ;;  %v14775_v15 = vsub.f32 %v4814_v36, %v14763_v54 }
 0x5a6   :  { %10683 = vmatprep.subr.mxu0 %v14474_v9  ;;  %10738 = vmatmul.mubr.f32.gmra.mxu1 %v14372_v39 }
 0x5a7   :  { %10684 = vmatpush3.msra.mxu0 %v16972_v62  ;;  %10740 = vmatprep.mubr.msk.f32.mxu1 %vm12002_vm0, %v14474_v9  ;;  %v4975_v26 = vand.u32 4294901760, %v4974_v19  ;;  %v4813_v62 = vld [vmem:[#allocation2 + $0x320] sm:$0xff]  ;;  %v4811_v19 = vld [vmem:[#allocation2 + $0x310] sm:$0xff] }
 0x5a8   :  { %10685 = vmatprep.subr.mxu0 %v14474_v9  ;;  %v14777_v33 = vand.u32 4294901760, %v4813_v62  ;;  %v14802_v52 = vand.u32 4294901760, %v4811_v19 }
 0x5a9   :  { %10686 = vmatpush3.msra.mxu0 %v16973_v59  ;;  %v5010_v59 = vand.u32 4294901760, %v5009_v46 }
 0x5aa   :  { %10688 = vmatmul.mubr.f32.vlgmr.msra.gmra.mxu0 %v14356_v42  ;;  %10741 = vmatmul.mubr.f32.gmra.mxu1 %v14393_v29  ;;  %v14685_v42 = vand.u32 4294901760, %v4821_v57  ;;  %v14785_v45 = vsub.f32 %v4813_v62, %v14777_v33  ;;  %v14812_v27 = vsub.f32 %v4811_v19, %v14802_v52 }
 0x5ab   :  { %10690 = vmatprep.mubr.msk.f32.mxu0 %vm12002_vm0, %v14474_v9  ;;  %10743 = vmatprep.mubr.msk.f32.mxu1 %vm12002_vm0, %v14474_v9 }
 0x5ac   :  { %10749 = vmatprep.subr.mxu0 %v14474_v9  ;;  %v16760_v46 = vand.u32 4294901760, %v14812_v27 }
 0x5ad   :  { %10750 = vmatpush3.msra.mxu0 %v14661_v28 }
 0x5ae   :  { %10691 = vmatmul.mubr.f32.gmra.mxu0 %v14372_v39  ;;  %10744 = vmatmul.mubr.f32.gmra.mxu1 %v14413_v40  ;;  %v4961_v39 = vand.u32 4294901760, %v4960_v22  ;;  %v4812_v22 = vld [vmem:[#allocation2 + $0x318] sm:$0xff] }
 0x5af   :  { %10693 = vmatprep.mubr.msk.f32.mxu0 %vm12002_vm0, %v14474_v9  ;;  %10746 = vmatprep.mubr.msk.f32.mxu1 %vm12002_vm0, %v14474_v9  ;;  %v14787_v12 = vand.u32 4294901760, %v4812_v22 }
 0x5b0   :  { %10751 = vmatprep.subr.mxu0 %v14474_v9  ;;  %10797 = vmatpush3.msra.mxu1 %v4961_v39  ;;  %v16764_v39 = vand.u32 4294901760, %v14775_v15 }
 0x5b1   :  { %10752 = vmatpush3.msra.mxu0 %v14666_v18  ;;  %10798 = vmatprep.subr.mxu1 %v14474_v9 }
 0x5b2   :  { %10694 = vmatmul.mubr.f32.gmra.mxu0 %v14393_v29  ;;  %10747 = vmatmul.mubr.f32.gmra.mxu1 %v14435_v60  ;;  %v14694_v29 = vsub.f32 %v4821_v57, %v14685_v42  ;;  %v16765_v57 = vand.u32 4294901760, %v14767_v63 }
 0x5b3   :  { %10696 = vmatprep.mubr.msk.f32.mxu0 %vm12002_vm0, %v14474_v9  ;;  %10828 = vmatprep.mubr.msk.f32.mxu1 %vm12002_vm0, %v14474_v9 }
 0x5b4   :  { %10753 = vmatprep.subr.mxu0 %v14474_v9  ;;  %v16771_v50 = vand.u32 4294901760, %v14694_v29  ;;  %10799 = vmatpush3.msra.mxu1 %v4968_v23  ;;  %v5023_v23 = vsub.f32 %v14767_v63, %v16765_v57 }
 0x5b5   :  { %10754 = vmatpush3.msra.mxu0 %v14674_v49  ;;  %10800 = vmatprep.subr.mxu1 %v14474_v9 }
 0x5b6   :  { %10697 = vmatmul.mubr.f32.gmra.mxu0 %v14413_v40  ;;  %10755 = vmatprep.subr.mxu0 %v14474_v9  ;;  %v4818_v40 = vld [vmem:[#allocation2 + $0x348] sm:$0xff]  ;;  %v4981_v31 = vsub.f32 %v14694_v29, %v16771_v50 }
 0x5b7   :  { %10699 = vmatprep.mubr.msk.f32.mxu0 %vm12002_vm0, %v14474_v9  ;;  %10756 = vmatpush3.msra.mxu0 %v14685_v42  ;;  %v14717_v0 = vand.u32 4294901760, %v4818_v40 }
 0x5b8   :  { %10757 = vmatprep.subr.mxu0 %v14474_v9  ;;  %10801 = vmatpush3.msra.mxu1 %v4975_v26  ;;  %v4982_v21 = vand.u32 4294901760, %v4981_v31  ;;  %v16762_v26 = vand.u32 4294901760, %v14785_v45  ;;  %v14800_v31 = vsub.f32 %v4812_v22, %v14787_v12  ;;  %v5051_v22 = vsub.f32 %v14812_v27, %v16760_v46 }
 0x5b9   :  { %10758 = vmatpush3.msra.mxu0 %v14697_v47  ;;  %v14725_v61 = vsub.f32 %v4818_v40, %v14717_v0  ;;  %10802 = vmatprep.subr.mxu1 %v14474_v9  ;;  %v5030_v40 = vsub.f32 %v14775_v15, %v16764_v39 }
 0x5ba   :  { %10700 = vmatmul.mubr.f32.gmra.mxu0 %v14435_v60  ;;  %10759 = vmatprep.subr.mxu0 %v14474_v9  ;;  %v16770_v60 = vand.u32 4294901760, %v14708_v6  ;;  %v5037_v20 = vsub.f32 %v14785_v45, %v16762_v26  ;;  %v5052_v19 = vand.u32 4294901760, %v5051_v22 }
 0x5bb   :  { %10781 = vmatprep.mubr.msk.f32.mxu0 %vm12002_vm0, %v14474_v9  ;;  %10760 = vmatpush3.msra.mxu0 %v14704_v2  ;;  %v16768_v8 = vand.u32 4294901760, %v14725_v61  ;;  %v5031_v7 = vand.u32 4294901760, %v5030_v40 }
 0x5bc   :  { %10761 = vmatprep.subr.mxu0 %v14474_v9  ;;  %v4988_v34 = vsub.f32 %v14708_v6, %v16770_v60  ;;  %10803 = vmatpush3.msra.mxu1 %v4982_v21  ;;  %v5024_v21 = vand.u32 4294901760, %v5023_v23  ;;  %v5038_v36 = vand.u32 4294901760, %v5037_v20 }
 0x5bd   :  { %10762 = vmatpush3.msra.mxu0 %v14717_v0  ;;  %10804 = vmatprep.subr.mxu1 %v14474_v9  ;;  %v5002_v24 = vsub.f32 %v14725_v61, %v16768_v8 }
 0x5be   :  { %10763 = vmatprep.subr.mxu0 %v14474_v9  ;;  %v4989_v53 = vand.u32 4294901760, %v4988_v34  ;;  %v4810_v34 = vld [vmem:[#allocation2 + $0x308] sm:$0xff] }
 0x5bf   :  { %10764 = vmatpush3.msra.mxu0 %v14727_v10  ;;  %v5003_v56 = vand.u32 4294901760, %v5002_v24  ;;  %v4809_v24 = vld [vmem:[#allocation2 + $0x300] sm:$0xff] }
 0x5c0   :  { %10765 = vmatprep.subr.mxu0 %v14474_v9  ;;  %10805 = vmatpush3.msra.mxu1 %v4989_v53  ;;  %v16761_v53 = vand.u32 4294901760, %v14800_v31  ;;  %v14823_v62 = vand.u32 4294901760, %v4809_v24 }
 0x5c1   :  { %10766 = vmatpush3.msra.mxu0 %v14742_v48  ;;  %10806 = vmatprep.subr.mxu1 %v14474_v9 }
 0x5c2   :  { %10767 = vmatprep.subr.mxu0 %v14474_v9  ;;  %10807 = vmatpush3.msra.mxu1 %v4996_v17  ;;  %v14815_v17 = vand.u32 4294901760, %v4810_v34 }
 0x5c3   :  { %10768 = vmatpush3.msra.mxu0 %v14755_v14  ;;  %10808 = vmatprep.subr.mxu1 %v14474_v9 }
 0x5c4   :  { %10769 = vmatprep.subr.mxu0 %v14474_v9  ;;  %10809 = vmatpush3.msra.mxu1 %v5003_v56  ;;  %v5044_v56 = vsub.f32 %v14800_v31, %v16761_v53 }
 0x5c5   :  { %10770 = vmatpush3.msra.mxu0 %v14763_v54  ;;  %10810 = vmatprep.subr.mxu1 %v14474_v9 }
 0x5c6   :  { %10771 = vmatprep.subr.mxu0 %v14474_v9  ;;  %10811 = vmatpush3.msra.mxu1 %v5010_v59  ;;  %v14827_v59 = vsub.f32 %v4810_v34, %v14815_v17  ;;  %v5045_v43 = vand.u32 4294901760, %v5044_v56 }
 0x5c7   :  { %10772 = vmatpush3.msra.mxu0 %v14777_v33  ;;  %10812 = vmatprep.subr.mxu1 %v14474_v9 }
 0x5c8   :  { %10773 = vmatprep.subr.mxu0 %v14474_v9  ;;  %10813 = vmatpush3.msra.mxu1 %v5017_v25  ;;  %v14835_v25 = vsub.f32 %v4809_v24, %v14823_v62  ;;  %v16759_v23 = vand.u32 4294901760, %v14827_v59 }
 0x5c9   :  { %10774 = vmatpush3.msra.mxu0 %v14787_v12  ;;  %10814 = vmatprep.subr.mxu1 %v14474_v9 }
 0x5ca   :  { %10775 = vmatprep.subr.mxu0 %v14474_v9  ;;  %10815 = vmatpush3.msra.mxu1 %v5024_v21  ;;  %v16763_v40 = vand.u32 4294901760, %v14835_v25  ;;  %v5058_v34 = vsub.f32 %v14827_v59, %v16759_v23 }
 0x5cb   :  { %10776 = vmatpush3.msra.mxu0 %v14802_v52  ;;  %10816 = vmatprep.subr.mxu1 %v14474_v9 }
 0x5cc   :  { %10777 = vmatprep.subr.mxu0 %v14474_v9  ;;  %10817 = vmatpush3.msra.mxu1 %v5031_v7  ;;  %v5065_v7 = vsub.f32 %v14835_v25, %v16763_v40  ;;  %v5059_v24 = vand.u32 4294901760, %v5058_v34 }
 0x5cd   :  { %10778 = vmatpush3.msra.mxu0 %v14815_v17  ;;  %10818 = vmatprep.subr.mxu1 %v14474_v9 }
 0x5ce   :  { %10779 = vmatprep.subr.mxu0 %v14474_v9  ;;  %10819 = vmatpush3.msra.mxu1 %v5038_v36  ;;  %v5066_v36 = vand.u32 4294901760, %v5065_v7 }
 0x5cf   :  { %10780 = vmatpush3.msra.mxu0 %v14823_v62  ;;  %10820 = vmatprep.subr.mxu1 %v14474_v9 }
 0x5d0   :  { %10843 = vmatprep.subr.mxu0 %v14474_v9  ;;  %10821 = vmatpush3.msra.mxu1 %v5045_v43 }
 0x5d1   :  { %10822 = vmatprep.subr.mxu1 %v14474_v9 }
 0x5d2   :  { %10823 = vmatpush3.msra.mxu1 %v5052_v19 }
 0x5d3   :  { %10824 = vmatprep.subr.mxu1 %v14474_v9 }
 0x5d4   :  { %10825 = vmatpush3.msra.mxu1 %v5059_v24 }
 0x5d5   :  { %10826 = vmatprep.subr.mxu1 %v14474_v9 }
 0x5d6   :  { %10827 = vmatpush3.msra.mxu1 %v5066_v36 }
 0x5d7   :  { %10890 = vmatprep.subr.mxu1 %v14474_v9 }
 0x611   :  { %v4239_v21 = vpop.f32.mrf.mxu1 }
 0x613   :  { %v10548_v20 = vpop.f32.mrf.mxu1 }
 0x615   :  { %v4245_v56 = vpop.f32.mrf.mxu1 }
 0x617   :  { %v10551_v43 = vpop.f32.mrf.mxu1 }
 0x619   :  { %v4048_v22 = vpop.f32.mrf.mxu0 }
 0x61a   :  { %v4240_v23 = vadd.f32 %v4239_v21, %v4048_v22  ;;  %v4251_v46 = vpop.f32.mrf.mxu1 }
 0x61b   :  { %v10501_v53 = vpop.f32.mrf.mxu0 }
 0x61c   :  { %v10554_v26 = vpop.f32.mrf.mxu1 }
 0x61f   :  { %v4058_v40 = vpop.f32.mrf.mxu0 }
 0x620   :  { %v4246_v20 = vadd.f32 %v4245_v56, %v4058_v40  ;;  %v4257_v19 = vpop.f32.mrf.mxu1 }
 0x621   :  { %v10504_v34 = vpop.f32.mrf.mxu0 }
 0x622   :  { %v10557_v39 = vpop.f32.mrf.mxu1 }
 0x625   :  { %v4068_v57 = vpop.f32.mrf.mxu0 }
 0x626   :  { %v4252_v7 = vadd.f32 %v4251_v46, %v4068_v57  ;;  %v4263_v51 = vpop.f32.mrf.mxu1 }
 0x627   :  { %v10507_v24 = vpop.f32.mrf.mxu0 }
 0x628   :  { %v10560_v44 = vpop.f32.mrf.mxu1 }
 0x62b   :  { %v4078_v8 = vpop.f32.mrf.mxu0 }
 0x62c   :  { %v4258_v43 = vadd.f32 %v4257_v19, %v4078_v8 }
 0x62d   :  { %v10510_v36 = vpop.f32.mrf.mxu0 }
 0x630   :  { %v4088_v30 = vpop.f32.mrf.mxu0 }
 0x631   :  { %v4264_v60 = vadd.f32 %v4263_v51, %v4088_v30 }
 0x632   :  { %v10513_v50 = vpop.f32.mrf.mxu0 }
 0x638   :  { %v4484_v21 = vpop.f32.mrf.mxu1 }
 0x63a   :  { %v10642_v22 = vpop.f32.mrf.mxu1 }
 0x63d   :  { %v4492_v53 = vpop.f32.mrf.mxu1 }
 0x63f   :  { %v10645_v26 = vpop.f32.mrf.mxu1 }
 0x642   :  { %v4367_v16 = vpop.f32.mrf.mxu0 }
 0x643   :  { %v4368_v40 = vadd.f32 %v4367_v16, %v4240_v23  ;;  %v4500_v56 = vpop.f32.mrf.mxu1 }
 0x644   :  { %v10595_v34 = vpop.f32.mrf.mxu0 }
 0x645   :  { %v10648_v39 = vpop.f32.mrf.mxu1  ;;  %v4485_v32 = vadd.f32 %v4484_v21, %v4368_v40 }
 0x648   :  { %v4374_v57 = vpop.f32.mrf.mxu0 }
 0x649   :  { %v4375_v46 = vadd.f32 %v4374_v57, %v4246_v20  ;;  %v4508_v24 = vpop.f32.mrf.mxu1  ;;  %v16974_v20 = vld [vmem:[#allocation5_spill] sm:$0xff] }
 0x64a   :  { %v10598_v44 = vpop.f32.mrf.mxu0  ;;  %v4776_v57 = vsub.s32 3, %v16974_v20 }
 0x64b   :  { %v10651_v5 = vpop.f32.mrf.mxu1  ;;  %v4493_v8 = vadd.f32 %v4492_v53, %v4375_v46 }
 0x64e   :  { %v4381_v19 = vpop.f32.mrf.mxu0 }
 0x64f   :  { %v4382_v36 = vadd.f32 %v4381_v19, %v4252_v7  ;;  %v4516_v30 = vpop.f32.mrf.mxu1  ;;  %v16975_v7 = vld [vmem:[#allocation6_spill] sm:$0xff] }
 0x650   :  { %v10601_v50 = vpop.f32.mrf.mxu0  ;;  %v4777_v19 = vrot.slane %v16975_v7, %v4776_v57 }
 0x651   :  { %v10654_v51 = vpop.f32.mrf.mxu1  ;;  %v4501_v22 = vadd.f32 %v4500_v56, %v4382_v36 }
 0x654   :  { %v4388_v1 = vpop.f32.mrf.mxu0 }
 0x655   :  { %v4389_v26 = vadd.f32 %v4388_v1, %v4258_v43 }
 0x656   :  { %v10604_v37 = vpop.f32.mrf.mxu0 }
 0x657   :  { %v4509_v16 = vadd.f32 %v4508_v24, %v4389_v26 }
 0x659   :  { %v4395_v23 = vpop.f32.mrf.mxu0 }
 0x65b   :  { %v10607_v34 = vpop.f32.mrf.mxu0 }
 0x662   :  { %v4746_v39 = vpop.f32.mrf.mxu1 }
 0x664   :  { %v10736_v21 = vpop.f32.mrf.mxu1 }
 0x666   :  { %v4752_v40 = vpop.f32.mrf.mxu1 }
 0x668   :  { %v10739_v44 = vpop.f32.mrf.mxu1 }
 0x66a   :  { %v4635_v5 = vpop.f32.mrf.mxu0  ;;  %v4758_v53 = vpop.f32.mrf.mxu1 }
 0x66b   :  { %v4636_v46 = vadd.f32 %v4635_v5, %v4485_v32  ;;  %v4396_v32 = vadd.f32 %v4395_v23, %v4264_v60 }
 0x66c   :  { %v10689_v50 = vpop.f32.mrf.mxu0  ;;  %v10742_v51 = vpop.f32.mrf.mxu1 }
 0x66d   :  { %v4747_v56 = vadd.f32 %v4746_v39, %v4636_v46 }
 0x66e   :  { %v4641_v36 = vpop.f32.mrf.mxu0  ;;  %v4764_v1 = vpop.f32.mrf.mxu1 }
 0x66f   :  { %v4778_v37 = vadd.f32 %v4777_v19, %v4747_v56  ;;  %v4642_v43 = vadd.f32 %v4641_v36, %v4493_v8  ;;  %v4517_v8 = vadd.f32 %v4516_v30, %v4396_v32 }
 0x670   :  { %v10692_v24 = vpop.f32.mrf.mxu0  ;;  %v10745_v26 = vpop.f32.mrf.mxu1 }
 0x671   :  { %11943 = vtanh.f32 %v4778_v37  ;;  %v4753_v34 = vadd.f32 %v4752_v40, %v4642_v43 }
 0x672   :  { %v4647_v21 = vpop.f32.mrf.mxu0  ;;  %v4770_v13 = vpop.f32.mrf.mxu1 }
 0x673   :  { %v4779_v35 = vadd.f32 %v4777_v19, %v4753_v34  ;;  %v4648_v44 = vadd.f32 %v4647_v21, %v4501_v22 }
 0x674   :  { %v10695_v58 = vpop.f32.mrf.mxu0  ;;  %v10748_v20 = vpop.f32.mrf.mxu1 }
 0x675   :  { %11945 = vtanh.f32 %v4779_v35  ;;  %v4759_v57 = vadd.f32 %v4758_v53, %v4648_v44 }
 0x676   :  { %v4653_v5 = vpop.f32.mrf.mxu0 }
 0x677   :  { %v4780_v7 = vadd.f32 %v4777_v19, %v4759_v57  ;;  %v4654_v39 = vadd.f32 %v4653_v5, %v4509_v16 }
 0x678   :  { %v10698_v46 = vpop.f32.mrf.mxu0 }
 0x679   :  { %11947 = vtanh.f32 %v4780_v7  ;;  %v4765_v50 = vadd.f32 %v4764_v1, %v4654_v39 }
 0x67a   :  { %v4659_v51 = vpop.f32.mrf.mxu0 }
 0x67b   :  { %v4781_v36 = vadd.f32 %v4777_v19, %v4765_v50  ;;  %v4660_v37 = vadd.f32 %v4659_v51, %v4517_v8 }
 0x67c   :  { %v10701_v40 = vpop.f32.mrf.mxu0 }
 0x67d   :  { %11949 = vtanh.f32 %v4781_v36  ;;  %v4771_v43 = vadd.f32 %v4770_v13, %v4660_v37 }
 0x67e   :  { %v11944_v24 = vpop.eup %11943 }
 0x67f   :  { %v4789_v22 = vmul.f32 %v11944_v24, %v11944_v24  ;;  %v4782_v58 = vadd.f32 %v4777_v19, %v4771_v43 }
 0x681   :  { %v4794_v20 = vsub.f32 1.0, %v4789_v22  ;;  %11951 = vtanh.f32 %v4782_v58 }
 0x682   :  { %v11946_v35 = vpop.eup %11945 }
 0x683   :  { %v4799_v60 = vmul.f32 %v4794_v20, %v4753_v34  ;;  %v4790_v23 = vmul.f32 %v11946_v35, %v11946_v35 }
 0x685   :  { %v4795_v53 = vsub.f32 1.0, %v4790_v23  ;;  %v4804_v26 = vsel %vm1353_vm5, %v4799_v60, %v11946_v35 }
 0x686   :  { %v11948_v1 = vpop.eup %11947  ;;  %v14863_v40 = vand.u32 4294901760, %v4804_v26 }
 0x687   :  { %v4800_v30 = vmul.f32 %v4795_v53, %v4759_v57  ;;  %v4791_v21 = vmul.f32 %v11948_v1, %v11948_v1 }
 0x688   :  { %v14874_v20 = vsub.f32 %v4804_v26, %v14863_v40 }
 0x689   :  { %v4796_v44 = vsub.f32 1.0, %v4791_v21  ;;  %v4805_v5 = vsel %vm1354_vm15, %v4800_v30, %v11948_v1 }
 0x68a   :  { %v11950_v13 = vpop.eup %11949  ;;  %v4918_v35 = vand.u32 4294901760, %v14874_v20 }
 0x68b   :  { %v4801_v7 = vmul.f32 %v4796_v44, %v4765_v50  ;;  %v4792_v39 = vmul.f32 %v11950_v13, %v11950_v13 }
 0x68c   :  { %v4919_v53 = vsub.f32 %v14874_v20, %v4918_v35 }
 0x68d   :  { %v4797_v19 = vsub.f32 1.0, %v4792_v39  ;;  %v4806_v46 = vsel %vm1353_vm5, %v4801_v7, %v11950_v13 }
 0x68e   :  { %v11952_v34 = vpop.eup %11951  ;;  %v14902_v26 = vand.u32 4294901760, %v4806_v46  ;;  %v4920_v30 = vand.u32 4294901760, %v4919_v53 }
 0x68f   :  { %v4788_v8 = vmul.f32 %v11952_v34, %v11952_v34  ;;  %v4802_v51 = vmul.f32 %v4797_v19, %v4771_v43  ;;  %v14881_v43 = vand.u32 4294901760, %v4805_v5 }
 0x690   :  { %v14915_v21 = vsub.f32 %v4806_v46, %v14902_v26 }
 0x691   :  { %v4793_v36 = vsub.f32 1.0, %v4788_v8  ;;  %v4807_v37 = vsel %vm1354_vm15, %v4802_v51, %v11952_v34  ;;  %v14895_v23 = vsub.f32 %v4805_v5, %v14881_v43 }
 0x692   :  { %v14920_v44 = vand.u32 4294901760, %v4807_v37  ;;  %v4938_v13 = vand.u32 4294901760, %v14915_v21 }
 0x693   :  { %v4798_v57 = vmul.f32 %v4793_v36, %v4747_v56  ;;  %v4928_v1 = vand.u32 4294901760, %v14895_v23  ;;  %v14977_v36 = vld [vmem:[%s16638_s3] sm:$0xff] }
 0x694   :  { %v14934_v7 = vsub.f32 %v4807_v37, %v14920_v44  ;;  %v4939_v19 = vsub.f32 %v14915_v21, %v4938_v13 }
 0x695   :  { %v4803_v22 = vsel %vm1353_vm5, %v4798_v57, %v11944_v24  ;;  %v4929_v5 = vsub.f32 %v14895_v23, %v4928_v1 }
 0x696   :  { %v14867_v58 = vand.u32 4294901760, %v4803_v22  ;;  %v4948_v46 = vand.u32 4294901760, %v14934_v7  ;;  %v4940_v34 = vand.u32 4294901760, %v4939_v19 }
 0x697   :  { %v4930_v39 = vand.u32 4294901760, %v4929_v5 }
 0x698   :  { %v14870_v50 = vsub.f32 %v4803_v22, %v14867_v58  ;;  %10829 = vmatmul.mubr.f32.vlgmr.msra.gmra.mxu1 %v14867_v58  ;;  %v4949_v8 = vsub.f32 %v14934_v7, %v4948_v46  ;;  %v5665_v22 = vld [vmem:[#allocation2 + $0x250] sm:$0xff] }
 0x699   :  { %10891 = vmatpush3.msra.mxu1 %v14661_v28  ;;  %10831 = vmatprep.mubr.msk.f32.mxu1 %vm12002_vm0, %v14474_v9 }
 0x69a   :  { %10892 = vmatprep.subr.mxu1 %v14474_v9  ;;  %v4908_v56 = vand.u32 4294901760, %v14870_v50  ;;  %v4950_v51 = vand.u32 4294901760, %v4949_v8 }
 0x69b   :  { %10893 = vmatpush3.msra.mxu1 %v14666_v18 }
 0x69c   :  { %10894 = vmatprep.subr.mxu1 %v14474_v9  ;;  %10832 = vmatmul.mubr.f32.gmra.mxu1 %v14863_v40  ;;  %v4909_v24 = vsub.f32 %v14870_v50, %v4908_v56 }
 0x69d   :  { %10895 = vmatpush3.msra.mxu1 %v14674_v49  ;;  %10834 = vmatprep.mubr.msk.f32.mxu1 %vm12002_vm0, %v14474_v9 }
 0x69e   :  { %10896 = vmatprep.subr.mxu1 %v14474_v9  ;;  %v4910_v60 = vand.u32 4294901760, %v4909_v24  ;;  %v5664_v24 = vld [vmem:[#allocation2 + $0x248] sm:$0xff] }
 0x69f   :  { %10897 = vmatpush3.msra.mxu1 %v14685_v42  ;;  %v15205_v53 = vand.u32 4294901760, %v5664_v24 }
 0x6a0   :  { %10898 = vmatprep.subr.mxu1 %v14474_v9  ;;  %10782 = vmatmul.mubr.f32.vlgmr.msra.gmra.mxu0 %v4910_v60 }
 0x6a1   :  { %10835 = vmatmul.mubr.f32.gmra.mxu1 %v14881_v43  ;;  %10844 = vmatpush3.msra.mxu0 %v14664_v11 }
 0x6a2   :  { %10899 = vmatpush3.msra.mxu1 %v14697_v47  ;;  %10845 = vmatprep.subr.mxu0 %v14474_v9 }
 0x6a3   :  { %10900 = vmatprep.subr.mxu1 %v14474_v9  ;;  %10846 = vmatpush3.msra.mxu0 %v14672_v3 }
 0x6a4   :  { %10901 = vmatpush3.msra.mxu1 %v14704_v2  ;;  %10784 = vmatprep.mubr.msk.f32.mxu0 %vm12002_vm0, %v14474_v9 }
 0x6a5   :  { %10837 = vmatprep.mubr.msk.f32.mxu1 %vm12002_vm0, %v14474_v9  ;;  %10847 = vmatprep.subr.mxu0 %v14474_v9 }
 0x6a6   :  { %10902 = vmatprep.subr.mxu1 %v14474_v9  ;;  %10785 = vmatmul.mubr.f32.gmra.mxu0 %v4920_v30 }
 0x6a7   :  { %10838 = vmatmul.mubr.f32.gmra.mxu1 %v14902_v26  ;;  %10848 = vmatpush3.msra.mxu0 %v14683_v4 }
 0x6a8   :  { %10903 = vmatpush3.msra.mxu1 %v14717_v0  ;;  %10849 = vmatprep.subr.mxu0 %v14474_v9 }
 0x6a9   :  { %10904 = vmatprep.subr.mxu1 %v14474_v9  ;;  %10850 = vmatpush3.msra.mxu0 %v14694_v29 }
 0x6aa   :  { %10905 = vmatpush3.msra.mxu1 %v14727_v10  ;;  %10787 = vmatprep.mubr.msk.f32.mxu0 %vm12002_vm0, %v14474_v9 }
 0x6ab   :  { %10840 = vmatprep.mubr.msk.f32.mxu1 %vm12002_vm0, %v14474_v9  ;;  %10851 = vmatprep.subr.mxu0 %v14474_v9 }
 0x6ac   :  { %10906 = vmatprep.subr.mxu1 %v14474_v9  ;;  %10788 = vmatmul.mubr.f32.gmra.mxu0 %v4930_v39 }
 0x6ad   :  { %10841 = vmatmul.mubr.f32.gmra.mxu1 %v14920_v44  ;;  %10852 = vmatpush3.msra.mxu0 %v14708_v6 }
 0x6ae   :  { %10907 = vmatpush3.msra.mxu1 %v14742_v48  ;;  %10853 = vmatprep.subr.mxu0 %v14474_v9 }
 0x6af   :  { %10908 = vmatprep.subr.mxu1 %v14474_v9  ;;  %10854 = vmatpush3.msra.mxu0 %v14715_v38 }
 0x6b0   :  { %10909 = vmatpush3.msra.mxu1 %v14755_v14  ;;  %10790 = vmatprep.mubr.msk.f32.mxu0 %vm12002_vm0, %v14474_v9 }
 0x6b1   :  { %10855 = vmatprep.subr.mxu0 %v14474_v9  ;;  %10910 = vmatprep.subr.mxu1 %v14474_v9 }
 0x6b2   :  { %10791 = vmatmul.mubr.f32.gmra.mxu0 %v4940_v34  ;;  %10911 = vmatpush3.msra.mxu1 %v14763_v54 }
 0x6b3   :  { %10856 = vmatpush3.msra.mxu0 %v14725_v61  ;;  %10912 = vmatprep.subr.mxu1 %v14474_v9 }
 0x6b4   :  { %10857 = vmatprep.subr.mxu0 %v14474_v9  ;;  %10913 = vmatpush3.msra.mxu1 %v14777_v33 }
 0x6b5   :  { %10858 = vmatpush3.msra.mxu0 %v14740_v41  ;;  %10793 = vmatprep.mubr.msk.f32.mxu0 %vm12002_vm0, %v14474_v9 }
 0x6b6   :  { %10859 = vmatprep.subr.mxu0 %v14474_v9  ;;  %10914 = vmatprep.subr.mxu1 %v14474_v9 }
 0x6b7   :  { %10794 = vmatmul.mubr.f32.gmra.mxu0 %v4950_v51  ;;  %10915 = vmatpush3.msra.mxu1 %v14787_v12  ;;  %v5661_v51 = vld [vmem:[#allocation2 + $0x230] sm:$0xff] }
 0x6b8   :  { %10860 = vmatpush3.msra.mxu0 %v14752_v55  ;;  %10916 = vmatprep.subr.mxu1 %v14474_v9  ;;  %v16978_v9 = vand.u32 4294901760, %v14664_v11  ;;  %v16980_v11 = vand.u32 4294901760, %v14683_v4  ;;  %v16984_v4 = vand.u32 4294901760, %v14725_v61  ;;  %v16992_v61 = vand.u32 4294901760, %v14827_v59 }
 0x6b9   :  { %10861 = vmatprep.subr.mxu0 %v14977_v36  ;;  %10917 = vmatpush3.msra.mxu1 %v14802_v52 }
 0x6ba   :  { %10862 = vmatpush3.msra.mxu0 %v14767_v63  ;;  %10918 = vmatprep.subr.mxu1 %v14977_v36 }
 0x6bb   :  { %10863 = vmatprep.subr.mxu0 %v14977_v36  ;;  %10919 = vmatpush3.msra.mxu1 %v14815_v17 }
 0x6bc   :  { %10864 = vmatpush3.msra.mxu0 %v14775_v15  ;;  %10920 = vmatprep.subr.mxu1 %v14977_v36 }
 0x6bd   :  { %10865 = vmatprep.subr.mxu0 %v14977_v36  ;;  %10921 = vmatpush3.msra.mxu1 %v14823_v62 }
 0x6be   :  { %10866 = vmatpush3.msra.mxu0 %v14785_v45  ;;  %10922 = vmatprep.mubr.msk.f32.mxu1 %vm12002_vm0, %v14977_v36 }
 0x6bf   :  { %10867 = vmatprep.subr.mxu0 %v14977_v36  ;;  %10923 = vmatmul.mubr.f32.vlgmr.msra.gmra.mxu1 %v4908_v56  ;;  %v15192_v56 = vand.u32 4294901760, %v5665_v22 }
 0x6c0   :  { %10984 = vmatprep.subr.mxu1 %v14977_v36  ;;  %10868 = vmatpush3.msra.mxu0 %v14800_v31 }
 0x6c1   :  { %10985 = vmatpush3.msra.mxu1 %v14661_v28  ;;  %10869 = vmatprep.subr.mxu0 %v14977_v36  ;;  %v16979_v28 = vand.u32 4294901760, %v14672_v3  ;;  %v16982_v3 = vand.u32 4294901760, %v14708_v6  ;;  %v16989_v6 = vand.u32 4294901760, %v14785_v45 }
 0x6c2   :  { %10986 = vmatprep.subr.mxu1 %v14977_v36  ;;  %10870 = vmatpush3.msra.mxu0 %v14812_v27 }
 0x6c3   :  { %10925 = vmatprep.mubr.msk.f32.mxu1 %vm12002_vm0, %v14977_v36  ;;  %10987 = vmatpush3.msra.mxu1 %v14666_v18  ;;  %v16981_v18 = vand.u32 4294901760, %v14694_v29  ;;  %v16986_v29 = vand.u32 4294901760, %v14752_v55  ;;  %v5669_v55 = vld [vmem:[#allocation2 + $0x270] sm:$0xff] }
 0x6c4   :  { %10871 = vmatprep.subr.mxu0 %v14977_v36  ;;  %10926 = vmatmul.mubr.f32.gmra.mxu1 %v4918_v35 }
 0x6c5   :  { %10988 = vmatprep.subr.mxu1 %v14977_v36  ;;  %10872 = vmatpush3.msra.mxu0 %v14827_v59 }
 0x6c6   :  { %10989 = vmatpush3.msra.mxu1 %v14674_v49  ;;  %10873 = vmatprep.subr.mxu0 %v14977_v36  ;;  %v16983_v49 = vand.u32 4294901760, %v14715_v38  ;;  %v16990_v38 = vand.u32 4294901760, %v14800_v31 }
 0x6c7   :  { %10990 = vmatprep.subr.mxu1 %v14977_v36  ;;  %10874 = vmatpush3.msra.mxu0 %v14835_v25 }
 0x6c8   :  { %10875 = vmatprep.mubr.msk.f32.mxu0 %vm12002_vm0, %v14977_v36  ;;  %10928 = vmatprep.mubr.msk.f32.mxu1 %vm12002_vm0, %v14977_v36 }
 0x6c9   :  { %10991 = vmatpush3.msra.mxu1 %v14685_v42  ;;  %10876 = vmatmul.mubr.f32.vlgmr.msra.gmra.mxu0 %v14870_v50  ;;  %v16985_v42 = vand.u32 4294901760, %v14740_v41  ;;  %v5670_v41 = vld [vmem:[#allocation2 + $0x278] sm:$0xff] }
 0x6ca   :  { %10929 = vmatmul.mubr.f32.gmra.mxu1 %v4928_v1  ;;  %10937 = vmatprep.subr.mxu0 %v14977_v36  ;;  %v5663_v1 = vld [vmem:[#allocation2 + $0x240] sm:$0xff] }
 0x6cb   :  { %10992 = vmatprep.subr.mxu1 %v14977_v36  ;;  %10938 = vmatpush3.msra.mxu0 %v16978_v9  ;;  %v15215_v5 = vand.u32 4294901760, %v5663_v1 }
 0x6cc   :  { %10993 = vmatpush3.msra.mxu1 %v14697_v47  ;;  %10939 = vmatprep.subr.mxu0 %v14977_v36  ;;  %v16987_v47 = vand.u32 4294901760, %v14767_v63  ;;  %v5668_v63 = vld [vmem:[#allocation2 + $0x268] sm:$0xff] }
 0x6cd   :  { %10994 = vmatprep.subr.mxu1 %v14977_v36  ;;  %10878 = vmatprep.mubr.msk.f32.mxu0 %vm12002_vm0, %v14977_v36  ;;  %v15162_v45 = vand.u32 4294901760, %v5668_v63 }
 0x6ce   :  { %10931 = vmatprep.mubr.msk.f32.mxu1 %vm12002_vm0, %v14977_v36  ;;  %10940 = vmatpush3.msra.mxu0 %v16979_v28 }
 0x6cf   :  { %10995 = vmatpush3.msra.mxu1 %v14704_v2  ;;  %10879 = vmatmul.mubr.f32.gmra.mxu0 %v14874_v20  ;;  %v16988_v2 = vand.u32 4294901760, %v14775_v15 }
 0x6d0   :  { %10932 = vmatmul.mubr.f32.gmra.mxu1 %v4938_v13  ;;  %10941 = vmatprep.subr.mxu0 %v14977_v36 }
 0x6d1   :  { %10996 = vmatprep.subr.mxu1 %v14977_v36  ;;  %10942 = vmatpush3.msra.mxu0 %v16980_v11 }
 0x6d2   :  { %10997 = vmatpush3.msra.mxu1 %v14717_v0  ;;  %10943 = vmatprep.subr.mxu0 %v14977_v36  ;;  %v16991_v0 = vand.u32 4294901760, %v14812_v27  ;;  %v15171_v27 = vsub.f32 %v5668_v63, %v15162_v45 }
 0x6d3   :  { %10998 = vmatprep.subr.mxu1 %v14977_v36  ;;  %10881 = vmatprep.mubr.msk.f32.mxu0 %vm12002_vm0, %v14977_v36 }
 0x6d4   :  { %10934 = vmatprep.mubr.msk.f32.mxu1 %vm12002_vm0, %v14977_v36  ;;  %10944 = vmatpush3.msra.mxu0 %v16981_v18  ;;  %v16793_v37 = vand.u32 4294901760, %v15171_v27 }
 0x6d5   :  { %10999 = vmatpush3.msra.mxu1 %v14727_v10  ;;  %10882 = vmatmul.mubr.f32.gmra.mxu0 %v14895_v23  ;;  %v16993_v10 = vand.u32 4294901760, %v14835_v25  ;;  %v15203_v23 = vsub.f32 %v5665_v22, %v15192_v56 }
 0x6d6   :  { %10935 = vmatmul.mubr.f32.gmra.mxu1 %v4948_v46  ;;  %10945 = vmatprep.subr.mxu0 %v14977_v36  ;;  %v5820_v50 = vsub.f32 %v15171_v27, %v16793_v37  ;;  %v15228_v46 = vsub.f32 %v5663_v1, %v15215_v5 }
 0x6d7   :  { %11000 = vmatprep.subr.mxu1 %v14977_v36  ;;  %10946 = vmatpush3.msra.mxu0 %v16982_v3  ;;  %v15243_v3 = vand.u32 4294901760, %v5661_v51 }
 0x6d8   :  { %11001 = vmatpush3.msra.mxu1 %v14742_v48  ;;  %10947 = vmatprep.subr.mxu0 %v14977_v36  ;;  %v15149_v48 = vand.u32 4294901760, %v5670_v41  ;;  %v5821_v35 = vand.u32 4294901760, %v5820_v50  ;;  %v16788_v11 = vand.u32 4294901760, %v15228_v46 }
 0x6d9   :  { %11002 = vmatprep.subr.mxu1 %v14977_v36  ;;  %10884 = vmatprep.mubr.msk.f32.mxu0 %vm12002_vm0, %v14977_v36 }
 0x6da   :  { %10948 = vmatpush3.msra.mxu0 %v16983_v49  ;;  %11003 = vmatpush3.msra.mxu1 %v14755_v14  ;;  %v15152_v14 = vsub.f32 %v5670_v41, %v15149_v48  ;;  %v5660_v49 = vld [vmem:[#allocation2 + $0x228] sm:$0xff] }
 0x6db   :  { %10885 = vmatmul.mubr.f32.gmra.mxu0 %v14915_v21  ;;  %10949 = vmatprep.subr.mxu0 %v14977_v36  ;;  %v16790_v21 = vand.u32 4294901760, %v15203_v23 }
 0x6dc   :  { %11004 = vmatprep.subr.mxu1 %v14977_v36  ;;  %10950 = vmatpush3.msra.mxu0 %v16984_v4  ;;  %v16795_v15 = vand.u32 4294901760, %v15152_v14 }
 0x6dd   :  { %11005 = vmatpush3.msra.mxu1 %v14763_v54  ;;  %10951 = vmatprep.subr.mxu0 %v14977_v36  ;;  %v15154_v54 = vand.u32 4294901760, %v5669_v55  ;;  %v5841_v39 = vsub.f32 %v15203_v23, %v16790_v21 }
 0x6de   :  { %11006 = vmatprep.subr.mxu1 %v14977_v36  ;;  %10887 = vmatprep.mubr.msk.f32.mxu0 %vm12002_vm0, %v14977_v36  ;;  %v5806_v31 = vsub.f32 %v15152_v14, %v16795_v15 }
 0x6df   :  { %10952 = vmatpush3.msra.mxu0 %v16985_v42  ;;  %11007 = vmatpush3.msra.mxu1 %v14777_v33  ;;  %v15160_v33 = vsub.f32 %v5669_v55, %v15154_v54  ;;  %v5842_v9 = vand.u32 4294901760, %v5841_v39  ;;  %v5855_v42 = vsub.f32 %v15228_v46, %v16788_v11  ;;  %v5658_v55 = vld [vmem:[#allocation2 + $0x218] sm:$0xff] }
 0x6e0   :  { %10888 = vmatmul.mubr.f32.gmra.mxu0 %v14934_v7  ;;  %10953 = vmatprep.subr.mxu0 %v14977_v36  ;;  %v5807_v59 = vand.u32 4294901760, %v5806_v31  ;;  %v5662_v7 = vld [vmem:[#allocation2 + $0x238] sm:$0xff] }
 0x6e1   :  { %11008 = vmatprep.subr.mxu1 %v14977_v36  ;;  %10954 = vmatpush3.msra.mxu0 %v16986_v29  ;;  %v15230_v34 = vand.u32 4294901760, %v5662_v7 }
 0x6e2   :  { %11009 = vmatpush3.msra.mxu1 %v14787_v12  ;;  %10955 = vmatprep.subr.mxu0 %v14977_v36  ;;  %v5667_v12 = vld [vmem:[#allocation2 + $0x260] sm:$0xff] }
 0x6e3   :  { %11010 = vmatprep.subr.mxu1 %v14977_v36  ;;  %10956 = vmatpush3.msra.mxu0 %v16987_v47  ;;  %v15240_v18 = vsub.f32 %v5662_v7, %v15230_v34  ;;  %v15251_v47 = vand.u32 4294901760, %v5660_v49 }
 0x6e4   :  { %11011 = vmatpush3.msra.mxu1 %v14802_v52  ;;  %10957 = vmatprep.subr.mxu0 %v14977_v36  ;;  %v16794_v52 = vand.u32 4294901760, %v15160_v33 }
 0x6e5   :  { %11012 = vmatprep.subr.mxu1 %v14977_v36  ;;  %10958 = vmatpush3.msra.mxu0 %v16988_v2  ;;  %v16787_v29 = vand.u32 4294901760, %v15240_v18  ;;  %v15255_v2 = vsub.f32 %v5661_v51, %v15243_v3 }
 0x6e6   :  { %11013 = vmatpush3.msra.mxu1 %v14815_v17  ;;  %10959 = vmatprep.subr.mxu0 %v14977_v36  ;;  %v15173_v17 = vand.u32 4294901760, %v5667_v12  ;;  %v5813_v25 = vsub.f32 %v15160_v33, %v16794_v52 }
 0x6e7   :  { %11014 = vmatprep.subr.mxu1 %v14977_v36  ;;  %10960 = vmatpush3.msra.mxu0 %v16989_v6  ;;  %v5659_v6 = vld [vmem:[#allocation2 + $0x220] sm:$0xff]  ;;  %v16786_v41 = vand.u32 4294901760, %v15255_v2 }
 0x6e8   :  { %11015 = vmatpush3.msra.mxu1 %v14823_v62  ;;  %11016 = vmatprep.mubr.msk.f32.mxu1 %vm12002_vm0, %v14977_v36  ;;  %v5666_v62 = vld [vmem:[#allocation2 + $0x258] sm:$0xff]  ;;  %v15182_v57 = vsub.f32 %v5667_v12, %v15173_v17 }
 0x6e9   :  { %10961 = vmatprep.subr.mxu0 %v14977_v36  ;;  %11017 = vmatmul.mubr.f32.vlgmr.msra.gmra.mxu1 %v14867_v58 }
 0x6ea   :  { %10962 = vmatpush3.msra.mxu0 %v16990_v38  ;;  %11019 = vmatprep.mubr.msk.f32.mxu1 %vm12002_vm0, %v14977_v36  ;;  %v16792_v20 = vand.u32 4294901760, %v15182_v57  ;;  %v5856_v38 = vand.u32 4294901760, %v5855_v42 }
 0x6eb   :  { %10963 = vmatprep.subr.mxu0 %v14977_v36  ;;  %10969 = vmatprep.mubr.msk.f32.mxu0 %vm12002_vm0, %v14977_v36 }
 0x6ec   :  { %10964 = vmatpush3.msra.mxu0 %v16991_v0  ;;  %11078 = vmatprep.subr.mxu1 %v14977_v36  ;;  %v5827_v60 = vsub.f32 %v15182_v57, %v16792_v20  ;;  %v5862_v0 = vsub.f32 %v15240_v18, %v16787_v29 }
 0x6ed   :  { %10965 = vmatprep.subr.mxu0 %v14977_v36  ;;  %11020 = vmatmul.mubr.f32.gmra.mxu1 %v14863_v40 }
 0x6ee   :  { %10966 = vmatpush3.msra.mxu0 %v16992_v61  ;;  %11022 = vmatprep.mubr.msk.f32.mxu1 %vm12002_vm0, %v14977_v36  ;;  %v5828_v30 = vand.u32 4294901760, %v5827_v60  ;;  %v15263_v61 = vsub.f32 %v5660_v49, %v15251_v47  ;;  %v5863_v63 = vand.u32 4294901760, %v5862_v0  ;;  %v5656_v60 = vld [vmem:[#allocation2 + $0x208] sm:$0xff] }
 0x6ef   :  { %10967 = vmatprep.subr.mxu0 %v14977_v36  ;;  %11079 = vmatpush3.msra.mxu1 %v5807_v59  ;;  %v5869_v59 = vsub.f32 %v15255_v2, %v16786_v41  ;;  %v15303_v39 = vand.u32 4294901760, %v5656_v60 }
 0x6f0   :  { %10968 = vmatpush3.msra.mxu0 %v16993_v10  ;;  %11080 = vmatprep.subr.mxu1 %v14977_v36  ;;  %v15265_v10 = vand.u32 4294901760, %v5659_v6  ;;  %v16785_v12 = vand.u32 4294901760, %v15263_v61 }
 0x6f1   :  { %10970 = vmatmul.mubr.f32.vlgmr.msra.gmra.mxu0 %v14867_v58  ;;  %11023 = vmatmul.mubr.f32.gmra.mxu1 %v14881_v43  ;;  %v5814_v58 = vand.u32 4294901760, %v5813_v25  ;;  %v5657_v25 = vld [vmem:[#allocation2 + $0x210] sm:$0xff] }
 0x6f2   :  { %10972 = vmatprep.mubr.msk.f32.mxu0 %vm12002_vm0, %v14977_v36  ;;  %11025 = vmatprep.mubr.msk.f32.mxu1 %vm12002_vm0, %v14977_v36  ;;  %v15273_v31 = vsub.f32 %v5659_v6, %v15265_v10  ;;  %v5876_v22 = vsub.f32 %v15263_v61, %v16785_v12 }
 0x6f3   :  { %11031 = vmatprep.subr.mxu0 %v14977_v36  ;;  %11081 = vmatpush3.msra.mxu1 %v5814_v58 }
 0x6f4   :  { %11032 = vmatpush3.msra.mxu0 %v15149_v48  ;;  %11082 = vmatprep.subr.mxu1 %v14977_v36  ;;  %v16784_v58 = vand.u32 4294901760, %v15273_v31  ;;  %v5877_v1 = vand.u32 4294901760, %v5876_v22 }
 0x6f5   :  { %10973 = vmatmul.mubr.f32.gmra.mxu0 %v14863_v40  ;;  %11026 = vmatmul.mubr.f32.gmra.mxu1 %v14902_v26  ;;  %v15185_v40 = vand.u32 4294901760, %v5666_v62 }
 0x6f6   :  { %10975 = vmatprep.mubr.msk.f32.mxu0 %vm12002_vm0, %v14977_v36  ;;  %11028 = vmatprep.mubr.msk.f32.mxu1 %vm12002_vm0, %v14977_v36 }
 0x6f7   :  { %11033 = vmatprep.subr.mxu0 %v14977_v36  ;;  %11083 = vmatpush3.msra.mxu1 %v5821_v35  ;;  %v5870_v35 = vand.u32 4294901760, %v5869_v59 }
 0x6f8   :  { %11034 = vmatpush3.msra.mxu0 %v15154_v54  ;;  %11084 = vmatprep.subr.mxu1 %v14977_v36 }
 0x6f9   :  { %10976 = vmatmul.mubr.f32.gmra.mxu0 %v14881_v43  ;;  %11029 = vmatmul.mubr.f32.gmra.mxu1 %v14920_v44  ;;  %v15196_v43 = vsub.f32 %v5666_v62, %v15185_v40  ;;  %v15275_v62 = vand.u32 4294901760, %v5658_v55 }
 0x6fa   :  { %10978 = vmatprep.mubr.msk.f32.mxu0 %vm12002_vm0, %v14977_v36  ;;  %11110 = vmatprep.mubr.msk.f32.mxu1 %vm12002_vm0, %v14977_v36 }
 0x6fb   :  { %11035 = vmatprep.subr.mxu0 %v14977_v36  ;;  %11085 = vmatpush3.msra.mxu1 %v5828_v30  ;;  %v15288_v50 = vsub.f32 %v5658_v55, %v15275_v62  ;;  %v5883_v30 = vsub.f32 %v15273_v31, %v16784_v58 }
 0x6fc   :  { %11036 = vmatpush3.msra.mxu0 %v15162_v45  ;;  %11086 = vmatprep.subr.mxu1 %v14977_v36 }
 0x6fd   :  { %10979 = vmatmul.mubr.f32.gmra.mxu0 %v14902_v26  ;;  %11037 = vmatprep.subr.mxu0 %v14977_v36  ;;  %v16791_v26 = vand.u32 4294901760, %v15196_v43  ;;  %v5884_v51 = vand.u32 4294901760, %v5883_v30 }
 0x6fe   :  { %10981 = vmatprep.mubr.msk.f32.mxu0 %vm12002_vm0, %v14977_v36  ;;  %11038 = vmatpush3.msra.mxu0 %v15173_v17 }
 0x6ff   :  { %11039 = vmatprep.subr.mxu0 %v14977_v36  ;;  %v5834_v13 = vsub.f32 %v15196_v43, %v16791_v26 }
 0x700   :  { %11040 = vmatpush3.msra.mxu0 %v15185_v40 }
 0x701   :  { %10982 = vmatmul.mubr.f32.gmra.mxu0 %v14920_v44  ;;  %11041 = vmatprep.subr.mxu0 %v14977_v36  ;;  %v15213_v44 = vsub.f32 %v5664_v24, %v15205_v53  ;;  %v5835_v8 = vand.u32 4294901760, %v5834_v13  ;;  %v15290_v24 = vand.u32 4294901760, %v5657_v25  ;;  %v16783_v13 = vand.u32 4294901760, %v15288_v50 }
 0x702   :  { %11063 = vmatprep.mubr.msk.f32.mxu0 %vm12002_vm0, %v14977_v36  ;;  %11042 = vmatpush3.msra.mxu0 %v15192_v56 }
 0x703   :  { %11043 = vmatprep.subr.mxu0 %v14977_v36  ;;  %v16789_v19 = vand.u32 4294901760, %v15213_v44  ;;  %11087 = vmatpush3.msra.mxu1 %v5835_v8  ;;  %v15300_v7 = vsub.f32 %v5657_v25, %v15290_v24  ;;  %v5655_v8 = vld [vmem:[#allocation2 + $0x200] sm:$0xff] }
 0x704   :  { %11044 = vmatpush3.msra.mxu0 %v15205_v53  ;;  %11088 = vmatprep.subr.mxu1 %v14977_v36  ;;  %v15311_v49 = vand.u32 4294901760, %v5655_v8 }
 0x705   :  { %11045 = vmatprep.subr.mxu0 %v14977_v36  ;;  %v5848_v28 = vsub.f32 %v15213_v44, %v16789_v19  ;;  %11089 = vmatpush3.msra.mxu1 %v5842_v9  ;;  %v5890_v9 = vsub.f32 %v15288_v50, %v16783_v13 }
 0x706   :  { %11046 = vmatpush3.msra.mxu0 %v15215_v5  ;;  %11090 = vmatprep.subr.mxu1 %v14977_v36 }
 0x707   :  { %11047 = vmatprep.subr.mxu0 %v14977_v36  ;;  %v5849_v4 = vand.u32 4294901760, %v5848_v28  ;;  %v16782_v28 = vand.u32 4294901760, %v15300_v7  ;;  %v5891_v42 = vand.u32 4294901760, %v5890_v9 }
 0x708   :  { %11048 = vmatpush3.msra.mxu0 %v15230_v34 }
 0x709   :  { %11049 = vmatprep.subr.mxu0 %v14977_v36  ;;  %11091 = vmatpush3.msra.mxu1 %v5849_v4  ;;  %v15315_v4 = vsub.f32 %v5656_v60, %v15303_v39  ;;  %v5897_v6 = vsub.f32 %v15300_v7, %v16782_v28 }
 0x70a   :  { %11050 = vmatpush3.msra.mxu0 %v15243_v3  ;;  %11092 = vmatprep.subr.mxu1 %v14977_v36 }
 0x70b   :  { %11051 = vmatprep.subr.mxu0 %v14977_v36  ;;  %11093 = vmatpush3.msra.mxu1 %v5856_v38  ;;  %16994 = vst [vmem:[#allocation10_spill] sm:$0xff] %v15315_v4  ;;  %v15323_v38 = vsub.f32 %v5655_v8, %v15311_v49  ;;  %v16781_v0 = vand.u32 4294901760, %v15315_v4  ;;  %v5898_v55 = vand.u32 4294901760, %v5897_v6 }
 0x70c   :  { %11052 = vmatpush3.msra.mxu0 %v15251_v47  ;;  %11094 = vmatprep.subr.mxu1 %v14977_v36 }
 0x70d   :  { %11053 = vmatprep.subr.mxu0 %v14977_v36  ;;  %11095 = vmatpush3.msra.mxu1 %v5863_v63  ;;  %16995 = vst [vmem:[#allocation13_spill] sm:$0xff] %v15323_v38  ;;  %v16780_v63 = vand.u32 4294901760, %v15323_v38  ;;  %v5904_v59 = vsub.f32 %v15315_v4, %v16781_v0 }
 0x70e   :  { %11054 = vmatpush3.msra.mxu0 %v15265_v10  ;;  %11096 = vmatprep.subr.mxu1 %v14977_v36 }
 0x70f   :  { %11055 = vmatprep.subr.mxu0 %v14977_v36  ;;  %11097 = vmatpush3.msra.mxu1 %v5870_v35  ;;  %v5911_v25 = vsub.f32 %v15323_v38, %v16780_v63  ;;  %v5905_v22 = vand.u32 4294901760, %v5904_v59 }
 0x710   :  { %11056 = vmatpush3.msra.mxu0 %v15275_v62  ;;  %11098 = vmatprep.subr.mxu1 %v14977_v36 }
 0x711   :  { %11057 = vmatprep.subr.mxu0 %v14977_v36  ;;  %11099 = vmatpush3.msra.mxu1 %v5877_v1  ;;  %v5912_v35 = vand.u32 4294901760, %v5911_v25 }
 0x712   :  { %11058 = vmatpush3.msra.mxu0 %v15290_v24  ;;  %11100 = vmatprep.subr.mxu1 %v14977_v36 }
 0x713   :  { %11059 = vmatprep.subr.mxu0 %v14977_v36  ;;  %11101 = vmatpush3.msra.mxu1 %v5884_v51 }
 0x714   :  { %11060 = vmatpush3.msra.mxu0 %v15303_v39  ;;  %11102 = vmatprep.subr.mxu1 %v14977_v36 }
 0x715   :  { %11061 = vmatprep.subr.mxu0 %v14977_v36  ;;  %11103 = vmatpush3.msra.mxu1 %v5891_v42 }
 0x716   :  { %11062 = vmatpush3.msra.mxu0 %v15311_v49  ;;  %11104 = vmatprep.subr.mxu1 %v14977_v36 }
 0x717   :  { %11125 = vmatprep.subr.mxu0 %v14977_v36  ;;  %11105 = vmatpush3.msra.mxu1 %v5898_v55 }
 0x718   :  { %11106 = vmatprep.subr.mxu1 %v14977_v36 }
 0x719   :  { %11107 = vmatpush3.msra.mxu1 %v5905_v22 }
 0x71a   :  { %11108 = vmatprep.subr.mxu1 %v14977_v36 }
 0x71b   :  { %11109 = vmatpush3.msra.mxu1 %v5912_v35 }
 0x71c   :  { %11172 = vmatprep.subr.mxu1 %v14977_v36 }
 0x758   :  { %v5103_v60 = vpop.f32.mrf.mxu1 }
 0x75a   :  { %v10830_v1 = vpop.f32.mrf.mxu1 }
 0x75c   :  { %v5109_v30 = vpop.f32.mrf.mxu1 }
 0x75e   :  { %v10833_v8 = vpop.f32.mrf.mxu1 }
 0x760   :  { %v4912_v51 = vpop.f32.mrf.mxu0 }
 0x761   :  { %v5104_v9 = vadd.f32 %v5103_v60, %v4912_v51  ;;  %v5115_v42 = vpop.f32.mrf.mxu1 }
 0x762   :  { %v10783_v6 = vpop.f32.mrf.mxu0 }
 0x763   :  { %v10836_v63 = vpop.f32.mrf.mxu1 }
 0x766   :  { %v4922_v55 = vpop.f32.mrf.mxu0 }
 0x767   :  { %v5110_v59 = vadd.f32 %v5109_v30, %v4922_v55  ;;  %v5121_v0 = vpop.f32.mrf.mxu1 }
 0x768   :  { %v10786_v28 = vpop.f32.mrf.mxu0 }
 0x769   :  { %v10839_v25 = vpop.f32.mrf.mxu1 }
 0x76c   :  { %v4932_v22 = vpop.f32.mrf.mxu0 }
 0x76d   :  { %v5116_v13 = vadd.f32 %v5115_v42, %v4932_v22  ;;  %v5127_v58 = vpop.f32.mrf.mxu1 }
 0x76e   :  { %v10789_v35 = vpop.f32.mrf.mxu0 }
 0x76f   :  { %v10842_v12 = vpop.f32.mrf.mxu1 }
 0x772   :  { %v4942_v41 = vpop.f32.mrf.mxu0 }
 0x773   :  { %v5122_v29 = vadd.f32 %v5121_v0, %v4942_v41 }
 0x774   :  { %v10792_v1 = vpop.f32.mrf.mxu0 }
 0x777   :  { %v4952_v11 = vpop.f32.mrf.mxu0 }
 0x778   :  { %v5128_v8 = vadd.f32 %v5127_v58, %v4952_v11 }
 0x779   :  { %v10795_v19 = vpop.f32.mrf.mxu0 }
 0x77f   :  { %v5348_v60 = vpop.f32.mrf.mxu1 }
 0x781   :  { %v10924_v51 = vpop.f32.mrf.mxu1 }
 0x784   :  { %v5356_v6 = vpop.f32.mrf.mxu1 }
 0x786   :  { %v10927_v63 = vpop.f32.mrf.mxu1 }
 0x789   :  { %v5231_v21 = vpop.f32.mrf.mxu0 }
 0x78a   :  { %v5364_v30 = vpop.f32.mrf.mxu1  ;;  %v5232_v37 = vadd.f32 %v5231_v21, %v5104_v9 }
 0x78b   :  { %v10877_v55 = vpop.f32.mrf.mxu0 }
 0x78c   :  { %v10930_v28 = vpop.f32.mrf.mxu1  ;;  %v5349_v55 = vadd.f32 %v5348_v60, %v5232_v37  ;;  %v16998_v37 = vld [vmem:[#allocation12_spill] sm:$0xff] }
 0x78d   :  { %v16996_v28 = vld [vmem:[#allocation5_spill] sm:$0xff] }
 0x78e   :  { %v5645_v32 = vsub.s32 6, %v16996_v28 }
 0x78f   :  { %v5238_v25 = vpop.f32.mrf.mxu0 }
 0x790   :  { %v5372_v26 = vpop.f32.mrf.mxu1  ;;  %v5239_v15 = vadd.f32 %v5238_v25, %v5110_v59 }
 0x791   :  { %v10880_v42 = vpop.f32.mrf.mxu0 }
 0x792   :  { %v10933_v22 = vpop.f32.mrf.mxu1  ;;  %v5357_v9 = vadd.f32 %v5356_v6, %v5239_v15 }
 0x795   :  { %v5245_v35 = vpop.f32.mrf.mxu0 }
 0x796   :  { %v5380_v12 = vpop.f32.mrf.mxu1 }
 0x797   :  { %v10883_v20 = vpop.f32.mrf.mxu0 }
 0x798   :  { %v10936_v41 = vpop.f32.mrf.mxu1  ;;  %v5246_v20 = vadd.f32 %v5245_v35, %v5116_v13 }
 0x79b   :  { %v5252_v0 = vpop.f32.mrf.mxu0 }
 0x79d   :  { %v10886_v1 = vpop.f32.mrf.mxu0 }
 0x79e   :  { %v15345_v1 = vld [vmem:[%s16637_s2] sm:$0xff] }
 0x79f   :  { %16997 = vst [vmem:[#allocation6_spill] sm:$0xff] %v15345_v1  ;;  %v5646_v21 = vrot.slane %v15345_v1, %v5645_v32 }
 0x7a0   :  { %v5259_v11 = vpop.f32.mrf.mxu0 }
 0x7a1   :  { %v5260_v6 = vadd.f32 %v5259_v11, %v5128_v8  ;;  %v5648_v1 = vmul.f32 0.0, %v5646_v21  ;;  %v17002_v11 = vld [vmem:[#allocation11_spill] sm:$0xff] }
 0x7a2   :  { %v10889_v19 = vpop.f32.mrf.mxu0 }
 0x7a9   :  { %v5610_v58 = vpop.f32.mrf.mxu1 }
 0x7ab   :  { %v11018_v51 = vpop.f32.mrf.mxu1 }
 0x7ad   :  { %v5616_v63 = vpop.f32.mrf.mxu1 }
 0x7af   :  { %v11021_v52 = vpop.f32.mrf.mxu1 }
 0x7b1   :  { %v5499_v16 = vpop.f32.mrf.mxu0  ;;  %v5622_v42 = vpop.f32.mrf.mxu1 }
 0x7b2   :  { %v5500_v22 = vadd.f32 %v5499_v16, %v5349_v55  ;;  %v5253_v16 = vadd.f32 %v5252_v0, %v5122_v29 }
 0x7b3   :  { %v10971_v38 = vpop.f32.mrf.mxu0  ;;  %v11024_v4 = vpop.f32.mrf.mxu1 }
 0x7b4   :  { %v5611_v41 = vadd.f32 %v5610_v58, %v5500_v22  ;;  %v5365_v4 = vadd.f32 %v5364_v30, %v5246_v20  ;;  %v17000_v22 = vld [vmem:[#allocation7_spill] sm:$0xff]  ;;  %v5373_v30 = vadd.f32 %v5372_v26, %v5253_v16  ;;  %v5381_v26 = vadd.f32 %v5380_v12, %v5260_v6  ;;  %v17004_v16 = vld [vmem:[#allocation8_spill] sm:$0xff] }
 0x7b5   :  { %v5505_v52 = vpop.f32.mrf.mxu0  ;;  %v5628_v59 = vpop.f32.mrf.mxu1 }
 0x7b6   :  { %v5638_v60 = vadd.f32 %v5611_v41, %v16998_v37  ;;  %v5506_v25 = vadd.f32 %v5505_v52, %v5357_v9 }
 0x7b7   :  { %v10974_v19 = vpop.f32.mrf.mxu0  ;;  %v11027_v51 = vpop.f32.mrf.mxu1 }
 0x7b8   :  { %v15349_v38 = vadd.f32 %v5646_v21, %v5638_v60  ;;  %v5617_v13 = vadd.f32 %v5616_v63, %v5506_v25 }
 0x7b9   :  { %v5511_v35 = vpop.f32.mrf.mxu0  ;;  %v5634_v58 = vpop.f32.mrf.mxu1 }
 0x7ba   :  { %16999 = vst [vmem:[#allocation12_spill] sm:$0xff] %v15349_v38  ;;  %v15352_v55 = vand.u32 4294901760, %v15349_v38  ;;  %v5639_v32 = vadd.f32 %v5617_v13, %v17000_v22  ;;  %v5512_v15 = vadd.f32 %v5511_v35, %v5365_v4 }
 0x7bb   :  { %v10977_v28 = vpop.f32.mrf.mxu0  ;;  %v11030_v41 = vpop.f32.mrf.mxu1 }
 0x7bc   :  { %v15357_v9 = vsub.f32 %v15349_v38, %v15352_v55  ;;  %v15359_v29 = vadd.f32 %v5646_v21, %v5639_v32  ;;  %v5623_v0 = vadd.f32 %v5622_v42, %v5512_v15  ;;  %11111 = vmatmul.mubr.f32.vlgmr.msra.gmra.mxu1 %v15352_v55 }
 0x7bd   :  { %11173 = vmatpush3.msra.mxu1 %v15149_v48  ;;  %v5517_v63 = vpop.f32.mrf.mxu0  ;;  %11113 = vmatprep.mubr.msk.f32.mxu1 %vm12002_vm0, %v14977_v36 }
 0x7be   :  { %17001 = vst [vmem:[#allocation7_spill] sm:$0xff] %v15359_v29  ;;  %v5754_v8 = vand.u32 4294901760, %v15357_v9  ;;  %v5640_v28 = vadd.f32 %v5623_v0, %v17002_v11  ;;  %v5518_v20 = vadd.f32 %v5517_v63, %v5373_v30  ;;  %11174 = vmatprep.subr.mxu1 %v14977_v36  ;;  %v15369_v52 = vand.u32 4294901760, %v15359_v29  ;;  %v17006_v0 = vld [vmem:[#allocation9_spill] sm:$0xff] }
 0x7bf   :  { %11175 = vmatpush3.msra.mxu1 %v15154_v54  ;;  %v10980_v42 = vpop.f32.mrf.mxu0 }
 0x7c0   :  { %v5755_v37 = vsub.f32 %v15357_v9, %v5754_v8  ;;  %v15375_v60 = vadd.f32 %v5648_v1, %v5640_v28  ;;  %v5629_v25 = vadd.f32 %v5628_v59, %v5518_v20  ;;  %11176 = vmatprep.subr.mxu1 %v14977_v36  ;;  %11114 = vmatmul.mubr.f32.gmra.mxu1 %v15369_v52 }
 0x7c1   :  { %11177 = vmatpush3.msra.mxu1 %v15162_v45  ;;  %v5523_v19 = vpop.f32.mrf.mxu0  ;;  %11116 = vmatprep.mubr.msk.f32.mxu1 %vm12002_vm0, %v14977_v36  ;;  %v15384_v12 = vsub.f32 %v15359_v29, %v15369_v52 }
 0x7c2   :  { %17003 = vst [vmem:[#allocation11_spill] sm:$0xff] %v15375_v60  ;;  %v5756_v51 = vand.u32 4294901760, %v5755_v37  ;;  %v5641_v13 = vadd.f32 %v5629_v25, %v17004_v16  ;;  %v5524_v4 = vadd.f32 %v5523_v19, %v5381_v26  ;;  %11178 = vmatprep.subr.mxu1 %v14977_v36  ;;  %v15389_v59 = vand.u32 4294901760, %v15375_v60 }
 0x7c3   :  { %11179 = vmatpush3.msra.mxu1 %v15173_v17  ;;  %v10983_v35 = vpop.f32.mrf.mxu0  ;;  %v5764_v22 = vand.u32 4294901760, %v15384_v12 }
 0x7c4   :  { %v15393_v32 = vadd.f32 %v5646_v21, %v5641_v13  ;;  %v5635_v15 = vadd.f32 %v5634_v58, %v5524_v4  ;;  %11180 = vmatprep.subr.mxu1 %v14977_v36  ;;  %11064 = vmatmul.mubr.f32.vlgmr.msra.gmra.mxu0 %v5756_v51  ;;  %v15398_v6 = vsub.f32 %v15375_v60, %v15389_v59 }
 0x7c5   :  { %11117 = vmatmul.mubr.f32.gmra.mxu1 %v15389_v59  ;;  %11126 = vmatpush3.msra.mxu0 %v15152_v14  ;;  %v5765_v41 = vsub.f32 %v15384_v12, %v5764_v22 }
 0x7c6   :  { %17005 = vst [vmem:[#allocation8_spill] sm:$0xff] %v15393_v32  ;;  %v5642_v30 = vadd.f32 %v5635_v15, %v17006_v0  ;;  %11181 = vmatpush3.msra.mxu1 %v15185_v40  ;;  %11127 = vmatprep.subr.mxu0 %v14977_v36  ;;  %v15409_v21 = vand.u32 4294901760, %v15393_v32  ;;  %v5774_v58 = vand.u32 4294901760, %v15398_v6 }
 0x7c7   :  { %11182 = vmatprep.subr.mxu1 %v14977_v36  ;;  %11128 = vmatpush3.msra.mxu0 %v15160_v33  ;;  %v5766_v63 = vand.u32 4294901760, %v5765_v41 }
 0x7c8   :  { %v15414_v11 = vadd.f32 %v5648_v1, %v5642_v30  ;;  %11183 = vmatpush3.msra.mxu1 %v15192_v56  ;;  %11066 = vmatprep.mubr.msk.f32.mxu0 %vm12002_vm0, %v14977_v36  ;;  %v5775_v28 = vsub.f32 %v15398_v6, %v5774_v58  ;;  %v15424_v20 = vsub.f32 %v15393_v32, %v15409_v21 }
 0x7c9   :  { %11119 = vmatprep.mubr.msk.f32.mxu1 %vm12002_vm0, %v14977_v36  ;;  %11129 = vmatprep.subr.mxu0 %v14977_v36 }
 0x7ca   :  { %17007 = vst [vmem:[#allocation9_spill] sm:$0xff] %v15414_v11  ;;  %11184 = vmatprep.subr.mxu1 %v14977_v36  ;;  %11067 = vmatmul.mubr.f32.gmra.mxu0 %v5766_v63  ;;  %v15431_v1 = vand.u32 4294901760, %v15414_v11  ;;  %v5784_v42 = vand.u32 4294901760, %v15424_v20  ;;  %v5776_v26 = vand.u32 4294901760, %v5775_v28 }
 0x7cb   :  { %11120 = vmatmul.mubr.f32.gmra.mxu1 %v15409_v21  ;;  %11130 = vmatpush3.msra.mxu0 %v15171_v27 }
 0x7cc   :  { %11185 = vmatpush3.msra.mxu1 %v15205_v53  ;;  %11131 = vmatprep.subr.mxu0 %v14977_v36  ;;  %v15440_v37 = vsub.f32 %v15414_v11, %v15431_v1  ;;  %v5785_v25 = vsub.f32 %v15424_v20, %v5784_v42 }
 0x7cd   :  { %11186 = vmatprep.subr.mxu1 %v14977_v36  ;;  %11132 = vmatpush3.msra.mxu0 %v15182_v57 }
 0x7ce   :  { %11187 = vmatpush3.msra.mxu1 %v15215_v5  ;;  %11069 = vmatprep.mubr.msk.f32.mxu0 %vm12002_vm0, %v14977_v36  ;;  %v5794_v19 = vand.u32 4294901760, %v15440_v37  ;;  %v5786_v51 = vand.u32 4294901760, %v5785_v25 }
 0x7cf   :  { %11122 = vmatprep.mubr.msk.f32.mxu1 %vm12002_vm0, %v14977_v36  ;;  %11133 = vmatprep.subr.mxu0 %v14977_v36 }
 0x7d0   :  { %11188 = vmatprep.subr.mxu1 %v14977_v36  ;;  %11070 = vmatmul.mubr.f32.gmra.mxu0 %v5776_v26  ;;  %v5795_v16 = vsub.f32 %v15440_v37, %v5794_v19 }
 0x7d1   :  { %11123 = vmatmul.mubr.f32.gmra.mxu1 %v15431_v1  ;;  %11134 = vmatpush3.msra.mxu0 %v15196_v43 }
 0x7d2   :  { %11189 = vmatpush3.msra.mxu1 %v15230_v34  ;;  %11135 = vmatprep.subr.mxu0 %v14977_v36  ;;  %v5796_v13 = vand.u32 4294901760, %v5795_v16  ;;  %v6526_v16 = vld [vmem:[#allocation2 + $0x3b8] sm:$0xff] }
 0x7d3   :  { %11190 = vmatprep.subr.mxu1 %v14977_v36  ;;  %11136 = vmatpush3.msra.mxu0 %v15203_v23 }
 0x7d4   :  { %11191 = vmatpush3.msra.mxu1 %v15243_v3  ;;  %11072 = vmatprep.mubr.msk.f32.mxu0 %vm12002_vm0, %v14977_v36 }
 0x7d5   :  { %11137 = vmatprep.subr.mxu0 %v14977_v36  ;;  %11192 = vmatprep.subr.mxu1 %v14977_v36 }
 0x7d6   :  { %11073 = vmatmul.mubr.f32.gmra.mxu0 %v5786_v51  ;;  %11193 = vmatpush3.msra.mxu1 %v15251_v47 }
 0x7d7   :  { %11138 = vmatpush3.msra.mxu0 %v15213_v44  ;;  %11194 = vmatprep.subr.mxu1 %v14977_v36 }
 0x7d8   :  { %11139 = vmatprep.subr.mxu0 %v14977_v36  ;;  %11195 = vmatpush3.msra.mxu1 %v15265_v10 }
 0x7d9   :  { %11140 = vmatpush3.msra.mxu0 %v15228_v46  ;;  %11075 = vmatprep.mubr.msk.f32.mxu0 %vm12002_vm0, %v14977_v36 }
 0x7da   :  { %11141 = vmatprep.subr.mxu0 %v14977_v36  ;;  %11196 = vmatprep.subr.mxu1 %v14977_v36 }
 0x7db   :  { %11076 = vmatmul.mubr.f32.gmra.mxu0 %v5796_v13  ;;  %11197 = vmatpush3.msra.mxu1 %v15275_v62 }
 0x7dc   :  { %11142 = vmatpush3.msra.mxu0 %v15240_v18  ;;  %11198 = vmatprep.subr.mxu1 %v14977_v36 }
 0x7dd   :  { %11143 = vmatprep.subr.mxu0 %v14977_v36  ;;  %11199 = vmatpush3.msra.mxu1 %v15290_v24 }
 0x7de   :  { %11144 = vmatpush3.msra.mxu0 %v15255_v2  ;;  %11200 = vmatprep.subr.mxu1 %v14977_v36 }
 0x7df   :  { %11145 = vmatprep.subr.mxu0 %v14977_v36  ;;  %11201 = vmatpush3.msra.mxu1 %v15303_v39 }
 0x7e0   :  { %11146 = vmatpush3.msra.mxu0 %v15263_v61  ;;  %11202 = vmatprep.subr.mxu1 %v14977_v36 }
 0x7e1   :  { %11147 = vmatprep.subr.mxu0 %v14977_v36  ;;  %11203 = vmatpush3.msra.mxu1 %v15311_v49 }
 0x7e2   :  { %11148 = vmatpush3.msra.mxu0 %v15273_v31  ;;  %11204 = vmatprep.mubr.msk.f32.mxu1 %vm12002_vm0, %v14977_v36 }
 0x7e3   :  { %11149 = vmatprep.subr.mxu0 %v14977_v36  ;;  %11205 = vmatmul.mubr.f32.vlgmr.msra.gmra.mxu1 %v5754_v8  ;;  %v17008_v8 = vld [vmem:[#allocation10_spill] sm:$0xff] }
 0x7e4   :  { %11266 = vmatprep.subr.mxu1 %v14977_v36  ;;  %11150 = vmatpush3.msra.mxu0 %v15288_v50 }
 0x7e5   :  { %11267 = vmatpush3.msra.mxu1 %v15149_v48  ;;  %11151 = vmatprep.subr.mxu0 %v14977_v36  ;;  %v17009_v48 = vld [vmem:[#allocation13_spill] sm:$0xff] }
 0x7e6   :  { %11268 = vmatprep.subr.mxu1 %v14977_v36  ;;  %11152 = vmatpush3.msra.mxu0 %v15300_v7 }
 0x7e7   :  { %11207 = vmatprep.mubr.msk.f32.mxu1 %vm12002_vm0, %v14977_v36  ;;  %11269 = vmatpush3.msra.mxu1 %v15154_v54  ;;  %v17010_v54 = vand.u32 4294901760, %v15152_v14  ;;  %v17011_v14 = vand.u32 4294901760, %v15160_v33  ;;  %v17013_v33 = vand.u32 4294901760, %v15182_v57  ;;  %v17016_v57 = vand.u32 4294901760, %v15213_v44 }
 0x7e8   :  { %11153 = vmatprep.subr.mxu0 %v14977_v36  ;;  %11208 = vmatmul.mubr.f32.gmra.mxu1 %v5764_v22  ;;  %v17022_v44 = vand.u32 4294901760, %v15288_v50  ;;  %v6529_v22 = vld [vmem:[#allocation2 + $0x3d0] sm:$0xff] }
 0x7e9   :  { %11270 = vmatprep.subr.mxu1 %v14977_v36  ;;  %11154 = vmatpush3.msra.mxu0 %v17008_v8  ;;  %v15700_v0 = vand.u32 4294901760, %v6529_v22 }
 0x7ea   :  { %11271 = vmatpush3.msra.mxu1 %v15162_v45  ;;  %11155 = vmatprep.subr.mxu0 %v14977_v36  ;;  %v15534_v45 = vld [vmem:[%s16638_s3] sm:$0xff] }
 0x7eb   :  { %11272 = vmatprep.subr.mxu1 %v14977_v36  ;;  %11156 = vmatpush3.msra.mxu0 %v17009_v48  ;;  %v15711_v28 = vsub.f32 %v6529_v22, %v15700_v0 }
 0x7ec   :  { %11157 = vmatprep.mubr.msk.f32.mxu0 %vm12002_vm0, %v14977_v36  ;;  %11210 = vmatprep.mubr.msk.f32.mxu1 %vm12002_vm0, %v14977_v36 }
 0x7ed   :  { %11273 = vmatpush3.msra.mxu1 %v15173_v17  ;;  %11158 = vmatmul.mubr.f32.vlgmr.msra.gmra.mxu0 %v15357_v9  ;;  %v17015_v17 = vand.u32 4294901760, %v15203_v23  ;;  %v17020_v23 = vand.u32 4294901760, %v15263_v61  ;;  %v6530_v9 = vld [vmem:[#allocation2 + $0x3d8] sm:$0xff] }
 0x7ee   :  { %11211 = vmatmul.mubr.f32.gmra.mxu1 %v5774_v58  ;;  %11219 = vmatprep.subr.mxu0 %v14977_v36  ;;  %v15693_v35 = vand.u32 4294901760, %v6530_v9 }
 0x7ef   :  { %11274 = vmatprep.subr.mxu1 %v14977_v36  ;;  %11220 = vmatpush3.msra.mxu0 %v17010_v54  ;;  %v15738_v54 = vand.u32 4294901760, %v6526_v16 }
 0x7f0   :  { %11275 = vmatpush3.msra.mxu1 %v15185_v40  ;;  %11221 = vmatprep.subr.mxu0 %v14977_v36  ;;  %v17017_v40 = vand.u32 4294901760, %v15228_v46  ;;  %v17024_v46 = vand.u32 4294901760, %v17008_v8  ;;  %v15704_v30 = vsub.f32 %v6530_v9, %v15693_v35 }
 0x7f1   :  { %11276 = vmatprep.subr.mxu1 %v14977_v36  ;;  %11160 = vmatprep.mubr.msk.f32.mxu0 %vm12002_vm0, %v15534_v45  ;;  %v17012_v36 = vand.u32 4294901760, %v15171_v27  ;;  %v17014_v27 = vand.u32 4294901760, %v15196_v43  ;;  %v17019_v43 = vand.u32 4294901760, %v15255_v2 }
 0x7f2   :  { %11213 = vmatprep.mubr.msk.f32.mxu1 %vm12002_vm0, %v15534_v45  ;;  %11222 = vmatpush3.msra.mxu0 %v17011_v14 }
 0x7f3   :  { %11277 = vmatpush3.msra.mxu1 %v15192_v56  ;;  %11161 = vmatmul.mubr.f32.gmra.mxu0 %v15384_v12  ;;  %v17018_v56 = vand.u32 4294901760, %v15240_v18  ;;  %v6534_v18 = vld [vmem:[#allocation2 + $0x3f8] sm:$0xff] }
 0x7f4   :  { %11214 = vmatmul.mubr.f32.gmra.mxu1 %v5784_v42  ;;  %11223 = vmatprep.subr.mxu0 %v15534_v45  ;;  %v6527_v42 = vld [vmem:[#allocation2 + $0x3c0] sm:$0xff] }
 0x7f5   :  { %11278 = vmatprep.subr.mxu1 %v15534_v45  ;;  %11224 = vmatpush3.msra.mxu0 %v17012_v36  ;;  %v6525_v36 = vld [vmem:[#allocation2 + $0x3b0] sm:$0xff] }
 0x7f6   :  { %11279 = vmatpush3.msra.mxu1 %v15205_v53  ;;  %11225 = vmatprep.subr.mxu0 %v15534_v45  ;;  %v17021_v53 = vand.u32 4294901760, %v15273_v31 }
 0x7f7   :  { %11280 = vmatprep.subr.mxu1 %v15534_v45  ;;  %11163 = vmatprep.mubr.msk.f32.mxu0 %vm12002_vm0, %v15534_v45 }
 0x7f8   :  { %11216 = vmatprep.mubr.msk.f32.mxu1 %vm12002_vm0, %v15534_v45  ;;  %11226 = vmatpush3.msra.mxu0 %v17013_v33 }
 0x7f9   :  { %11281 = vmatpush3.msra.mxu1 %v15215_v5  ;;  %11164 = vmatmul.mubr.f32.gmra.mxu0 %v15398_v6  ;;  %v17023_v5 = vand.u32 4294901760, %v15300_v7 }
 0x7fa   :  { %11217 = vmatmul.mubr.f32.gmra.mxu1 %v5794_v19  ;;  %11227 = vmatprep.subr.mxu0 %v15534_v45  ;;  %v15723_v19 = vand.u32 4294901760, %v6527_v42 }
 0x7fb   :  { %11282 = vmatprep.subr.mxu1 %v15534_v45  ;;  %11228 = vmatpush3.msra.mxu0 %v17014_v27 }
 0x7fc   :  { %11283 = vmatpush3.msra.mxu1 %v15230_v34  ;;  %11229 = vmatprep.subr.mxu0 %v15534_v45  ;;  %v17025_v34 = vand.u32 4294901760, %v17009_v48  ;;  %v15736_v48 = vsub.f32 %v6527_v42, %v15723_v19 }
 0x7fd   :  { %11284 = vmatprep.subr.mxu1 %v15534_v45  ;;  %11166 = vmatprep.mubr.msk.f32.mxu0 %vm12002_vm0, %v15534_v45 }
 0x7fe   :  { %11230 = vmatpush3.msra.mxu0 %v17015_v17  ;;  %11285 = vmatpush3.msra.mxu1 %v15243_v3  ;;  %v15657_v3 = vand.u32 4294901760, %v6534_v18  ;;  %v16811_v17 = vand.u32 4294901760, %v15736_v48 }
 0x7ff   :  { %11167 = vmatmul.mubr.f32.gmra.mxu0 %v15424_v20  ;;  %11231 = vmatprep.subr.mxu0 %v15534_v45 }
 0x800   :  { %11286 = vmatprep.subr.mxu1 %v15534_v45  ;;  %11232 = vmatpush3.msra.mxu0 %v17016_v57  ;;  %v15660_v2 = vsub.f32 %v6534_v18, %v15657_v3  ;;  %v15748_v57 = vsub.f32 %v6526_v16, %v15738_v54 }
 0x801   :  { %11287 = vmatpush3.msra.mxu1 %v15251_v47  ;;  %11233 = vmatprep.subr.mxu0 %v15534_v45  ;;  %v6533_v47 = vld [vmem:[#allocation2 + $0x3f0] sm:$0xff] }
 0x802   :  { %11288 = vmatprep.subr.mxu1 %v15534_v45  ;;  %11169 = vmatprep.mubr.msk.f32.mxu0 %vm12002_vm0, %v15534_v45  ;;  %v15662_v61 = vand.u32 4294901760, %v6533_v47  ;;  %v16818_v31 = vand.u32 4294901760, %v15660_v2 }
 0x803   :  { %11234 = vmatpush3.msra.mxu0 %v17017_v40  ;;  %11289 = vmatpush3.msra.mxu1 %v15265_v10  ;;  %v6532_v10 = vld [vmem:[#allocation2 + $0x3e8] sm:$0xff]  ;;  %v15751_v40 = vand.u32 4294901760, %v6525_v36 }
 0x804   :  { %11170 = vmatmul.mubr.f32.gmra.mxu0 %v15440_v37  ;;  %11235 = vmatprep.subr.mxu0 %v15534_v45  ;;  %v15670_v50 = vand.u32 4294901760, %v6532_v10  ;;  %v6670_v7 = vsub.f32 %v15660_v2, %v16818_v31  ;;  %v16813_v37 = vand.u32 4294901760, %v15711_v28 }
 0x805   :  { %11290 = vmatprep.subr.mxu1 %v15534_v45  ;;  %11236 = vmatpush3.msra.mxu0 %v17018_v56  ;;  %v6524_v56 = vld [vmem:[#allocation2 + $0x3a8] sm:$0xff] }
 0x806   :  { %11291 = vmatpush3.msra.mxu1 %v15275_v62  ;;  %11237 = vmatprep.subr.mxu0 %v15534_v45  ;;  %v15668_v62 = vsub.f32 %v6533_v47, %v15662_v61  ;;  %v6705_v13 = vsub.f32 %v15711_v28, %v16813_v37 }
 0x807   :  { %11292 = vmatprep.subr.mxu1 %v15534_v45  ;;  %11238 = vmatpush3.msra.mxu0 %v17019_v43 }
 0x808   :  { %11293 = vmatpush3.msra.mxu1 %v15290_v24  ;;  %11239 = vmatprep.subr.mxu0 %v15534_v45  ;;  %v6531_v24 = vld [vmem:[#allocation2 + $0x3e0] sm:$0xff]  ;;  %v6706_v33 = vand.u32 4294901760, %v6705_v13 }
 0x809   :  { %11294 = vmatprep.subr.mxu1 %v15534_v45  ;;  %11240 = vmatpush3.msra.mxu0 %v17020_v23  ;;  %v6719_v23 = vsub.f32 %v15736_v48, %v16811_v17 }
 0x80a   :  { %11295 = vmatpush3.msra.mxu1 %v15303_v39  ;;  %11241 = vmatprep.subr.mxu0 %v15534_v45  ;;  %v16817_v39 = vand.u32 4294901760, %v15668_v62 }
 0x80b   :  { %11296 = vmatprep.subr.mxu1 %v15534_v45  ;;  %11242 = vmatpush3.msra.mxu0 %v17021_v53  ;;  %v16810_v53 = vand.u32 4294901760, %v15748_v57 }
 0x80c   :  { %11297 = vmatpush3.msra.mxu1 %v15311_v49  ;;  %11298 = vmatprep.mubr.msk.f32.mxu1 %vm12002_vm0, %v15534_v45  ;;  %v15679_v49 = vsub.f32 %v6532_v10, %v15670_v50  ;;  %v6677_v12 = vsub.f32 %v15668_v62, %v16817_v39 }
 0x80d   :  { %11243 = vmatprep.subr.mxu0 %v15534_v45  ;;  %11299 = vmatmul.mubr.f32.vlgmr.msra.gmra.mxu1 %v15352_v55  ;;  %v6726_v18 = vsub.f32 %v15748_v57, %v16810_v53 }
 0x80e   :  { %11244 = vmatpush3.msra.mxu0 %v17022_v44  ;;  %11301 = vmatprep.mubr.msk.f32.mxu1 %vm12002_vm0, %v15534_v45  ;;  %v16816_v4 = vand.u32 4294901760, %v15679_v49  ;;  %v6678_v15 = vand.u32 4294901760, %v6677_v12  ;;  %v15759_v44 = vand.u32 4294901760, %v6524_v56 }
 0x80f   :  { %11245 = vmatprep.subr.mxu0 %v15534_v45  ;;  %11251 = vmatprep.mubr.msk.f32.mxu0 %vm12002_vm0, %v15534_v45  ;;  %v6727_v9 = vand.u32 4294901760, %v6726_v18 }
 0x810   :  { %11246 = vmatpush3.msra.mxu0 %v17023_v5  ;;  %11360 = vmatprep.subr.mxu1 %v15534_v45  ;;  %v6684_v6 = vsub.f32 %v15679_v49, %v16816_v4  ;;  %v15763_v5 = vsub.f32 %v6525_v36, %v15751_v40  ;;  %v15771_v47 = vsub.f32 %v6524_v56, %v15759_v44 }
 0x811   :  { %11247 = vmatprep.subr.mxu0 %v15534_v45  ;;  %11302 = vmatmul.mubr.f32.gmra.mxu1 %v15369_v52 }
 0x812   :  { %11248 = vmatpush3.msra.mxu0 %v17024_v46  ;;  %11304 = vmatprep.mubr.msk.f32.mxu1 %vm12002_vm0, %v15534_v45  ;;  %v6685_v58 = vand.u32 4294901760, %v6684_v6  ;;  %v6523_v46 = vld [vmem:[#allocation2 + $0x3a0] sm:$0xff]  ;;  %v6521_v6 = vld [vmem:[#allocation2 + $0x390] sm:$0xff] }
 0x813   :  { %11249 = vmatprep.subr.mxu0 %v15534_v45  ;;  %v15773_v10 = vand.u32 4294901760, %v6523_v46  ;;  %v15798_v42 = vand.u32 4294901760, %v6521_v6 }
 0x814   :  { %11250 = vmatpush3.msra.mxu0 %v17025_v34  ;;  %v6720_v34 = vand.u32 4294901760, %v6719_v23 }
 0x815   :  { %11252 = vmatmul.mubr.f32.vlgmr.msra.gmra.mxu0 %v15352_v55  ;;  %11305 = vmatmul.mubr.f32.gmra.mxu1 %v15389_v59  ;;  %v15681_v55 = vand.u32 4294901760, %v6531_v24  ;;  %v15781_v12 = vsub.f32 %v6523_v46, %v15773_v10  ;;  %v15808_v36 = vsub.f32 %v6521_v6, %v15798_v42 }
 0x816   :  { %11254 = vmatprep.mubr.msk.f32.mxu0 %vm12002_vm0, %v15534_v45  ;;  %11307 = vmatprep.mubr.msk.f32.mxu1 %vm12002_vm0, %v15534_v45 }
 0x817   :  { %11313 = vmatprep.subr.mxu0 %v15534_v45  ;;  %v16804_v23 = vand.u32 4294901760, %v15808_v36 }
 0x818   :  { %11314 = vmatpush3.msra.mxu0 %v15657_v3 }
 0x819   :  { %11255 = vmatmul.mubr.f32.gmra.mxu0 %v15369_v52  ;;  %11308 = vmatmul.mubr.f32.gmra.mxu1 %v15409_v21  ;;  %v6671_v52 = vand.u32 4294901760, %v6670_v7  ;;  %v6522_v7 = vld [vmem:[#allocation2 + $0x398] sm:$0xff] }
 0x81a   :  { %11257 = vmatprep.mubr.msk.f32.mxu0 %vm12002_vm0, %v15534_v45  ;;  %11310 = vmatprep.mubr.msk.f32.mxu1 %vm12002_vm0, %v15534_v45  ;;  %v15783_v22 = vand.u32 4294901760, %v6522_v7 }
 0x81b   :  { %11315 = vmatprep.subr.mxu0 %v15534_v45  ;;  %11361 = vmatpush3.msra.mxu1 %v6671_v52  ;;  %v16808_v52 = vand.u32 4294901760, %v15771_v47 }
 0x81c   :  { %11316 = vmatpush3.msra.mxu0 %v15662_v61  ;;  %11362 = vmatprep.subr.mxu1 %v15534_v45 }
 0x81d   :  { %11258 = vmatmul.mubr.f32.gmra.mxu0 %v15389_v59  ;;  %11311 = vmatmul.mubr.f32.gmra.mxu1 %v15431_v1  ;;  %v15690_v59 = vsub.f32 %v6531_v24, %v15681_v55  ;;  %v16809_v24 = vand.u32 4294901760, %v15763_v5 }
 0x81e   :  { %11260 = vmatprep.mubr.msk.f32.mxu0 %vm12002_vm0, %v15534_v45  ;;  %11392 = vmatprep.mubr.msk.f32.mxu1 %vm12002_vm0, %v15534_v45 }
 0x81f   :  { %11317 = vmatprep.subr.mxu0 %v15534_v45  ;;  %v16815_v41 = vand.u32 4294901760, %v15690_v59  ;;  %11363 = vmatpush3.msra.mxu1 %v6678_v15  ;;  %v6733_v15 = vsub.f32 %v15763_v5, %v16809_v24 }
 0x820   :  { %11318 = vmatpush3.msra.mxu0 %v15670_v50  ;;  %11364 = vmatprep.subr.mxu1 %v15534_v45 }
 0x821   :  { %11261 = vmatmul.mubr.f32.gmra.mxu0 %v15409_v21  ;;  %11319 = vmatprep.subr.mxu0 %v15534_v45  ;;  %v6528_v21 = vld [vmem:[#allocation2 + $0x3c8] sm:$0xff]  ;;  %v6691_v63 = vsub.f32 %v15690_v59, %v16815_v41 }
 0x822   :  { %11263 = vmatprep.mubr.msk.f32.mxu0 %vm12002_vm0, %v15534_v45  ;;  %11320 = vmatpush3.msra.mxu0 %v15681_v55  ;;  %v15713_v20 = vand.u32 4294901760, %v6528_v21 }
 0x823   :  { %11321 = vmatprep.subr.mxu0 %v15534_v45  ;;  %11365 = vmatpush3.msra.mxu1 %v6685_v58  ;;  %v6692_v26 = vand.u32 4294901760, %v6691_v63  ;;  %v16806_v58 = vand.u32 4294901760, %v15781_v12  ;;  %v15796_v63 = vsub.f32 %v6522_v7, %v15783_v22  ;;  %v6761_v7 = vsub.f32 %v15808_v36, %v16804_v23 }
 0x824   :  { %11322 = vmatpush3.msra.mxu0 %v15693_v35  ;;  %v15721_v25 = vsub.f32 %v6528_v21, %v15713_v20  ;;  %11366 = vmatprep.subr.mxu1 %v15534_v45  ;;  %v6740_v21 = vsub.f32 %v15771_v47, %v16808_v52 }
 0x825   :  { %11264 = vmatmul.mubr.f32.gmra.mxu0 %v15431_v1  ;;  %11323 = vmatprep.subr.mxu0 %v15534_v45  ;;  %v16814_v1 = vand.u32 4294901760, %v15704_v30  ;;  %v6747_v13 = vsub.f32 %v15781_v12, %v16806_v58  ;;  %v6762_v6 = vand.u32 4294901760, %v6761_v7 }
 0x826   :  { %11345 = vmatprep.mubr.msk.f32.mxu0 %vm12002_vm0, %v15534_v45  ;;  %11324 = vmatpush3.msra.mxu0 %v15700_v0  ;;  %v16812_v8 = vand.u32 4294901760, %v15721_v25  ;;  %v6741_v16 = vand.u32 4294901760, %v6740_v21 }
 0x827   :  { %11325 = vmatprep.subr.mxu0 %v15534_v45  ;;  %v6698_v51 = vsub.f32 %v15704_v30, %v16814_v1  ;;  %11367 = vmatpush3.msra.mxu1 %v6692_v26  ;;  %v6734_v26 = vand.u32 4294901760, %v6733_v15  ;;  %v6748_v56 = vand.u32 4294901760, %v6747_v13 }
 0x828   :  { %11326 = vmatpush3.msra.mxu0 %v15713_v20  ;;  %11368 = vmatprep.subr.mxu1 %v15534_v45  ;;  %v6712_v27 = vsub.f32 %v15721_v25, %v16812_v8 }
 0x829   :  { %11327 = vmatprep.subr.mxu0 %v15534_v45  ;;  %v6699_v14 = vand.u32 4294901760, %v6698_v51  ;;  %v6520_v51 = vld [vmem:[#allocation2 + $0x388] sm:$0xff] }
 0x82a   :  { %11328 = vmatpush3.msra.mxu0 %v15723_v19  ;;  %v6713_v43 = vand.u32 4294901760, %v6712_v27  ;;  %v6519_v27 = vld [vmem:[#allocation2 + $0x380] sm:$0xff] }
 0x82b   :  { %11329 = vmatprep.subr.mxu0 %v15534_v45  ;;  %11369 = vmatpush3.msra.mxu1 %v6699_v14  ;;  %v16805_v14 = vand.u32 4294901760, %v15796_v63  ;;  %v15819_v46 = vand.u32 4294901760, %v6519_v27 }
 0x82c   :  { %11330 = vmatpush3.msra.mxu0 %v15738_v54  ;;  %11370 = vmatprep.subr.mxu1 %v15534_v45 }
 0x82d   :  { %11331 = vmatprep.subr.mxu0 %v15534_v45  ;;  %11371 = vmatpush3.msra.mxu1 %v6706_v33  ;;  %v15811_v33 = vand.u32 4294901760, %v6520_v51 }
 0x82e   :  { %11332 = vmatpush3.msra.mxu0 %v15751_v40  ;;  %11372 = vmatprep.subr.mxu1 %v15534_v45 }
 0x82f   :  { %11333 = vmatprep.subr.mxu0 %v15534_v45  ;;  %11373 = vmatpush3.msra.mxu1 %v6713_v43  ;;  %v6754_v43 = vsub.f32 %v15796_v63, %v16805_v14 }
 0x830   :  { %11334 = vmatpush3.msra.mxu0 %v15759_v44  ;;  %11374 = vmatprep.subr.mxu1 %v15534_v45 }
 0x831   :  { %11335 = vmatprep.subr.mxu0 %v15534_v45  ;;  %11375 = vmatpush3.msra.mxu1 %v6720_v34  ;;  %v15823_v34 = vsub.f32 %v6520_v51, %v15811_v33  ;;  %v6755_v18 = vand.u32 4294901760, %v6754_v43 }
 0x832   :  { %11336 = vmatpush3.msra.mxu0 %v15773_v10  ;;  %11376 = vmatprep.subr.mxu1 %v15534_v45 }
 0x833   :  { %11337 = vmatprep.subr.mxu0 %v15534_v45  ;;  %11377 = vmatpush3.msra.mxu1 %v6727_v9  ;;  %v15831_v9 = vsub.f32 %v6519_v27, %v15819_v46  ;;  %v16803_v15 = vand.u32 4294901760, %v15823_v34 }
 0x834   :  { %11338 = vmatpush3.msra.mxu0 %v15783_v22  ;;  %11378 = vmatprep.subr.mxu1 %v15534_v45 }
 0x835   :  { %11339 = vmatprep.subr.mxu0 %v15534_v45  ;;  %11379 = vmatpush3.msra.mxu1 %v6734_v26  ;;  %v16807_v21 = vand.u32 4294901760, %v15831_v9  ;;  %v6768_v51 = vsub.f32 %v15823_v34, %v16803_v15 }
 0x836   :  { %11340 = vmatpush3.msra.mxu0 %v15798_v42  ;;  %11380 = vmatprep.subr.mxu1 %v15534_v45 }
 0x837   :  { %11341 = vmatprep.subr.mxu0 %v15534_v45  ;;  %11381 = vmatpush3.msra.mxu1 %v6741_v16  ;;  %v6775_v16 = vsub.f32 %v15831_v9, %v16807_v21  ;;  %v6769_v27 = vand.u32 4294901760, %v6768_v51 }
 0x838   :  { %11342 = vmatpush3.msra.mxu0 %v15811_v33  ;;  %11382 = vmatprep.subr.mxu1 %v15534_v45 }
 0x839   :  { %11343 = vmatprep.subr.mxu0 %v15534_v45  ;;  %11383 = vmatpush3.msra.mxu1 %v6748_v56  ;;  %v6776_v56 = vand.u32 4294901760, %v6775_v16 }
 0x83a   :  { %11344 = vmatpush3.msra.mxu0 %v15819_v46  ;;  %11384 = vmatprep.subr.mxu1 %v15534_v45 }
 0x83b   :  { %11407 = vmatprep.subr.mxu0 %v15534_v45  ;;  %11385 = vmatpush3.msra.mxu1 %v6755_v18 }
 0x83c   :  { %11386 = vmatprep.subr.mxu1 %v15534_v45 }
 0x83d   :  { %11387 = vmatpush3.msra.mxu1 %v6762_v6 }
 0x83e   :  { %11388 = vmatprep.subr.mxu1 %v15534_v45 }
 0x83f   :  { %11389 = vmatpush3.msra.mxu1 %v6769_v27 }
 0x840   :  { %11390 = vmatprep.subr.mxu1 %v15534_v45 }
 0x841   :  { %11391 = vmatpush3.msra.mxu1 %v6776_v56 }
 0x842   :  { %11454 = vmatprep.subr.mxu1 %v15534_v45 }
 0x87c   :  { %v5949_v26 = vpop.f32.mrf.mxu1 }
 0x87e   :  { %v11112_v13 = vpop.f32.mrf.mxu1 }
 0x880   :  { %v5955_v43 = vpop.f32.mrf.mxu1 }
 0x882   :  { %v11115_v18 = vpop.f32.mrf.mxu1 }
 0x884   :  { %v5758_v7 = vpop.f32.mrf.mxu0 }
 0x885   :  { %v5950_v15 = vadd.f32 %v5949_v26, %v5758_v7  ;;  %v5961_v23 = vpop.f32.mrf.mxu1 }
 0x886   :  { %v11065_v14 = vpop.f32.mrf.mxu0 }
 0x887   :  { %v11118_v58 = vpop.f32.mrf.mxu1 }
 0x88a   :  { %v5768_v21 = vpop.f32.mrf.mxu0 }
 0x88b   :  { %v5956_v13 = vadd.f32 %v5955_v43, %v5768_v21  ;;  %v5967_v6 = vpop.f32.mrf.mxu1 }
 0x88c   :  { %v11068_v51 = vpop.f32.mrf.mxu0 }
 0x88d   :  { %v11121_v52 = vpop.f32.mrf.mxu1 }
 0x890   :  { %v5778_v24 = vpop.f32.mrf.mxu0 }
 0x891   :  { %v5962_v16 = vadd.f32 %v5961_v23, %v5778_v24  ;;  %v5973_v53 = vpop.f32.mrf.mxu1 }
 0x892   :  { %v11071_v27 = vpop.f32.mrf.mxu0 }
 0x893   :  { %v11124_v17 = vpop.f32.mrf.mxu1 }
 0x896   :  { %v5788_v8 = vpop.f32.mrf.mxu0 }
 0x897   :  { %v5968_v18 = vadd.f32 %v5967_v6, %v5788_v8 }
 0x898   :  { %v11074_v56 = vpop.f32.mrf.mxu0 }
 0x89b   :  { %v5798_v37 = vpop.f32.mrf.mxu0 }
 0x89c   :  { %v5974_v1 = vadd.f32 %v5973_v53, %v5798_v37 }
 0x89d   :  { %v11077_v41 = vpop.f32.mrf.mxu0 }
 0x8a3   :  { %v6194_v26 = vpop.f32.mrf.mxu1 }
 0x8a5   :  { %v11206_v7 = vpop.f32.mrf.mxu1 }
 0x8a8   :  { %v6202_v14 = vpop.f32.mrf.mxu1 }
 0x8aa   :  { %v11209_v58 = vpop.f32.mrf.mxu1 }
 0x8ad   :  { %v6077_v4 = vpop.f32.mrf.mxu0 }
 0x8ae   :  { %v6078_v21 = vadd.f32 %v6077_v4, %v5950_v15  ;;  %v6210_v43 = vpop.f32.mrf.mxu1 }
 0x8af   :  { %v11159_v51 = vpop.f32.mrf.mxu0 }
 0x8b0   :  { %v11212_v52 = vpop.f32.mrf.mxu1  ;;  %v6195_v39 = vadd.f32 %v6194_v26, %v6078_v21 }
 0x8b3   :  { %v6084_v24 = vpop.f32.mrf.mxu0 }
 0x8b4   :  { %v6085_v23 = vadd.f32 %v6084_v24, %v5956_v13  ;;  %v6218_v27 = vpop.f32.mrf.mxu1  ;;  %v17026_v13 = vld [vmem:[#allocation5_spill] sm:$0xff] }
 0x8b5   :  { %v11162_v17 = vpop.f32.mrf.mxu0  ;;  %v6486_v24 = vsub.s32 4, %v17026_v13 }
 0x8b6   :  { %v11215_v31 = vpop.f32.mrf.mxu1  ;;  %v6203_v8 = vadd.f32 %v6202_v14, %v6085_v23 }
 0x8b9   :  { %v6091_v6 = vpop.f32.mrf.mxu0 }
 0x8ba   :  { %v6092_v56 = vadd.f32 %v6091_v6, %v5962_v16  ;;  %v6226_v37 = vpop.f32.mrf.mxu1  ;;  %v17027_v16 = vld [vmem:[#allocation6_spill] sm:$0xff] }
 0x8bb   :  { %v11165_v41 = vpop.f32.mrf.mxu0  ;;  %v6487_v6 = vrot.slane %v17027_v16, %v6486_v24 }
 0x8bc   :  { %v11218_v53 = vpop.f32.mrf.mxu1  ;;  %v6211_v7 = vadd.f32 %v6210_v43, %v6092_v56 }
 0x8bf   :  { %v6098_v11 = vpop.f32.mrf.mxu0 }
 0x8c0   :  { %v6099_v58 = vadd.f32 %v6098_v11, %v5968_v18 }
 0x8c1   :  { %v11168_v32 = vpop.f32.mrf.mxu0 }
 0x8c2   :  { %v6219_v4 = vadd.f32 %v6218_v27, %v6099_v58 }
 0x8c4   :  { %v6105_v15 = vpop.f32.mrf.mxu0 }
 0x8c6   :  { %v11171_v51 = vpop.f32.mrf.mxu0 }
 0x8cd   :  { %v6456_v52 = vpop.f32.mrf.mxu1 }
 0x8cf   :  { %v11300_v26 = vpop.f32.mrf.mxu1 }
 0x8d1   :  { %v6462_v21 = vpop.f32.mrf.mxu1 }
 0x8d3   :  { %v11303_v17 = vpop.f32.mrf.mxu1 }
 0x8d5   :  { %v6345_v31 = vpop.f32.mrf.mxu0  ;;  %v6468_v14 = vpop.f32.mrf.mxu1 }
 0x8d6   :  { %v6346_v23 = vadd.f32 %v6345_v31, %v6195_v39  ;;  %v6106_v39 = vadd.f32 %v6105_v15, %v5974_v1 }
 0x8d7   :  { %v11253_v41 = vpop.f32.mrf.mxu0  ;;  %v11306_v53 = vpop.f32.mrf.mxu1 }
 0x8d8   :  { %v6457_v43 = vadd.f32 %v6456_v52, %v6346_v23 }
 0x8d9   :  { %v6351_v56 = vpop.f32.mrf.mxu0  ;;  %v6474_v11 = vpop.f32.mrf.mxu1 }
 0x8da   :  { %v6488_v32 = vadd.f32 %v6487_v6, %v6457_v43  ;;  %v6352_v18 = vadd.f32 %v6351_v56, %v6203_v8  ;;  %v6227_v8 = vadd.f32 %v6226_v37, %v6106_v39 }
 0x8db   :  { %v11256_v27 = vpop.f32.mrf.mxu0  ;;  %v11309_v58 = vpop.f32.mrf.mxu1 }
 0x8dc   :  { %11953 = vtanh.f32 %v6488_v32  ;;  %v6463_v51 = vadd.f32 %v6462_v21, %v6352_v18 }
 0x8dd   :  { %v6357_v26 = vpop.f32.mrf.mxu0  ;;  %v6480_v60 = vpop.f32.mrf.mxu1 }
 0x8de   :  { %v6489_v29 = vadd.f32 %v6487_v6, %v6463_v51  ;;  %v6358_v17 = vadd.f32 %v6357_v26, %v6211_v7 }
 0x8df   :  { %v11259_v38 = vpop.f32.mrf.mxu0  ;;  %v11312_v13 = vpop.f32.mrf.mxu1 }
 0x8e0   :  { %11955 = vtanh.f32 %v6489_v29  ;;  %v6469_v24 = vadd.f32 %v6468_v14, %v6358_v17 }
 0x8e1   :  { %v6363_v31 = vpop.f32.mrf.mxu0 }
 0x8e2   :  { %v6490_v16 = vadd.f32 %v6487_v6, %v6469_v24  ;;  %v6364_v52 = vadd.f32 %v6363_v31, %v6219_v4 }
 0x8e3   :  { %v11262_v23 = vpop.f32.mrf.mxu0 }
 0x8e4   :  { %11957 = vtanh.f32 %v6490_v16  ;;  %v6475_v41 = vadd.f32 %v6474_v11, %v6364_v52 }
 0x8e5   :  { %v6369_v53 = vpop.f32.mrf.mxu0 }
 0x8e6   :  { %v6491_v56 = vadd.f32 %v6487_v6, %v6475_v41  ;;  %v6370_v32 = vadd.f32 %v6369_v53, %v6227_v8 }
 0x8e7   :  { %v11265_v21 = vpop.f32.mrf.mxu0 }
 0x8e8   :  { %11959 = vtanh.f32 %v6491_v56  ;;  %v6481_v18 = vadd.f32 %v6480_v60, %v6370_v32 }
 0x8e9   :  { %v11954_v27 = vpop.eup %11953 }
 0x8ea   :  { %v6499_v7 = vmul.f32 %v11954_v27, %v11954_v27  ;;  %v6492_v38 = vadd.f32 %v6487_v6, %v6481_v18 }
 0x8ec   :  { %v6504_v13 = vsub.f32 1.0, %v6499_v7  ;;  %11961 = vtanh.f32 %v6492_v38 }
 0x8ed   :  { %v11956_v29 = vpop.eup %11955 }
 0x8ee   :  { %v6509_v1 = vmul.f32 %v6504_v13, %v6463_v51  ;;  %v6500_v15 = vmul.f32 %v11956_v29, %v11956_v29 }
 0x8f0   :  { %v6505_v14 = vsub.f32 1.0, %v6500_v15  ;;  %v6514_v58 = vsel %vm1353_vm5, %v6509_v1, %v11956_v29 }
 0x8f1   :  { %v11958_v11 = vpop.eup %11957  ;;  %v15859_v21 = vand.u32 4294901760, %v6514_v58 }
 0x8f2   :  { %v6510_v37 = vmul.f32 %v6505_v14, %v6469_v24  ;;  %v6501_v26 = vmul.f32 %v11958_v11, %v11958_v11 }
 0x8f3   :  { %v15870_v13 = vsub.f32 %v6514_v58, %v15859_v21 }
 0x8f4   :  { %v6506_v17 = vsub.f32 1.0, %v6501_v26  ;;  %v6515_v31 = vsel %vm1354_vm15, %v6510_v37, %v11958_v11 }
 0x8f5   :  { %v11960_v60 = vpop.eup %11959  ;;  %v6628_v29 = vand.u32 4294901760, %v15870_v13 }
 0x8f6   :  { %v6511_v16 = vmul.f32 %v6506_v17, %v6475_v41  ;;  %v6502_v52 = vmul.f32 %v11960_v60, %v11960_v60 }
 0x8f7   :  { %v6629_v14 = vsub.f32 %v15870_v13, %v6628_v29 }
 0x8f8   :  { %v6507_v6 = vsub.f32 1.0, %v6502_v52  ;;  %v6516_v23 = vsel %vm1353_vm5, %v6511_v16, %v11960_v60 }
 0x8f9   :  { %v11962_v51 = vpop.eup %11961  ;;  %v15898_v4 = vand.u32 4294901760, %v6516_v23  ;;  %v6630_v11 = vand.u32 4294901760, %v6629_v14  ;;  %v7373_v14 = vld [vmem:[#allocation2 + $0x440] sm:$0xff] }
 0x8fa   :  { %v6498_v8 = vmul.f32 %v11962_v51, %v11962_v51  ;;  %v6512_v53 = vmul.f32 %v6507_v6, %v6481_v18  ;;  %v15877_v18 = vand.u32 4294901760, %v6515_v31 }
 0x8fb   :  { %v15911_v37 = vsub.f32 %v6516_v23, %v15898_v4 }
 0x8fc   :  { %v6503_v56 = vsub.f32 1.0, %v6498_v8  ;;  %v6517_v32 = vsel %vm1354_vm15, %v6512_v53, %v11962_v51  ;;  %v15891_v15 = vsub.f32 %v6515_v31, %v15877_v18 }
 0x8fd   :  { %v15916_v26 = vand.u32 4294901760, %v6517_v32  ;;  %v6648_v39 = vand.u32 4294901760, %v15911_v37 }
 0x8fe   :  { %v6508_v24 = vmul.f32 %v6503_v56, %v6457_v43  ;;  %v6638_v58 = vand.u32 4294901760, %v15891_v15 }
 0x8ff   :  { %v15930_v31 = vsub.f32 %v6517_v32, %v15916_v26  ;;  %v6649_v16 = vsub.f32 %v15911_v37, %v6648_v39 }
 0x900   :  { %v6513_v7 = vsel %vm1353_vm5, %v6508_v24, %v11954_v27  ;;  %v6639_v17 = vsub.f32 %v15891_v15, %v6638_v58  ;;  %v7375_v24 = vld [vmem:[#allocation2 + $0x450] sm:$0xff] }
 0x901   :  { %v15863_v38 = vand.u32 4294901760, %v6513_v7  ;;  %v6658_v52 = vand.u32 4294901760, %v15930_v31  ;;  %v6650_v6 = vand.u32 4294901760, %v6649_v16 }
 0x902   :  { %v6640_v60 = vand.u32 4294901760, %v6639_v17  ;;  %v7372_v17 = vld [vmem:[#allocation2 + $0x438] sm:$0xff] }
 0x903   :  { %v15866_v41 = vsub.f32 %v6513_v7, %v15863_v38  ;;  %11393 = vmatmul.mubr.f32.vlgmr.msra.gmra.mxu1 %v15863_v38  ;;  %v6659_v23 = vsub.f32 %v15930_v31, %v6658_v52  ;;  %v16226_v16 = vand.u32 4294901760, %v7372_v17 }
 0x904   :  { %11455 = vmatpush3.msra.mxu1 %v15657_v3  ;;  %11395 = vmatprep.mubr.msk.f32.mxu1 %vm12002_vm0, %v15534_v45 }
 0x905   :  { %11456 = vmatprep.subr.mxu1 %v15534_v45  ;;  %v6618_v43 = vand.u32 4294901760, %v15866_v41  ;;  %v6660_v51 = vand.u32 4294901760, %v6659_v23 }
 0x906   :  { %11457 = vmatpush3.msra.mxu1 %v15662_v61 }
 0x907   :  { %11458 = vmatprep.subr.mxu1 %v15534_v45  ;;  %11396 = vmatmul.mubr.f32.gmra.mxu1 %v15859_v21  ;;  %v6619_v27 = vsub.f32 %v15866_v41, %v6618_v43 }
 0x908   :  { %11459 = vmatpush3.msra.mxu1 %v15670_v50  ;;  %11398 = vmatprep.mubr.msk.f32.mxu1 %vm12002_vm0, %v15534_v45 }
 0x909   :  { %11460 = vmatprep.subr.mxu1 %v15534_v45  ;;  %v6620_v1 = vand.u32 4294901760, %v6619_v27 }
 0x90a   :  { %11461 = vmatpush3.msra.mxu1 %v15681_v55 }
 0x90b   :  { %11462 = vmatprep.subr.mxu1 %v15534_v45  ;;  %11346 = vmatmul.mubr.f32.vlgmr.msra.gmra.mxu0 %v6620_v1 }
 0x90c   :  { %11399 = vmatmul.mubr.f32.gmra.mxu1 %v15877_v18  ;;  %11408 = vmatpush3.msra.mxu0 %v15660_v2 }
 0x90d   :  { %11463 = vmatpush3.msra.mxu1 %v15693_v35  ;;  %11409 = vmatprep.subr.mxu0 %v15534_v45 }
 0x90e   :  { %11464 = vmatprep.subr.mxu1 %v15534_v45  ;;  %11410 = vmatpush3.msra.mxu0 %v15668_v62 }
 0x90f   :  { %11465 = vmatpush3.msra.mxu1 %v15700_v0  ;;  %11348 = vmatprep.mubr.msk.f32.mxu0 %vm12002_vm0, %v15534_v45 }
 0x910   :  { %11401 = vmatprep.mubr.msk.f32.mxu1 %vm12002_vm0, %v15534_v45  ;;  %11411 = vmatprep.subr.mxu0 %v15534_v45 }
 0x911   :  { %11466 = vmatprep.subr.mxu1 %v15534_v45  ;;  %11349 = vmatmul.mubr.f32.gmra.mxu0 %v6630_v11 }
 0x912   :  { %11402 = vmatmul.mubr.f32.gmra.mxu1 %v15898_v4  ;;  %11412 = vmatpush3.msra.mxu0 %v15679_v49 }
 0x913   :  { %11467 = vmatpush3.msra.mxu1 %v15713_v20  ;;  %11413 = vmatprep.subr.mxu0 %v15534_v45 }
 0x914   :  { %11468 = vmatprep.subr.mxu1 %v15534_v45  ;;  %11414 = vmatpush3.msra.mxu0 %v15690_v59 }
 0x915   :  { %11469 = vmatpush3.msra.mxu1 %v15723_v19  ;;  %11351 = vmatprep.mubr.msk.f32.mxu0 %vm12002_vm0, %v15534_v45 }
 0x916   :  { %11404 = vmatprep.mubr.msk.f32.mxu1 %vm12002_vm0, %v15534_v45  ;;  %11415 = vmatprep.subr.mxu0 %v15534_v45 }
 0x917   :  { %11470 = vmatprep.subr.mxu1 %v15534_v45  ;;  %11352 = vmatmul.mubr.f32.gmra.mxu0 %v6640_v60 }
 0x918   :  { %11405 = vmatmul.mubr.f32.gmra.mxu1 %v15916_v26  ;;  %11416 = vmatpush3.msra.mxu0 %v15704_v30 }
 0x919   :  { %11471 = vmatpush3.msra.mxu1 %v15738_v54  ;;  %11417 = vmatprep.subr.mxu0 %v15534_v45 }
 0x91a   :  { %11472 = vmatprep.subr.mxu1 %v15534_v45  ;;  %11418 = vmatpush3.msra.mxu0 %v15711_v28 }
 0x91b   :  { %11473 = vmatpush3.msra.mxu1 %v15751_v40  ;;  %11354 = vmatprep.mubr.msk.f32.mxu0 %vm12002_vm0, %v15534_v45 }
 0x91c   :  { %11419 = vmatprep.subr.mxu0 %v15534_v45  ;;  %11474 = vmatprep.subr.mxu1 %v15534_v45 }
 0x91d   :  { %11355 = vmatmul.mubr.f32.gmra.mxu0 %v6650_v6  ;;  %11475 = vmatpush3.msra.mxu1 %v15759_v44  ;;  %v7371_v6 = vld [vmem:[#allocation2 + $0x430] sm:$0xff] }
 0x91e   :  { %11420 = vmatpush3.msra.mxu0 %v15721_v25  ;;  %11476 = vmatprep.subr.mxu1 %v15534_v45 }
 0x91f   :  { %11421 = vmatprep.subr.mxu0 %v15534_v45  ;;  %11477 = vmatpush3.msra.mxu1 %v15773_v10 }
 0x920   :  { %11422 = vmatpush3.msra.mxu0 %v15736_v48  ;;  %11357 = vmatprep.mubr.msk.f32.mxu0 %vm12002_vm0, %v15534_v45 }
 0x921   :  { %11423 = vmatprep.subr.mxu0 %v15534_v45  ;;  %11478 = vmatprep.subr.mxu1 %v15534_v45 }
 0x922   :  { %11358 = vmatmul.mubr.f32.gmra.mxu0 %v6660_v51  ;;  %11479 = vmatpush3.msra.mxu1 %v15783_v22 }
 0x923   :  { %11424 = vmatpush3.msra.mxu0 %v15748_v57  ;;  %11480 = vmatprep.subr.mxu1 %v15534_v45 }
 0x924   :  { %11425 = vmatprep.subr.mxu0 %v15534_v45  ;;  %11481 = vmatpush3.msra.mxu1 %v15798_v42 }
 0x925   :  { %11426 = vmatpush3.msra.mxu0 %v15763_v5  ;;  %11482 = vmatprep.subr.mxu1 %v15534_v45 }
 0x926   :  { %11427 = vmatprep.subr.mxu0 %v15534_v45  ;;  %11483 = vmatpush3.msra.mxu1 %v15811_v33 }
 0x927   :  { %11428 = vmatpush3.msra.mxu0 %v15771_v47  ;;  %11484 = vmatprep.subr.mxu1 %v15534_v45 }
 0x928   :  { %11429 = vmatprep.subr.mxu0 %v15534_v45  ;;  %11485 = vmatpush3.msra.mxu1 %v15819_v46 }
 0x929   :  { %11430 = vmatpush3.msra.mxu0 %v15781_v12  ;;  %11486 = vmatprep.mubr.msk.f32.mxu1 %vm12002_vm0, %v15534_v45 }
 0x92a   :  { %11431 = vmatprep.subr.mxu0 %v15534_v45  ;;  %11487 = vmatmul.mubr.f32.vlgmr.msra.gmra.mxu1 %v6618_v43  ;;  %v7374_v43 = vld [vmem:[#allocation2 + $0x448] sm:$0xff] }
 0x92b   :  { %11548 = vmatprep.subr.mxu1 %v15534_v45  ;;  %11432 = vmatpush3.msra.mxu0 %v15796_v63  ;;  %v16201_v1 = vand.u32 4294901760, %v7374_v43 }
 0x92c   :  { %11549 = vmatpush3.msra.mxu1 %v15657_v3  ;;  %11433 = vmatprep.subr.mxu0 %v15534_v45  ;;  %v17030_v3 = vand.u32 4294901760, %v15660_v2  ;;  %v17032_v2 = vand.u32 4294901760, %v15679_v49  ;;  %v17035_v49 = vand.u32 4294901760, %v15711_v28  ;;  %v17041_v28 = vand.u32 4294901760, %v15781_v12 }
 0x92d   :  { %11550 = vmatprep.subr.mxu1 %v15534_v45  ;;  %11434 = vmatpush3.msra.mxu0 %v15808_v36  ;;  %v16209_v11 = vsub.f32 %v7374_v43, %v16201_v1  ;;  %v7366_v43 = vld [vmem:[#allocation2 + $0x408] sm:$0xff] }
 0x92e   :  { %11489 = vmatprep.mubr.msk.f32.mxu1 %vm12002_vm0, %v15534_v45  ;;  %11551 = vmatpush3.msra.mxu1 %v15662_v61  ;;  %v17031_v61 = vand.u32 4294901760, %v15668_v62  ;;  %v17033_v62 = vand.u32 4294901760, %v15690_v59  ;;  %v17037_v59 = vand.u32 4294901760, %v15736_v48  ;;  %v17045_v48 = vand.u32 4294901760, %v15831_v9 }
 0x92f   :  { %11435 = vmatprep.subr.mxu0 %v15534_v45  ;;  %11490 = vmatmul.mubr.f32.gmra.mxu1 %v6628_v29 }
 0x930   :  { %11552 = vmatprep.subr.mxu1 %v15534_v45  ;;  %11436 = vmatpush3.msra.mxu0 %v15823_v34 }
 0x931   :  { %11553 = vmatpush3.msra.mxu1 %v15670_v50  ;;  %11437 = vmatprep.subr.mxu0 %v15534_v45  ;;  %v16049_v50 = vld [vmem:[%s16638_s3] sm:$0xff] }
 0x932   :  { %11554 = vmatprep.subr.mxu1 %v15534_v45  ;;  %11438 = vmatpush3.msra.mxu0 %v15831_v9 }
 0x933   :  { %11439 = vmatprep.mubr.msk.f32.mxu0 %vm12002_vm0, %v15534_v45  ;;  %11492 = vmatprep.mubr.msk.f32.mxu1 %vm12002_vm0, %v15534_v45 }
 0x934   :  { %11555 = vmatpush3.msra.mxu1 %v15681_v55  ;;  %11440 = vmatmul.mubr.f32.vlgmr.msra.gmra.mxu0 %v15866_v41  ;;  %v17036_v55 = vand.u32 4294901760, %v15721_v25  ;;  %v17043_v25 = vand.u32 4294901760, %v15808_v36  ;;  %v16188_v41 = vand.u32 4294901760, %v7375_v24 }
 0x935   :  { %11493 = vmatmul.mubr.f32.gmra.mxu1 %v6638_v58  ;;  %11501 = vmatprep.subr.mxu0 %v15534_v45 }
 0x936   :  { %11556 = vmatprep.subr.mxu1 %v15534_v45  ;;  %11502 = vmatpush3.msra.mxu0 %v17030_v3  ;;  %v16199_v29 = vsub.f32 %v7375_v24, %v16188_v41 }
 0x937   :  { %11557 = vmatpush3.msra.mxu1 %v15693_v35  ;;  %11503 = vmatprep.subr.mxu0 %v15534_v45  ;;  %v17038_v35 = vand.u32 4294901760, %v15748_v57 }
 0x938   :  { %11558 = vmatprep.subr.mxu1 %v15534_v45  ;;  %11442 = vmatprep.mubr.msk.f32.mxu0 %vm12002_vm0, %v15534_v45  ;;  %v16834_v58 = vand.u32 4294901760, %v16199_v29 }
 0x939   :  { %11495 = vmatprep.mubr.msk.f32.mxu1 %vm12002_vm0, %v15534_v45  ;;  %11504 = vmatpush3.msra.mxu0 %v17031_v61  ;;  %v16236_v61 = vsub.f32 %v7372_v17, %v16226_v16  ;;  %v7365_v17 = vld [vmem:[#allocation2 + $0x400] sm:$0xff] }
 0x93a   :  { %11559 = vmatpush3.msra.mxu1 %v15700_v0  ;;  %11443 = vmatmul.mubr.f32.gmra.mxu0 %v15870_v13  ;;  %v17039_v0 = vand.u32 4294901760, %v15763_v5 }
 0x93b   :  { %11496 = vmatmul.mubr.f32.gmra.mxu1 %v6648_v39  ;;  %11505 = vmatprep.subr.mxu0 %v15534_v45  ;;  %v7557_v39 = vsub.f32 %v16199_v29, %v16834_v58 }
 0x93c   :  { %11560 = vmatprep.subr.mxu1 %v15534_v45  ;;  %11506 = vmatpush3.msra.mxu0 %v17032_v2  ;;  %v16239_v2 = vand.u32 4294901760, %v7371_v6 }
 0x93d   :  { %11561 = vmatpush3.msra.mxu1 %v15713_v20  ;;  %11507 = vmatprep.subr.mxu0 %v15534_v45  ;;  %v17042_v20 = vand.u32 4294901760, %v15796_v63  ;;  %v7377_v63 = vld [vmem:[#allocation2 + $0x460] sm:$0xff]  ;;  %v7558_v23 = vand.u32 4294901760, %v7557_v39 }
 0x93e   :  { %11562 = vmatprep.subr.mxu1 %v15534_v45  ;;  %11445 = vmatprep.mubr.msk.f32.mxu0 %vm12002_vm0, %v15534_v45 }
 0x93f   :  { %11498 = vmatprep.mubr.msk.f32.mxu1 %vm12002_vm0, %v15534_v45  ;;  %11508 = vmatpush3.msra.mxu0 %v17033_v62  ;;  %v17034_v45 = vand.u32 4294901760, %v15704_v30  ;;  %v17040_v30 = vand.u32 4294901760, %v15771_v47  ;;  %v7378_v47 = vld [vmem:[#allocation2 + $0x468] sm:$0xff] }
 0x940   :  { %11563 = vmatpush3.msra.mxu1 %v15723_v19  ;;  %11446 = vmatmul.mubr.f32.gmra.mxu0 %v15891_v15  ;;  %v17044_v19 = vand.u32 4294901760, %v15823_v34  ;;  %v7376_v34 = vld [vmem:[#allocation2 + $0x458] sm:$0xff]  ;;  %v7370_v62 = vld [vmem:[#allocation2 + $0x428] sm:$0xff] }
 0x941   :  { %11499 = vmatmul.mubr.f32.gmra.mxu1 %v6658_v52  ;;  %11509 = vmatprep.subr.mxu0 %v16049_v50  ;;  %v16181_v32 = vand.u32 4294901760, %v7376_v34 }
 0x942   :  { %11564 = vmatprep.subr.mxu1 %v16049_v50  ;;  %11510 = vmatpush3.msra.mxu0 %v17034_v45 }
 0x943   :  { %11565 = vmatpush3.msra.mxu1 %v15738_v54  ;;  %11511 = vmatprep.subr.mxu0 %v16049_v50  ;;  %v7380_v54 = vld [vmem:[#allocation2 + $0x478] sm:$0xff]  ;;  %v16192_v13 = vsub.f32 %v7376_v34, %v16181_v32  ;;  %v7367_v34 = vld [vmem:[#allocation2 + $0x410] sm:$0xff] }
 0x944   :  { %11566 = vmatprep.subr.mxu1 %v16049_v50  ;;  %11448 = vmatprep.mubr.msk.f32.mxu0 %vm12002_vm0, %v16049_v50  ;;  %v16145_v57 = vand.u32 4294901760, %v7380_v54 }
 0x945   :  { %11512 = vmatpush3.msra.mxu0 %v17035_v49  ;;  %11567 = vmatpush3.msra.mxu1 %v15751_v40  ;;  %v7379_v40 = vld [vmem:[#allocation2 + $0x470] sm:$0xff]  ;;  %v16835_v15 = vand.u32 4294901760, %v16192_v13 }
 0x946   :  { %11449 = vmatmul.mubr.f32.gmra.mxu0 %v15911_v37  ;;  %11513 = vmatprep.subr.mxu0 %v16049_v50  ;;  %v16150_v5 = vand.u32 4294901760, %v7379_v40  ;;  %v16211_v37 = vand.u32 4294901760, %v7373_v14 }
 0x947   :  { %11568 = vmatprep.subr.mxu1 %v16049_v50  ;;  %11514 = vmatpush3.msra.mxu0 %v17036_v55  ;;  %v16831_v55 = vand.u32 4294901760, %v16236_v61 }
 0x948   :  { %11569 = vmatpush3.msra.mxu1 %v15759_v44  ;;  %11515 = vmatprep.subr.mxu0 %v16049_v50  ;;  %v16148_v44 = vsub.f32 %v7380_v54, %v16145_v57  ;;  %v16156_v12 = vsub.f32 %v7379_v40, %v16150_v5  ;;  %v16224_v60 = vsub.f32 %v7373_v14, %v16211_v37 }
 0x949   :  { %11570 = vmatprep.subr.mxu1 %v16049_v50  ;;  %11451 = vmatprep.mubr.msk.f32.mxu0 %vm12002_vm0, %v16049_v50 }
 0x94a   :  { %11516 = vmatpush3.msra.mxu0 %v17037_v59  ;;  %11571 = vmatpush3.msra.mxu1 %v15773_v10  ;;  %v16839_v10 = vand.u32 4294901760, %v16148_v44  ;;  %v16838_v36 = vand.u32 4294901760, %v16156_v12  ;;  %v16832_v3 = vand.u32 4294901760, %v16224_v60  ;;  %v16247_v59 = vand.u32 4294901760, %v7370_v62 }
 0x94b   :  { %11452 = vmatmul.mubr.f32.gmra.mxu0 %v15930_v31  ;;  %11517 = vmatprep.subr.mxu0 %v16049_v50  ;;  %v16833_v31 = vand.u32 4294901760, %v16209_v11 }
 0x94c   :  { %11572 = vmatprep.subr.mxu1 %v16049_v50  ;;  %11518 = vmatpush3.msra.mxu0 %v17038_v35  ;;  %v7529_v8 = vsub.f32 %v16156_v12, %v16838_v36  ;;  %v7571_v49 = vsub.f32 %v16224_v60, %v16832_v3  ;;  %v16251_v35 = vsub.f32 %v7371_v6, %v16239_v2 }
 0x94d   :  { %11573 = vmatpush3.msra.mxu1 %v15783_v22  ;;  %11519 = vmatprep.subr.mxu0 %v16049_v50  ;;  %v16158_v22 = vand.u32 4294901760, %v7378_v47  ;;  %v7564_v51 = vsub.f32 %v16209_v11, %v16833_v31 }
 0x94e   :  { %11574 = vmatprep.subr.mxu1 %v16049_v50  ;;  %11520 = vmatpush3.msra.mxu0 %v17039_v0  ;;  %v7369_v0 = vld [vmem:[#allocation2 + $0x420] sm:$0xff] }
 0x94f   :  { %11575 = vmatpush3.msra.mxu1 %v15798_v42  ;;  %11521 = vmatprep.subr.mxu0 %v16049_v50  ;;  %v7522_v42 = vsub.f32 %v16148_v44, %v16839_v10  ;;  %v7565_v45 = vand.u32 4294901760, %v7564_v51 }
 0x950   :  { %11576 = vmatprep.subr.mxu1 %v16049_v50  ;;  %11522 = vmatpush3.msra.mxu0 %v17040_v30  ;;  %v7572_v30 = vand.u32 4294901760, %v7571_v49 }
 0x951   :  { %11577 = vmatpush3.msra.mxu1 %v15811_v33  ;;  %11523 = vmatprep.subr.mxu0 %v16049_v50  ;;  %v16167_v33 = vsub.f32 %v7378_v47, %v16158_v22  ;;  %v7523_v9 = vand.u32 4294901760, %v7522_v42 }
 0x952   :  { %11578 = vmatprep.subr.mxu1 %v16049_v50  ;;  %11524 = vmatpush3.msra.mxu0 %v17041_v28  ;;  %v7578_v28 = vsub.f32 %v16236_v61, %v16831_v55 }
 0x953   :  { %11579 = vmatpush3.msra.mxu1 %v15819_v46  ;;  %11580 = vmatprep.mubr.msk.f32.mxu1 %vm12002_vm0, %v16049_v50  ;;  %v16169_v46 = vand.u32 4294901760, %v7377_v63  ;;  %v16837_v53 = vand.u32 4294901760, %v16167_v33 }
 0x954   :  { %11525 = vmatprep.subr.mxu0 %v16049_v50  ;;  %11581 = vmatmul.mubr.f32.vlgmr.msra.gmra.mxu1 %v15863_v38  ;;  %v7579_v54 = vand.u32 4294901760, %v7578_v28 }
 0x955   :  { %11526 = vmatpush3.msra.mxu0 %v17042_v20  ;;  %11583 = vmatprep.mubr.msk.f32.mxu1 %vm12002_vm0, %v16049_v50  ;;  %v16178_v56 = vsub.f32 %v7377_v63, %v16169_v46  ;;  %v7536_v7 = vsub.f32 %v16167_v33, %v16837_v53  ;;  %v16259_v20 = vsub.f32 %v7370_v62, %v16247_v59 }
 0x956   :  { %11527 = vmatprep.subr.mxu0 %v16049_v50  ;;  %11533 = vmatprep.mubr.msk.f32.mxu0 %vm12002_vm0, %v16049_v50 }
 0x957   :  { %11528 = vmatpush3.msra.mxu0 %v17043_v25  ;;  %11642 = vmatprep.subr.mxu1 %v16049_v50  ;;  %v16261_v25 = vand.u32 4294901760, %v7369_v0  ;;  %v16829_v40 = vand.u32 4294901760, %v16259_v20 }
 0x958   :  { %11529 = vmatprep.subr.mxu0 %v16049_v50  ;;  %11584 = vmatmul.mubr.f32.gmra.mxu1 %v15859_v21 }
 0x959   :  { %11530 = vmatpush3.msra.mxu0 %v17044_v19  ;;  %11586 = vmatprep.mubr.msk.f32.mxu1 %vm12002_vm0, %v16049_v50  ;;  %v16830_v19 = vand.u32 4294901760, %v16251_v35  ;;  %v16269_v47 = vsub.f32 %v7369_v0, %v16261_v25 }
 0x95a   :  { %11531 = vmatprep.subr.mxu0 %v16049_v50  ;;  %11643 = vmatpush3.msra.mxu1 %v7523_v9  ;;  %v7592_v9 = vsub.f32 %v16259_v20, %v16829_v40 }
 0x95b   :  { %11532 = vmatpush3.msra.mxu0 %v17045_v48  ;;  %11644 = vmatprep.subr.mxu1 %v16049_v50  ;;  %v7368_v48 = vld [vmem:[#allocation2 + $0x418] sm:$0xff]  ;;  %v7585_v42 = vsub.f32 %v16251_v35, %v16830_v19 }
 0x95c   :  { %11534 = vmatmul.mubr.f32.vlgmr.msra.gmra.mxu0 %v15863_v38  ;;  %11587 = vmatmul.mubr.f32.gmra.mxu1 %v15877_v18  ;;  %v16836_v38 = vand.u32 4294901760, %v16178_v56  ;;  %v16271_v63 = vand.u32 4294901760, %v7368_v48 }
 0x95d   :  { %11536 = vmatprep.mubr.msk.f32.mxu0 %vm12002_vm0, %v16049_v50  ;;  %11589 = vmatprep.mubr.msk.f32.mxu1 %vm12002_vm0, %v16049_v50 }
 0x95e   :  { %11595 = vmatprep.subr.mxu0 %v16049_v50  ;;  %v7543_v27 = vsub.f32 %v16178_v56, %v16836_v38  ;;  %v16284_v24 = vsub.f32 %v7368_v48, %v16271_v63 }
 0x95f   :  { %11596 = vmatpush3.msra.mxu0 %v16145_v57 }
 0x960   :  { %11537 = vmatmul.mubr.f32.gmra.mxu0 %v15859_v21  ;;  %11590 = vmatmul.mubr.f32.gmra.mxu1 %v15898_v4  ;;  %v7530_v21 = vand.u32 4294901760, %v7529_v8  ;;  %v16828_v8 = vand.u32 4294901760, %v16269_v47  ;;  %v16827_v14 = vand.u32 4294901760, %v16284_v24 }
 0x961   :  { %11539 = vmatprep.mubr.msk.f32.mxu0 %vm12002_vm0, %v16049_v50  ;;  %11592 = vmatprep.mubr.msk.f32.mxu1 %vm12002_vm0, %v16049_v50 }
 0x962   :  { %11597 = vmatprep.subr.mxu0 %v16049_v50  ;;  %11645 = vmatpush3.msra.mxu1 %v7530_v21  ;;  %v16286_v21 = vand.u32 4294901760, %v7367_v34 }
 0x963   :  { %11598 = vmatpush3.msra.mxu0 %v16150_v5  ;;  %11646 = vmatprep.subr.mxu1 %v16049_v50 }
 0x964   :  { %11540 = vmatmul.mubr.f32.gmra.mxu0 %v15877_v18  ;;  %11593 = vmatmul.mubr.f32.gmra.mxu1 %v15916_v26  ;;  %v7537_v18 = vand.u32 4294901760, %v7536_v7  ;;  %v7586_v7 = vand.u32 4294901760, %v7585_v42 }
 0x965   :  { %11542 = vmatprep.mubr.msk.f32.mxu0 %vm12002_vm0, %v16049_v50  ;;  %11674 = vmatprep.mubr.msk.f32.mxu1 %vm12002_vm0, %v16049_v50 }
 0x966   :  { %11599 = vmatprep.subr.mxu0 %v16049_v50  ;;  %11647 = vmatpush3.msra.mxu1 %v7537_v18  ;;  %v7593_v18 = vand.u32 4294901760, %v7592_v9 }
 0x967   :  { %11600 = vmatpush3.msra.mxu0 %v16158_v22  ;;  %11648 = vmatprep.subr.mxu1 %v16049_v50 }
 0x968   :  { %11543 = vmatmul.mubr.f32.gmra.mxu0 %v15898_v4  ;;  %11601 = vmatprep.subr.mxu0 %v16049_v50  ;;  %v7544_v4 = vand.u32 4294901760, %v7543_v27  ;;  %v7599_v27 = vsub.f32 %v16269_v47, %v16828_v8 }
 0x969   :  { %11545 = vmatprep.mubr.msk.f32.mxu0 %vm12002_vm0, %v16049_v50  ;;  %11602 = vmatpush3.msra.mxu0 %v16169_v46 }
 0x96a   :  { %11603 = vmatprep.subr.mxu0 %v16049_v50  ;;  %11649 = vmatpush3.msra.mxu1 %v7544_v4  ;;  %v16296_v4 = vsub.f32 %v7367_v34, %v16286_v21  ;;  %v7600_v39 = vand.u32 4294901760, %v7599_v27 }
 0x96b   :  { %11604 = vmatpush3.msra.mxu0 %v16181_v32  ;;  %11650 = vmatprep.subr.mxu1 %v16049_v50 }
 0x96c   :  { %11546 = vmatmul.mubr.f32.gmra.mxu0 %v15916_v26  ;;  %11605 = vmatprep.subr.mxu0 %v16049_v50  ;;  %v7550_v26 = vsub.f32 %v16192_v13, %v16835_v15  ;;  %17046 = vst [vmem:[#allocation10_spill] sm:$0xff] %v16296_v4  ;;  %v16826_v6 = vand.u32 4294901760, %v16296_v4 }
 0x96d   :  { %11627 = vmatprep.mubr.msk.f32.mxu0 %vm12002_vm0, %v16049_v50  ;;  %11606 = vmatpush3.msra.mxu0 %v16188_v41 }
 0x96e   :  { %11607 = vmatprep.subr.mxu0 %v16049_v50  ;;  %v7551_v52 = vand.u32 4294901760, %v7550_v26  ;;  %v16299_v26 = vand.u32 4294901760, %v7366_v43 }
 0x96f   :  { %11608 = vmatpush3.msra.mxu0 %v16201_v1 }
 0x970   :  { %11609 = vmatprep.subr.mxu0 %v16049_v50  ;;  %11651 = vmatpush3.msra.mxu1 %v7551_v52  ;;  %v7606_v52 = vsub.f32 %v16284_v24, %v16827_v14  ;;  %v16311_v51 = vsub.f32 %v7366_v43, %v16299_v26 }
 0x971   :  { %11610 = vmatpush3.msra.mxu0 %v16211_v37  ;;  %11652 = vmatprep.subr.mxu1 %v16049_v50 }
 0x972   :  { %11611 = vmatprep.subr.mxu0 %v16049_v50  ;;  %11653 = vmatpush3.msra.mxu1 %v7558_v23  ;;  %v16307_v23 = vand.u32 4294901760, %v7365_v17  ;;  %17047 = vst [vmem:[#allocation13_spill] sm:$0xff] %v16311_v51  ;;  %v7607_v62 = vand.u32 4294901760, %v7606_v52  ;;  %v16825_v0 = vand.u32 4294901760, %v16311_v51 }
 0x973   :  { %11612 = vmatpush3.msra.mxu0 %v16226_v16  ;;  %11654 = vmatprep.subr.mxu1 %v16049_v50 }
 0x974   :  { %11613 = vmatprep.subr.mxu0 %v16049_v50  ;;  %11655 = vmatpush3.msra.mxu1 %v7565_v45  ;;  %v7613_v45 = vsub.f32 %v16296_v4, %v16826_v6  ;;  %v16319_v49 = vsub.f32 %v7365_v17, %v16307_v23  ;;  %v7620_v48 = vsub.f32 %v16311_v51, %v16825_v0 }
 0x975   :  { %11614 = vmatpush3.msra.mxu0 %v16239_v2  ;;  %11656 = vmatprep.subr.mxu1 %v16049_v50 }
 0x976   :  { %11615 = vmatprep.subr.mxu0 %v16049_v50  ;;  %11657 = vmatpush3.msra.mxu1 %v7572_v30  ;;  %17048 = vst [vmem:[#allocation6_spill] sm:$0xff] %v16319_v49  ;;  %v7614_v30 = vand.u32 4294901760, %v7613_v45  ;;  %v16824_v28 = vand.u32 4294901760, %v16319_v49  ;;  %v7621_v42 = vand.u32 4294901760, %v7620_v48 }
 0x977   :  { %11616 = vmatpush3.msra.mxu0 %v16247_v59  ;;  %11658 = vmatprep.subr.mxu1 %v16049_v50 }
 0x978   :  { %11617 = vmatprep.subr.mxu0 %v16049_v50  ;;  %11659 = vmatpush3.msra.mxu1 %v7579_v54  ;;  %v7627_v54 = vsub.f32 %v16319_v49, %v16824_v28 }
 0x979   :  { %11618 = vmatpush3.msra.mxu0 %v16261_v25  ;;  %11660 = vmatprep.subr.mxu1 %v16049_v50 }
 0x97a   :  { %11619 = vmatprep.subr.mxu0 %v16049_v50  ;;  %11661 = vmatpush3.msra.mxu1 %v7586_v7  ;;  %v7628_v34 = vand.u32 4294901760, %v7627_v54 }
 0x97b   :  { %11620 = vmatpush3.msra.mxu0 %v16271_v63  ;;  %11662 = vmatprep.subr.mxu1 %v16049_v50 }
 0x97c   :  { %11621 = vmatprep.subr.mxu0 %v16049_v50  ;;  %11663 = vmatpush3.msra.mxu1 %v7593_v18 }
 0x97d   :  { %11622 = vmatpush3.msra.mxu0 %v16286_v21  ;;  %11664 = vmatprep.subr.mxu1 %v16049_v50 }
 0x97e   :  { %11623 = vmatprep.subr.mxu0 %v16049_v50  ;;  %11665 = vmatpush3.msra.mxu1 %v7600_v39 }
 0x97f   :  { %11624 = vmatpush3.msra.mxu0 %v16299_v26  ;;  %11666 = vmatprep.subr.mxu1 %v16049_v50 }
 0x980   :  { %11625 = vmatprep.subr.mxu0 %v16049_v50  ;;  %11667 = vmatpush3.msra.mxu1 %v7607_v62 }
 0x981   :  { %11626 = vmatpush3.msra.mxu0 %v16307_v23  ;;  %11668 = vmatprep.subr.mxu1 %v16049_v50 }
 0x982   :  { %11689 = vmatprep.subr.mxu0 %v16049_v50  ;;  %11669 = vmatpush3.msra.mxu1 %v7614_v30 }
 0x983   :  { %11670 = vmatprep.subr.mxu1 %v16049_v50 }
 0x984   :  { %11671 = vmatpush3.msra.mxu1 %v7621_v42 }
 0x985   :  { %11672 = vmatprep.subr.mxu1 %v16049_v50 }
 0x986   :  { %11673 = vmatpush3.msra.mxu1 %v7628_v34 }
 0x987   :  { %11736 = vmatprep.subr.mxu1 %v16049_v50 }
 0x9c3   :  { %v6813_v9 = vpop.f32.mrf.mxu1 }
 0x9c5   :  { %v11394_v7 = vpop.f32.mrf.mxu1 }
 0x9c7   :  { %v6819_v43 = vpop.f32.mrf.mxu1 }
 0x9c9   :  { %v11397_v18 = vpop.f32.mrf.mxu1 }
 0x9cb   :  { %v6622_v27 = vpop.f32.mrf.mxu0 }
 0x9cc   :  { %v6814_v17 = vadd.f32 %v6813_v9, %v6622_v27  ;;  %v6825_v39 = vpop.f32.mrf.mxu1 }
 0x9cd   :  { %v11347_v52 = vpop.f32.mrf.mxu0 }
 0x9ce   :  { %v11400_v62 = vpop.f32.mrf.mxu1 }
 0x9d1   :  { %v6632_v45 = vpop.f32.mrf.mxu0 }
 0x9d2   :  { %v6820_v30 = vadd.f32 %v6819_v43, %v6632_v45  ;;  %v6831_v48 = vpop.f32.mrf.mxu1 }
 0x9d3   :  { %v11350_v28 = vpop.f32.mrf.mxu0 }
 0x9d4   :  { %v11403_v54 = vpop.f32.mrf.mxu1 }
 0x9d7   :  { %v6642_v42 = vpop.f32.mrf.mxu0 }
 0x9d8   :  { %v6826_v0 = vadd.f32 %v6825_v39, %v6642_v42  ;;  %v6837_v6 = vpop.f32.mrf.mxu1 }
 0x9d9   :  { %v11353_v34 = vpop.f32.mrf.mxu0 }
 0x9da   :  { %v11406_v14 = vpop.f32.mrf.mxu1 }
 0x9dd   :  { %v6652_v8 = vpop.f32.mrf.mxu0 }
 0x9de   :  { %v6832_v40 = vadd.f32 %v6831_v48, %v6652_v8 }
 0x9df   :  { %v11356_v7 = vpop.f32.mrf.mxu0 }
 0x9e2   :  { %v6662_v19 = vpop.f32.mrf.mxu0 }
 0x9e3   :  { %v6838_v18 = vadd.f32 %v6837_v6, %v6662_v19 }
 0x9e4   :  { %v11359_v55 = vpop.f32.mrf.mxu0 }
 0x9ea   :  { %v7058_v9 = vpop.f32.mrf.mxu1 }
 0x9ec   :  { %v11488_v27 = vpop.f32.mrf.mxu1 }
 0x9ef   :  { %v7066_v52 = vpop.f32.mrf.mxu1 }
 0x9f1   :  { %v11491_v62 = vpop.f32.mrf.mxu1 }
 0x9f4   :  { %v6941_v3 = vpop.f32.mrf.mxu0 }
 0x9f5   :  { %v7074_v43 = vpop.f32.mrf.mxu1  ;;  %v6942_v15 = vadd.f32 %v6941_v3, %v6814_v17 }
 0x9f6   :  { %v11441_v45 = vpop.f32.mrf.mxu0 }
 0x9f7   :  { %v11494_v28 = vpop.f32.mrf.mxu1  ;;  %v7059_v45 = vadd.f32 %v7058_v9, %v6942_v15 }
 0x9f8   :  { %v17049_v28 = vld [vmem:[#allocation5_spill] sm:$0xff] }
 0x9f9   :  { %v7355_v36 = vsub.s32 7, %v17049_v28 }
 0x9fa   :  { %v6948_v54 = vpop.f32.mrf.mxu0 }
 0x9fb   :  { %v7082_v31 = vpop.f32.mrf.mxu1  ;;  %v6949_v53 = vadd.f32 %v6948_v54, %v6820_v30 }
 0x9fc   :  { %v11444_v39 = vpop.f32.mrf.mxu0 }
 0x9fd   :  { %v11497_v42 = vpop.f32.mrf.mxu1 }
 0xa00   :  { %v6955_v34 = vpop.f32.mrf.mxu0 }
 0xa01   :  { %v7090_v14 = vpop.f32.mrf.mxu1 }
 0xa02   :  { %v11447_v58 = vpop.f32.mrf.mxu0 }
 0xa03   :  { %v11500_v8 = vpop.f32.mrf.mxu1  ;;  %v6956_v58 = vadd.f32 %v6955_v34, %v6826_v0 }
 0xa06   :  { %v6962_v48 = vpop.f32.mrf.mxu0 }
 0xa07   :  { %v6963_v28 = vadd.f32 %v6962_v48, %v6832_v40 }
 0xa08   :  { %v11450_v7 = vpop.f32.mrf.mxu0 }
 0xa09   :  { %v11973_v7 = vld [vmem:[%s16637_s2] sm:$0xff]  ;;  %v7083_v40 = vadd.f32 %v7082_v31, %v6963_v28 }
 0xa0b   :  { %v6969_v19 = vpop.f32.mrf.mxu0 }
 0xa0d   :  { %v11453_v55 = vpop.f32.mrf.mxu0 }
 0xa0e   :  { %v7356_v55 = vrot.slane %v11973_v7, %v7355_v36  ;;  %v6970_v36 = vadd.f32 %v6969_v19, %v6838_v18  ;;  %v17052_v18 = vld [vmem:[#allocation11_spill] sm:$0xff] }
 0xa14   :  { %v7320_v6 = vpop.f32.mrf.mxu1 }
 0xa16   :  { %v11582_v27 = vpop.f32.mrf.mxu1 }
 0xa17   :  { %v7067_v27 = vadd.f32 %v7066_v52, %v6949_v53  ;;  %v7358_v53 = vmul.f32 0.0, %v7356_v55 }
 0xa18   :  { %v7326_v62 = vpop.f32.mrf.mxu1 }
 0xa1a   :  { %v11585_v38 = vpop.f32.mrf.mxu1 }
 0xa1b   :  { %v17050_v38 = vld [vmem:[#allocation12_spill] sm:$0xff] }
 0xa1c   :  { %v7209_v10 = vpop.f32.mrf.mxu0  ;;  %v7332_v39 = vpop.f32.mrf.mxu1 }
 0xa1d   :  { %v7210_v42 = vadd.f32 %v7209_v10, %v7059_v45 }
 0xa1e   :  { %v11535_v49 = vpop.f32.mrf.mxu0  ;;  %v11588_v51 = vpop.f32.mrf.mxu1 }
 0xa1f   :  { %v7321_v8 = vadd.f32 %v7320_v6, %v7210_v42  ;;  %v7075_v49 = vadd.f32 %v7074_v43, %v6956_v58  ;;  %v17051_v6 = vld [vmem:[#allocation7_spill] sm:$0xff]  ;;  %v7091_v58 = vadd.f32 %v7090_v14, %v6970_v36 }
 0xa20   :  { %v7215_v3 = vpop.f32.mrf.mxu0  ;;  %v7338_v17 = vpop.f32.mrf.mxu1 }
 0xa21   :  { %v7348_v30 = vadd.f32 %v7321_v8, %v17050_v38  ;;  %v7216_v15 = vadd.f32 %v7215_v3, %v7067_v27 }
 0xa22   :  { %v11538_v9 = vpop.f32.mrf.mxu0  ;;  %v11591_v54 = vpop.f32.mrf.mxu1 }
 0xa23   :  { %v7359_v4 = vadd.f32 %v7356_v55, %v7348_v30  ;;  %v7327_v10 = vadd.f32 %v7326_v62, %v7216_v15  ;;  %v17053_v54 = vld [vmem:[#allocation8_spill] sm:$0xff] }
 0xa24   :  { %v7221_v51 = vpop.f32.mrf.mxu0  ;;  %v7344_v0 = vpop.f32.mrf.mxu1 }
 0xa25   :  { %v16342_v34 = vand.u32 4294901760, %v7359_v4  ;;  %v7349_v45 = vadd.f32 %v7327_v10, %v17051_v6  ;;  %v7222_v42 = vadd.f32 %v7221_v51, %v7075_v49 }
 0xa26   :  { %v11541_v52 = vpop.f32.mrf.mxu0  ;;  %v11594_v7 = vpop.f32.mrf.mxu1 }
 0xa27   :  { %v16346_v8 = vsub.f32 %v7359_v4, %v16342_v34  ;;  %v7360_v27 = vadd.f32 %v7356_v55, %v7349_v45  ;;  %v7333_v3 = vadd.f32 %v7332_v39, %v7222_v42  ;;  %11675 = vmatmul.mubr.f32.vlgmr.msra.gmra.mxu1 %v16342_v34  ;;  %v17054_v52 = vld [vmem:[#allocation9_spill] sm:$0xff] }
 0xa28   :  { %11737 = vmatpush3.msra.mxu1 %v16145_v57  ;;  %v7227_v43 = vpop.f32.mrf.mxu0  ;;  %11677 = vmatprep.mubr.msk.f32.mxu1 %vm12002_vm0, %v16049_v50 }
 0xa29   :  { %v7470_v48 = vand.u32 4294901760, %v16346_v8  ;;  %v7350_v19 = vadd.f32 %v7333_v3, %v17052_v18  ;;  %v7228_v62 = vadd.f32 %v7227_v43, %v7083_v40  ;;  %11738 = vmatprep.subr.mxu1 %v16049_v50  ;;  %v16355_v4 = vand.u32 4294901760, %v7360_v27 }
 0xa2a   :  { %11739 = vmatpush3.msra.mxu1 %v16150_v5  ;;  %v11544_v39 = vpop.f32.mrf.mxu0 }
 0xa2b   :  { %v7471_v31 = vsub.f32 %v16346_v8, %v7470_v48  ;;  %v7361_v38 = vadd.f32 %v7358_v53, %v7350_v19  ;;  %v7339_v30 = vadd.f32 %v7338_v17, %v7228_v62  ;;  %11740 = vmatprep.subr.mxu1 %v16049_v50  ;;  %11678 = vmatmul.mubr.f32.gmra.mxu1 %v16355_v4 }
 0xa2c   :  { %11741 = vmatpush3.msra.mxu1 %v16158_v22  ;;  %v7233_v15 = vpop.f32.mrf.mxu0  ;;  %11680 = vmatprep.mubr.msk.f32.mxu1 %vm12002_vm0, %v16049_v50  ;;  %v16367_v9 = vsub.f32 %v7360_v27, %v16355_v4 }
 0xa2d   :  { %v7472_v14 = vand.u32 4294901760, %v7471_v31  ;;  %v7351_v28 = vadd.f32 %v7339_v30, %v17053_v54  ;;  %v7234_v10 = vadd.f32 %v7233_v15, %v7091_v58  ;;  %11742 = vmatprep.subr.mxu1 %v16049_v50  ;;  %v16371_v17 = vand.u32 4294901760, %v7361_v38  ;;  %v17055_v15 = vld [vmem:[#allocation10_spill] sm:$0xff] }
 0xa2e   :  { %11743 = vmatpush3.msra.mxu1 %v16169_v46  ;;  %v11547_v49 = vpop.f32.mrf.mxu0  ;;  %v7480_v51 = vand.u32 4294901760, %v16367_v9 }
 0xa2f   :  { %v7362_v6 = vadd.f32 %v7356_v55, %v7351_v28  ;;  %v7345_v45 = vadd.f32 %v7344_v0, %v7234_v10  ;;  %11744 = vmatprep.subr.mxu1 %v16049_v50  ;;  %11628 = vmatmul.mubr.f32.vlgmr.msra.gmra.mxu0 %v7472_v14  ;;  %v16377_v42 = vsub.f32 %v7361_v38, %v16371_v17 }
 0xa30   :  { %11681 = vmatmul.mubr.f32.gmra.mxu1 %v16371_v17  ;;  %11690 = vmatpush3.msra.mxu0 %v16148_v44  ;;  %v7481_v36 = vsub.f32 %v16367_v9, %v7480_v51 }
 0xa31   :  { %v7352_v7 = vadd.f32 %v7345_v45, %v17054_v52  ;;  %11745 = vmatpush3.msra.mxu1 %v16181_v32  ;;  %11691 = vmatprep.subr.mxu0 %v16049_v50  ;;  %v16387_v55 = vand.u32 4294901760, %v7362_v6  ;;  %v7490_v0 = vand.u32 4294901760, %v16377_v42 }
 0xa32   :  { %11746 = vmatprep.subr.mxu1 %v16049_v50  ;;  %11692 = vmatpush3.msra.mxu0 %v16156_v12  ;;  %v7482_v27 = vand.u32 4294901760, %v7481_v36 }
 0xa33   :  { %v7363_v3 = vadd.f32 %v7358_v53, %v7352_v7  ;;  %11747 = vmatpush3.msra.mxu1 %v16188_v41  ;;  %11630 = vmatprep.mubr.msk.f32.mxu0 %vm12002_vm0, %v16049_v50  ;;  %v7491_v40 = vsub.f32 %v16377_v42, %v7490_v0  ;;  %v16399_v43 = vsub.f32 %v7362_v6, %v16387_v55 }
 0xa34   :  { %11683 = vmatprep.mubr.msk.f32.mxu1 %vm12002_vm0, %v16049_v50  ;;  %11693 = vmatprep.subr.mxu0 %v16049_v50 }
 0xa35   :  { %11748 = vmatprep.subr.mxu1 %v16049_v50  ;;  %11631 = vmatmul.mubr.f32.gmra.mxu0 %v7482_v27  ;;  %v16405_v53 = vand.u32 4294901760, %v7363_v3  ;;  %v7500_v18 = vand.u32 4294901760, %v16399_v43  ;;  %v7492_v19 = vand.u32 4294901760, %v7491_v40 }
 0xa36   :  { %11684 = vmatmul.mubr.f32.gmra.mxu1 %v16387_v55  ;;  %11694 = vmatpush3.msra.mxu0 %v16167_v33 }
 0xa37   :  { %11749 = vmatpush3.msra.mxu1 %v16201_v1  ;;  %11695 = vmatprep.subr.mxu0 %v16049_v50  ;;  %v16413_v62 = vsub.f32 %v7363_v3, %v16405_v53  ;;  %v7501_v39 = vsub.f32 %v16399_v43, %v7500_v18 }
 0xa38   :  { %11750 = vmatprep.subr.mxu1 %v16049_v50  ;;  %11696 = vmatpush3.msra.mxu0 %v16178_v56 }
 0xa39   :  { %11751 = vmatpush3.msra.mxu1 %v16211_v37  ;;  %11633 = vmatprep.mubr.msk.f32.mxu0 %vm12002_vm0, %v16049_v50  ;;  %v7510_v58 = vand.u32 4294901760, %v16413_v62  ;;  %v7502_v31 = vand.u32 4294901760, %v7501_v39 }
 0xa3a   :  { %11686 = vmatprep.mubr.msk.f32.mxu1 %vm12002_vm0, %v16049_v50  ;;  %11697 = vmatprep.subr.mxu0 %v16049_v50 }
 0xa3b   :  { %11752 = vmatprep.subr.mxu1 %v16049_v50  ;;  %11634 = vmatmul.mubr.f32.gmra.mxu0 %v7492_v19  ;;  %v7511_v38 = vsub.f32 %v16413_v62, %v7510_v58 }
 0xa3c   :  { %11687 = vmatmul.mubr.f32.gmra.mxu1 %v16405_v53  ;;  %11698 = vmatpush3.msra.mxu0 %v16192_v13 }
 0xa3d   :  { %11753 = vmatpush3.msra.mxu1 %v16226_v16  ;;  %11699 = vmatprep.subr.mxu0 %v16049_v50  ;;  %v7512_v30 = vand.u32 4294901760, %v7511_v38 }
 0xa3e   :  { %11754 = vmatprep.subr.mxu1 %v16049_v50  ;;  %11700 = vmatpush3.msra.mxu0 %v16199_v29 }
 0xa3f   :  { %11755 = vmatpush3.msra.mxu1 %v16239_v2  ;;  %11636 = vmatprep.mubr.msk.f32.mxu0 %vm12002_vm0, %v16049_v50 }
 0xa40   :  { %11701 = vmatprep.subr.mxu0 %v16049_v50  ;;  %11756 = vmatprep.subr.mxu1 %v16049_v50 }
 0xa41   :  { %11637 = vmatmul.mubr.f32.gmra.mxu0 %v7502_v31  ;;  %11757 = vmatpush3.msra.mxu1 %v16247_v59 }
 0xa42   :  { %11702 = vmatpush3.msra.mxu0 %v16209_v11  ;;  %11758 = vmatprep.subr.mxu1 %v16049_v50 }
 0xa43   :  { %11703 = vmatprep.subr.mxu0 %v16049_v50  ;;  %11759 = vmatpush3.msra.mxu1 %v16261_v25 }
 0xa44   :  { %11704 = vmatpush3.msra.mxu0 %v16224_v60  ;;  %11639 = vmatprep.mubr.msk.f32.mxu0 %vm12002_vm0, %v16049_v50 }
 0xa45   :  { %11705 = vmatprep.subr.mxu0 %v16049_v50  ;;  %11760 = vmatprep.subr.mxu1 %v16049_v50 }
 0xa46   :  { %11640 = vmatmul.mubr.f32.gmra.mxu0 %v7512_v30  ;;  %11761 = vmatpush3.msra.mxu1 %v16271_v63 }
 0xa47   :  { %11706 = vmatpush3.msra.mxu0 %v16236_v61  ;;  %11762 = vmatprep.subr.mxu1 %v16049_v50 }
 0xa48   :  { %11707 = vmatprep.subr.mxu0 %v16049_v50  ;;  %11763 = vmatpush3.msra.mxu1 %v16286_v21 }
 0xa49   :  { %11708 = vmatpush3.msra.mxu0 %v16251_v35  ;;  %11764 = vmatprep.subr.mxu1 %v16049_v50 }
 0xa4a   :  { %11709 = vmatprep.subr.mxu0 %v16049_v50  ;;  %11765 = vmatpush3.msra.mxu1 %v16299_v26 }
 0xa4b   :  { %11710 = vmatpush3.msra.mxu0 %v16259_v20  ;;  %11766 = vmatprep.subr.mxu1 %v16049_v50 }
 0xa4c   :  { %11711 = vmatprep.subr.mxu0 %v16049_v50  ;;  %11767 = vmatpush3.msra.mxu1 %v16307_v23 }
 0xa4d   :  { %11712 = vmatpush3.msra.mxu0 %v16269_v47  ;;  %11768 = vmatprep.mubr.msk.f32.mxu1 %vm12002_vm0, %v16049_v50 }
 0xa4e   :  { %11713 = vmatprep.subr.mxu0 %v16049_v50  ;;  %11769 = vmatmul.mubr.f32.vlgmr.msra.gmra.mxu1 %v7470_v48  ;;  %v17056_v48 = vld [vmem:[#allocation13_spill] sm:$0xff] }
 0xa4f   :  { %11830 = vmatprep.subr.mxu1 %v16049_v50  ;;  %11714 = vmatpush3.msra.mxu0 %v16284_v24 }
 0xa50   :  { %11831 = vmatpush3.msra.mxu1 %v16145_v57  ;;  %11715 = vmatprep.subr.mxu0 %v16049_v50  ;;  %v17057_v57 = vld [vmem:[#allocation6_spill] sm:$0xff] }
 0xa51   :  { %11832 = vmatprep.subr.mxu1 %v16049_v50  ;;  %11716 = vmatpush3.msra.mxu0 %v17055_v15 }
 0xa52   :  { %11771 = vmatprep.mubr.msk.f32.mxu1 %vm12002_vm0, %v16049_v50  ;;  %11833 = vmatpush3.msra.mxu1 %v16150_v5  ;;  %v17058_v5 = vand.u32 4294901760, %v16148_v44  ;;  %v17060_v44 = vand.u32 4294901760, %v16167_v33  ;;  %v17062_v33 = vand.u32 4294901760, %v16192_v13  ;;  %v17067_v13 = vand.u32 4294901760, %v16251_v35 }
 0xa53   :  { %11717 = vmatprep.subr.mxu0 %v16049_v50  ;;  %11772 = vmatmul.mubr.f32.gmra.mxu1 %v7480_v51 }
 0xa54   :  { %11834 = vmatprep.subr.mxu1 %v16049_v50  ;;  %11718 = vmatpush3.msra.mxu0 %v17056_v48 }
 0xa55   :  { %11835 = vmatpush3.msra.mxu1 %v16158_v22  ;;  %11719 = vmatprep.subr.mxu0 %v16049_v50  ;;  %v17059_v22 = vand.u32 4294901760, %v16156_v12  ;;  %v17061_v12 = vand.u32 4294901760, %v16178_v56  ;;  %v17064_v56 = vand.u32 4294901760, %v16209_v11  ;;  %v17070_v11 = vand.u32 4294901760, %v16284_v24 }
 0xa56   :  { %11836 = vmatprep.subr.mxu1 %v16049_v50  ;;  %11720 = vmatpush3.msra.mxu0 %v17057_v57 }
 0xa57   :  { %11721 = vmatprep.mubr.msk.f32.mxu0 %vm12002_vm0, %v16049_v50  ;;  %11774 = vmatprep.mubr.msk.f32.mxu1 %vm12002_vm0, %v16049_v50 }
 0xa58   :  { %11837 = vmatpush3.msra.mxu1 %v16169_v46  ;;  %11722 = vmatmul.mubr.f32.vlgmr.msra.gmra.mxu0 %v16346_v8  ;;  %v17063_v46 = vand.u32 4294901760, %v16199_v29  ;;  %v17068_v29 = vand.u32 4294901760, %v16259_v20 }
 0xa59   :  { %11775 = vmatmul.mubr.f32.gmra.mxu1 %v7490_v0  ;;  %11783 = vmatprep.subr.mxu0 %v16049_v50 }
 0xa5a   :  { %11838 = vmatprep.subr.mxu1 %v16049_v50  ;;  %11784 = vmatpush3.msra.mxu0 %v17058_v5 }
 0xa5b   :  { %11839 = vmatpush3.msra.mxu1 %v16181_v32  ;;  %11785 = vmatprep.subr.mxu0 %v16049_v50  ;;  %v17065_v32 = vand.u32 4294901760, %v16224_v60  ;;  %v17071_v60 = vand.u32 4294901760, %v17055_v15 }
 0xa5c   :  { %11840 = vmatprep.subr.mxu1 %v16049_v50  ;;  %11724 = vmatprep.mubr.msk.f32.mxu0 %vm12002_vm0, %v16049_v50 }
 0xa5d   :  { %11777 = vmatprep.mubr.msk.f32.mxu1 %vm12002_vm0, %v16049_v50  ;;  %11786 = vmatpush3.msra.mxu0 %v17059_v22 }
 0xa5e   :  { %11841 = vmatpush3.msra.mxu1 %v16188_v41  ;;  %11725 = vmatmul.mubr.f32.gmra.mxu0 %v16367_v9  ;;  %v17066_v41 = vand.u32 4294901760, %v16236_v61  ;;  %v16614_v61 = vld [vmem:[%s16635_s0] sm:$0xff]  ;;  %s12013_s0 = smov 4  }
 0xa5f   :  { %11778 = vmatmul.mubr.f32.gmra.mxu1 %v7500_v18  ;;  %11787 = vmatprep.subr.mxu0 %v16049_v50 }
 0xa60   :  { %11842 = vmatprep.subr.mxu1 %v16049_v50  ;;  %11788 = vmatpush3.msra.mxu0 %v17060_v44 }
 0xa61   :  { %11843 = vmatpush3.msra.mxu1 %v16201_v1  ;;  %11789 = vmatprep.subr.mxu0 %v16049_v50  ;;  %v17069_v1 = vand.u32 4294901760, %v16269_v47 }
 0xa62   :  { %11844 = vmatprep.subr.mxu1 %v16049_v50  ;;  %11727 = vmatprep.mubr.msk.f32.mxu0 %vm12002_vm0, %v16049_v50 }
 0xa63   :  { %11780 = vmatprep.mubr.msk.f32.mxu1 %vm12002_vm0, %v16049_v50  ;;  %11790 = vmatpush3.msra.mxu0 %v17061_v12 }
 0xa64   :  { %11845 = vmatpush3.msra.mxu1 %v16211_v37  ;;  %11728 = vmatmul.mubr.f32.gmra.mxu0 %v16377_v42  ;;  %v11974_v37 = vld [vmem:[%s16638_s3] sm:$0xff] }
 0xa65   :  { %11781 = vmatmul.mubr.f32.gmra.mxu1 %v7510_v58  ;;  %11791 = vmatprep.subr.mxu0 %v16049_v50 }
 0xa66   :  { %11846 = vmatprep.subr.mxu1 %v16049_v50  ;;  %11792 = vmatpush3.msra.mxu0 %v17062_v33 }
 0xa67   :  { %11847 = vmatpush3.msra.mxu1 %v16226_v16  ;;  %11793 = vmatprep.subr.mxu0 %v16049_v50  ;;  %v17072_v16 = vand.u32 4294901760, %v17056_v48 }
 0xa68   :  { %11848 = vmatprep.subr.mxu1 %v16049_v50  ;;  %11730 = vmatprep.mubr.msk.f32.mxu0 %vm12002_vm0, %v16049_v50 }
 0xa69   :  { %11794 = vmatpush3.msra.mxu0 %v17063_v46  ;;  %11849 = vmatpush3.msra.mxu1 %v16239_v2  ;;  %v8245_v2 = vmul.f32 %v16614_v61, %v16614_v61 }
 0xa6a   :  { %11731 = vmatmul.mubr.f32.gmra.mxu0 %v16399_v43  ;;  %11795 = vmatprep.subr.mxu0 %v16049_v50 }
 0xa6b   :  { %11850 = vmatprep.subr.mxu1 %v16049_v50  ;;  %11796 = vmatpush3.msra.mxu0 %v17064_v56 }
 0xa6c   :  { %11851 = vmatpush3.msra.mxu1 %v16247_v59  ;;  %11797 = vmatprep.subr.mxu0 %v16049_v50  ;;  %v8260_v59 = vmul.f32 %v16614_v61, %v8245_v2 }
 0xa6d   :  { %11852 = vmatprep.subr.mxu1 %v16049_v50  ;;  %11733 = vmatprep.mubr.msk.f32.mxu0 %vm12002_vm0, %v16049_v50 }
 0xa6e   :  { %11798 = vmatpush3.msra.mxu0 %v17065_v32  ;;  %11853 = vmatpush3.msra.mxu1 %v16261_v25 }
 0xa6f   :  { %11734 = vmatmul.mubr.f32.gmra.mxu0 %v16413_v62  ;;  %11799 = vmatprep.subr.mxu0 %v16049_v50 }
 0xa70   :  { %11854 = vmatprep.subr.mxu1 %v16049_v50  ;;  %11800 = vmatpush3.msra.mxu0 %v17066_v41 }
 0xa71   :  { %11855 = vmatpush3.msra.mxu1 %v16271_v63  ;;  %11801 = vmatprep.subr.mxu0 %v16049_v50  ;;  %v8300_v63 = vld [vmem:[%s16637_s2 + $0x8] ss:$0 sm:$0xff]  ;;  %s12014_s2 = smov 126  }
 0xa72   :  { %11856 = vmatprep.subr.mxu1 %v16049_v50  ;;  %11802 = vmatpush3.msra.mxu0 %v17067_v13  ;;  %v7386_v10 = vmul.f32 0.0, %v8300_v63 }
 0xa73   :  { %11857 = vmatpush3.msra.mxu1 %v16286_v21  ;;  %11803 = vmatprep.subr.mxu0 %v16049_v50 }
 0xa74   :  { %11858 = vmatprep.subr.mxu1 %v16049_v50  ;;  %11804 = vmatpush3.msra.mxu0 %v17068_v29 }
 0xa75   :  { %11859 = vmatpush3.msra.mxu1 %v16299_v26  ;;  %11805 = vmatprep.subr.mxu0 %v16049_v50 }
 0xa76   :  { %11860 = vmatprep.subr.mxu1 %v16049_v50  ;;  %11806 = vmatpush3.msra.mxu0 %v17069_v1 }
 0xa77   :  { %11861 = vmatpush3.msra.mxu1 %v16307_v23  ;;  %11862 = vmatprep.mubr.msk.f32.mxu1 %vm12002_vm0, %v16049_v50 }
 0xa78   :  { %11807 = vmatprep.subr.mxu0 %v16049_v50  ;;  %11863 = vmatmul.mubr.f32.vlgmr.msra.gmra.mxu1 %v16342_v34 }
 0xa79   :  { %11808 = vmatpush3.msra.mxu0 %v17070_v11  ;;  %11865 = vmatprep.mubr.msk.f32.mxu1 %vm12002_vm0, %v16049_v50  ;;  %v17073_v50 = vand.u32 4294901760, %v17057_v57 }
 0xa7a   :  { %11809 = vmatprep.subr.mxu0 %v11974_v37  ;;  %11815 = vmatprep.mubr.msk.f32.mxu0 %vm12002_vm0, %v11974_v37 }
 0xa7b   :  { %11810 = vmatpush3.msra.mxu0 %v17071_v60  ;;  %8255 = vperm.xlu0 %11910, %v8245_v2  }
 0xa7c   :  { %11811 = vmatprep.subr.mxu0 %v11974_v37  ;;  %11866 = vmatmul.mubr.f32.gmra.mxu1 %v16355_v4 }
 0xa7d   :  { %11812 = vmatpush3.msra.mxu0 %v17072_v16  ;;  %11868 = vmatprep.mubr.msk.f32.mxu1 %vm12002_vm0, %v11974_v37 }
 0xa7e   :  { %11813 = vmatprep.subr.mxu0 %v11974_v37 }
 0xa7f   :  { %11814 = vmatpush3.msra.mxu0 %v17073_v50  ;;  %8263 = vperm.xlu0 %11910, %v8260_v59  }
 0xa80   :  { %11816 = vmatmul.mubr.f32.vlgmr.msra.gmra.mxu0 %v16342_v34  ;;  %11869 = vmatmul.mubr.f32.gmra.mxu1 %v16371_v17 }
 0xa81   :  { %11818 = vmatprep.mubr.msk.f32.mxu0 %vm12002_vm0, %v11974_v37  ;;  %11871 = vmatprep.mubr.msk.f32.mxu1 %vm12002_vm0, %v11974_v37 }
 0xa83   :  { %8240 = vrot.lane.b32.xlu0 %v16614_v61, %s12012_s22 }
 0xa84   :  { %11819 = vmatmul.mubr.f32.gmra.mxu0 %v16355_v4  ;;  %11872 = vmatmul.mubr.f32.gmra.mxu1 %v16387_v55 }
 0xa85   :  { %11821 = vmatprep.mubr.msk.f32.mxu0 %vm12002_vm0, %v11974_v37  ;;  %11874 = vmatprep.mubr.msk.f32.mxu1 %vm12002_vm0, %v11974_v37 }
 0xa88   :  { %11822 = vmatmul.mubr.f32.gmra.mxu0 %v16371_v17  ;;  %11875 = vmatmul.mubr.f32.gmra.mxu1 %v16405_v53 }
 0xa89   :  { %11824 = vmatprep.mubr.msk.f32.mxu0 %vm12002_vm0, %v11974_v37 }
 0xa8c   :  { %11825 = vmatmul.mubr.f32.gmra.mxu0 %v16387_v55 }
 0xa8d   :  { %11827 = vmatprep.mubr.msk.f32.mxu0 %vm12002_vm0, %v11974_v37  ;;  %vm8269_vm0 = vcmask 15360  }
 0xa90   :  { %11828 = vmatmul.mubr.f32.gmra.mxu0 %v16405_v53 }
 0xae7   :  { %v7665_v35 = vpop.f32.mrf.mxu1 }
 0xae9   :  { %v11676_v20 = vpop.f32.mrf.mxu1 }
 0xaeb   :  { %v7671_v25 = vpop.f32.mrf.mxu1 }
 0xaed   :  { %v11679_v47 = vpop.f32.mrf.mxu1 }
 0xaef   :  { %v7474_v24 = vpop.f32.mrf.mxu0 }
 0xaf0   :  { %v7475_v21 = vadd.f32 %v8300_v63, %v7474_v24  ;;  %v7677_v26 = vpop.f32.mrf.mxu1 }
 0xaf1   :  { %v11629_v23 = vpop.f32.mrf.mxu0 }
 0xaf2   :  { %v11682_v34 = vpop.f32.mrf.mxu1  ;;  %v7666_v8 = vadd.f32 %v7665_v35, %v7475_v21 }
 0xaf5   :  { %v7484_v4 = vpop.f32.mrf.mxu0 }
 0xaf6   :  { %v7485_v9 = vadd.f32 %v8300_v63, %v7484_v4  ;;  %v7683_v14 = vpop.f32.mrf.mxu1 }
 0xaf7   :  { %v11632_v54 = vpop.f32.mrf.mxu0 }
 0xaf8   :  { %v11685_v28 = vpop.f32.mrf.mxu1  ;;  %v7672_v17 = vadd.f32 %v7671_v25, %v7485_v9 }
 0xafb   :  { %v7494_v49 = vpop.f32.mrf.mxu0 }
 0xafc   :  { %v7495_v51 = vadd.f32 %v7494_v49, %v7386_v10  ;;  %v7689_v6 = vpop.f32.mrf.mxu1 }
 0xafd   :  { %v11635_v45 = vpop.f32.mrf.mxu0 }
 0xafe   :  { %v11688_v42 = vpop.f32.mrf.mxu1  ;;  %v7678_v36 = vadd.f32 %v7677_v26, %v7495_v51 }
 0xb01   :  { %v7504_v52 = vpop.f32.mrf.mxu0 }
 0xb02   :  { %v7505_v7 = vadd.f32 %v8300_v63, %v7504_v52 }
 0xb03   :  { %v11638_v55 = vpop.f32.mrf.mxu0 }
 0xb04   :  { %v7684_v0 = vadd.f32 %v7683_v14, %v7505_v7 }
 0xb06   :  { %v7514_v27 = vpop.f32.mrf.mxu0 }
 0xb07   :  { %v7515_v3 = vadd.f32 %v7514_v27, %v7386_v10 }
 0xb08   :  { %v11641_v40 = vpop.f32.mrf.mxu0 }
 0xb09   :  { %v7690_v43 = vadd.f32 %v7689_v6, %v7515_v3  ;;  %v8219_v40 = vmul.f32 2.0, %v16614_v61 }
 0xb0e   :  { %v7910_v53 = vpop.f32.mrf.mxu1 }
 0xb10   :  { %v11770_v18 = vpop.f32.mrf.mxu1 }
 0xb13   :  { %v7918_v19 = vpop.f32.mrf.mxu1 }
 0xb15   :  { %v11773_v62 = vpop.f32.mrf.mxu1 }
 0xb18   :  { %v7793_v39 = vpop.f32.mrf.mxu0 }
 0xb19   :  { %v7794_v58 = vadd.f32 %v7793_v39, %v7666_v8  ;;  %v7926_v31 = vpop.f32.mrf.mxu1 }
 0xb1a   :  { %v11723_v38 = vpop.f32.mrf.mxu0 }
 0xb1b   :  { %v11776_v30 = vpop.f32.mrf.mxu1  ;;  %v7911_v15 = vadd.f32 %v7910_v53, %v7794_v58 }
 0xb1e   :  { %v7800_v48 = vpop.f32.mrf.mxu0 }
 0xb1f   :  { %v7801_v57 = vadd.f32 %v7800_v48, %v7672_v17  ;;  %v7934_v5 = vpop.f32.mrf.mxu1 }
 0xb20   :  { %v11726_v22 = vpop.f32.mrf.mxu0 }
 0xb21   :  { %v11779_v44 = vpop.f32.mrf.mxu1  ;;  %v7919_v12 = vadd.f32 %v7918_v19, %v7801_v57 }
 0xb24   :  { %v7807_v33 = vpop.f32.mrf.mxu0 }
 0xb25   :  { %v7942_v46 = vpop.f32.mrf.mxu1  ;;  %v7808_v21 = vadd.f32 %v7807_v33, %v7678_v36  ;;  %v8212_v36 = vmul.f32 3.0, %v16614_v61 }
 0xb26   :  { %v11729_v56 = vpop.f32.mrf.mxu0 }
 0xb27   :  { %v11782_v32 = vpop.f32.mrf.mxu1  ;;  %v7927_v54 = vadd.f32 %v7926_v31, %v7808_v21 }
 0xb2a   :  { %v7814_v41 = vpop.f32.mrf.mxu0 }
 0xb2b   :  { %v7815_v13 = vadd.f32 %v7814_v41, %v7684_v0  ;;  %v8256_v41 = vpop.permute.xlu0 %8255 }
 0xb2c   :  { %v11732_v29 = vpop.f32.mrf.mxu0 }
 0xb2d   :  { %v7935_v1 = vadd.f32 %v7934_v5, %v7815_v13 }
 0xb2f   :  { %v7821_v11 = vpop.f32.mrf.mxu0  ;;  %v8264_v29 = vpop.permute.xlu0 %8263 }
 0xb30   :  { %v7822_v37 = vadd.f32 %v7821_v11, %v7690_v43 }
 0xb31   :  { %v11735_v60 = vpop.f32.mrf.mxu0 }
 0xb32   :  { %v7943_v16 = vadd.f32 %v7942_v46, %v7822_v37  ;;  %v17074_v46 = vld [vmem:[#allocation14_spill] sm:$0xff] }
 0xb33   :  { %v8241_v37 = vpop.permute.xlu0 %8240 }
 0xb38   :  { %v8172_v50 = vpop.f32.mrf.mxu1 }
 0xb3a   :  { %v11864_v2 = vpop.f32.mrf.mxu1 }
 0xb3c   :  { %v8178_v59 = vpop.f32.mrf.mxu1 }
 0xb3e   :  { %v11867_v35 = vpop.f32.mrf.mxu1 }
 0xb40   :  { %v8061_v20 = vpop.f32.mrf.mxu0  ;;  %v8184_v25 = vpop.f32.mrf.mxu1 }
 0xb41   :  { %v8062_v47 = vadd.f32 %v8061_v20, %v7911_v15 }
 0xb42   :  { %v11817_v63 = vpop.f32.mrf.mxu0  ;;  %v11870_v24 = vpop.f32.mrf.mxu1 }
 0xb43   :  { %v8173_v26 = vadd.f32 %v8172_v50, %v8062_v47 }
 0xb44   :  { %v8067_v23 = vpop.f32.mrf.mxu0  ;;  %v8190_v34 = vpop.f32.mrf.mxu1 }
 0xb45   :  { %v8068_v8 = vadd.f32 %v8067_v23, %v7919_v12 }
 0xb46   :  { %v11820_v4 = vpop.f32.mrf.mxu0  ;;  %v11873_v9 = vpop.f32.mrf.mxu1 }
 0xb47   :  { %v8179_v14 = vadd.f32 %v8178_v59, %v8068_v8 }
 0xb48   :  { %v8073_v28 = vpop.f32.mrf.mxu0  ;;  %v8196_v10 = vpop.f32.mrf.mxu1 }
 0xb49   :  { %v8074_v17 = vadd.f32 %v8073_v28, %v7927_v54  ;;  %v8200_v49 = vsub.f32 %v16614_v61, %v8179_v14  ;;  %v8232_v31 = vmul.f32 2.0, %v8179_v14  ;;  %v8210_v30 = vmul.f32 3.0, %v8179_v14 }
 0xb4a   :  { %v11823_v51 = vpop.f32.mrf.mxu0  ;;  %v11876_v6 = vpop.f32.mrf.mxu1 }
 0xb4b   :  { %v8185_v45 = vadd.f32 %v8184_v25, %v8074_v17  ;;  %v8246_v42 = vadd.f32 %v8200_v49, %v8173_v26 }
 0xb4c   :  { %v8079_v52 = vpop.f32.mrf.mxu0 }
 0xb4d   :  { %v8080_v7 = vadd.f32 %v8079_v52, %v7935_v1  ;;  %8202 = vrot.lane.b32.xlu1 %v8185_v45, %s12013_s0  ;;  %v8206_v18 = vmul.f32 2.0, %v8185_v45 }
 0xb4e   :  { %v11826_v55 = vpop.f32.mrf.mxu0 }
 0xb4f   :  { %v8191_v0 = vadd.f32 %v8190_v34, %v8080_v7 }
 0xb50   :  { %v8085_v27 = vpop.f32.mrf.mxu0 }
 0xb51   :  { %v8086_v3 = vadd.f32 %v8085_v27, %v7943_v16  ;;  %8215 = vrot.lane.b32.xlu1 %v8212_v36, %s12014_s2  ;;  %v8208_v19 = vmul.f32 3.0, %v8191_v0  ;;  %v8230_v62 = vmul.f32 2.0, %v8191_v0 }
 0xb52   :  { %v11829_v43 = vpop.f32.mrf.mxu0 }
 0xb53   :  { %v8197_v53 = vadd.f32 %v8196_v10, %v8086_v3 }
 0xb55   :  { %v8207_v39 = vadd.f32 %v8206_v18, %v8197_v53  ;;  %v8229_v58 = vsub.f32 0.0, %v8197_v53  ;;  %8221 = vrot.lane.b32.xlu1 %v8219_v40, %s12012_s22 }
 0xb57   :  { %v8231_v38 = vadd.f32 %v8230_v62, %v8229_v58  ;;  %v8209_v15 = vsub.f32 %v8207_v39, %v8208_v19 }
 0xb59   :  { %8236 = vrot.lane.b32.xlu1 %v8219_v40, %s12014_s2  ;;  %v8211_v48 = vadd.f32 %v8210_v30, %v8209_v15  ;;  %v8233_v57 = vsub.f32 %v8231_v38, %v8232_v31 }
 0xb5b   :  { %v8213_v5 = vsub.f32 %v8211_v48, %v8212_v36  ;;  %v8234_v22 = vadd.f32 %v8233_v57, %v8219_v40 }
 0xb5d   :  { %8225 = vrot.lane.b32.xlu1 %v16614_v61, %s12015_s25  ;;  %v8235_v44 = vsub.f32 %v8234_v22, %v8185_v45 }
 0xbbf   :  { %v8203_v12 = vpop.permute.xlu1 %8202 }
 0xbc0   :  { %v8205_v33 = vsub.f32 %v16614_v61, %v8203_v12 }
 0xbc2   :  { %v8247_v56 = vmul.f32 %v8205_v33, %v17074_v46 }
 0xbc3   :  { %v8216_v32 = vpop.permute.xlu1 %8215 }
 0xbc4   :  { %8249 = vrot.lane.b32.xlu1 %v8247_v56, %s12012_s22  ;;  %v8218_v60 = vadd.f32 %v8216_v32, %v8213_v5 }
 0xbc7   :  { %v8222_v13 = vpop.permute.xlu1 %8221 }
 0xbc8   :  { %v8224_v50 = vsub.f32 %v8218_v60, %v8222_v13 }
 0xbcb   :  { %v8237_v1 = vpop.permute.xlu1 %8236 }
 0xbcc   :  { %v8239_v11 = vsub.f32 %v8235_v44, %v8237_v1 }
 0xbce   :  { %v8243_v2 = vadd.f32 %v8241_v37, %v8239_v11 }
 0xbcf   :  { %v8226_v16 = vpop.permute.xlu1 %8225 }
 0xbd0   :  { %v8228_v59 = vsub.f32 %v8224_v50, %v8226_v16  ;;  %v8244_v35 = vadd.f32 %v8243_v2, %v8226_v16 }
 0xbd2   :  { %v8258_v25 = vmul.f32 %v8256_v41, %v8228_v59  ;;  %v8266_v47 = vmul.f32 %v8264_v29, %v8244_v35 }
 0xc36   :  { %v8250_v20 = vpop.permute.xlu1 %8249 }
 0xc37   :  { %v8252_v61 = vadd.f32 %v8250_v20, %v8246_v42 }
 0xc39   :  { %v8259_v63 = vadd.f32 %v8258_v25, %v8252_v61 }
 0xc3b   :  { %v8267_v24 = vadd.f32 %v8266_v47, %v8259_v63 }
 0xc3d   :  { %8270 = vst.msk [vmem:[%s16638_s3] sm:$0xff] %vm8269_vm0, %v8267_v24 }
 0xc3e   :  { %8275 = vsyncpa [#allocation3], 1 }

</bundles_post_ra>
